<compile_context>
chip_gen: v7x
topology: tpu7x:2x2x1
jax: 0.10.0
libtpu: 0.0.40
codegen_flags: <defaults>
</compile_context>

<pallas_src>
import functools

import jax
import jax.numpy as jnp
from jax import lax
from jax.experimental import pallas as pl
from jax.experimental.pallas import tpu as pltpu

K = 4  # ConvTranspose2d kernel size
S = 2  # stride
P = 1  # padding
BN_EPS = 1e-5


# ----------------------------------------------------------------------------
# Pallas kernel: one deconv block = four parity 2x2 correlations (each a single
# im2col matmul) fused with the BN affine epilogue and activation.
# ----------------------------------------------------------------------------
def _deconv_parity_kernel(x_ref, w_ref, s_ref, b_ref, o_ref, *, activation):
    # x_ref: (1, H+2, W+2, Cin)   bf16 input with a 1-pixel zero halo
    # w_ref: (2, 2, 4*Cin, Cout)  bf16 per-output-parity im2col weights
    # s_ref: (1, Cout)            f32 fused scale (BN gamma/sqrt(var+eps) or 1)
    # b_ref: (1, Cout)            f32 fused bias  (BN beta + scale*(conv_b-mean))
    # o_ref: (1, 2, 2, H*W, Cout) parity-planar output
    _, Hp, Wp, Cin = x_ref.shape
    H, W = Hp - 2, Wp - 2
    scale = s_ref[0, :]
    bias = b_ref[0, :]

    for po in range(2):            # output row parity (static unroll)
        for pw in range(2):        # output col parity
            # im2col: the four 2x2 taps of this parity, concatenated on the
            # channel (lane) axis -> ONE matmul with contraction 4*Cin.
            taps = [
                x_ref[0, po + a:po + a + H, pw + b:pw + b + W, :]
                .reshape(H * W, Cin)
                for a in range(2) for b in range(2)
            ]
            patch = jnp.concatenate(taps, axis=1)          # (H*W, 4*Cin) bf16
            acc = jnp.dot(patch, w_ref[po, pw],
                          preferred_element_type=jnp.float32)
            y = acc * scale + bias                          # f32 epilogue
            if activation == "relu":
                y = jnp.maximum(y, 0.0)
            elif activation == "tanh":
                y = jnp.tanh(y)
            o_ref[0, po, pw] = y.astype(o_ref.dtype)


def _deconv_block(x_nhwc, w, conv_b, bn=None, *, activation,
                  out_dtype=jnp.float32):
    """One ConvTranspose2d(4,2,1) [+ BN] + activation via a Pallas kernel.

    x_nhwc : (N, H, W, Cin)
    w      : (Cin, Cout, 4, 4)  PyTorch ConvTranspose2d weight layout
    conv_b : (Cout,)
    bn     : optional dict {gamma, beta, mean, var}, each (Cout,)
    returns: (N, 2H, 2W, Cout) in `out_dtype`
    """
    N, H, W, Cin = x_nhwc.shape
    Cout = w.shape[1]

    # 1-pixel zero halo (replaces the old zero-upsample + pad-2); bf16 operands.
    xpad = jnp.pad(x_nhwc.astype(jnp.bfloat16),
                   ((0, 0), (1, 1), (1, 1), (0, 0)))

    # Spatially flipped transposed-conv kernel, regrouped into four 2x2
    # sub-kernels by output parity, flattened to im2col (tap-major, cin-minor).
    wf = jnp.transpose(w[:, :, ::-1, ::-1], (2, 3, 0, 1))   # (4, 4, Cin, Cout)
    w_par = jnp.stack([
        jnp.stack([
            jnp.concatenate(
                [wf[2 * a + po, 2 * b + pw] for a in range(2) for b in range(2)],
                axis=0)                                      # (4*Cin, Cout)
            for pw in range(2)], axis=0)
        for po in range(2)], axis=0).astype(jnp.bfloat16)    # (2, 2, 4*Cin, Cout)

    if bn is not None:
        scale = bn["gamma"] / jnp.sqrt(bn["var"] + BN_EPS)
        bias = bn["beta"] + scale * (conv_b - bn["mean"])
    else:
        scale = jnp.ones((Cout,), jnp.float32)
        bias = conv_b
    scale = scale.reshape(1, Cout).astype(jnp.float32)
    bias = bias.reshape(1, Cout).astype(jnp.float32)

    kern = functools.partial(_deconv_parity_kernel, activation=activation)
    out = pl.pallas_call(
        kern,
        out_shape=jax.ShapeDtypeStruct((N, 2, 2, H * W, Cout), out_dtype),
        grid_spec=pltpu.PrefetchScalarGridSpec(
            num_scalar_prefetch=0,
            grid=(N,),
            in_specs=[
                pl.BlockSpec((1, H + 2, W + 2, Cin), lambda n: (n, 0, 0, 0)),
                pl.BlockSpec((2, 2, 4 * Cin, Cout), lambda n: (0, 0, 0, 0)),
                pl.BlockSpec((1, Cout), lambda n: (0, 0)),
                pl.BlockSpec((1, Cout), lambda n: (0, 0)),
            ],
            out_specs=pl.BlockSpec((1, 2, 2, H * W, Cout),
                                   lambda n: (n, 0, 0, 0, 0)),
        ),
        compiler_params=pltpu.CompilerParams(
            dimension_semantics=("parallel",)),
    )(xpad, w_par, scale, bias)

    # Interleave the four parity planes back to NHWC (cheap XLA glue).
    y = out.reshape(N, 2, 2, H, W, Cout)
    y = jnp.transpose(y, (0, 3, 1, 4, 2, 5))   # (N, H, 2, W, 2, Cout)
    return y.reshape(N, 2 * H, 2 * W, Cout)


# ----------------------------------------------------------------------------
# Parameter init (deterministic, in-script) and full forward pass.
# ----------------------------------------------------------------------------
def init_ewm_convG(key, l_dim, dec_sizes):
    sizes = [l_dim] + list(dec_sizes)
    params = {"main": [], "last": None}
    for idx, (in_f, out_f) in enumerate(zip(sizes, sizes[1:-1])):
        k = jax.random.fold_in(key, idx)
        kw_, kb, kg, kbe, km, kv = jax.random.split(k, 6)
        bound = 1.0 / jnp.sqrt(in_f * K * K)
        params["main"].append(dict(
            w=jax.random.uniform(kw_, (in_f, out_f, K, K), jnp.float32, -bound, bound),
            b=jax.random.uniform(kb, (out_f,), jnp.float32, -bound, bound),
            bn=dict(
                gamma=jax.random.uniform(kg, (out_f,), jnp.float32, 0.5, 1.5),
                beta=jax.random.uniform(kbe, (out_f,), jnp.float32, -0.5, 0.5),
                mean=jax.random.uniform(km, (out_f,), jnp.float32, -0.1, 0.1),
                var=jax.random.uniform(kv, (out_f,), jnp.float32, 0.5, 1.5),
            ),
        ))
    in_f, out_f = sizes[-2], sizes[-1]
    k = jax.random.fold_in(key, 10_000)
    kw_, kb = jax.random.split(k, 2)
    bound = 1.0 / jnp.sqrt(in_f * K * K)
    params["last"] = dict(
        w=jax.random.uniform(kw_, (in_f, out_f, K, K), jnp.float32, -bound, bound),
        b=jax.random.uniform(kb, (out_f,), jnp.float32, -bound, bound),
    )
    return params


def ewm_convG_forward(params, z_nchw):
    """z_nchw: (N, l_dim, H, W) -> (N, dec_sizes[-1], H*2^L, W*2^L), NCHW."""
    x = jnp.transpose(z_nchw, (0, 2, 3, 1)).astype(jnp.float32)  # NCHW -> NHWC
    for blk in params["main"]:
        x = _deconv_block(x, blk["w"], blk["b"], blk["bn"],
                          activation="relu", out_dtype=jnp.bfloat16)
    x = _deconv_block(x, params["last"]["w"], params["last"]["b"], None,
                      activation="tanh", out_dtype=jnp.float32)
    return jnp.transpose(x, (0, 3, 1, 2))  # NHWC -> NCHW


# ----------------------------------------------------------------------------
# Pure-JAX reference (lax.conv_general_dilated, f32) for correctness checking.
# ----------------------------------------------------------------------------
def _ref_deconv(x_nchw, w, b):
    w_rot = jnp.transpose(w, (1, 0, 2, 3))[:, :, ::-1, ::-1]  # (Cout,Cin,K,K)
    y = lax.conv_general_dilated(
        x_nchw, w_rot, window_strides=(1, 1),
        padding=[(K - 1 - P, K - 1 - P)] * 2,
        lhs_dilation=(S, S), rhs_dilation=(1, 1),
        dimension_numbers=("NCHW", "OIHW", "NCHW"))
    return y + b.reshape(1, -1, 1, 1)


def _ref_forward(params, z_nchw):
    x = z_nchw.astype(jnp.float32)
    for blk in params["main"]:
        y = _ref_deconv(x, blk["w"], blk["b"])
        bn = blk["bn"]
        scale = (bn["gamma"] / jnp.sqrt(bn["var"] + BN_EPS)).reshape(1, -1, 1, 1)
        shift = (bn["beta"] - bn["gamma"] * bn["mean"] /
                 jnp.sqrt(bn["var"] + BN_EPS)).reshape(1, -1, 1, 1)
        x = jnp.maximum(scale * y + shift, 0.0)
    y = _ref_deconv(x, params["last"]["w"], params["last"]["b"])
    return jnp.tanh(y)


if __name__ == "__main__":
    key = jax.random.PRNGKey(0)

    # Small DCGAN-consistent config: l_dim=32, dec_sizes=(16, 8, 1), im_size=32
    l_dim, dec_sizes, im_size = 32, (16, 8, 1), 32
    N, H0 = 2, 4  # latent is spatial: (N, l_dim, 4, 4) -> 8 -> 16 -> 32

    params = init_ewm_convG(key, l_dim, dec_sizes)
    z = jax.random.normal(jax.random.fold_in(key, 999),
                          (N, l_dim, H0, H0), jnp.float32)

    fwd = jax.jit(ewm_convG_forward)
    out = jax.block_until_ready(fwd(params, z))

    assert out.shape == (N, dec_sizes[-1], im_size, im_size), out.shape
    ref = jax.block_until_ready(_ref_forward(params, z))
    # bf16 MXU operands (+ bf16 inter-layer activations) -> relaxed tolerance
    # against the f32 reference; structural errors would be O(0.1+).
    max_err = float(jnp.max(jnp.abs(out - ref)))
    assert max_err < 5e-2, max_err
    assert bool(jnp.all(jnp.isfinite(out)))

    print("KERNEL_OK")
</pallas_src>

<mosaic_0001>
module attributes {stable_mosaic.version = 11 : i64} {
  func.func @_deconv_parity_kernel(%arg0: i32, %arg1: memref<1x6x6x32xbf16, #tpu.memory_space<vmem>>, %arg2: memref<2x2x128x16xbf16, #tpu.memory_space<vmem>>, %arg3: memref<1x16xf32, #tpu.memory_space<vmem>>, %arg4: memref<1x16xf32, #tpu.memory_space<vmem>>, %arg5: memref<1x2x2x16x16xbf16, #tpu.memory_space<vmem>>) attributes {dimension_semantics = [#tpu.dimension_semantics<parallel>], iteration_bounds = array<i64: 2>, scalar_prefetch = 0 : i64, scratch_operands = 0 : i64, tpu.core_type = #tpu.core_type<tc>, window_params = [{transform_indices = @transform_0, window_bounds = array<i64: 1, 6, 6, 32>}, {pipeline_mode = #tpu.pipeline_mode<synchronous>, transform_indices = @transform_1, window_bounds = array<i64: 2, 2, 128, 16>}, {pipeline_mode = #tpu.pipeline_mode<synchronous>, transform_indices = @transform_2, window_bounds = array<i64: 1, 16>}, {pipeline_mode = #tpu.pipeline_mode<synchronous>, transform_indices = @transform_3, window_bounds = array<i64: 1, 16>}, {transform_indices = @transform_4, window_bounds = array<i64: 1, 2, 2, 16, 16>}]} {
    %c0 = arith.constant 0 : index
    %c0_0 = arith.constant 0 : index
    %0 = vector.load %arg3[%c0, %c0_0] : memref<1x16xf32, #tpu.memory_space<vmem>>, vector<1x16xf32>
    %1 = vector.shape_cast %0 : vector<1x16xf32> to vector<16xf32>
    %c0_1 = arith.constant 0 : index
    %c0_2 = arith.constant 0 : index
    %2 = vector.load %arg4[%c0_1, %c0_2] : memref<1x16xf32, #tpu.memory_space<vmem>>, vector<1x16xf32>
    %3 = vector.shape_cast %2 : vector<1x16xf32> to vector<16xf32>
    %c0_3 = arith.constant 0 : index
    %c0_4 = arith.constant 0 : index
    %c0_5 = arith.constant 0 : index
    %c0_6 = arith.constant 0 : index
    %4 = vector.load %arg1[%c0_3, %c0_4, %c0_5, %c0_6] : memref<1x6x6x32xbf16, #tpu.memory_space<vmem>>, vector<1x4x4x32xbf16>
    %5 = vector.shape_cast %4 : vector<1x4x4x32xbf16> to vector<4x4x32xbf16>
    %6 = vector.shape_cast %5 : vector<4x4x32xbf16> to vector<16x32xbf16>
    %c0_7 = arith.constant 0 : index
    %c0_8 = arith.constant 0 : index
    %c1 = arith.constant 1 : index
    %c0_9 = arith.constant 0 : index
    %7 = vector.load %arg1[%c0_7, %c0_8, %c1, %c0_9] : memref<1x6x6x32xbf16, #tpu.memory_space<vmem>>, vector<1x4x4x32xbf16>
    %8 = vector.shape_cast %7 : vector<1x4x4x32xbf16> to vector<4x4x32xbf16>
    %9 = vector.shape_cast %8 : vector<4x4x32xbf16> to vector<16x32xbf16>
    %c0_10 = arith.constant 0 : index
    %c1_11 = arith.constant 1 : index
    %c0_12 = arith.constant 0 : index
    %c0_13 = arith.constant 0 : index
    %10 = vector.load %arg1[%c0_10, %c1_11, %c0_12, %c0_13] : memref<1x6x6x32xbf16, #tpu.memory_space<vmem>>, vector<1x4x4x32xbf16>
    %11 = vector.shape_cast %10 : vector<1x4x4x32xbf16> to vector<4x4x32xbf16>
    %12 = vector.shape_cast %11 : vector<4x4x32xbf16> to vector<16x32xbf16>
    %c0_14 = arith.constant 0 : index
    %c1_15 = arith.constant 1 : index
    %c1_16 = arith.constant 1 : index
    %c0_17 = arith.constant 0 : index
    %13 = vector.load %arg1[%c0_14, %c1_15, %c1_16, %c0_17] : memref<1x6x6x32xbf16, #tpu.memory_space<vmem>>, vector<1x4x4x32xbf16>
    %14 = vector.shape_cast %13 : vector<1x4x4x32xbf16> to vector<4x4x32xbf16>
    %15 = vector.shape_cast %14 : vector<4x4x32xbf16> to vector<16x32xbf16>
    %16 = tpu.concatenate %6, %9, %12, %15 in 1 : vector<16x32xbf16>, vector<16x32xbf16>, vector<16x32xbf16>, vector<16x32xbf16> -> vector<16x128xbf16>
    %c0_18 = arith.constant 0 : index
    %c0_19 = arith.constant 0 : index
    %c0_20 = arith.constant 0 : index
    %c0_21 = arith.constant 0 : index
    %17 = vector.load %arg2[%c0_18, %c0_19, %c0_20, %c0_21] : memref<2x2x128x16xbf16, #tpu.memory_space<vmem>>, vector<1x1x128x16xbf16>
    %18 = vector.shape_cast %17 : vector<1x1x128x16xbf16> to vector<128x16xbf16>
    %cst = arith.constant dense<0.000000e+00> : vector<16x16xf32>
    %19 = tpu.matmul %16, %18, %cst {dimension_numbers = #tpu.dot_dimension_numbers<[1], [0], [0], [1], [0, 0, 1, 1], [], []>} : vector<16x128xbf16>, vector<128x16xbf16>, vector<16x16xf32> -> vector<16x16xf32>
    %20 = vector.shape_cast %1 : vector<16xf32> to vector<1x16xf32>
    %21 = vector.broadcast %20 : vector<1x16xf32> to vector<16x16xf32>
    %22 = arith.mulf %19, %21 : vector<16x16xf32>
    %23 = vector.shape_cast %3 : vector<16xf32> to vector<1x16xf32>
    %24 = vector.broadcast %23 : vector<1x16xf32> to vector<16x16xf32>
    %25 = arith.addf %22, %24 : vector<16x16xf32>
    %cst_22 = arith.constant 0.000000e+00 : f32
    %26 = vector.broadcast %cst_22 : f32 to vector<16x16xf32>
    %27 = arith.maximumf %25, %26 : vector<16x16xf32>
    %28 = arith.truncf %27 : vector<16x16xf32> to vector<16x16xbf16>
    %c0_23 = arith.constant 0 : index
    %c0_24 = arith.constant 0 : index
    %c0_25 = arith.constant 0 : index
    %c0_26 = arith.constant 0 : index
    %c0_27 = arith.constant 0 : index
    %29 = vector.load %arg5[%c0_23, %c0_24, %c0_25, %c0_26, %c0_27] : memref<1x2x2x16x16xbf16, #tpu.memory_space<vmem>>, vector<1x1x1x16x16xbf16>
    %30 = vector.shape_cast %29 : vector<1x1x1x16x16xbf16> to vector<16x16xbf16>
    %31 = vector.shape_cast %28 : vector<16x16xbf16> to vector<1x1x1x16x16xbf16>
    tpu.vector_store %arg5[%c0_23, %c0_24, %c0_25, %c0_26, %c0_27], %31 {strides = array<i32>} : memref<1x2x2x16x16xbf16, #tpu.memory_space<vmem>>, vector<1x1x1x16x16xbf16>,
    %c0_28 = arith.constant 0 : index
    %c0_29 = arith.constant 0 : index
    %c1_30 = arith.constant 1 : index
    %c0_31 = arith.constant 0 : index
    %32 = vector.load %arg1[%c0_28, %c0_29, %c1_30, %c0_31] : memref<1x6x6x32xbf16, #tpu.memory_space<vmem>>, vector<1x4x4x32xbf16>
    %33 = vector.shape_cast %32 : vector<1x4x4x32xbf16> to vector<4x4x32xbf16>
    %34 = vector.shape_cast %33 : vector<4x4x32xbf16> to vector<16x32xbf16>
    %c0_32 = arith.constant 0 : index
    %c0_33 = arith.constant 0 : index
    %c2 = arith.constant 2 : index
    %c0_34 = arith.constant 0 : index
    %35 = vector.load %arg1[%c0_32, %c0_33, %c2, %c0_34] : memref<1x6x6x32xbf16, #tpu.memory_space<vmem>>, vector<1x4x4x32xbf16>
    %36 = vector.shape_cast %35 : vector<1x4x4x32xbf16> to vector<4x4x32xbf16>
    %37 = vector.shape_cast %36 : vector<4x4x32xbf16> to vector<16x32xbf16>
    %c0_35 = arith.constant 0 : index
    %c1_36 = arith.constant 1 : index
    %c1_37 = arith.constant 1 : index
    %c0_38 = arith.constant 0 : index
    %38 = vector.load %arg1[%c0_35, %c1_36, %c1_37, %c0_38] : memref<1x6x6x32xbf16, #tpu.memory_space<vmem>>, vector<1x4x4x32xbf16>
    %39 = vector.shape_cast %38 : vector<1x4x4x32xbf16> to vector<4x4x32xbf16>
    %40 = vector.shape_cast %39 : vector<4x4x32xbf16> to vector<16x32xbf16>
    %c0_39 = arith.constant 0 : index
    %c1_40 = arith.constant 1 : index
    %c2_41 = arith.constant 2 : index
    %c0_42 = arith.constant 0 : index
    %41 = vector.load %arg1[%c0_39, %c1_40, %c2_41, %c0_42] : memref<1x6x6x32xbf16, #tpu.memory_space<vmem>>, vector<1x4x4x32xbf16>
    %42 = vector.shape_cast %41 : vector<1x4x4x32xbf16> to vector<4x4x32xbf16>
    %43 = vector.shape_cast %42 : vector<4x4x32xbf16> to vector<16x32xbf16>
    %44 = tpu.concatenate %34, %37, %40, %43 in 1 : vector<16x32xbf16>, vector<16x32xbf16>, vector<16x32xbf16>, vector<16x32xbf16> -> vector<16x128xbf16>
    %c0_43 = arith.constant 0 : index
    %c1_44 = arith.constant 1 : index
    %c0_45 = arith.constant 0 : index
    %c0_46 = arith.constant 0 : index
    %45 = vector.load %arg2[%c0_43, %c1_44, %c0_45, %c0_46] : memref<2x2x128x16xbf16, #tpu.memory_space<vmem>>, vector<1x1x128x16xbf16>
    %46 = vector.shape_cast %45 : vector<1x1x128x16xbf16> to vector<128x16xbf16>
    %cst_47 = arith.constant dense<0.000000e+00> : vector<16x16xf32>
    %47 = tpu.matmul %44, %46, %cst_47 {dimension_numbers = #tpu.dot_dimension_numbers<[1], [0], [0], [1], [0, 0, 1, 1], [], []>} : vector<16x128xbf16>, vector<128x16xbf16>, vector<16x16xf32> -> vector<16x16xf32>
    %48 = vector.shape_cast %1 : vector<16xf32> to vector<1x16xf32>
    %49 = vector.broadcast %48 : vector<1x16xf32> to vector<16x16xf32>
    %50 = arith.mulf %47, %49 : vector<16x16xf32>
    %51 = vector.shape_cast %3 : vector<16xf32> to vector<1x16xf32>
    %52 = vector.broadcast %51 : vector<1x16xf32> to vector<16x16xf32>
    %53 = arith.addf %50, %52 : vector<16x16xf32>
    %cst_48 = arith.constant 0.000000e+00 : f32
    %54 = vector.broadcast %cst_48 : f32 to vector<16x16xf32>
    %55 = arith.maximumf %53, %54 : vector<16x16xf32>
    %56 = arith.truncf %55 : vector<16x16xf32> to vector<16x16xbf16>
    %c0_49 = arith.constant 0 : index
    %c0_50 = arith.constant 0 : index
    %c1_51 = arith.constant 1 : index
    %c0_52 = arith.constant 0 : index
    %c0_53 = arith.constant 0 : index
    %57 = vector.load %arg5[%c0_49, %c0_50, %c1_51, %c0_52, %c0_53] : memref<1x2x2x16x16xbf16, #tpu.memory_space<vmem>>, vector<1x1x1x16x16xbf16>
    %58 = vector.shape_cast %57 : vector<1x1x1x16x16xbf16> to vector<16x16xbf16>
    %59 = vector.shape_cast %56 : vector<16x16xbf16> to vector<1x1x1x16x16xbf16>
    tpu.vector_store %arg5[%c0_49, %c0_50, %c1_51, %c0_52, %c0_53], %59 {strides = array<i32>} : memref<1x2x2x16x16xbf16, #tpu.memory_space<vmem>>, vector<1x1x1x16x16xbf16>,
    %c0_54 = arith.constant 0 : index
    %c1_55 = arith.constant 1 : index
    %c0_56 = arith.constant 0 : index
    %c0_57 = arith.constant 0 : index
    %60 = vector.load %arg1[%c0_54, %c1_55, %c0_56, %c0_57] : memref<1x6x6x32xbf16, #tpu.memory_space<vmem>>, vector<1x4x4x32xbf16>
    %61 = vector.shape_cast %60 : vector<1x4x4x32xbf16> to vector<4x4x32xbf16>
    %62 = vector.shape_cast %61 : vector<4x4x32xbf16> to vector<16x32xbf16>
    %c0_58 = arith.constant 0 : index
    %c1_59 = arith.constant 1 : index
    %c1_60 = arith.constant 1 : index
    %c0_61 = arith.constant 0 : index
    %63 = vector.load %arg1[%c0_58, %c1_59, %c1_60, %c0_61] : memref<1x6x6x32xbf16, #tpu.memory_space<vmem>>, vector<1x4x4x32xbf16>
    %64 = vector.shape_cast %63 : vector<1x4x4x32xbf16> to vector<4x4x32xbf16>
    %65 = vector.shape_cast %64 : vector<4x4x32xbf16> to vector<16x32xbf16>
    %c0_62 = arith.constant 0 : index
    %c2_63 = arith.constant 2 : index
    %c0_64 = arith.constant 0 : index
    %c0_65 = arith.constant 0 : index
    %66 = vector.load %arg1[%c0_62, %c2_63, %c0_64, %c0_65] : memref<1x6x6x32xbf16, #tpu.memory_space<vmem>>, vector<1x4x4x32xbf16>
    %67 = vector.shape_cast %66 : vector<1x4x4x32xbf16> to vector<4x4x32xbf16>
    %68 = vector.shape_cast %67 : vector<4x4x32xbf16> to vector<16x32xbf16>
    %c0_66 = arith.constant 0 : index
    %c2_67 = arith.constant 2 : index
    %c1_68 = arith.constant 1 : index
    %c0_69 = arith.constant 0 : index
    %69 = vector.load %arg1[%c0_66, %c2_67, %c1_68, %c0_69] : memref<1x6x6x32xbf16, #tpu.memory_space<vmem>>, vector<1x4x4x32xbf16>
    %70 = vector.shape_cast %69 : vector<1x4x4x32xbf16> to vector<4x4x32xbf16>
    %71 = vector.shape_cast %70 : vector<4x4x32xbf16> to vector<16x32xbf16>
    %72 = tpu.concatenate %62, %65, %68, %71 in 1 : vector<16x32xbf16>, vector<16x32xbf16>, vector<16x32xbf16>, vector<16x32xbf16> -> vector<16x128xbf16>
    %c1_70 = arith.constant 1 : index
    %c0_71 = arith.constant 0 : index
    %c0_72 = arith.constant 0 : index
    %c0_73 = arith.constant 0 : index
    %73 = vector.load %arg2[%c1_70, %c0_71, %c0_72, %c0_73] : memref<2x2x128x16xbf16, #tpu.memory_space<vmem>>, vector<1x1x128x16xbf16>
    %74 = vector.shape_cast %73 : vector<1x1x128x16xbf16> to vector<128x16xbf16>
    %cst_74 = arith.constant dense<0.000000e+00> : vector<16x16xf32>
    %75 = tpu.matmul %72, %74, %cst_74 {dimension_numbers = #tpu.dot_dimension_numbers<[1], [0], [0], [1], [0, 0, 1, 1], [], []>} : vector<16x128xbf16>, vector<128x16xbf16>, vector<16x16xf32> -> vector<16x16xf32>
    %76 = vector.shape_cast %1 : vector<16xf32> to vector<1x16xf32>
    %77 = vector.broadcast %76 : vector<1x16xf32> to vector<16x16xf32>
    %78 = arith.mulf %75, %77 : vector<16x16xf32>
    %79 = vector.shape_cast %3 : vector<16xf32> to vector<1x16xf32>
    %80 = vector.broadcast %79 : vector<1x16xf32> to vector<16x16xf32>
    %81 = arith.addf %78, %80 : vector<16x16xf32>
    %cst_75 = arith.constant 0.000000e+00 : f32
    %82 = vector.broadcast %cst_75 : f32 to vector<16x16xf32>
    %83 = arith.maximumf %81, %82 : vector<16x16xf32>
    %84 = arith.truncf %83 : vector<16x16xf32> to vector<16x16xbf16>
    %c0_76 = arith.constant 0 : index
    %c1_77 = arith.constant 1 : index
    %c0_78 = arith.constant 0 : index
    %c0_79 = arith.constant 0 : index
    %c0_80 = arith.constant 0 : index
    %85 = vector.load %arg5[%c0_76, %c1_77, %c0_78, %c0_79, %c0_80] : memref<1x2x2x16x16xbf16, #tpu.memory_space<vmem>>, vector<1x1x1x16x16xbf16>
    %86 = vector.shape_cast %85 : vector<1x1x1x16x16xbf16> to vector<16x16xbf16>
    %87 = vector.shape_cast %84 : vector<16x16xbf16> to vector<1x1x1x16x16xbf16>
    tpu.vector_store %arg5[%c0_76, %c1_77, %c0_78, %c0_79, %c0_80], %87 {strides = array<i32>} : memref<1x2x2x16x16xbf16, #tpu.memory_space<vmem>>, vector<1x1x1x16x16xbf16>,
    %c0_81 = arith.constant 0 : index
    %c1_82 = arith.constant 1 : index
    %c1_83 = arith.constant 1 : index
    %c0_84 = arith.constant 0 : index
    %88 = vector.load %arg1[%c0_81, %c1_82, %c1_83, %c0_84] : memref<1x6x6x32xbf16, #tpu.memory_space<vmem>>, vector<1x4x4x32xbf16>
    %89 = vector.shape_cast %88 : vector<1x4x4x32xbf16> to vector<4x4x32xbf16>
    %90 = vector.shape_cast %89 : vector<4x4x32xbf16> to vector<16x32xbf16>
    %c0_85 = arith.constant 0 : index
    %c1_86 = arith.constant 1 : index
    %c2_87 = arith.constant 2 : index
    %c0_88 = arith.constant 0 : index
    %91 = vector.load %arg1[%c0_85, %c1_86, %c2_87, %c0_88] : memref<1x6x6x32xbf16, #tpu.memory_space<vmem>>, vector<1x4x4x32xbf16>
    %92 = vector.shape_cast %91 : vector<1x4x4x32xbf16> to vector<4x4x32xbf16>
    %93 = vector.shape_cast %92 : vector<4x4x32xbf16> to vector<16x32xbf16>
    %c0_89 = arith.constant 0 : index
    %c2_90 = arith.constant 2 : index
    %c1_91 = arith.constant 1 : index
    %c0_92 = arith.constant 0 : index
    %94 = vector.load %arg1[%c0_89, %c2_90, %c1_91, %c0_92] : memref<1x6x6x32xbf16, #tpu.memory_space<vmem>>, vector<1x4x4x32xbf16>
    %95 = vector.shape_cast %94 : vector<1x4x4x32xbf16> to vector<4x4x32xbf16>
    %96 = vector.shape_cast %95 : vector<4x4x32xbf16> to vector<16x32xbf16>
    %c0_93 = arith.constant 0 : index
    %c2_94 = arith.constant 2 : index
    %c2_95 = arith.constant 2 : index
    %c0_96 = arith.constant 0 : index
    %97 = vector.load %arg1[%c0_93, %c2_94, %c2_95, %c0_96] : memref<1x6x6x32xbf16, #tpu.memory_space<vmem>>, vector<1x4x4x32xbf16>
    %98 = vector.shape_cast %97 : vector<1x4x4x32xbf16> to vector<4x4x32xbf16>
    %99 = vector.shape_cast %98 : vector<4x4x32xbf16> to vector<16x32xbf16>
    %100 = tpu.concatenate %90, %93, %96, %99 in 1 : vector<16x32xbf16>, vector<16x32xbf16>, vector<16x32xbf16>, vector<16x32xbf16> -> vector<16x128xbf16>
    %c1_97 = arith.constant 1 : index
    %c1_98 = arith.constant 1 : index
    %c0_99 = arith.constant 0 : index
    %c0_100 = arith.constant 0 : index
    %101 = vector.load %arg2[%c1_97, %c1_98, %c0_99, %c0_100] : memref<2x2x128x16xbf16, #tpu.memory_space<vmem>>, vector<1x1x128x16xbf16>
    %102 = vector.shape_cast %101 : vector<1x1x128x16xbf16> to vector<128x16xbf16>
    %cst_101 = arith.constant dense<0.000000e+00> : vector<16x16xf32>
    %103 = tpu.matmul %100, %102, %cst_101 {dimension_numbers = #tpu.dot_dimension_numbers<[1], [0], [0], [1], [0, 0, 1, 1], [], []>} : vector<16x128xbf16>, vector<128x16xbf16>, vector<16x16xf32> -> vector<16x16xf32>
    %104 = vector.shape_cast %1 : vector<16xf32> to vector<1x16xf32>
    %105 = vector.broadcast %104 : vector<1x16xf32> to vector<16x16xf32>
    %106 = arith.mulf %103, %105 : vector<16x16xf32>
    %107 = vector.shape_cast %3 : vector<16xf32> to vector<1x16xf32>
    %108 = vector.broadcast %107 : vector<1x16xf32> to vector<16x16xf32>
    %109 = arith.addf %106, %108 : vector<16x16xf32>
    %cst_102 = arith.constant 0.000000e+00 : f32
    %110 = vector.broadcast %cst_102 : f32 to vector<16x16xf32>
    %111 = arith.maximumf %109, %110 : vector<16x16xf32>
    %112 = arith.truncf %111 : vector<16x16xf32> to vector<16x16xbf16>
    %c0_103 = arith.constant 0 : index
    %c1_104 = arith.constant 1 : index
    %c1_105 = arith.constant 1 : index
    %c0_106 = arith.constant 0 : index
    %c0_107 = arith.constant 0 : index
    %113 = vector.load %arg5[%c0_103, %c1_104, %c1_105, %c0_106, %c0_107] : memref<1x2x2x16x16xbf16, #tpu.memory_space<vmem>>, vector<1x1x1x16x16xbf16>
    %114 = vector.shape_cast %113 : vector<1x1x1x16x16xbf16> to vector<16x16xbf16>
    %115 = vector.shape_cast %112 : vector<16x16xbf16> to vector<1x1x1x16x16xbf16>
    tpu.vector_store %arg5[%c0_103, %c1_104, %c1_105, %c0_106, %c0_107], %115 {strides = array<i32>} : memref<1x2x2x16x16xbf16, #tpu.memory_space<vmem>>, vector<1x1x1x16x16xbf16>,
    return
  }
  func.func @transform_0(%arg0: i32) -> (i32, i32, i32, i32) {
    %c0_i32 = arith.constant 0 : i32
    %c0_i32_0 = arith.constant 0 : i32
    %c0_i32_1 = arith.constant 0 : i32
    %c0_i32_2 = arith.constant 0 : i32
    return %arg0, %c0_i32, %c0_i32_0, %c0_i32_1 : i32, i32, i32, i32
  }
  func.func @transform_1(%arg0: i32) -> (i32, i32, i32, i32) {
    %c0_i32 = arith.constant 0 : i32
    %c0_i32_0 = arith.constant 0 : i32
    %c0_i32_1 = arith.constant 0 : i32
    %c0_i32_2 = arith.constant 0 : i32
    %c0_i32_3 = arith.constant 0 : i32
    return %c0_i32, %c0_i32_0, %c0_i32_1, %c0_i32_2 : i32, i32, i32, i32
  }
  func.func @transform_2(%arg0: i32) -> (i32, i32) {
    %c0_i32 = arith.constant 0 : i32
    %c0_i32_0 = arith.constant 0 : i32
    %c0_i32_1 = arith.constant 0 : i32
    return %c0_i32, %c0_i32_0 : i32, i32
  }
  func.func @transform_3(%arg0: i32) -> (i32, i32) {
    %c0_i32 = arith.constant 0 : i32
    %c0_i32_0 = arith.constant 0 : i32
    %c0_i32_1 = arith.constant 0 : i32
    return %c0_i32, %c0_i32_0 : i32, i32
  }
  func.func @transform_4(%arg0: i32) -> (i32, i32, i32, i32, i32) {
    %c0_i32 = arith.constant 0 : i32
    %c0_i32_0 = arith.constant 0 : i32
    %c0_i32_1 = arith.constant 0 : i32
    %c0_i32_2 = arith.constant 0 : i32
    %c0_i32_3 = arith.constant 0 : i32
    return %arg0, %c0_i32, %c0_i32_0, %c0_i32_1, %c0_i32_2 : i32, i32, i32, i32, i32
  }
}

module attributes {stable_mosaic.version = 11 : i64} {
  func.func @_deconv_parity_kernel(%arg0: i32, %arg1: memref<1x10x10x16xbf16, #tpu.memory_space<vmem>>, %arg2: memref<2x2x64x8xbf16, #tpu.memory_space<vmem>>, %arg3: memref<1x8xf32, #tpu.memory_space<vmem>>, %arg4: memref<1x8xf32, #tpu.memory_space<vmem>>, %arg5: memref<1x2x2x64x8xbf16, #tpu.memory_space<vmem>>) attributes {dimension_semantics = [#tpu.dimension_semantics<parallel>], iteration_bounds = array<i64: 2>, scalar_prefetch = 0 : i64, scratch_operands = 0 : i64, tpu.core_type = #tpu.core_type<tc>, window_params = [{transform_indices = @transform_0, window_bounds = array<i64: 1, 10, 10, 16>}, {pipeline_mode = #tpu.pipeline_mode<synchronous>, transform_indices = @transform_1, window_bounds = array<i64: 2, 2, 64, 8>}, {pipeline_mode = #tpu.pipeline_mode<synchronous>, transform_indices = @transform_2, window_bounds = array<i64: 1, 8>}, {pipeline_mode = #tpu.pipeline_mode<synchronous>, transform_indices = @transform_3, window_bounds = array<i64: 1, 8>}, {transform_indices = @transform_4, window_bounds = array<i64: 1, 2, 2, 64, 8>}]} {
    %c0 = arith.constant 0 : index
    %c0_0 = arith.constant 0 : index
    %0 = vector.load %arg3[%c0, %c0_0] : memref<1x8xf32, #tpu.memory_space<vmem>>, vector<1x8xf32>
    %1 = vector.shape_cast %0 : vector<1x8xf32> to vector<8xf32>
    %c0_1 = arith.constant 0 : index
    %c0_2 = arith.constant 0 : index
    %2 = vector.load %arg4[%c0_1, %c0_2] : memref<1x8xf32, #tpu.memory_space<vmem>>, vector<1x8xf32>
    %3 = vector.shape_cast %2 : vector<1x8xf32> to vector<8xf32>
    %c0_3 = arith.constant 0 : index
    %c0_4 = arith.constant 0 : index
    %c0_5 = arith.constant 0 : index
    %c0_6 = arith.constant 0 : index
    %4 = vector.load %arg1[%c0_3, %c0_4, %c0_5, %c0_6] : memref<1x10x10x16xbf16, #tpu.memory_space<vmem>>, vector<1x8x8x16xbf16>
    %5 = vector.shape_cast %4 : vector<1x8x8x16xbf16> to vector<8x8x16xbf16>
    %6 = vector.shape_cast %5 : vector<8x8x16xbf16> to vector<64x16xbf16>
    %c0_7 = arith.constant 0 : index
    %c0_8 = arith.constant 0 : index
    %c1 = arith.constant 1 : index
    %c0_9 = arith.constant 0 : index
    %7 = vector.load %arg1[%c0_7, %c0_8, %c1, %c0_9] : memref<1x10x10x16xbf16, #tpu.memory_space<vmem>>, vector<1x8x8x16xbf16>
    %8 = vector.shape_cast %7 : vector<1x8x8x16xbf16> to vector<8x8x16xbf16>
    %9 = vector.shape_cast %8 : vector<8x8x16xbf16> to vector<64x16xbf16>
    %c0_10 = arith.constant 0 : index
    %c1_11 = arith.constant 1 : index
    %c0_12 = arith.constant 0 : index
    %c0_13 = arith.constant 0 : index
    %10 = vector.load %arg1[%c0_10, %c1_11, %c0_12, %c0_13] : memref<1x10x10x16xbf16, #tpu.memory_space<vmem>>, vector<1x8x8x16xbf16>
    %11 = vector.shape_cast %10 : vector<1x8x8x16xbf16> to vector<8x8x16xbf16>
    %12 = vector.shape_cast %11 : vector<8x8x16xbf16> to vector<64x16xbf16>
    %c0_14 = arith.constant 0 : index
    %c1_15 = arith.constant 1 : index
    %c1_16 = arith.constant 1 : index
    %c0_17 = arith.constant 0 : index
    %13 = vector.load %arg1[%c0_14, %c1_15, %c1_16, %c0_17] : memref<1x10x10x16xbf16, #tpu.memory_space<vmem>>, vector<1x8x8x16xbf16>
    %14 = vector.shape_cast %13 : vector<1x8x8x16xbf16> to vector<8x8x16xbf16>
    %15 = vector.shape_cast %14 : vector<8x8x16xbf16> to vector<64x16xbf16>
    %16 = tpu.concatenate %6, %9, %12, %15 in 1 : vector<64x16xbf16>, vector<64x16xbf16>, vector<64x16xbf16>, vector<64x16xbf16> -> vector<64x64xbf16>
    %c0_18 = arith.constant 0 : index
    %c0_19 = arith.constant 0 : index
    %c0_20 = arith.constant 0 : index
    %c0_21 = arith.constant 0 : index
    %17 = vector.load %arg2[%c0_18, %c0_19, %c0_20, %c0_21] : memref<2x2x64x8xbf16, #tpu.memory_space<vmem>>, vector<1x1x64x8xbf16>
    %18 = vector.shape_cast %17 : vector<1x1x64x8xbf16> to vector<64x8xbf16>
    %cst = arith.constant dense<0.000000e+00> : vector<64x8xf32>
    %19 = tpu.matmul %16, %18, %cst {dimension_numbers = #tpu.dot_dimension_numbers<[1], [0], [0], [1], [0, 0, 1, 1], [], []>} : vector<64x64xbf16>, vector<64x8xbf16>, vector<64x8xf32> -> vector<64x8xf32>
    %20 = vector.shape_cast %1 : vector<8xf32> to vector<1x8xf32>
    %21 = vector.broadcast %20 : vector<1x8xf32> to vector<64x8xf32>
    %22 = arith.mulf %19, %21 : vector<64x8xf32>
    %23 = vector.shape_cast %3 : vector<8xf32> to vector<1x8xf32>
    %24 = vector.broadcast %23 : vector<1x8xf32> to vector<64x8xf32>
    %25 = arith.addf %22, %24 : vector<64x8xf32>
    %cst_22 = arith.constant 0.000000e+00 : f32
    %26 = vector.broadcast %cst_22 : f32 to vector<64x8xf32>
    %27 = arith.maximumf %25, %26 : vector<64x8xf32>
    %28 = arith.truncf %27 : vector<64x8xf32> to vector<64x8xbf16>
    %c0_23 = arith.constant 0 : index
    %c0_24 = arith.constant 0 : index
    %c0_25 = arith.constant 0 : index
    %c0_26 = arith.constant 0 : index
    %c0_27 = arith.constant 0 : index
    %29 = vector.load %arg5[%c0_23, %c0_24, %c0_25, %c0_26, %c0_27] : memref<1x2x2x64x8xbf16, #tpu.memory_space<vmem>>, vector<1x1x1x64x8xbf16>
    %30 = vector.shape_cast %29 : vector<1x1x1x64x8xbf16> to vector<64x8xbf16>
    %31 = vector.shape_cast %28 : vector<64x8xbf16> to vector<1x1x1x64x8xbf16>
    tpu.vector_store %arg5[%c0_23, %c0_24, %c0_25, %c0_26, %c0_27], %31 {strides = array<i32>} : memref<1x2x2x64x8xbf16, #tpu.memory_space<vmem>>, vector<1x1x1x64x8xbf16>,
    %c0_28 = arith.constant 0 : index
    %c0_29 = arith.constant 0 : index
    %c1_30 = arith.constant 1 : index
    %c0_31 = arith.constant 0 : index
    %32 = vector.load %arg1[%c0_28, %c0_29, %c1_30, %c0_31] : memref<1x10x10x16xbf16, #tpu.memory_space<vmem>>, vector<1x8x8x16xbf16>
    %33 = vector.shape_cast %32 : vector<1x8x8x16xbf16> to vector<8x8x16xbf16>
    %34 = vector.shape_cast %33 : vector<8x8x16xbf16> to vector<64x16xbf16>
    %c0_32 = arith.constant 0 : index
    %c0_33 = arith.constant 0 : index
    %c2 = arith.constant 2 : index
    %c0_34 = arith.constant 0 : index
    %35 = vector.load %arg1[%c0_32, %c0_33, %c2, %c0_34] : memref<1x10x10x16xbf16, #tpu.memory_space<vmem>>, vector<1x8x8x16xbf16>
    %36 = vector.shape_cast %35 : vector<1x8x8x16xbf16> to vector<8x8x16xbf16>
    %37 = vector.shape_cast %36 : vector<8x8x16xbf16> to vector<64x16xbf16>
    %c0_35 = arith.constant 0 : index
    %c1_36 = arith.constant 1 : index
    %c1_37 = arith.constant 1 : index
    %c0_38 = arith.constant 0 : index
    %38 = vector.load %arg1[%c0_35, %c1_36, %c1_37, %c0_38] : memref<1x10x10x16xbf16, #tpu.memory_space<vmem>>, vector<1x8x8x16xbf16>
    %39 = vector.shape_cast %38 : vector<1x8x8x16xbf16> to vector<8x8x16xbf16>
    %40 = vector.shape_cast %39 : vector<8x8x16xbf16> to vector<64x16xbf16>
    %c0_39 = arith.constant 0 : index
    %c1_40 = arith.constant 1 : index
    %c2_41 = arith.constant 2 : index
    %c0_42 = arith.constant 0 : index
    %41 = vector.load %arg1[%c0_39, %c1_40, %c2_41, %c0_42] : memref<1x10x10x16xbf16, #tpu.memory_space<vmem>>, vector<1x8x8x16xbf16>
    %42 = vector.shape_cast %41 : vector<1x8x8x16xbf16> to vector<8x8x16xbf16>
    %43 = vector.shape_cast %42 : vector<8x8x16xbf16> to vector<64x16xbf16>
    %44 = tpu.concatenate %34, %37, %40, %43 in 1 : vector<64x16xbf16>, vector<64x16xbf16>, vector<64x16xbf16>, vector<64x16xbf16> -> vector<64x64xbf16>
    %c0_43 = arith.constant 0 : index
    %c1_44 = arith.constant 1 : index
    %c0_45 = arith.constant 0 : index
    %c0_46 = arith.constant 0 : index
    %45 = vector.load %arg2[%c0_43, %c1_44, %c0_45, %c0_46] : memref<2x2x64x8xbf16, #tpu.memory_space<vmem>>, vector<1x1x64x8xbf16>
    %46 = vector.shape_cast %45 : vector<1x1x64x8xbf16> to vector<64x8xbf16>
    %cst_47 = arith.constant dense<0.000000e+00> : vector<64x8xf32>
    %47 = tpu.matmul %44, %46, %cst_47 {dimension_numbers = #tpu.dot_dimension_numbers<[1], [0], [0], [1], [0, 0, 1, 1], [], []>} : vector<64x64xbf16>, vector<64x8xbf16>, vector<64x8xf32> -> vector<64x8xf32>
    %48 = vector.shape_cast %1 : vector<8xf32> to vector<1x8xf32>
    %49 = vector.broadcast %48 : vector<1x8xf32> to vector<64x8xf32>
    %50 = arith.mulf %47, %49 : vector<64x8xf32>
    %51 = vector.shape_cast %3 : vector<8xf32> to vector<1x8xf32>
    %52 = vector.broadcast %51 : vector<1x8xf32> to vector<64x8xf32>
    %53 = arith.addf %50, %52 : vector<64x8xf32>
    %cst_48 = arith.constant 0.000000e+00 : f32
    %54 = vector.broadcast %cst_48 : f32 to vector<64x8xf32>
    %55 = arith.maximumf %53, %54 : vector<64x8xf32>
    %56 = arith.truncf %55 : vector<64x8xf32> to vector<64x8xbf16>
    %c0_49 = arith.constant 0 : index
    %c0_50 = arith.constant 0 : index
    %c1_51 = arith.constant 1 : index
    %c0_52 = arith.constant 0 : index
    %c0_53 = arith.constant 0 : index
    %57 = vector.load %arg5[%c0_49, %c0_50, %c1_51, %c0_52, %c0_53] : memref<1x2x2x64x8xbf16, #tpu.memory_space<vmem>>, vector<1x1x1x64x8xbf16>
    %58 = vector.shape_cast %57 : vector<1x1x1x64x8xbf16> to vector<64x8xbf16>
    %59 = vector.shape_cast %56 : vector<64x8xbf16> to vector<1x1x1x64x8xbf16>
    tpu.vector_store %arg5[%c0_49, %c0_50, %c1_51, %c0_52, %c0_53], %59 {strides = array<i32>} : memref<1x2x2x64x8xbf16, #tpu.memory_space<vmem>>, vector<1x1x1x64x8xbf16>,
    %c0_54 = arith.constant 0 : index
    %c1_55 = arith.constant 1 : index
    %c0_56 = arith.constant 0 : index
    %c0_57 = arith.constant 0 : index
    %60 = vector.load %arg1[%c0_54, %c1_55, %c0_56, %c0_57] : memref<1x10x10x16xbf16, #tpu.memory_space<vmem>>, vector<1x8x8x16xbf16>
    %61 = vector.shape_cast %60 : vector<1x8x8x16xbf16> to vector<8x8x16xbf16>
    %62 = vector.shape_cast %61 : vector<8x8x16xbf16> to vector<64x16xbf16>
    %c0_58 = arith.constant 0 : index
    %c1_59 = arith.constant 1 : index
    %c1_60 = arith.constant 1 : index
    %c0_61 = arith.constant 0 : index
    %63 = vector.load %arg1[%c0_58, %c1_59, %c1_60, %c0_61] : memref<1x10x10x16xbf16, #tpu.memory_space<vmem>>, vector<1x8x8x16xbf16>
    %64 = vector.shape_cast %63 : vector<1x8x8x16xbf16> to vector<8x8x16xbf16>
    %65 = vector.shape_cast %64 : vector<8x8x16xbf16> to vector<64x16xbf16>
    %c0_62 = arith.constant 0 : index
    %c2_63 = arith.constant 2 : index
    %c0_64 = arith.constant 0 : index
    %c0_65 = arith.constant 0 : index
    %66 = vector.load %arg1[%c0_62, %c2_63, %c0_64, %c0_65] : memref<1x10x10x16xbf16, #tpu.memory_space<vmem>>, vector<1x8x8x16xbf16>
    %67 = vector.shape_cast %66 : vector<1x8x8x16xbf16> to vector<8x8x16xbf16>
    %68 = vector.shape_cast %67 : vector<8x8x16xbf16> to vector<64x16xbf16>
    %c0_66 = arith.constant 0 : index
    %c2_67 = arith.constant 2 : index
    %c1_68 = arith.constant 1 : index
    %c0_69 = arith.constant 0 : index
    %69 = vector.load %arg1[%c0_66, %c2_67, %c1_68, %c0_69] : memref<1x10x10x16xbf16, #tpu.memory_space<vmem>>, vector<1x8x8x16xbf16>
    %70 = vector.shape_cast %69 : vector<1x8x8x16xbf16> to vector<8x8x16xbf16>
    %71 = vector.shape_cast %70 : vector<8x8x16xbf16> to vector<64x16xbf16>
    %72 = tpu.concatenate %62, %65, %68, %71 in 1 : vector<64x16xbf16>, vector<64x16xbf16>, vector<64x16xbf16>, vector<64x16xbf16> -> vector<64x64xbf16>
    %c1_70 = arith.constant 1 : index
    %c0_71 = arith.constant 0 : index
    %c0_72 = arith.constant 0 : index
    %c0_73 = arith.constant 0 : index
    %73 = vector.load %arg2[%c1_70, %c0_71, %c0_72, %c0_73] : memref<2x2x64x8xbf16, #tpu.memory_space<vmem>>, vector<1x1x64x8xbf16>
    %74 = vector.shape_cast %73 : vector<1x1x64x8xbf16> to vector<64x8xbf16>
    %cst_74 = arith.constant dense<0.000000e+00> : vector<64x8xf32>
    %75 = tpu.matmul %72, %74, %cst_74 {dimension_numbers = #tpu.dot_dimension_numbers<[1], [0], [0], [1], [0, 0, 1, 1], [], []>} : vector<64x64xbf16>, vector<64x8xbf16>, vector<64x8xf32> -> vector<64x8xf32>
    %76 = vector.shape_cast %1 : vector<8xf32> to vector<1x8xf32>
    %77 = vector.broadcast %76 : vector<1x8xf32> to vector<64x8xf32>
    %78 = arith.mulf %75, %77 : vector<64x8xf32>
    %79 = vector.shape_cast %3 : vector<8xf32> to vector<1x8xf32>
    %80 = vector.broadcast %79 : vector<1x8xf32> to vector<64x8xf32>
    %81 = arith.addf %78, %80 : vector<64x8xf32>
    %cst_75 = arith.constant 0.000000e+00 : f32
    %82 = vector.broadcast %cst_75 : f32 to vector<64x8xf32>
    %83 = arith.maximumf %81, %82 : vector<64x8xf32>
    %84 = arith.truncf %83 : vector<64x8xf32> to vector<64x8xbf16>
    %c0_76 = arith.constant 0 : index
    %c1_77 = arith.constant 1 : index
    %c0_78 = arith.constant 0 : index
    %c0_79 = arith.constant 0 : index
    %c0_80 = arith.constant 0 : index
    %85 = vector.load %arg5[%c0_76, %c1_77, %c0_78, %c0_79, %c0_80] : memref<1x2x2x64x8xbf16, #tpu.memory_space<vmem>>, vector<1x1x1x64x8xbf16>
    %86 = vector.shape_cast %85 : vector<1x1x1x64x8xbf16> to vector<64x8xbf16>
    %87 = vector.shape_cast %84 : vector<64x8xbf16> to vector<1x1x1x64x8xbf16>
    tpu.vector_store %arg5[%c0_76, %c1_77, %c0_78, %c0_79, %c0_80], %87 {strides = array<i32>} : memref<1x2x2x64x8xbf16, #tpu.memory_space<vmem>>, vector<1x1x1x64x8xbf16>,
    %c0_81 = arith.constant 0 : index
    %c1_82 = arith.constant 1 : index
    %c1_83 = arith.constant 1 : index
    %c0_84 = arith.constant 0 : index
    %88 = vector.load %arg1[%c0_81, %c1_82, %c1_83, %c0_84] : memref<1x10x10x16xbf16, #tpu.memory_space<vmem>>, vector<1x8x8x16xbf16>
    %89 = vector.shape_cast %88 : vector<1x8x8x16xbf16> to vector<8x8x16xbf16>
    %90 = vector.shape_cast %89 : vector<8x8x16xbf16> to vector<64x16xbf16>
    %c0_85 = arith.constant 0 : index
    %c1_86 = arith.constant 1 : index
    %c2_87 = arith.constant 2 : index
    %c0_88 = arith.constant 0 : index
    %91 = vector.load %arg1[%c0_85, %c1_86, %c2_87, %c0_88] : memref<1x10x10x16xbf16, #tpu.memory_space<vmem>>, vector<1x8x8x16xbf16>
    %92 = vector.shape_cast %91 : vector<1x8x8x16xbf16> to vector<8x8x16xbf16>
    %93 = vector.shape_cast %92 : vector<8x8x16xbf16> to vector<64x16xbf16>
    %c0_89 = arith.constant 0 : index
    %c2_90 = arith.constant 2 : index
    %c1_91 = arith.constant 1 : index
    %c0_92 = arith.constant 0 : index
    %94 = vector.load %arg1[%c0_89, %c2_90, %c1_91, %c0_92] : memref<1x10x10x16xbf16, #tpu.memory_space<vmem>>, vector<1x8x8x16xbf16>
    %95 = vector.shape_cast %94 : vector<1x8x8x16xbf16> to vector<8x8x16xbf16>
    %96 = vector.shape_cast %95 : vector<8x8x16xbf16> to vector<64x16xbf16>
    %c0_93 = arith.constant 0 : index
    %c2_94 = arith.constant 2 : index
    %c2_95 = arith.constant 2 : index
    %c0_96 = arith.constant 0 : index
    %97 = vector.load %arg1[%c0_93, %c2_94, %c2_95, %c0_96] : memref<1x10x10x16xbf16, #tpu.memory_space<vmem>>, vector<1x8x8x16xbf16>
    %98 = vector.shape_cast %97 : vector<1x8x8x16xbf16> to vector<8x8x16xbf16>
    %99 = vector.shape_cast %98 : vector<8x8x16xbf16> to vector<64x16xbf16>
    %100 = tpu.concatenate %90, %93, %96, %99 in 1 : vector<64x16xbf16>, vector<64x16xbf16>, vector<64x16xbf16>, vector<64x16xbf16> -> vector<64x64xbf16>
    %c1_97 = arith.constant 1 : index
    %c1_98 = arith.constant 1 : index
    %c0_99 = arith.constant 0 : index
    %c0_100 = arith.constant 0 : index
    %101 = vector.load %arg2[%c1_97, %c1_98, %c0_99, %c0_100] : memref<2x2x64x8xbf16, #tpu.memory_space<vmem>>, vector<1x1x64x8xbf16>
    %102 = vector.shape_cast %101 : vector<1x1x64x8xbf16> to vector<64x8xbf16>
    %cst_101 = arith.constant dense<0.000000e+00> : vector<64x8xf32>
    %103 = tpu.matmul %100, %102, %cst_101 {dimension_numbers = #tpu.dot_dimension_numbers<[1], [0], [0], [1], [0, 0, 1, 1], [], []>} : vector<64x64xbf16>, vector<64x8xbf16>, vector<64x8xf32> -> vector<64x8xf32>
    %104 = vector.shape_cast %1 : vector<8xf32> to vector<1x8xf32>
    %105 = vector.broadcast %104 : vector<1x8xf32> to vector<64x8xf32>
    %106 = arith.mulf %103, %105 : vector<64x8xf32>
    %107 = vector.shape_cast %3 : vector<8xf32> to vector<1x8xf32>
    %108 = vector.broadcast %107 : vector<1x8xf32> to vector<64x8xf32>
    %109 = arith.addf %106, %108 : vector<64x8xf32>
    %cst_102 = arith.constant 0.000000e+00 : f32
    %110 = vector.broadcast %cst_102 : f32 to vector<64x8xf32>
    %111 = arith.maximumf %109, %110 : vector<64x8xf32>
    %112 = arith.truncf %111 : vector<64x8xf32> to vector<64x8xbf16>
    %c0_103 = arith.constant 0 : index
    %c1_104 = arith.constant 1 : index
    %c1_105 = arith.constant 1 : index
    %c0_106 = arith.constant 0 : index
    %c0_107 = arith.constant 0 : index
    %113 = vector.load %arg5[%c0_103, %c1_104, %c1_105, %c0_106, %c0_107] : memref<1x2x2x64x8xbf16, #tpu.memory_space<vmem>>, vector<1x1x1x64x8xbf16>
    %114 = vector.shape_cast %113 : vector<1x1x1x64x8xbf16> to vector<64x8xbf16>
    %115 = vector.shape_cast %112 : vector<64x8xbf16> to vector<1x1x1x64x8xbf16>
    tpu.vector_store %arg5[%c0_103, %c1_104, %c1_105, %c0_106, %c0_107], %115 {strides = array<i32>} : memref<1x2x2x64x8xbf16, #tpu.memory_space<vmem>>, vector<1x1x1x64x8xbf16>,
    return
  }
  func.func @transform_0(%arg0: i32) -> (i32, i32, i32, i32) {
    %c0_i32 = arith.constant 0 : i32
    %c0_i32_0 = arith.constant 0 : i32
    %c0_i32_1 = arith.constant 0 : i32
    %c0_i32_2 = arith.constant 0 : i32
    return %arg0, %c0_i32, %c0_i32_0, %c0_i32_1 : i32, i32, i32, i32
  }
  func.func @transform_1(%arg0: i32) -> (i32, i32, i32, i32) {
    %c0_i32 = arith.constant 0 : i32
    %c0_i32_0 = arith.constant 0 : i32
    %c0_i32_1 = arith.constant 0 : i32
    %c0_i32_2 = arith.constant 0 : i32
    %c0_i32_3 = arith.constant 0 : i32
    return %c0_i32, %c0_i32_0, %c0_i32_1, %c0_i32_2 : i32, i32, i32, i32
  }
  func.func @transform_2(%arg0: i32) -> (i32, i32) {
    %c0_i32 = arith.constant 0 : i32
    %c0_i32_0 = arith.constant 0 : i32
    %c0_i32_1 = arith.constant 0 : i32
    return %c0_i32, %c0_i32_0 : i32, i32
  }
  func.func @transform_3(%arg0: i32) -> (i32, i32) {
    %c0_i32 = arith.constant 0 : i32
    %c0_i32_0 = arith.constant 0 : i32
    %c0_i32_1 = arith.constant 0 : i32
    return %c0_i32, %c0_i32_0 : i32, i32
  }
  func.func @transform_4(%arg0: i32) -> (i32, i32, i32, i32, i32) {
    %c0_i32 = arith.constant 0 : i32
    %c0_i32_0 = arith.constant 0 : i32
    %c0_i32_1 = arith.constant 0 : i32
    %c0_i32_2 = arith.constant 0 : i32
    %c0_i32_3 = arith.constant 0 : i32
    return %arg0, %c0_i32, %c0_i32_0, %c0_i32_1, %c0_i32_2 : i32, i32, i32, i32, i32
  }
}

module attributes {stable_mosaic.version = 11 : i64} {
  func.func @_deconv_parity_kernel(%arg0: i32, %arg1: memref<1x18x18x8xbf16, #tpu.memory_space<vmem>>, %arg2: memref<2x2x32x1xbf16, #tpu.memory_space<vmem>>, %arg3: memref<1x1xf32, #tpu.memory_space<vmem>>, %arg4: memref<1x1xf32, #tpu.memory_space<vmem>>, %arg5: memref<1x2x2x256x1xf32, #tpu.memory_space<vmem>>) attributes {dimension_semantics = [#tpu.dimension_semantics<parallel>], iteration_bounds = array<i64: 2>, scalar_prefetch = 0 : i64, scratch_operands = 0 : i64, tpu.core_type = #tpu.core_type<tc>, window_params = [{transform_indices = @transform_0, window_bounds = array<i64: 1, 18, 18, 8>}, {pipeline_mode = #tpu.pipeline_mode<synchronous>, transform_indices = @transform_1, window_bounds = array<i64: 2, 2, 32, 1>}, {pipeline_mode = #tpu.pipeline_mode<synchronous>, transform_indices = @transform_2, window_bounds = array<i64: 1, 1>}, {pipeline_mode = #tpu.pipeline_mode<synchronous>, transform_indices = @transform_3, window_bounds = array<i64: 1, 1>}, {transform_indices = @transform_4, window_bounds = array<i64: 1, 2, 2, 256, 1>}]} {
    %c0 = arith.constant 0 : index
    %c0_0 = arith.constant 0 : index
    %0 = vector.load %arg3[%c0, %c0_0] : memref<1x1xf32, #tpu.memory_space<vmem>>, vector<1x1xf32>
    %1 = vector.shape_cast %0 : vector<1x1xf32> to vector<1xf32>
    %c0_1 = arith.constant 0 : index
    %c0_2 = arith.constant 0 : index
    %2 = vector.load %arg4[%c0_1, %c0_2] : memref<1x1xf32, #tpu.memory_space<vmem>>, vector<1x1xf32>
    %3 = vector.shape_cast %2 : vector<1x1xf32> to vector<1xf32>
    %c0_3 = arith.constant 0 : index
    %c0_4 = arith.constant 0 : index
    %c0_5 = arith.constant 0 : index
    %c0_6 = arith.constant 0 : index
    %4 = vector.load %arg1[%c0_3, %c0_4, %c0_5, %c0_6] : memref<1x18x18x8xbf16, #tpu.memory_space<vmem>>, vector<1x16x16x8xbf16>
    %5 = vector.shape_cast %4 : vector<1x16x16x8xbf16> to vector<16x16x8xbf16>
    %6 = vector.shape_cast %5 : vector<16x16x8xbf16> to vector<256x8xbf16>
    %c0_7 = arith.constant 0 : index
    %c0_8 = arith.constant 0 : index
    %c1 = arith.constant 1 : index
    %c0_9 = arith.constant 0 : index
    %7 = vector.load %arg1[%c0_7, %c0_8, %c1, %c0_9] : memref<1x18x18x8xbf16, #tpu.memory_space<vmem>>, vector<1x16x16x8xbf16>
    %8 = vector.shape_cast %7 : vector<1x16x16x8xbf16> to vector<16x16x8xbf16>
    %9 = vector.shape_cast %8 : vector<16x16x8xbf16> to vector<256x8xbf16>
    %c0_10 = arith.constant 0 : index
    %c1_11 = arith.constant 1 : index
    %c0_12 = arith.constant 0 : index
    %c0_13 = arith.constant 0 : index
    %10 = vector.load %arg1[%c0_10, %c1_11, %c0_12, %c0_13] : memref<1x18x18x8xbf16, #tpu.memory_space<vmem>>, vector<1x16x16x8xbf16>
    %11 = vector.shape_cast %10 : vector<1x16x16x8xbf16> to vector<16x16x8xbf16>
    %12 = vector.shape_cast %11 : vector<16x16x8xbf16> to vector<256x8xbf16>
    %c0_14 = arith.constant 0 : index
    %c1_15 = arith.constant 1 : index
    %c1_16 = arith.constant 1 : index
    %c0_17 = arith.constant 0 : index
    %13 = vector.load %arg1[%c0_14, %c1_15, %c1_16, %c0_17] : memref<1x18x18x8xbf16, #tpu.memory_space<vmem>>, vector<1x16x16x8xbf16>
    %14 = vector.shape_cast %13 : vector<1x16x16x8xbf16> to vector<16x16x8xbf16>
    %15 = vector.shape_cast %14 : vector<16x16x8xbf16> to vector<256x8xbf16>
    %16 = tpu.concatenate %6, %9, %12, %15 in 1 : vector<256x8xbf16>, vector<256x8xbf16>, vector<256x8xbf16>, vector<256x8xbf16> -> vector<256x32xbf16>
    %c0_18 = arith.constant 0 : index
    %c0_19 = arith.constant 0 : index
    %c0_20 = arith.constant 0 : index
    %c0_21 = arith.constant 0 : index
    %17 = vector.load %arg2[%c0_18, %c0_19, %c0_20, %c0_21] : memref<2x2x32x1xbf16, #tpu.memory_space<vmem>>, vector<1x1x32x1xbf16>
    %18 = vector.shape_cast %17 : vector<1x1x32x1xbf16> to vector<32x1xbf16>
    %cst = arith.constant dense<0.000000e+00> : vector<256x1xf32>
    %19 = tpu.matmul %16, %18, %cst {dimension_numbers = #tpu.dot_dimension_numbers<[1], [0], [0], [1], [0, 0, 1, 1], [], []>} : vector<256x32xbf16>, vector<32x1xbf16>, vector<256x1xf32> -> vector<256x1xf32>
    %20 = vector.shape_cast %1 : vector<1xf32> to vector<1x1xf32>
    %21 = vector.broadcast %20 : vector<1x1xf32> to vector<256x1xf32>
    %22 = arith.mulf %19, %21 : vector<256x1xf32>
    %23 = vector.shape_cast %3 : vector<1xf32> to vector<1x1xf32>
    %24 = vector.broadcast %23 : vector<1x1xf32> to vector<256x1xf32>
    %25 = arith.addf %22, %24 : vector<256x1xf32>
    %26 = math.tanh %25 : vector<256x1xf32>
    %c0_22 = arith.constant 0 : index
    %c0_23 = arith.constant 0 : index
    %c0_24 = arith.constant 0 : index
    %c0_25 = arith.constant 0 : index
    %c0_26 = arith.constant 0 : index
    %27 = vector.load %arg5[%c0_22, %c0_23, %c0_24, %c0_25, %c0_26] : memref<1x2x2x256x1xf32, #tpu.memory_space<vmem>>, vector<1x1x1x256x1xf32>
    %28 = vector.shape_cast %27 : vector<1x1x1x256x1xf32> to vector<256x1xf32>
    %29 = vector.shape_cast %26 : vector<256x1xf32> to vector<1x1x1x256x1xf32>
    tpu.vector_store %arg5[%c0_22, %c0_23, %c0_24, %c0_25, %c0_26], %29 {strides = array<i32>} : memref<1x2x2x256x1xf32, #tpu.memory_space<vmem>>, vector<1x1x1x256x1xf32>,
    %c0_27 = arith.constant 0 : index
    %c0_28 = arith.constant 0 : index
    %c1_29 = arith.constant 1 : index
    %c0_30 = arith.constant 0 : index
    %30 = vector.load %arg1[%c0_27, %c0_28, %c1_29, %c0_30] : memref<1x18x18x8xbf16, #tpu.memory_space<vmem>>, vector<1x16x16x8xbf16>
    %31 = vector.shape_cast %30 : vector<1x16x16x8xbf16> to vector<16x16x8xbf16>
    %32 = vector.shape_cast %31 : vector<16x16x8xbf16> to vector<256x8xbf16>
    %c0_31 = arith.constant 0 : index
    %c0_32 = arith.constant 0 : index
    %c2 = arith.constant 2 : index
    %c0_33 = arith.constant 0 : index
    %33 = vector.load %arg1[%c0_31, %c0_32, %c2, %c0_33] : memref<1x18x18x8xbf16, #tpu.memory_space<vmem>>, vector<1x16x16x8xbf16>
    %34 = vector.shape_cast %33 : vector<1x16x16x8xbf16> to vector<16x16x8xbf16>
    %35 = vector.shape_cast %34 : vector<16x16x8xbf16> to vector<256x8xbf16>
    %c0_34 = arith.constant 0 : index
    %c1_35 = arith.constant 1 : index
    %c1_36 = arith.constant 1 : index
    %c0_37 = arith.constant 0 : index
    %36 = vector.load %arg1[%c0_34, %c1_35, %c1_36, %c0_37] : memref<1x18x18x8xbf16, #tpu.memory_space<vmem>>, vector<1x16x16x8xbf16>
    %37 = vector.shape_cast %36 : vector<1x16x16x8xbf16> to vector<16x16x8xbf16>
    %38 = vector.shape_cast %37 : vector<16x16x8xbf16> to vector<256x8xbf16>
    %c0_38 = arith.constant 0 : index
    %c1_39 = arith.constant 1 : index
    %c2_40 = arith.constant 2 : index
    %c0_41 = arith.constant 0 : index
    %39 = vector.load %arg1[%c0_38, %c1_39, %c2_40, %c0_41] : memref<1x18x18x8xbf16, #tpu.memory_space<vmem>>, vector<1x16x16x8xbf16>
    %40 = vector.shape_cast %39 : vector<1x16x16x8xbf16> to vector<16x16x8xbf16>
    %41 = vector.shape_cast %40 : vector<16x16x8xbf16> to vector<256x8xbf16>
    %42 = tpu.concatenate %32, %35, %38, %41 in 1 : vector<256x8xbf16>, vector<256x8xbf16>, vector<256x8xbf16>, vector<256x8xbf16> -> vector<256x32xbf16>
    %c0_42 = arith.constant 0 : index
    %c1_43 = arith.constant 1 : index
    %c0_44 = arith.constant 0 : index
    %c0_45 = arith.constant 0 : index
    %43 = vector.load %arg2[%c0_42, %c1_43, %c0_44, %c0_45] : memref<2x2x32x1xbf16, #tpu.memory_space<vmem>>, vector<1x1x32x1xbf16>
    %44 = vector.shape_cast %43 : vector<1x1x32x1xbf16> to vector<32x1xbf16>
    %cst_46 = arith.constant dense<0.000000e+00> : vector<256x1xf32>
    %45 = tpu.matmul %42, %44, %cst_46 {dimension_numbers = #tpu.dot_dimension_numbers<[1], [0], [0], [1], [0, 0, 1, 1], [], []>} : vector<256x32xbf16>, vector<32x1xbf16>, vector<256x1xf32> -> vector<256x1xf32>
    %46 = vector.shape_cast %1 : vector<1xf32> to vector<1x1xf32>
    %47 = vector.broadcast %46 : vector<1x1xf32> to vector<256x1xf32>
    %48 = arith.mulf %45, %47 : vector<256x1xf32>
    %49 = vector.shape_cast %3 : vector<1xf32> to vector<1x1xf32>
    %50 = vector.broadcast %49 : vector<1x1xf32> to vector<256x1xf32>
    %51 = arith.addf %48, %50 : vector<256x1xf32>
    %52 = math.tanh %51 : vector<256x1xf32>
    %c0_47 = arith.constant 0 : index
    %c0_48 = arith.constant 0 : index
    %c1_49 = arith.constant 1 : index
    %c0_50 = arith.constant 0 : index
    %c0_51 = arith.constant 0 : index
    %53 = vector.load %arg5[%c0_47, %c0_48, %c1_49, %c0_50, %c0_51] : memref<1x2x2x256x1xf32, #tpu.memory_space<vmem>>, vector<1x1x1x256x1xf32>
    %54 = vector.shape_cast %53 : vector<1x1x1x256x1xf32> to vector<256x1xf32>
    %55 = vector.shape_cast %52 : vector<256x1xf32> to vector<1x1x1x256x1xf32>
    tpu.vector_store %arg5[%c0_47, %c0_48, %c1_49, %c0_50, %c0_51], %55 {strides = array<i32>} : memref<1x2x2x256x1xf32, #tpu.memory_space<vmem>>, vector<1x1x1x256x1xf32>,
    %c0_52 = arith.constant 0 : index
    %c1_53 = arith.constant 1 : index
    %c0_54 = arith.constant 0 : index
    %c0_55 = arith.constant 0 : index
    %56 = vector.load %arg1[%c0_52, %c1_53, %c0_54, %c0_55] : memref<1x18x18x8xbf16, #tpu.memory_space<vmem>>, vector<1x16x16x8xbf16>
    %57 = vector.shape_cast %56 : vector<1x16x16x8xbf16> to vector<16x16x8xbf16>
    %58 = vector.shape_cast %57 : vector<16x16x8xbf16> to vector<256x8xbf16>
    %c0_56 = arith.constant 0 : index
    %c1_57 = arith.constant 1 : index
    %c1_58 = arith.constant 1 : index
    %c0_59 = arith.constant 0 : index
    %59 = vector.load %arg1[%c0_56, %c1_57, %c1_58, %c0_59] : memref<1x18x18x8xbf16, #tpu.memory_space<vmem>>, vector<1x16x16x8xbf16>
    %60 = vector.shape_cast %59 : vector<1x16x16x8xbf16> to vector<16x16x8xbf16>
    %61 = vector.shape_cast %60 : vector<16x16x8xbf16> to vector<256x8xbf16>
    %c0_60 = arith.constant 0 : index
    %c2_61 = arith.constant 2 : index
    %c0_62 = arith.constant 0 : index
    %c0_63 = arith.constant 0 : index
    %62 = vector.load %arg1[%c0_60, %c2_61, %c0_62, %c0_63] : memref<1x18x18x8xbf16, #tpu.memory_space<vmem>>, vector<1x16x16x8xbf16>
    %63 = vector.shape_cast %62 : vector<1x16x16x8xbf16> to vector<16x16x8xbf16>
    %64 = vector.shape_cast %63 : vector<16x16x8xbf16> to vector<256x8xbf16>
    %c0_64 = arith.constant 0 : index
    %c2_65 = arith.constant 2 : index
    %c1_66 = arith.constant 1 : index
    %c0_67 = arith.constant 0 : index
    %65 = vector.load %arg1[%c0_64, %c2_65, %c1_66, %c0_67] : memref<1x18x18x8xbf16, #tpu.memory_space<vmem>>, vector<1x16x16x8xbf16>
    %66 = vector.shape_cast %65 : vector<1x16x16x8xbf16> to vector<16x16x8xbf16>
    %67 = vector.shape_cast %66 : vector<16x16x8xbf16> to vector<256x8xbf16>
    %68 = tpu.concatenate %58, %61, %64, %67 in 1 : vector<256x8xbf16>, vector<256x8xbf16>, vector<256x8xbf16>, vector<256x8xbf16> -> vector<256x32xbf16>
    %c1_68 = arith.constant 1 : index
    %c0_69 = arith.constant 0 : index
    %c0_70 = arith.constant 0 : index
    %c0_71 = arith.constant 0 : index
    %69 = vector.load %arg2[%c1_68, %c0_69, %c0_70, %c0_71] : memref<2x2x32x1xbf16, #tpu.memory_space<vmem>>, vector<1x1x32x1xbf16>
    %70 = vector.shape_cast %69 : vector<1x1x32x1xbf16> to vector<32x1xbf16>
    %cst_72 = arith.constant dense<0.000000e+00> : vector<256x1xf32>
    %71 = tpu.matmul %68, %70, %cst_72 {dimension_numbers = #tpu.dot_dimension_numbers<[1], [0], [0], [1], [0, 0, 1, 1], [], []>} : vector<256x32xbf16>, vector<32x1xbf16>, vector<256x1xf32> -> vector<256x1xf32>
    %72 = vector.shape_cast %1 : vector<1xf32> to vector<1x1xf32>
    %73 = vector.broadcast %72 : vector<1x1xf32> to vector<256x1xf32>
    %74 = arith.mulf %71, %73 : vector<256x1xf32>
    %75 = vector.shape_cast %3 : vector<1xf32> to vector<1x1xf32>
    %76 = vector.broadcast %75 : vector<1x1xf32> to vector<256x1xf32>
    %77 = arith.addf %74, %76 : vector<256x1xf32>
    %78 = math.tanh %77 : vector<256x1xf32>
    %c0_73 = arith.constant 0 : index
    %c1_74 = arith.constant 1 : index
    %c0_75 = arith.constant 0 : index
    %c0_76 = arith.constant 0 : index
    %c0_77 = arith.constant 0 : index
    %79 = vector.load %arg5[%c0_73, %c1_74, %c0_75, %c0_76, %c0_77] : memref<1x2x2x256x1xf32, #tpu.memory_space<vmem>>, vector<1x1x1x256x1xf32>
    %80 = vector.shape_cast %79 : vector<1x1x1x256x1xf32> to vector<256x1xf32>
    %81 = vector.shape_cast %78 : vector<256x1xf32> to vector<1x1x1x256x1xf32>
    tpu.vector_store %arg5[%c0_73, %c1_74, %c0_75, %c0_76, %c0_77], %81 {strides = array<i32>} : memref<1x2x2x256x1xf32, #tpu.memory_space<vmem>>, vector<1x1x1x256x1xf32>,
    %c0_78 = arith.constant 0 : index
    %c1_79 = arith.constant 1 : index
    %c1_80 = arith.constant 1 : index
    %c0_81 = arith.constant 0 : index
    %82 = vector.load %arg1[%c0_78, %c1_79, %c1_80, %c0_81] : memref<1x18x18x8xbf16, #tpu.memory_space<vmem>>, vector<1x16x16x8xbf16>
    %83 = vector.shape_cast %82 : vector<1x16x16x8xbf16> to vector<16x16x8xbf16>
    %84 = vector.shape_cast %83 : vector<16x16x8xbf16> to vector<256x8xbf16>
    %c0_82 = arith.constant 0 : index
    %c1_83 = arith.constant 1 : index
    %c2_84 = arith.constant 2 : index
    %c0_85 = arith.constant 0 : index
    %85 = vector.load %arg1[%c0_82, %c1_83, %c2_84, %c0_85] : memref<1x18x18x8xbf16, #tpu.memory_space<vmem>>, vector<1x16x16x8xbf16>
    %86 = vector.shape_cast %85 : vector<1x16x16x8xbf16> to vector<16x16x8xbf16>
    %87 = vector.shape_cast %86 : vector<16x16x8xbf16> to vector<256x8xbf16>
    %c0_86 = arith.constant 0 : index
    %c2_87 = arith.constant 2 : index
    %c1_88 = arith.constant 1 : index
    %c0_89 = arith.constant 0 : index
    %88 = vector.load %arg1[%c0_86, %c2_87, %c1_88, %c0_89] : memref<1x18x18x8xbf16, #tpu.memory_space<vmem>>, vector<1x16x16x8xbf16>
    %89 = vector.shape_cast %88 : vector<1x16x16x8xbf16> to vector<16x16x8xbf16>
    %90 = vector.shape_cast %89 : vector<16x16x8xbf16> to vector<256x8xbf16>
    %c0_90 = arith.constant 0 : index
    %c2_91 = arith.constant 2 : index
    %c2_92 = arith.constant 2 : index
    %c0_93 = arith.constant 0 : index
    %91 = vector.load %arg1[%c0_90, %c2_91, %c2_92, %c0_93] : memref<1x18x18x8xbf16, #tpu.memory_space<vmem>>, vector<1x16x16x8xbf16>
    %92 = vector.shape_cast %91 : vector<1x16x16x8xbf16> to vector<16x16x8xbf16>
    %93 = vector.shape_cast %92 : vector<16x16x8xbf16> to vector<256x8xbf16>
    %94 = tpu.concatenate %84, %87, %90, %93 in 1 : vector<256x8xbf16>, vector<256x8xbf16>, vector<256x8xbf16>, vector<256x8xbf16> -> vector<256x32xbf16>
    %c1_94 = arith.constant 1 : index
    %c1_95 = arith.constant 1 : index
    %c0_96 = arith.constant 0 : index
    %c0_97 = arith.constant 0 : index
    %95 = vector.load %arg2[%c1_94, %c1_95, %c0_96, %c0_97] : memref<2x2x32x1xbf16, #tpu.memory_space<vmem>>, vector<1x1x32x1xbf16>
    %96 = vector.shape_cast %95 : vector<1x1x32x1xbf16> to vector<32x1xbf16>
    %cst_98 = arith.constant dense<0.000000e+00> : vector<256x1xf32>
    %97 = tpu.matmul %94, %96, %cst_98 {dimension_numbers = #tpu.dot_dimension_numbers<[1], [0], [0], [1], [0, 0, 1, 1], [], []>} : vector<256x32xbf16>, vector<32x1xbf16>, vector<256x1xf32> -> vector<256x1xf32>
    %98 = vector.shape_cast %1 : vector<1xf32> to vector<1x1xf32>
    %99 = vector.broadcast %98 : vector<1x1xf32> to vector<256x1xf32>
    %100 = arith.mulf %97, %99 : vector<256x1xf32>
    %101 = vector.shape_cast %3 : vector<1xf32> to vector<1x1xf32>
    %102 = vector.broadcast %101 : vector<1x1xf32> to vector<256x1xf32>
    %103 = arith.addf %100, %102 : vector<256x1xf32>
    %104 = math.tanh %103 : vector<256x1xf32>
    %c0_99 = arith.constant 0 : index
    %c1_100 = arith.constant 1 : index
    %c1_101 = arith.constant 1 : index
    %c0_102 = arith.constant 0 : index
    %c0_103 = arith.constant 0 : index
    %105 = vector.load %arg5[%c0_99, %c1_100, %c1_101, %c0_102, %c0_103] : memref<1x2x2x256x1xf32, #tpu.memory_space<vmem>>, vector<1x1x1x256x1xf32>
    %106 = vector.shape_cast %105 : vector<1x1x1x256x1xf32> to vector<256x1xf32>
    %107 = vector.shape_cast %104 : vector<256x1xf32> to vector<1x1x1x256x1xf32>
    tpu.vector_store %arg5[%c0_99, %c1_100, %c1_101, %c0_102, %c0_103], %107 {strides = array<i32>} : memref<1x2x2x256x1xf32, #tpu.memory_space<vmem>>, vector<1x1x1x256x1xf32>,
    return
  }
  func.func @transform_0(%arg0: i32) -> (i32, i32, i32, i32) {
    %c0_i32 = arith.constant 0 : i32
    %c0_i32_0 = arith.constant 0 : i32
    %c0_i32_1 = arith.constant 0 : i32
    %c0_i32_2 = arith.constant 0 : i32
    return %arg0, %c0_i32, %c0_i32_0, %c0_i32_1 : i32, i32, i32, i32
  }
  func.func @transform_1(%arg0: i32) -> (i32, i32, i32, i32) {
    %c0_i32 = arith.constant 0 : i32
    %c0_i32_0 = arith.constant 0 : i32
    %c0_i32_1 = arith.constant 0 : i32
    %c0_i32_2 = arith.constant 0 : i32
    %c0_i32_3 = arith.constant 0 : i32
    return %c0_i32, %c0_i32_0, %c0_i32_1, %c0_i32_2 : i32, i32, i32, i32
  }
  func.func @transform_2(%arg0: i32) -> (i32, i32) {
    %c0_i32 = arith.constant 0 : i32
    %c0_i32_0 = arith.constant 0 : i32
    %c0_i32_1 = arith.constant 0 : i32
    return %c0_i32, %c0_i32_0 : i32, i32
  }
  func.func @transform_3(%arg0: i32) -> (i32, i32) {
    %c0_i32 = arith.constant 0 : i32
    %c0_i32_0 = arith.constant 0 : i32
    %c0_i32_1 = arith.constant 0 : i32
    return %c0_i32, %c0_i32_0 : i32, i32
  }
  func.func @transform_4(%arg0: i32) -> (i32, i32, i32, i32, i32) {
    %c0_i32 = arith.constant 0 : i32
    %c0_i32_0 = arith.constant 0 : i32
    %c0_i32_1 = arith.constant 0 : i32
    %c0_i32_2 = arith.constant 0 : i32
    %c0_i32_3 = arith.constant 0 : i32
    return %arg0, %c0_i32, %c0_i32_0, %c0_i32_1, %c0_i32_2 : i32, i32, i32, i32, i32
  }
}

</mosaic_0001>

<bundles_post_ra>
// kernel: ewm_convG_forward.3
= control target key start
LH: loop header
LB: loop body
LE: loop exit
PB: predicated region body
PF: predicated region fallthrough
CT: control target
= control target key end

     0   :  { %s2575_s15 = smov 0   ;;  %s2929_s0 = inlined_call_operand.vmem [shape: bf16[2,6,6,32], index: 0, kind: input, shape index: {}]   ;;  %s2930_s1 = inlined_call_operand.vmem [shape: bf16[2,2,128,16], index: 1, kind: input, shape index: {}]   ;;  %s2931_s2 = inlined_call_operand.vmem [shape: f32[1,16], index: 2, kind: input, shape index: {}]   ;;  %s2932_s3 = inlined_call_operand.vmem [shape: f32[1,16], index: 3, kind: input, shape index: {}]   ;;  %s2933_s4 = inlined_call_operand.vmem [shape: bf16[2,2,2,16,16], index: 4, kind: output, shape index: {}]  }
   0x1 LB: > { %s2130_s16 = sadd.s32 4294967295, %s2542_s15   ;;  %p2134_p0 = scmp.ge.s32.totalorder %s2542_s15, 1  ;;  %s2542_s15 = sphi %s2575_s15, %s14_s15  }
   0x2   : > { %p162_p1 = scmp.lt.s32.totalorder %s2542_s15, 3 }
   0x4   : > { %p163_p2 = pnand %p2134_p0, %p162_p1 }
   0x5   : > { %p188_p3 = scmp.lt.s32.totalorder (!%p163_p2), %s2130_s16, 1  ;;  %vm772_vm0 = vcmask (!%p163_p2), 1040384   ;;  %vm773_vm1 = vcmask (!%p163_p2), 1042434   ;;  %v418_v0 = vlaneseq (!%p163_p2)  ;;  %v2544_v1 = vmov (!%p163_p2), 1983009808   ;;  %v2492_v3 = vld [vmem:[%s2930_s1] sm:$0xff] (!%p163_p2)  }
   0x6   : > { %166 = sbr.rel (%p163_p2) target bundleno = 425 (0x1a9), region = 36  ;;  %v416_v2 = vunpack.c.l.s4 (!%p163_p2), %v2544_v1  ;;  %vm774_vm2 = vmor (!%p163_p2), %vm772_vm0, %vm773_vm1  ;;  %vm775_vm3 = vcmask (!%p163_p2), 1044484   ;;  %vm777_vm4 = vcmask (!%p163_p2), 1046534   ;;  %v2545_v4 = vmov (!%p163_p2), 0.0   ;;  %v2493_v6 = vld [vmem:[%s2930_s1 + $0x40] sm:$0xff] (!%p163_p2)   ;;  %v2494_v12 = vld [vmem:[%s2930_s1 + $0x8] sm:$0xff] (!%p163_p2)  }
   0x7   : > { %2393 = vmatprep.subr.bf16.mxu0 (!%p163_p2), %v2545_v4  ;;  %2413 = vmatprep.subr.bf16.mxu1 (!%p163_p2), %v2545_v4  ;;  %v419_v5 = vshrl.u32 (!%p163_p2), %v418_v0, 7  ;;  %vm245_vm5 = vsmask.f32 (!%p163_p2), 1280  ;;  %vm776_vm6 = vmor (!%p163_p2), %vm774_vm2, %vm775_vm3  ;;  %vm246_vm7 = vsmask.f32 (!%p163_p2), 3336  ;;  %v2495_v17 = vld [vmem:[%s2930_s1 + $0x48] sm:$0xff] (!%p163_p2)  }
   0x8   : > { %2394 = vmatpush3.bf16.msra.mxu0 (!%p163_p2), %v2492_v3  ;;  %v417_v7 = vunpack.c.0.s8 (!%p163_p2), %v416_v2  ;;  %vm248_vm8 = vsmask.f32 (!%p163_p2), 5392  ;;  %2414 = vmatpush3.bf16.msra.mxu1 (!%p163_p2), %v2493_v6  ;;  %vm2608_vm9 = vmor (!%p163_p2), %vm776_vm6, %vm777_vm4  ;;  %vm250_vm10 = vsmask.f32 (!%p163_p2), 7448  ;;  %v2496_v29 = vld [vmem:[%s2930_s1 + $0x10] sm:$0xff] (!%p163_p2)   ;;  %v2498_v42 = vld [vmem:[%s2930_s1 + $0x18] sm:$0xff] (!%p163_p2)  }
   0x9   : > { %2395 = vmatprep.subr.bf16.mxu0 (!%p163_p2), %v2545_v4  ;;  %2415 = vmatprep.subr.bf16.mxu1 (!%p163_p2), %v2545_v4  ;;  %v2497_v33 = vld [vmem:[%s2930_s1 + $0x50] sm:$0xff] (!%p163_p2)   ;;  %vm2646_vm11 = vmor (!%p163_p2), %vm245_vm5, %vm246_vm7  ;;  %v2499_v48 = vld [vmem:[%s2930_s1 + $0x58] sm:$0xff] (!%p163_p2)   ;;  %s2546_s11 = smov (!%p163_p2), 64   ;;  %s2547_s12 = smov (!%p163_p2), 32   ;;  %vm2549_vm14 = vmmov (!%p163_p2), 0   ;;  %vm491_vm15 = vcmask (!%p163_p2), 261120  }
   0xa   : > { %v2615_v18 = vsub.s32 (!%p163_p2), %v417_v7, %v419_v5  ;;  %vm2670_vm12 = vmor (!%p163_p2), %vm2646_vm11, %vm248_vm8  ;;  %s2548_s6 = smov (!%p163_p2), 96   ;;  %2409 = vmatprep.mubr.msk.bf16.mxu0 (!%p163_p2), %vm2549_vm14, %v2545_v4  ;;  %2429 = vmatprep.mubr.msk.bf16.mxu1 (!%p163_p2), %vm2549_vm14, %v2545_v4  ;;  %vm495_vm0 = vcmask (!%p163_p2), 523264   ;;  %vm498_vm1 = vcmask (!%p163_p2), 785408   ;;  %v2511_v5 = vld [vmem:[%s2930_s1 + $0xc0] sm:$0xff] (!%p163_p2)   ;;  %vm633_vm2 = vcmask (!%p163_p2), 125952  }
   0xb   : > { %vm2682_vm13 = vmor (!%p163_p2), %vm2670_vm12, %vm250_vm10 }
   0xc   : > { %2396 = vmatpush3.bf16.msra.mxu0 (!%p163_p2), %v2494_v12  ;;  %2416 = vmatpush3.bf16.msra.mxu1 (!%p163_p2), %v2495_v17 }
   0xd   : > { %s2943_s16 = smov (!%p188_p3, %s2130_s16), 1  ;;  %2397 = vmatprep.subr.bf16.mxu0 %v2545_v4  ;;  %2417 = vmatprep.subr.bf16.mxu1 %v2545_v4 }
   0xe   : > { %s2473_s19 = smul.u32 24, %s2943_s16  ;;  %s2348_s20 = sshll.u32 %s2943_s16, 5 }
   0xf   : > { %s2908_s23 = scalar_lea.vmem %s2933_s4, %s2348_s20 }
  0x10   : > { %s2597_s24 = scalar_lea.vmem %s2929_s0, %s2473_s19  ;;  %2398 = vmatpush3.bf16.msra.mxu0 %v2496_v29  ;;  %2418 = vmatpush3.bf16.msra.mxu1 %v2497_v33 }
  0x11   : > { %v2170_v8 = vld.sshfl [vmem:[%s2597_s24] sm:$0x12 pattern:$0x76325410]  ;;  %2399 = vmatprep.subr.bf16.mxu0 %v2545_v4  ;;  %2419 = vmatprep.subr.bf16.mxu1 %v2545_v4 }
  0x12   : > { %v2171_v9 = vld.sshfl [vmem:[%s2597_s24 + $0x4] sm:$0x12 pattern:$0x76325410]  ;;  %v747_v10 = vcombine.high %v2170_v8, %v2170_v8  ;;  %v2174_v11 = vrot.slane %v2170_v8, 9 }
  0x13   : > { %v2172_v13 = vld.sshfl [vmem:[%s2597_s24 + $0x8] sm:$0x12 pattern:$0x76325410]  ;;  %v755_v14 = vcombine.high %v2171_v9, %v2171_v9  ;;  %v2175_v16 = vrot.slane %v2171_v9, 9 }
  0x14   : > { %v2173_v19 = vld.sshfl [vmem:[%s2597_s24 + $0xc] sm:$0x12 pattern:$0x76325410]  ;;  %v763_v20 = vcombine.high %v2172_v13, %v2172_v13  ;;  %v781_v21 = vrot.slane %v747_v10, 7  ;;  %v2176_v22 = vrot.slane %v2172_v13, 9  ;;  %2400 = vmatpush3.bf16.msra.mxu0 %v2498_v42  ;;  %2420 = vmatpush3.bf16.msra.mxu1 %v2499_v48 }
  0x15   : > { %v771_v23 = vcombine.high %v2173_v19, %v2173_v19  ;;  %v785_v24 = vrot.slane %v755_v14, 7  ;;  %v2177_v25 = vrot.slane %v2173_v19, 9  ;;  %v2528_v28 = vld.sshfl [vmem:[%s2597_s24 + $0x4] sm:$0xf pattern:$0x76325410]  ;;  %2401 = vmatprep.subr.bf16.mxu0 %v2545_v4  ;;  %2421 = vmatprep.subr.bf16.mxu1 %v2545_v4 }
  0x16   : > { %v782_v26 = vsel %vm2608_vm9, %v2174_v11, %v781_v21  ;;  %v789_v27 = vrot.slane %v763_v20, 7  ;;  %v2529_v32 = vld.sshfl [vmem:[%s2597_s24 + $0xc] sm:$0xf pattern:$0x76325410] }
  0x17   : > { %v2628_v30 = vsel %vm2608_vm9, %v2175_v16, %v785_v24  ;;  %v793_v31 = vrot.slane %v771_v23, 7  ;;  %v2182_v36 = vld.sshfl [vmem:[%s2597_s24 + $0x4] sm:$0x13 pattern:$0x76325410]  ;;  %v469_v49 = vcombine.low %v2528_v28, %v2529_v32 }
  0x18   : > { %v2636_v34 = vsel %vm2608_vm9, %v2176_v22, %v789_v27  ;;  %v964_v35 = vcombine.low %v782_v26, %v2628_v30  ;;  %v2183_v39 = vld.sshfl [vmem:[%s2597_s24 + $0x8] sm:$0x13 pattern:$0x76325410]  ;;  %v810_v40 = vcombine.high %v2182_v36, %v2182_v36  ;;  %v836_v41 = vshrl.u32 %v2182_v36, 16 }
  0x19   : > { %v2642_v37 = vsel %vm2608_vm9, %v2177_v25, %v793_v31  ;;  %v2184_v45 = vld.sshfl [vmem:[%s2597_s24 + $0xc] sm:$0x13 pattern:$0x76325410]  ;;  %v818_v46 = vcombine.high %v2183_v39, %v2183_v39  ;;  %v839_v47 = vshll.u32 %v2182_v36, 16  ;;  %v850_v58 = vshrl.u32 %v2183_v39, 16  ;;  %470 = vrot.lane.b32.xlu1 %v469_v49, %s2546_s11 }
  0x1a   : > { %v965_v43 = vcombine.low %v2636_v34, %v2642_v37  ;;  %v972_v44 = vrot.slane %v964_v35, %v2615_v18  ;;  %v2185_v50 = vld.sshfl [vmem:[%s2597_s24 + $0x10] sm:$0x13 pattern:$0x76325410]  ;;  %v826_v51 = vcombine.high %v2184_v45, %v2184_v45  ;;  %v838_v52 = vrot.slane %v836_v41, 6  ;;  %v2501_v49 = vld [vmem:[%s2930_s1 + $0x60] sm:$0xff]  }
  0x1b   : > { %v845_v53 = vshll.u32 %v810_v40, 16  ;;  %v834_v56 = vcombine.high %v2185_v50, %v2185_v50  ;;  %v841_v57 = vrot.slane %v839_v47, 7  ;;  %v853_v60 = vshll.u32 %v2183_v39, 16  ;;  %v2500_v40 = vld [vmem:[%s2930_s1 + $0x20] sm:$0xff]   ;;  %2422 = vmatpush3.bf16.msra.mxu1 %v2501_v49 }
  0x1c   : > { %v2665_v54 = vrot.slane %v965_v43, %v2615_v18  ;;  %v859_v61 = vshll.u32 %v818_v46, 16  ;;  %v864_v62 = vshrl.u32 %v2184_v45, 16  ;;  %v852_v1 = vrot.slane %v850_v58, 6  ;;  %2402 = vmatpush3.bf16.msra.mxu0 %v2500_v40  ;;  %2423 = vmatprep.subr.bf16.mxu1 %v2545_v4 }
  0x1d   : > { %v847_v59 = vrot.slane %v845_v53, 7  ;;  %v842_v0 = vor.u32 %v841_v57, %v838_v52  ;;  %v867_v2 = vshll.u32 %v2184_v45, 16  ;;  %v2138_v3 = vld.sshfl [vmem:[%s2597_s24] sm:$0x13 pattern:$0x76325410]  ;;  %v1002_v48 = vcombine.low %v2628_v30, %v2636_v34  ;;  %2403 = vmatprep.subr.bf16.mxu0 %v2545_v4 }
  0x1e   : > { %v980_v63 = vcombine.low %v972_v44, %v2665_v54  ;;  %v855_v6 = vrot.slane %v853_v60, 7  ;;  %v861_v7 = vrot.slane %v859_v61, 7  ;;  %v866_v8 = vrot.slane %v864_v62, 6  ;;  %v2502_v34 = vld [vmem:[%s2930_s1 + $0x28] sm:$0xff]  }
  0x1f   : > { %v873_v9 = vshll.u32 %v826_v51, 16  ;;  %v2193_v10 = vld.sshfl [vmem:[%s2597_s24 + $0x10] sm:$0x12 pattern:$0x76325410]  ;;  %v843_v11 = vrot.slane %v842_v0, 2  ;;  %v220_v20 = vcombine.high %v2138_v3, %v2138_v3  ;;  %v1010_v57 = vrot.slane %v1002_v48, %v2615_v18 }
  0x20   : > { %981 = vrot.lane.b32.xlu0 %v980_v63, %s2547_s12  ;;  %v869_v12 = vrot.slane %v867_v2, 7  ;;  %v878_v13 = vshrl.u32 %v2185_v50, 16  ;;  %v881_v14 = vshll.u32 %v2185_v50, 16  ;;  %v856_v16 = vor.u32 %v855_v6, %v852_v1  ;;  %2404 = vmatpush3.bf16.msra.mxu0 %v2502_v34  ;;  %v2503_v1 = vld [vmem:[%s2930_s1 + $0x68] sm:$0xff]  }
  0x21   : > { %v875_v17 = vrot.slane %v873_v9, 7  ;;  %v887_v19 = vshll.u32 %v834_v56, 16  ;;  %v848_v21 = vsel %vm2682_vm13, %v843_v11, %v847_v59  ;;  %v253_v27 = vshrl.u32 %v2138_v3, 16  ;;  %2405 = vmatprep.subr.bf16.mxu0 %v2545_v4  ;;  %2424 = vmatpush3.bf16.msra.mxu1 %v2503_v1 }
  0x22   : > { %v870_v22 = vor.u32 %v869_v12, %v866_v8  ;;  %v880_v23 = vrot.slane %v878_v13, 6  ;;  %v883_v24 = vrot.slane %v881_v14, 7  ;;  %v857_v25 = vrot.slane %v856_v16, 2  ;;  %2425 = vmatprep.subr.bf16.mxu1 %v2545_v4  ;;  %v2505_v13 = vld [vmem:[%s2930_s1 + $0x70] sm:$0xff]  }
  0x23   : > { %v889_v26 = vrot.slane %v887_v19, 7  ;;  %v256_v28 = vshll.u32 %v2138_v3, 16  ;;  %v262_v32 = vshll.u32 %v220_v20, 16  ;;  %v930_v33 = vcombine.high %v2193_v10, %v2193_v10  ;;  %v2508_v19 = vld [vmem:[%s2930_s1 + $0x38] sm:$0xff]  }
  0x24   : > { %v871_v29 = vrot.slane %v870_v22, 2  ;;  %v884_v31 = vor.u32 %v883_v24, %v880_v23  ;;  %v862_v35 = vsel %vm2682_vm13, %v857_v25, %v861_v7  ;;  %v255_v36 = vrot.slane %v253_v27, 6  ;;  %v2305_v45 = vld.sshfl [vmem:[%s2597_s24 + $0x14] sm:$0x13 pattern:$0x76325410] }
  0x25   : > { %v258_v38 = vrot.slane %v256_v28, 7  ;;  %v2197_v39 = vrot.slane %v2193_v10, 9  ;;  %v983_v43 = vcombine.low %v848_v21, %v862_v35  ;;  %v264_v44 = vrot.slane %v262_v32, 7  ;;  %v2504_v7 = vld [vmem:[%s2930_s1 + $0x30] sm:$0xff]   ;;  %2426 = vmatpush3.bf16.msra.mxu1 %v2505_v13 }
  0x26   : > { %v876_v41 = vsel %vm2682_vm13, %v871_v29, %v875_v17  ;;  %v885_v42 = vrot.slane %v884_v31, 2  ;;  %v945_v47 = vrot.slane %v930_v33, 7  ;;  %v2313_v58 = vld.sshfl [vmem:[%s2597_s24 + $0x14] sm:$0x12 pattern:$0x76325410]  ;;  %v1757_v63 = vcombine.high %v2305_v45, %v2305_v45  ;;  %2406 = vmatpush3.bf16.msra.mxu0 %v2504_v7  ;;  %2427 = vmatprep.subr.bf16.mxu1 %v2545_v4 }
  0x27   : > { %v259_v46 = vor.u32 %v258_v38, %v255_v36  ;;  %v431_v51 = vcombine.low %v862_v35, %v876_v41  ;;  %v991_v53 = vrot.slane %v983_v43, %v2615_v18  ;;  %v2530_v61 = vld.sshfl [vmem:[%s2597_s24 + $0x8] sm:$0xf pattern:$0x76325410]  ;;  %v1801_v0 = vshrl.u32 %v2305_v45, 16  ;;  %2407 = vmatprep.subr.bf16.mxu0 %v2545_v4 }
  0x28   : > { %v2705_v50 = vsel %vm2682_vm13, %v885_v42, %v889_v26  ;;  %v2712_v30 = vsel %vm2608_vm9, %v2197_v39, %v945_v47  ;;  %v2531_v62 = vld.sshfl [vmem:[%s2597_s24 + $0x10] sm:$0xf pattern:$0x76325410]  ;;  %v1804_v6 = vshll.u32 %v2305_v45, 16  ;;  %v1810_v10 = vshll.u32 %v1757_v63, 16 }
  0x29   : > { %v984_v52 = vcombine.low %v876_v41, %v2705_v50  ;;  %v260_v55 = vrot.slane %v259_v46, 2  ;;  %v1003_v56 = vcombine.low %v2642_v37, %v2712_v30  ;;  %v445_v2 = vrot.slane %v431_v51, %v2615_v18  ;;  %v2748_v23 = vld.sshfl [vmem:[%s2597_s24] sm:$0xf pattern:$0x76325410]  ;;  %v2509_v26 = vld [vmem:[%s2930_s1 + $0x78] sm:$0xff]  }
  0x2a   : > { %v1803_v9 = vrot.slane %v1801_v0, 6  ;;  %v1806_v12 = vrot.slane %v1804_v6, 7  ;;  %v1812_v16 = vrot.slane %v1810_v10, 7  ;;  %v1853_v17 = vcombine.high %v2313_v58, %v2313_v58  ;;  %2408 = vmatpush3.bf16.msra.mxu0 %v2508_v19  ;;  %2428 = vmatpush3.bf16.msra.mxu1 %v2509_v26 }
  0x2b   : > { %v998_v59 = vrot.slane %v984_v52, %v2615_v18  ;;  %v265_v60 = vsel %vm2682_vm13, %v260_v55, %v264_v44  ;;  %v1017_v3 = vrot.slane %v1003_v56, %v2615_v18  ;;  %v2317_v22 = vrot.slane %v2313_v58, 9  ;;  %v2752_v25 = vld.sshfl [vmem:[%s2597_s24 + $0x8] sm:$0xf pattern:$0x76325410]  ;;  %2433 = vmatprep.subr.bf16.mxu0 %v2545_v4  ;;  %2453 = vmatprep.subr.bf16.mxu1 %v2545_v4 }
  0x2c   : > { %v430_v37 = vcombine.low %v265_v60, %v848_v21  ;;  %v1807_v21 = vor.u32 %v1806_v12, %v1803_v9  ;;  %v1868_v24 = vrot.slane %v1853_v17, 7  ;;  %v429_v15 = vcombine.low %v2748_v23, %v2752_v25  ;;  %v2282_v40 = vld.sshfl [vmem:[%s2597_s24 + $0x4] sm:$0x13 pattern:$0x76325410]  ;;  %v2512_v25 = vld [vmem:[%s2930_s1 + $0x88] sm:$0xff]  }
  0x2d   : > { %v999_v8 = vcombine.low %v991_v53, %v998_v59  ;;  %v1018_v14 = vcombine.low %v1010_v57, %v1017_v3  ;;  %v1413_v33 = vcombine.low %v2530_v61, %v2531_v62  ;;  %v2283_v41 = vld.sshfl [vmem:[%s2597_s24 + $0x8] sm:$0x13 pattern:$0x76325410]  ;;  %v1581_v42 = vcombine.high %v2282_v40, %v2282_v40 }
  0x2e   : > { %v438_v11 = vrot.slane %v430_v37, %v2615_v18  ;;  %v1808_v27 = vrot.slane %v1807_v21, 2  ;;  %v1869_v28 = vsel %vm2608_vm9, %v2317_v22, %v1868_v24  ;;  %v1607_v43 = vshrl.u32 %v2282_v40, 16  ;;  %v2284_v45 = vld.sshfl [vmem:[%s2597_s24 + $0xc] sm:$0x13 pattern:$0x76325410] }
  0x2f   : > { %1000 = vrot.lane.b32.xlu1 %v999_v8, %s2546_s11  ;;  %v1926_v31 = vcombine.low %v2712_v30, %v1869_v28  ;;  %v1610_v44 = vshll.u32 %v2282_v40, 16  ;;  %v1589_v46 = vcombine.high %v2283_v41, %v2283_v41  ;;  %v1621_v47 = vshrl.u32 %v2283_v41, 16  ;;  %v2285_v49 = vld.sshfl [vmem:[%s2597_s24 + $0x10] sm:$0x13 pattern:$0x76325410] }
  0x30   : > { %v2745_v20 = vcombine.low %v438_v11, %v445_v2  ;;  %v1813_v29 = vsel %vm2682_vm13, %v1808_v27, %v1812_v16  ;;  %v1624_v48 = vshll.u32 %v2283_v41, 16  ;;  %v1609_v51 = vrot.slane %v1607_v43, 6  ;;  %v2794_v13 = vld.sshfl [vmem:[%s2597_s24 + $0x4] sm:$0xf pattern:$0x76325410] }
  0x31   : > { %v1907_v32 = vcombine.low %v2705_v50, %v1813_v29  ;;  %v1940_v36 = vrot.slane %v1926_v31, %v2615_v18  ;;  %v1597_v50 = vcombine.high %v2284_v45, %v2284_v45  ;;  %v1612_v52 = vrot.slane %v1610_v44, 7  ;;  %v2797_v19 = vld.sshfl [vmem:[%s2597_s24 + $0xc] sm:$0xf pattern:$0x76325410] }
  0x32   : > { %447 = vrot.lane.b32.xlu0 %v2745_v20, %s2547_s12  ;;  %v1605_v53 = vcombine.high %v2285_v49, %v2285_v49  ;;  %v1616_v55 = vshll.u32 %v1581_v42, 16  ;;  %v1626_v30 = vrot.slane %v1624_v48, 7  ;;  %v1630_v56 = vshll.u32 %v1589_v46, 16  ;;  %v2514_v46 = vld [vmem:[%s2930_s1 + $0x90] sm:$0xff]   ;;  %v2516_v48 = vld [vmem:[%s2930_s1 + $0x98] sm:$0xff]  }
  0x33   : > { %1019 = vrot.lane.b32.xlu1 %v1018_v14, %s2548_s6  ;;  %v1921_v35 = vrot.slane %v1907_v32, %v2615_v18  ;;  %v1941_v39 = vcombine.low %v2665_v54, %v1940_v36  ;;  %v1623_v54 = vrot.slane %v1621_v47, 6  ;;  %v1613_v34 = vor.u32 %v1612_v52, %v1609_v51  ;;  %v2517_v47 = vld [vmem:[%s2930_s1 + $0xd8] sm:$0xff]   ;;  %v2518_v51 = vld [vmem:[%s2930_s1 + $0xa0] sm:$0xff]   ;;  %v2523_v52 = vld [vmem:[%s2930_s1 + $0xe8] sm:$0xff]  }
  0x34   : > { %v1635_v57 = vshrl.u32 %v2284_v45, 16  ;;  %v1638_v58 = vshll.u32 %v2284_v45, 16  ;;  %v1618_v59 = vrot.slane %v1616_v55, 7  ;;  %v1644_v61 = vshll.u32 %v1597_v50, 16  ;;  %v2513_v45 = vld [vmem:[%s2930_s1 + $0xc8] sm:$0xff]  }
  0x35   : > { %v1922_v38 = vcombine.low %v445_v2, %v1921_v35  ;;  %v1627_v60 = vor.u32 %v1626_v30, %v1623_v54  ;;  %v1649_v62 = vshrl.u32 %v2285_v49, 16  ;;  %v1614_v63 = vrot.slane %v1613_v34, 2  ;;  %v2522_v55 = vld [vmem:[%s2930_s1 + $0xa8] sm:$0xff]   ;;  %v2525_v54 = vld [vmem:[%s2930_s1 + $0xf0] sm:$0xff]  }
  0x36   : > { %489 = vrot.lane.b32.xlu0 %v999_v8, %s2548_s6  ;;  %v1632_v0 = vrot.slane %v1630_v56, 7  ;;  %v1637_v1 = vrot.slane %v1635_v57, 6  ;;  %v1640_v37 = vrot.slane %v1638_v58, 7  ;;  %v1652_v6 = vshll.u32 %v2285_v49, 16  ;;  %v2519_v49 = vld [vmem:[%s2930_s1 + $0xe0] sm:$0xff]   ;;  %v2524_v34 = vld [vmem:[%s2930_s1 + $0xb0] sm:$0xff]  }
  0x37   : > { %1904 = vrot.lane.b32.xlu1 %v1018_v14, %s2547_s12  ;;  %v1628_v2 = vrot.slane %v1627_v60, 2  ;;  %v1651_v3 = vrot.slane %v1649_v62, 6  ;;  %v1619_v7 = vsel %vm2682_vm13, %v1614_v63, %v1618_v59  ;;  %v1646_v9 = vrot.slane %v1644_v61, 7  ;;  %v2527_v58 = vld [vmem:[%s2930_s1 + $0xf8] sm:$0xff]  }
  0x38   : > { %v1658_v10 = vshll.u32 %v1605_v53, 16  ;;  %v1654_v12 = vrot.slane %v1652_v6, 7  ;;  %v1373_v27 = vcombine.low %v2794_v13, %v2797_v19  ;;  %v2526_v62 = vld [vmem:[%s2930_s1 + $0xb8] sm:$0xff]  }
  0x39   : > { %v1633_v11 = vsel %vm2682_vm13, %v1628_v2, %v1632_v0  ;;  %v2162_v2 = vld [vmem:[%s2931_s2] ss:$0 sm:$0xff] }
  0x3a   : > { %1414 = vrot.lane.b32.xlu0 %v1413_v33, %s2546_s11  ;;  %v1660_v16 = vrot.slane %v1658_v10, 7  ;;  %v1870_v17 = vcombine.low %v1619_v7, %v1633_v11  ;;  %v1655_v21 = vor.u32 %v1654_v12, %v1651_v3  ;;  %v2163_v3 = vld [vmem:[%s2932_s3] ss:$0 sm:$0xff] }
  0x3b   : > { %1923 = vrot.lane.b32.xlu1 %v1922_v38, %s2546_s11 }
  0x3c   : > { %v2802_v24 = vrot.slane %v1870_v17, %v2615_v18  ;;  %v1656_v26 = vrot.slane %v1655_v21, 2 }
  0x3e   : > { %1391 = vrot.lane.b32.xlu0 %v999_v8, %s2547_s12  ;;  %v1641_v8 = vor.u32 %v1640_v37, %v1637_v1  ;;  %v1661_v28 = vsel %vm2682_vm13, %v1656_v26, %v1660_v16 }
  0x3f   : > { %1942 = vrot.lane.b32.xlu1 %v1941_v39, %s2548_s6 }
  0x40   : > { %v1642_v14 = vrot.slane %v1641_v8, 2 }
  0x42   : > { %1433 = vrot.lane.b32.xlu0 %v1922_v38, %s2548_s6  ;;  %v1647_v22 = vsel %vm2682_vm13, %v1642_v14, %v1646_v9 }
  0x43   : > { %v1871_v29 = vcombine.low %v1647_v22, %v1661_v28 }
  0x45   : > { %v2809_v31 = vrot.slane %v1871_v29, %v2615_v18 }
  0x47   : > { %v1886_v32 = vcombine.low %v2802_v24, %v2809_v31 }
  0x8b   : > { %v471_v33 = vpop.permute.xlu1 %470 }
  0x92   : > { %v982_v35 = vpop.permute.xlu0 %981 }
  0x93   : > { %v1023_v38 = vsel %vm491_vm15, %v2745_v20, %v982_v35  ;;  %v2510_v20 = vld [vmem:[%s2930_s1 + $0x80] sm:$0xff]  }
  0xa1   : > { %v1001_v36 = vpop.permute.xlu1 %1000 }
  0xa2   : > { %v1025_v18 = vsel %vm495_vm0, %v1023_v38, %v1001_v36 }
  0xa4   : > { %v448_v39 = vpop.permute.xlu0 %447 }
  0xa5   : > { %v494_v40 = vsel %vm491_vm15, %v429_v15, %v448_v39  ;;  %v1020_v41 = vpop.permute.xlu1 %1019  ;;  %v2515_v15 = vld [vmem:[%s2930_s1 + $0xd0] sm:$0xff]  }
  0xa6   : > { %v1027_v42 = vsel %vm498_vm1, %v1025_v18, %v1020_v41  ;;  %v497_v44 = vsel %vm495_vm0, %v494_v40, %v471_v33 }
  0xa7   : > { %2430 = vmatmul.mubr.bf16.vlgmr.msra.gmra.mrb[0].mxu1 %v1027_v42 }
  0xa8   : > { %v490_v43 = vpop.permute.xlu0 %489  ;;  %2454 = vmatpush3.bf16.msra.mxu1 %v2511_v5  ;;  %2469 = vmatprep.mubr.msk.bf16.mxu1 %vm2549_vm14, %v2545_v4 }
  0xa9   : > { %v500_v23 = vsel %vm498_vm1, %v497_v44, %v490_v43  ;;  %2455 = vmatprep.subr.bf16.mxu1 %v2545_v4  ;;  %v1905_v50 = vpop.permute.xlu1 %1904 }
  0xaa   : > { %2410 = vmatmul.mubr.bf16.vlgmr.msra.gmra.mrb[0].mxu0 %v500_v23  ;;  %v1946_v56 = vsel %vm491_vm15, %v1886_v32, %v1905_v50 }
  0xab   : > { %2434 = vmatpush3.bf16.msra.mxu0 %v2510_v20  ;;  %2449 = vmatprep.mubr.msk.bf16.mxu0 %vm2549_vm14, %v2545_v4 }
  0xac   : > { %2435 = vmatprep.subr.bf16.mxu0 %v2545_v4  ;;  %2456 = vmatpush3.bf16.msra.mxu1 %v2513_v45  ;;  %v1415_v53 = vpop.permute.xlu0 %1414 }
  0xad   : > { %2457 = vmatprep.subr.bf16.mxu1 %v2545_v4  ;;  %v1924_v30 = vpop.permute.xlu1 %1923 }
  0xae   : > { %v1948_v60 = vsel %vm495_vm0, %v1946_v56, %v1924_v30 }
  0xaf   : > { %2436 = vmatpush3.bf16.msra.mxu0 %v2512_v25 }
  0xb0   : > { %2437 = vmatprep.subr.bf16.mxu0 %v2545_v4  ;;  %2458 = vmatpush3.bf16.msra.mxu1 %v2515_v15  ;;  %v1392_v57 = vpop.permute.xlu0 %1391 }
  0xb1   : > { %2459 = vmatprep.subr.bf16.mxu1 %v2545_v4  ;;  %v1437_v59 = vsel %vm491_vm15, %v1373_v27, %v1392_v57  ;;  %v1943_v61 = vpop.permute.xlu1 %1942 }
  0xb2   : > { %v1439_v63 = vsel %vm495_vm0, %v1437_v59, %v1415_v53  ;;  %v1950_v1 = vsel %vm498_vm1, %v1948_v60, %v1943_v61 }
  0xb3   : > { %2438 = vmatpush3.bf16.msra.mxu0 %v2514_v46 }
  0xb4   : > { %2439 = vmatprep.subr.bf16.mxu0 %v2545_v4  ;;  %2460 = vmatpush3.bf16.msra.mxu1 %v2517_v47  ;;  %v1434_v0 = vpop.permute.xlu0 %1433 }
  0xb5   : > { %2461 = vmatprep.subr.bf16.mxu1 %v2545_v4  ;;  %v1441_v37 = vsel %vm498_vm1, %v1439_v63, %v1434_v0 }
  0xb7   : > { %2440 = vmatpush3.bf16.msra.mxu0 %v2516_v48 }
  0xb8   : > { %2441 = vmatprep.subr.bf16.mxu0 %v2545_v4  ;;  %2462 = vmatpush3.bf16.msra.mxu1 %v2519_v49 }
  0xb9   : > { %2463 = vmatprep.subr.bf16.mxu1 %v2545_v4 }
  0xbb   : > { %2442 = vmatpush3.bf16.msra.mxu0 %v2518_v51 }
  0xbc   : > { %2443 = vmatprep.subr.bf16.mxu0 %v2545_v4  ;;  %2464 = vmatpush3.bf16.msra.mxu1 %v2523_v52 }
  0xbd   : > { %2465 = vmatprep.subr.bf16.mxu1 %v2545_v4 }
  0xbf   : > { %2444 = vmatpush3.bf16.msra.mxu0 %v2522_v55 }
  0xc0   : > { %2445 = vmatprep.subr.bf16.mxu0 %v2545_v4  ;;  %2466 = vmatpush3.bf16.msra.mxu1 %v2525_v54 }
  0xc1   : > { %2467 = vmatprep.subr.bf16.mxu1 %v2545_v4 }
  0xc3   : > { %2446 = vmatpush3.bf16.msra.mxu0 %v2524_v34 }
  0xc4   : > { %2447 = vmatprep.subr.bf16.mxu0 %v2545_v4  ;;  %2468 = vmatpush3.bf16.msra.mxu1 %v2527_v58 }
  0xc7   : > { %2448 = vmatpush3.bf16.msra.mxu0 %v2526_v62  ;;  %2470 = vmatmul.mubr.bf16.vlgmr.msra.gmra.mrb[4].mxu1 %v1950_v1 }
  0xca   : > { %2450 = vmatmul.mubr.bf16.vlgmr.msra.gmra.mrb[4].mxu0 %v1441_v37 }
 0x17a   : > { %v1128_v4 = vpop.f32.mrb[0].mxu1 }
 0x17b   : > { %v1135_v6 = vmul.f32 %v2162_v2, %v1128_v4  ;;  %v2431_v7 = vpop.f32.mrb[1].mxu1 }
 0x17c   : > { %v1131_v8 = vpop.f32.mrb[2].mxu1 }
 0x17d   : > { %v600_v9 = vpop.f32.mrb[0].mxu0  ;;  %v1137_v10 = vadd.f32 %v2163_v3, %v1135_v6  ;;  %v1136_v11 = vmul.f32 %v2162_v2, %v1131_v8  ;;  %v2432_v12 = vpop.f32.mrb[3].mxu1 }
 0x17e   : > { %v613_v13 = vmul.f32 %v2162_v2, %v600_v9  ;;  %v2411_v14 = vpop.f32.mrb[1].mxu0 }
 0x17f   : > { %v1139_v16 = vmax.f32 %v1137_v10, 0.0  ;;  %v603_v17 = vpop.f32.mrb[2].mxu0  ;;  %v1138_v19 = vadd.f32 %v2163_v3, %v1136_v11 }
 0x180   : > { %v621_v21 = vadd.f32 %v2163_v3, %v613_v13  ;;  %v614_v22 = vmul.f32 %v2162_v2, %v603_v17  ;;  %v2412_v24 = vpop.f32.mrb[3].mxu0 }
 0x181   : > { %v2351_v26 = vpack.c.bf16 %v1139_v16, %v1139_v16  ;;  %v1140_v27 = vmax.f32 %v1138_v19, 0.0 }
 0x182   : > { %v623_v28 = vmax.f32 %v621_v21, 0.0  ;;  %v622_v29 = vadd.f32 %v2163_v3, %v614_v22 }
 0x183   : > { %2224 = vst.msk [vmem:[%s2908_s23 + $0x8] sm:$0xf] %vm633_vm2, %v2351_v26  ;;  %v2352_v31 = vpack.c.bf16 %v1140_v27, %v1140_v27 }
 0x184   : > { %v2349_v32 = vpack.c.bf16 %v623_v28, %v623_v28  ;;  %v624_v33 = vmax.f32 %v622_v29, 0.0 }
 0x185   : > { %2225 = vst.msk [vmem:[%s2908_s23 + $0xc] sm:$0xf] %vm633_vm2, %v2352_v31 }
 0x186   : > { %634 = vst.msk [vmem:[%s2908_s23] sm:$0xf] %vm633_vm2, %v2349_v32  ;;  %v2350_v35 = vpack.c.bf16 %v624_v33, %v624_v33 }
 0x188   : > { %635 = vst.msk [vmem:[%s2908_s23 + $0x4] sm:$0xf] %vm633_vm2, %v2350_v35 }
 0x19a   : > { %v2051_v36 = vpop.f32.mrb[4].mxu1 }
 0x19b   : > { %v2058_v38 = vmul.f32 %v2162_v2, %v2051_v36  ;;  %v2471_v39 = vpop.f32.mrb[5].mxu1 }
 0x19c   : > { %v2054_v5 = vpop.f32.mrb[6].mxu1 }
 0x19d   : > { %v1542_v18 = vpop.f32.mrb[4].mxu0  ;;  %v2060_v40 = vadd.f32 %v2163_v3, %v2058_v38  ;;  %v2059_v41 = vmul.f32 %v2162_v2, %v2054_v5  ;;  %v2472_v42 = vpop.f32.mrb[7].mxu1 }
 0x19e   : > { %v1549_v20 = vmul.f32 %v2162_v2, %v1542_v18  ;;  %v2451_v43 = vpop.f32.mrb[5].mxu0 }
 0x19f   : > { %v2062_v44 = vmax.f32 %v2060_v40, 0.0  ;;  %v1545_v45 = vpop.f32.mrb[6].mxu0  ;;  %v2061_v23 = vadd.f32 %v2163_v3, %v2059_v41 }
 0x1a0   : > { %v1551_v25 = vadd.f32 %v2163_v3, %v1549_v20  ;;  %v1550_v15 = vmul.f32 %v2162_v2, %v1545_v45  ;;  %v2452_v46 = vpop.f32.mrb[7].mxu0 }
 0x1a1   : > { %v2355_v47 = vpack.c.bf16 %v2062_v44, %v2062_v44  ;;  %v2063_v48 = vmax.f32 %v2061_v23, 0.0 }
 0x1a2   : > { %v1553_v49 = vmax.f32 %v1551_v25, 0.0  ;;  %v1552_v50 = vadd.f32 %v2163_v3, %v1550_v15 }
 0x1a3   : > { %2344 = vst.msk [vmem:[%s2908_s23 + $0x18] sm:$0xf] %vm633_vm2, %v2355_v47  ;;  %v2356_v51 = vpack.c.bf16 %v2063_v48, %v2063_v48 }
 0x1a4   : > { %v2353_v52 = vpack.c.bf16 %v1553_v49, %v1553_v49  ;;  %v1554_v53 = vmax.f32 %v1552_v50, 0.0 }
 0x1a5   : > { %2345 = vst.msk [vmem:[%s2908_s23 + $0x1c] sm:$0xf] %vm633_vm2, %v2356_v51 }
 0x1a6   : > { %2276 = vst.msk [vmem:[%s2908_s23 + $0x10] sm:$0xf] %vm633_vm2, %v2353_v52  ;;  %v2354_v55 = vpack.c.bf16 %v1554_v53, %v1554_v53 }
 0x1a8   : > { %2277 = vst.msk [vmem:[%s2908_s23 + $0x14] sm:$0xf] %vm633_vm2, %v2354_v55 }
 0x1a9 PF: > { %s14_s15 = sadd.s32 1, %s2542_s15  }
 0x1aa   : > { %p11_p4 = scmp.ge.s32.totalorder %s14_s15, 4  }
 0x1ac   :  { %13 = sbr.rel (!%p11_p4) target bundleno = 1 (0x1), region = 74 }

// kernel: ewm_convG_forward.4
= control target key start
LH: loop header
LB: loop body
LE: loop exit
PB: predicated region body
PF: predicated region fallthrough
CT: control target
= control target key end

     0   :  { %s3206_s15 = smov 0   ;;  %s4171_s0 = inlined_call_operand.vmem [shape: bf16[2,10,10,16], index: 0, kind: input, shape index: {}]   ;;  %s4172_s1 = inlined_call_operand.vmem [shape: bf16[2,2,64,8], index: 1, kind: input, shape index: {}]   ;;  %s4173_s2 = inlined_call_operand.vmem [shape: f32[1,8], index: 2, kind: input, shape index: {}]   ;;  %s4174_s3 = inlined_call_operand.vmem [shape: f32[1,8], index: 3, kind: input, shape index: {}]   ;;  %s4175_s4 = inlined_call_operand.vmem [shape: bf16[2,2,2,64,8], index: 4, kind: output, shape index: {}]  }
   0x1 LB: > { %s2643_s16 = sadd.s32 4294967295, %s3176_s15   ;;  %p2647_p0 = scmp.ge.s32.totalorder %s3176_s15, 1  ;;  %s3176_s15 = sphi %s3206_s15, %s14_s15  }
   0x2   : > { %p162_p1 = scmp.lt.s32.totalorder %s3176_s15, 3 }
   0x4   : > { %p163_p2 = pnand %p2647_p0, %p162_p1 }
   0x5   : > { %p188_p3 = scmp.lt.s32.totalorder (!%p163_p2), %s2643_s16, 1  ;;  %vm915_vm0 = vcmask (!%p163_p2), 1042432   ;;  %vm916_vm1 = vcmask (!%p163_p2), 1046532   ;;  %s3178_s21 = smov (!%p163_p2), 32   ;;  %vm217_vm3 = vsmask.f32 (!%p163_p2), 3328 }
   0x6   : > { %166 = sbr.rel (%p163_p2) target bundleno = 508 (0x1fc), region = 36  ;;  %vm3240_vm2 = vmor (!%p163_p2), %vm915_vm0, %vm916_vm1  ;;  %vm218_vm4 = vsmask.f32 (!%p163_p2), 7440  ;;  %s3179_s22 = smov (!%p163_p2), 16   ;;  %vm549_vm6 = vcmask (!%p163_p2), 130048   ;;  %vm562_vm7 = vcmask (!%p163_p2), 261120  }
   0x7   : > { %s3180_s23 = smov (!%p163_p2), 48   ;;  %vm3301_vm5 = vmor (!%p163_p2), %vm217_vm3, %vm218_vm4  ;;  %vm571_vm8 = vcmask (!%p163_p2), 392192   ;;  %vm612_vm9 = vcmask (!%p163_p2), 523264   ;;  %vm754_vm10 = vcmask (!%p163_p2), 60416  }
   0xd   : > { %s4181_s16 = smov (!%p188_p3, %s2643_s16), 1 }
   0xe   : > { %s3112_s17 = smul.u32 80, %s4181_s16  ;;  %s2983_s10 = sshll.u32 %s4181_s16, 7 }
   0xf   : > { %s4045_s13 = scalar_lea.vmem %s4175_s4, %s2983_s10 }
  0x10   : > { %s3220_s20 = scalar_lea.vmem %s4171_s0, %s3112_s17 }
  0x11   : > { %v2653_v0 = vld [vmem:[%s3220_s20 + $0x18] sm:$0xf]  ;;  %v2654_v1 = vld [vmem:[%s3220_s20 + $0x20] sm:$0xf]  ;;  %v2651_v2 = vld [vmem:[%s3220_s20 + $0x8] sm:$0xf] }
  0x12   : > { %v392_v3 = vshrl.u32 %v2654_v1, 16  ;;  %v395_v4 = vshll.u32 %v2654_v1, 16  ;;  %v2676_v5 = vcombine.low %v2653_v0, %v2654_v1  ;;  %v378_v6 = vshrl.u32 %v2653_v0, 16  ;;  %v2652_v7 = vld [vmem:[%s3220_s20 + $0x10] sm:$0xf] }
  0x13   : > { %v381_v8 = vshll.u32 %v2653_v0, 16  ;;  %v364_v9 = vshrl.u32 %v2652_v7, 16  ;;  %v367_v10 = vshll.u32 %v2652_v7, 16  ;;  %v2675_v11 = vcombine.low %v2651_v2, %v2652_v7  ;;  %v3227_v12 = vld [vmem:[%s3220_s20 + $0x4] sm:$0x1] }
  0x14   : > { %v394_v13 = vrot.slane %v392_v3, 4  ;;  %v397_v14 = vrot.slane %v395_v4, 5  ;;  %523 = vrot.lane.b32.xlu0 %v2676_v5, %s3178_s21  ;;  %v380_v15 = vrot.slane %v378_v6, 4  ;;  %v350_v16 = vshrl.u32 %v2651_v2, 16  ;;  %v3231_v17 = vld [vmem:[%s3220_s20 + $0xc] sm:$0x1] }
  0x15   : > { %v383_v18 = vrot.slane %v381_v8, 5  ;;  %v366_v19 = vrot.slane %v364_v9, 4  ;;  %v369_v20 = vrot.slane %v367_v10, 5  ;;  %521 = vrot.lane.b32.xlu1 %v2675_v11, %s3178_s21  ;;  %v353_v21 = vshll.u32 %v2651_v2, 16  ;;  %v891_v22 = vld [vmem:[%s3220_s20] sm:$0xe] }
  0x16   : > { %v398_v23 = vor.u32 %v397_v14, %v394_v13  ;;  %v352_v24 = vrot.slane %v350_v16, 4  ;;  %v789_v25 = vshll.u32 %v3227_v12, 16  ;;  %v803_v26 = vshll.u32 %v3231_v17, 16  ;;  %v892_v27 = vld [vmem:[%s3220_s20 + $0x8] sm:$0xe] }
  0x17   : > { %v384_v28 = vor.u32 %v383_v18, %v380_v15  ;;  %v370_v29 = vor.u32 %v369_v20, %v366_v19  ;;  %v355_v30 = vrot.slane %v353_v21, 5  ;;  %v2701_v32 = vrot.slane %v891_v22, 9  ;;  %v3245_v33 = vld [vmem:[%s3220_s20 + $0xc] sm:$0x1]  ;;  %v3248_v34 = vld [vmem:[%s3220_s20 + $0x14] sm:$0x1] }
  0x18   : > { %v3250_v35 = vrot.slane %v398_v23, 4  ;;  %v920_v36 = vrot.slane %v3227_v12, 5  ;;  %v2702_v37 = vrot.slane %v892_v27, 9  ;;  %v924_v38 = vrot.slane %v3231_v17, 5  ;;  %v2725_v39 = vld [vmem:[%s3220_s20 + $0x8] sm:$0xe] }
  0x19   : > { %v3255_v40 = vrot.slane %v384_v28, 4  ;;  %v3257_v41 = vrot.slane %v370_v29, 4  ;;  %v356_v42 = vor.u32 %v355_v30, %v352_v24  ;;  %v2726_v43 = vld [vmem:[%s3220_s20 + $0x10] sm:$0xe]  ;;  %v2733_v44 = vrot.slane %v2725_v39, 9 }
  0x1a   : > { %v921_v45 = vsel %vm3240_vm2, %v2701_v32, %v920_v36  ;;  %v925_v46 = vsel %vm3240_vm2, %v2702_v37, %v924_v38  ;;  %v1104_v47 = vrot.slane %v3245_v33, 5  ;;  %v2734_v48 = vrot.slane %v2726_v43, 9  ;;  %v3266_v49 = vld [vmem:[%s3220_s20 + $0x14] sm:$0x1]  ;;  %v3269_v50 = vld [vmem:[%s3220_s20 + $0x1c] sm:$0x1] }
  0x1b   : > { %v3271_v51 = vrot.slane %v356_v42, 4  ;;  %v2745_v52 = vcombine.low %v921_v45, %v925_v46  ;;  %v1108_v53 = vrot.slane %v3248_v34, 5  ;;  %v817_v54 = vshll.u32 %v3266_v49, 16  ;;  %v893_v55 = vld [vmem:[%s3220_s20 + $0x10] sm:$0xe] }
  0x1c   : > { %v1105_v56 = vsel %vm3240_vm2, %v2733_v44, %v1104_v47  ;;  %v831_v57 = vshll.u32 %v3269_v50, 16  ;;  %v894_v58 = vld [vmem:[%s3220_s20 + $0x18] sm:$0xe]  ;;  %v2703_v59 = vrot.slane %v893_v55, 9  ;;  %v928_v60 = vrot.slane %v3266_v49, 5 }
  0x1d   : > { %1158 = vrot.lane.b32.xlu0 %v2745_v52, %s3179_s22  ;;  %v1109_v61 = vsel %vm3240_vm2, %v2734_v48, %v1108_v53  ;;  %v2704_v62 = vrot.slane %v894_v58, 9  ;;  %v932_v63 = vrot.slane %v3269_v50, 5  ;;  %v203_v0 = vld [vmem:[%s3220_s20 + $0x10] sm:$0xf]  ;;  %v204_v1 = vld [vmem:[%s3220_s20 + $0x18] sm:$0xf] }
  0x1e   : > { %v2753_v2 = vcombine.low %v1105_v56, %v1109_v61  ;;  %v929_v3 = vsel %vm3240_vm2, %v2703_v59, %v928_v60  ;;  %v211_v4 = vld [vmem:[%s3220_s20 + $0x14] sm:$0x1]  ;;  %v212_v5 = vld [vmem:[%s3220_s20 + $0x1c] sm:$0x1]  ;;  %v249_v6 = vshrl.u32 %v203_v0, 16  ;;  %v252_v7 = vshll.u32 %v203_v0, 16 }
  0x1f   : > { %v933_v8 = vsel %vm3240_vm2, %v2704_v62, %v932_v63  ;;  %v258_v9 = vshll.u32 %v211_v4, 16  ;;  %v263_v10 = vshrl.u32 %v204_v1, 16  ;;  %v266_v11 = vshll.u32 %v204_v1, 16  ;;  %v201_v13 = vld [vmem:[%s3220_s20] sm:$0xf] }
  0x20   : > { %1198 = vrot.lane.b32.xlu1 %v2753_v2, %s3180_s23  ;;  %v2746_v14 = vcombine.low %v929_v3, %v933_v8  ;;  %v251_v15 = vrot.slane %v249_v6, 4  ;;  %v254_v16 = vrot.slane %v252_v7, 5  ;;  %v272_v18 = vshll.u32 %v212_v5, 16  ;;  %v202_v19 = vld [vmem:[%s3220_s20 + $0x8] sm:$0xf] }
  0x21   : > { %v260_v20 = vrot.slane %v258_v9, 5  ;;  %v265_v21 = vrot.slane %v263_v10, 4  ;;  %v268_v22 = vrot.slane %v266_v11, 5  ;;  %v209_v23 = vld [vmem:[%s3220_s20 + $0x4] sm:$0x1]  ;;  %v221_v24 = vshrl.u32 %v201_v13, 16 }
  0x22   : > { %1160 = vrot.lane.b32.xlu0 %v2746_v14, %s3179_s22  ;;  %v255_v27 = vor.u32 %v254_v16, %v251_v15  ;;  %v274_v28 = vrot.slane %v272_v18, 5  ;;  %v210_v29 = vld [vmem:[%s3220_s20 + $0xc] sm:$0x1]  ;;  %v224_v30 = vshll.u32 %v201_v13, 16  ;;  %v230_v32 = vshll.u32 %v209_v23, 16 }
  0x23   : > { %v269_v37 = vor.u32 %v268_v22, %v265_v21  ;;  %v223_v38 = vrot.slane %v221_v24, 4  ;;  %v235_v39 = vshrl.u32 %v202_v19, 16  ;;  %v238_v42 = vshll.u32 %v202_v19, 16  ;;  %v2709_v43 = vld [vmem:[%s3220_s20 + $0x8] sm:$0xf] }
  0x24   : > { %v256_v44 = vrot.slane %v255_v27, 4  ;;  %v226_v45 = vrot.slane %v224_v30, 5  ;;  %v232_v46 = vrot.slane %v230_v32, 5  ;;  %v244_v47 = vshll.u32 %v210_v29, 16  ;;  %v2711_v55 = vld [vmem:[%s3220_s20 + $0x10] sm:$0xf] }
  0x25   : > { %v270_v48 = vrot.slane %v269_v37, 4  ;;  %v237_v52 = vrot.slane %v235_v39, 4  ;;  %v240_v53 = vrot.slane %v238_v42, 5  ;;  %v967_v56 = vshrl.u32 %v2709_v43, 16  ;;  %v2713_v2 = vld [vmem:[%s3220_s20 + $0x18] sm:$0xf] }
  0x26   : > { %v261_v58 = vsel %vm3301_vm5, %v256_v44, %v260_v20  ;;  %v227_v59 = vor.u32 %v226_v45, %v223_v38  ;;  %v246_v60 = vrot.slane %v244_v47, 5  ;;  %v970_v61 = vshll.u32 %v2709_v43, 16  ;;  %v3315_v11 = vld [vmem:[%s3220_s20 + $0x1c] sm:$0x1]  ;;  %v2715_v15 = vld [vmem:[%s3220_s20 + $0x20] sm:$0xf] }
  0x27   : > { %v275_v62 = vsel %vm3301_vm5, %v270_v48, %v274_v28  ;;  %v241_v63 = vor.u32 %v240_v53, %v237_v52  ;;  %v969_v0 = vrot.slane %v967_v56, 4  ;;  %v976_v1 = vshll.u32 %v3245_v33, 16  ;;  %v3322_v16 = vld [vmem:[%s3220_s20 + $0x24] sm:$0x1]  ;;  %v2659_v22 = vld [vmem:[%s3220_s20 + $0xc] sm:$0x1] }
  0x28   : > { %v2672_v3 = vcombine.low %v261_v58, %v275_v62  ;;  %v228_v4 = vrot.slane %v227_v59, 4  ;;  %v972_v5 = vrot.slane %v970_v61, 5  ;;  %v981_v6 = vshrl.u32 %v2711_v55, 16  ;;  %v2660_v29 = vld [vmem:[%s3220_s20 + $0x14] sm:$0x1] }
  0x29   : > { %v242_v7 = vrot.slane %v241_v63, 4  ;;  %v978_v8 = vrot.slane %v976_v1, 5  ;;  %v984_v9 = vshll.u32 %v2711_v55, 16  ;;  %v990_v10 = vshll.u32 %v3248_v34, 16  ;;  %v2661_v39 = vld [vmem:[%s3220_s20 + $0x1c] sm:$0x1] }
  0x2a   : > { %495 = vrot.lane.b32.xlu1 %v2672_v3, %s3179_s22  ;;  %v233_v33 = vsel %vm3301_vm5, %v228_v4, %v232_v46  ;;  %v973_v13 = vor.u32 %v972_v5, %v969_v0  ;;  %v983_v14 = vrot.slane %v981_v6, 4  ;;  %v995_v18 = vshrl.u32 %v2713_v2, 16  ;;  %v2662_v46 = vld [vmem:[%s3220_s20 + $0x24] sm:$0x1]  ;;  %v2728_v1 = vld [vmem:[%s3220_s20 + $0x20] sm:$0xe] }
  0x2b   : > { %v247_v19 = vsel %vm3301_vm5, %v242_v7, %v246_v60  ;;  %v986_v20 = vrot.slane %v984_v9, 5  ;;  %v992_v34 = vrot.slane %v990_v10, 5  ;;  %v998_v21 = vshll.u32 %v2713_v2, 16  ;;  %v2727_v60 = vld [vmem:[%s3220_s20 + $0x18] sm:$0xe] }
  0x2c   : > { %v2671_v23 = vcombine.low %v233_v33, %v247_v19  ;;  %v974_v24 = vrot.slane %v973_v13, 4  ;;  %v997_v27 = vrot.slane %v995_v18, 4  ;;  %v1004_v28 = vshll.u32 %v3315_v11, 16  ;;  %v205_v10 = vld [vmem:[%s3220_s20 + $0x20] sm:$0xf] }
  0x2d   : > { %v987_v30 = vor.u32 %v986_v20, %v983_v14  ;;  %v1000_v32 = vrot.slane %v998_v21, 5  ;;  %v1009_v37 = vshrl.u32 %v2715_v15, 16  ;;  %v1012_v38 = vshll.u32 %v2715_v15, 16  ;;  %v3132_v33 = vld [vmem:[%s4172_s1] sm:$0xff]   ;;  %v206_v18 = vld [vmem:[%s3220_s20 + $0x28] sm:$0xf] }
  0x2e   : > { %493 = vrot.lane.b32.xlu0 %v2671_v23, %s3179_s22  ;;  %v979_v42 = vsel %vm3301_vm5, %v974_v24, %v978_v8  ;;  %v1006_v43 = vrot.slane %v1004_v28, 5  ;;  %v1018_v44 = vshll.u32 %v3322_v16, 16  ;;  %v359_v45 = vshll.u32 %v2659_v22, 16  ;;  %v213_v19 = vld [vmem:[%s3220_s20 + $0x24] sm:$0x1]  ;;  %3048 = vmatprep.subr.bf16.mxu0 %v3132_v33 }
  0x2f   : > { %v988_v47 = vrot.slane %v987_v30, 4  ;;  %v1001_v48 = vor.u32 %v1000_v32, %v997_v27  ;;  %v1011_v52 = vrot.slane %v1009_v37, 4  ;;  %v1014_v53 = vrot.slane %v1012_v38, 5  ;;  %v214_v22 = vld [vmem:[%s3220_s20 + $0x2c] sm:$0x1]  ;;  %3049 = vmatpush3.bf16.msra.mxu0 %v3132_v33 }
  0x30   : > { %v1020_v55 = vrot.slane %v1018_v44, 5  ;;  %v361_v56 = vrot.slane %v359_v45, 5  ;;  %v373_v58 = vshll.u32 %v2660_v29, 16  ;;  %v387_v59 = vshll.u32 %v2661_v39, 16  ;;  %v3371_v28 = vld [vmem:[%s3220_s20 + $0x24] sm:$0x1] }
  0x31   : > { %v993_v61 = vsel %vm3301_vm5, %v988_v47, %v992_v34  ;;  %v1002_v62 = vrot.slane %v1001_v48, 4  ;;  %v1015_v63 = vor.u32 %v1014_v53, %v1011_v52  ;;  %v401_v0 = vshll.u32 %v2662_v46, 16  ;;  %v3374_v29 = vld [vmem:[%s3220_s20 + $0x2c] sm:$0x1]  ;;  %v895_v38 = vld [vmem:[%s3220_s20 + $0x20] sm:$0xe] }
  0x32   : > { %v2749_v2 = vcombine.low %v979_v42, %v993_v61  ;;  %v362_v3 = vsel %vm3301_vm5, %v3271_v51, %v361_v56  ;;  %v375_v4 = vrot.slane %v373_v58, 5  ;;  %v389_v5 = vrot.slane %v387_v59, 5  ;;  %v3136_v39 = vld [vmem:[%s4172_s1 + $0x28] sm:$0xff]   ;;  %v3138_v47 = vld [vmem:[%s4172_s1 + $0x10] sm:$0xff]   ;;  %v208_v61 = vld [vmem:[%s3220_s20 + $0x38] sm:$0xf] }
  0x33   : > { %v1007_v6 = vsel %vm3301_vm5, %v1002_v62, %v1006_v43  ;;  %v1016_v7 = vrot.slane %v1015_v63, 4  ;;  %v403_v8 = vrot.slane %v401_v0, 5  ;;  %v2735_v9 = vrot.slane %v2727_v60, 9  ;;  %v896_v46 = vld [vmem:[%s3220_s20 + $0x28] sm:$0xe] }
  0x34   : > { %1178 = vrot.lane.b32.xlu1 %v2749_v2, %s3178_s21  ;;  %v376_v51 = vsel %vm3301_vm5, %v3257_v41, %v375_v4  ;;  %v390_v13 = vsel %vm3301_vm5, %v3255_v40, %v389_v5  ;;  %v1112_v14 = vrot.slane %v3315_v11, 5  ;;  %v2736_v15 = vrot.slane %v2728_v1, 9  ;;  %v3133_v40 = vld [vmem:[%s4172_s1 + $0x20] sm:$0xff]   ;;  %v207_v53 = vld [vmem:[%s3220_s20 + $0x30] sm:$0xf] }
  0x35   : > { %v1021_v20 = vsel %vm3301_vm5, %v1016_v7, %v1020_v55  ;;  %v2679_v34 = vcombine.low %v362_v3, %v376_v51  ;;  %v404_v21 = vsel %vm3301_vm5, %v3250_v35, %v403_v8  ;;  %v1116_v41 = vrot.slane %v3322_v16, 5  ;;  %v3135_v35 = vld [vmem:[%s4172_s1 + $0x8] sm:$0xff]   ;;  %3064 = vmatprep.subr.bf16.mxu1 %v3133_v40  ;;  %v215_v55 = vld [vmem:[%s3220_s20 + $0x34] sm:$0x1]  ;;  %v3140_v7 = vld [vmem:[%s4172_s1 + $0x18] sm:$0xff]  }
  0x36   : > { %v2750_v11 = vcombine.low %v1007_v6, %v1021_v20  ;;  %v2680_v23 = vcombine.low %v390_v13, %v404_v21  ;;  %v1113_v24 = vsel %vm3240_vm2, %v2735_v9, %v1112_v14  ;;  %v277_v27 = vshrl.u32 %v205_v10, 16  ;;  %3065 = vmatpush3.bf16.msra.mxu1 %v3133_v40  ;;  %3050 = vmatprep.subr.bf16.mxu0 %v3135_v35  ;;  %v3139_v2 = vld [vmem:[%s4172_s1 + $0x30] sm:$0xff]   ;;  %v216_v33 = vld [vmem:[%s3220_s20 + $0x3c] sm:$0x1]  ;;  %v2655_v13 = vld [vmem:[%s3220_s20 + $0x28] sm:$0xf] }
  0x37   : > { %v1117_v16 = vsel %vm3240_vm2, %v2736_v15, %v1116_v41  ;;  %v280_v30 = vshll.u32 %v205_v10, 16  ;;  %v286_v32 = vshll.u32 %v213_v19, 16  ;;  %v291_v37 = vshrl.u32 %v206_v18, 16  ;;  %3051 = vmatpush3.bf16.msra.mxu0 %v3135_v35  ;;  %3066 = vmatprep.subr.bf16.mxu1 %v3136_v39  ;;  %v2656_v20 = vld [vmem:[%s3220_s20 + $0x30] sm:$0xf] }
  0x38   : > { %1180 = vrot.lane.b32.xlu0 %v2750_v11, %s3178_s21  ;;  %541 = vrot.lane.b32.xlu1 %v2679_v34, %s3180_s23  ;;  %v2754_v42 = vcombine.low %v1113_v24, %v1117_v16  ;;  %v279_v43 = vrot.slane %v277_v27, 4  ;;  %v294_v44 = vshll.u32 %v206_v18, 16  ;;  %v300_v45 = vshll.u32 %v214_v22, 16  ;;  %v3141_v34 = vld [vmem:[%s4172_s1 + $0x38] sm:$0xff]   ;;  %v776_v35 = vld [vmem:[%s3220_s20 + $0x34] sm:$0x1] }
  0x39   : > { %v282_v48 = vrot.slane %v280_v30, 5  ;;  %v293_v52 = vrot.slane %v291_v37, 4  ;;  %v288_v56 = vrot.slane %v286_v32, 5  ;;  %v2705_v60 = vrot.slane %v895_v38, 9  ;;  %3052 = vmatprep.subr.bf16.mxu0 %v3138_v47  ;;  %v778_v38 = vld [vmem:[%s3220_s20 + $0x3c] sm:$0x1] }
  0x3a   : > { %v296_v58 = vrot.slane %v294_v44, 5  ;;  %v302_v59 = vrot.slane %v300_v45, 5  ;;  %v936_v63 = vrot.slane %v3371_v28, 5  ;;  %v2706_v0 = vrot.slane %v896_v46, 9  ;;  %3067 = vmatpush3.bf16.msra.mxu1 %v3136_v39  ;;  %v897_v39 = vld [vmem:[%s3220_s20 + $0x30] sm:$0xe] }
  0x3b   : > { %v283_v62 = vor.u32 %v282_v48, %v279_v43  ;;  %v940_v1 = vrot.slane %v3374_v29, 5  ;;  %v305_v4 = vshrl.u32 %v207_v53, 16  ;;  %v308_v5 = vshll.u32 %v207_v53, 16  ;;  %3053 = vmatpush3.bf16.msra.mxu0 %v3138_v47  ;;  %3068 = vmatprep.subr.bf16.mxu1 %v3139_v2  ;;  %v898_v46 = vld [vmem:[%s3220_s20 + $0x38] sm:$0xe] }
  0x3c   : > { %543 = vrot.lane.b32.xlu0 %v2680_v23, %s3180_s23  ;;  %1200 = vrot.lane.b32.xlu1 %v2754_v42, %s3180_s23  ;;  %v297_v3 = vor.u32 %v296_v58, %v293_v52  ;;  %v314_v6 = vshll.u32 %v215_v55, 16  ;;  %v937_v9 = vsel %vm3240_vm2, %v2705_v60, %v936_v63  ;;  %v319_v51 = vshrl.u32 %v208_v61, 16  ;;  %v2717_v55 = vld [vmem:[%s3220_s20 + $0x28] sm:$0xf] }
  0x3d   : > { %v284_v8 = vrot.slane %v283_v62, 4  ;;  %v941_v10 = vsel %vm3240_vm2, %v2706_v0, %v940_v1  ;;  %v307_v18 = vrot.slane %v305_v4, 4  ;;  %v310_v19 = vrot.slane %v308_v5, 5  ;;  %3054 = vmatprep.subr.bf16.mxu0 %v3140_v7  ;;  %v2719_v62 = vld [vmem:[%s3220_s20 + $0x30] sm:$0xf] }
  0x3e   : > { %v298_v14 = vrot.slane %v297_v3, 4  ;;  %v2747_v15 = vcombine.low %v937_v9, %v941_v10  ;;  %v316_v41 = vrot.slane %v314_v6, 5  ;;  %v321_v22 = vrot.slane %v319_v51, 4  ;;  %3069 = vmatpush3.bf16.msra.mxu1 %v3139_v2  ;;  %v3442_v9 = vld [vmem:[%s3220_s20 + $0x34] sm:$0x1] }
  0x3f   : > { %v289_v21 = vsel %vm3301_vm5, %v284_v8, %v288_v56  ;;  %v322_v40 = vshll.u32 %v208_v61, 16  ;;  %v311_v23 = vor.u32 %v310_v19, %v307_v18  ;;  %v328_v24 = vshll.u32 %v216_v33, 16  ;;  %3055 = vmatpush3.bf16.msra.mxu0 %v3140_v7  ;;  %3070 = vmatprep.subr.bf16.mxu1 %v3141_v34  ;;  %v3430_v56 = vld [vmem:[%s3220_s20 + $0x2c] sm:$0x1]  ;;  %v2657_v51 = vld [vmem:[%s3220_s20 + $0x38] sm:$0xf] }
  0x40   : > { %v303_v11 = vsel %vm3301_vm5, %v298_v14, %v302_v59  ;;  %1162 = vrot.lane.b32.xlu1 %v2747_v15, %s3179_s22  ;;  %v406_v27 = vshrl.u32 %v2655_v13, 16  ;;  %v409_v32 = vshll.u32 %v2655_v13, 16  ;;  %v420_v37 = vshrl.u32 %v2656_v20, 16  ;;  %v2658_v19 = vld [vmem:[%s3220_s20 + $0x40] sm:$0xf] }
  0x41   : > { %v2673_v16 = vcombine.low %v289_v21, %v303_v11  ;;  %v324_v30 = vrot.slane %v322_v40, 5  ;;  %v845_v42 = vshll.u32 %v3371_v28, 16  ;;  %v859_v43 = vshll.u32 %v3374_v29, 16 }
  0x42   : > { %v312_v44 = vrot.slane %v311_v23, 4  ;;  %v423_v45 = vshll.u32 %v2656_v20, 16  ;;  %v330_v48 = vrot.slane %v328_v24, 5  ;;  %v3426_v52 = vrot.slane %v406_v27, 4  ;;  %3071 = vmatpush3.bf16.msra.mxu1 %v3141_v34 }
  0x43   : > { %497 = vrot.lane.b32.xlu0 %v2673_v16, %s3179_s22  ;;  %v325_v47 = vor.u32 %v324_v30, %v321_v22  ;;  %v2677_v53 = vcombine.low %v2655_v13, %v2656_v20  ;;  %v411_v59 = vrot.slane %v409_v32, 5  ;;  %v422_v60 = vrot.slane %v420_v37, 4  ;;  %v2663_v30 = vld [vmem:[%s3220_s20 + $0x2c] sm:$0x1]  ;;  %v2664_v32 = vld [vmem:[%s3220_s20 + $0x34] sm:$0x1] }
  0x44   : > { %v317_v58 = vsel %vm3301_vm5, %v312_v44, %v316_v41  ;;  %v425_v61 = vrot.slane %v423_v45, 5  ;;  %v2707_v0 = vrot.slane %v897_v39, 9  ;;  %v944_v1 = vrot.slane %v776_v35, 5  ;;  %v2721_v45 = vld [vmem:[%s3220_s20 + $0x38] sm:$0xf] }
  0x45   : > { %v326_v63 = vrot.slane %v325_v47, 4  ;;  %525 = vrot.lane.b32.xlu1 %v2677_v53, %s3178_s21  ;;  %v2708_v2 = vrot.slane %v898_v46, 9  ;;  %v948_v3 = vrot.slane %v778_v38, 5  ;;  %v1023_v4 = vshrl.u32 %v2717_v55, 16 }
  0x46   : > { %v1026_v5 = vshll.u32 %v2717_v55, 16  ;;  %v1032_v6 = vshll.u32 %v3430_v56, 16  ;;  %v945_v8 = vsel %vm3240_vm2, %v2707_v0, %v944_v1  ;;  %v1037_v10 = vshrl.u32 %v2719_v62, 16  ;;  %v3458_v0 = vld [vmem:[%s3220_s20 + $0x3c] sm:$0x1] }
  0x47   : > { %v331_v7 = vsel %vm3301_vm5, %v326_v63, %v330_v48  ;;  %v1040_v33 = vshll.u32 %v2719_v62, 16  ;;  %v949_v14 = vsel %vm3240_vm2, %v2708_v2, %v948_v3  ;;  %v1025_v15 = vrot.slane %v1023_v4, 4  ;;  %v2723_v1 = vld [vmem:[%s3220_s20 + $0x40] sm:$0xf]  ;;  %v3464_v4 = vld [vmem:[%s3220_s20 + $0x44] sm:$0x1] }
  0x48   : > { %v2674_v13 = vcombine.low %v317_v58, %v331_v7  ;;  %v1028_v18 = vrot.slane %v1026_v5, 5  ;;  %v2748_v20 = vcombine.low %v945_v8, %v949_v14  ;;  %v1034_v34 = vrot.slane %v1032_v6, 5 }
  0x49   : > { %v1039_v21 = vrot.slane %v1037_v10, 4  ;;  %v1042_v41 = vrot.slane %v1040_v33, 5  ;;  %v1046_v40 = vshll.u32 %v3442_v9, 16  ;;  %v434_v11 = vshrl.u32 %v2657_v51, 16 }
  0x4a   : > { %499 = vrot.lane.b32.xlu0 %v2674_v13, %s3179_s22  ;;  %v1029_v22 = vor.u32 %v1028_v18, %v1025_v15  ;;  %v437_v23 = vshll.u32 %v2657_v51, 16  ;;  %v448_v27 = vshrl.u32 %v2658_v19, 16  ;;  %v451_v35 = vshll.u32 %v2658_v19, 16 }
  0x4b   : > { %v1043_v24 = vor.u32 %v1042_v41, %v1039_v21  ;;  %v2678_v16 = vcombine.low %v2657_v51, %v2658_v19  ;;  %v1048_v38 = vrot.slane %v1046_v40, 5  ;;  %v436_v39 = vrot.slane %v434_v11, 4  ;;  %v2729_v51 = vld [vmem:[%s3220_s20 + $0x28] sm:$0xe]  ;;  %v2730_v19 = vld [vmem:[%s3220_s20 + $0x30] sm:$0xe] }
  0x4c   : > { %v1030_v37 = vrot.slane %v1029_v22, 4  ;;  %v439_v44 = vrot.slane %v437_v23, 5  ;;  %v450_v47 = vrot.slane %v448_v27, 4  ;;  %v453_v48 = vrot.slane %v451_v35, 5  ;;  %v2665_v22 = vld [vmem:[%s3220_s20 + $0x3c] sm:$0x1] }
  0x4d   : > { %v1044_v46 = vrot.slane %v1043_v24, 4  ;;  %v412_v53 = vor.u32 %v411_v59, %v3426_v52  ;;  %v415_v58 = vshll.u32 %v2663_v30, 16  ;;  %v426_v62 = vor.u32 %v425_v61, %v422_v60  ;;  %v2666_v27 = vld [vmem:[%s3220_s20 + $0x44] sm:$0x1] }
  0x4e   : > { %1164 = vrot.lane.b32.xlu0 %v2748_v20, %s3179_s22  ;;  %v1035_v55 = vsel %vm3301_vm5, %v1030_v37, %v1034_v34  ;;  %v429_v63 = vshll.u32 %v2664_v32, 16  ;;  %v1051_v5 = vshrl.u32 %v2721_v45, 16  ;;  %v1054_v52 = vshll.u32 %v2721_v45, 16 }
  0x4f   : > { %v1049_v2 = vsel %vm3301_vm5, %v1044_v46, %v1048_v38  ;;  %v413_v3 = vrot.slane %v412_v53, 4  ;;  %v417_v6 = vrot.slane %v415_v58, 5  ;;  %v427_v7 = vrot.slane %v426_v62, 4  ;;  %v2731_v53 = vld [vmem:[%s3220_s20 + $0x38] sm:$0xe] }
  0x50   : > { %v2751_v59 = vcombine.low %v1035_v55, %v1049_v2  ;;  %v431_v8 = vrot.slane %v429_v63, 5  ;;  %v1053_v10 = vrot.slane %v1051_v5, 4  ;;  %v1056_v60 = vrot.slane %v1054_v52, 5  ;;  %v2732_v55 = vld [vmem:[%s3220_s20 + $0x40] sm:$0xe] }
  0x51   : > { %v1060_v61 = vshll.u32 %v3458_v0, 16  ;;  %v1065_v33 = vshrl.u32 %v2723_v1, 16  ;;  %v418_v13 = vsel %vm3301_vm5, %v413_v3, %v417_v6  ;;  %v1068_v15 = vshll.u32 %v2723_v1, 16  ;;  %v2797_v52 = vld [vmem:[%s3220_s20 + $0xc] sm:$0x1] }
  0x52   : > { %1182 = vrot.lane.b32.xlu1 %v2751_v59, %s3178_s21  ;;  %527 = vrot.lane.b32.xlu0 %v2678_v16, %s3178_s21  ;;  %v432_v14 = vsel %vm3301_vm5, %v427_v7, %v431_v8  ;;  %v1074_v18 = vshll.u32 %v3464_v4, 16  ;;  %v1057_v34 = vor.u32 %v1056_v60, %v1053_v10  ;;  %v2737_v23 = vrot.slane %v2729_v51, 9  ;;  %v2790_v8 = vld [vmem:[%s3220_s20 + $0x10] sm:$0xf] }
  0x53   : > { %v2681_v20 = vcombine.low %v418_v13, %v432_v14  ;;  %v1062_v21 = vrot.slane %v1060_v61, 5  ;;  %v1067_v41 = vrot.slane %v1065_v33, 4  ;;  %v1070_v40 = vrot.slane %v1068_v15, 5  ;;  %v2798_v33 = vld [vmem:[%s3220_s20 + $0x14] sm:$0x1] }
  0x54   : > { %v1076_v11 = vrot.slane %v1074_v18, 5  ;;  %v1120_v24 = vrot.slane %v3430_v56, 5  ;;  %v1058_v35 = vrot.slane %v1057_v34, 4  ;;  %v2738_v16 = vrot.slane %v2730_v19, 9  ;;  %v3505_v13 = vld [vmem:[%s3220_s20 + $0xc] sm:$0x1] }
  0x55   : > { %v1124_v30 = vrot.slane %v3442_v9, 5  ;;  %v440_v32 = vor.u32 %v439_v44, %v436_v39  ;;  %v1071_v37 = vor.u32 %v1070_v40, %v1067_v41  ;;  %v443_v45 = vshll.u32 %v2665_v22, 16  ;;  %v2789_v39 = vld [vmem:[%s3220_s20 + $0x8] sm:$0xf]  ;;  %v3510_v19 = vld [vmem:[%s3220_s20 + $0x14] sm:$0x1] }
  0x56   : > { %545 = vrot.lane.b32.xlu1 %v2681_v20, %s3180_s23  ;;  %v1121_v38 = vsel %vm3240_vm2, %v2737_v23, %v1120_v24  ;;  %v454_v46 = vor.u32 %v453_v48, %v450_v47  ;;  %v1063_v56 = vsel %vm3301_vm5, %v1058_v35, %v1062_v21  ;;  %v457_v9 = vshll.u32 %v2666_v27, 16  ;;  %v2885_v20 = vld [vmem:[%s3220_s20 + $0x8] sm:$0xe]  ;;  %v2886_v40 = vld [vmem:[%s3220_s20 + $0x10] sm:$0xe] }
  0x57   : > { %v1125_v58 = vsel %vm3240_vm2, %v2738_v16, %v1124_v30  ;;  %v441_v62 = vrot.slane %v440_v32, 4  ;;  %v1072_v44 = vrot.slane %v1071_v37, 4  ;;  %v445_v1 = vrot.slane %v443_v45, 5  ;;  %v2791_v24 = vld [vmem:[%s3220_s20 + $0x18] sm:$0xf] }
  0x58   : > { %v2755_v63 = vcombine.low %v1121_v38, %v1125_v58  ;;  %v455_v2 = vrot.slane %v454_v46, 4  ;;  %v459_v3 = vrot.slane %v457_v9, 5  ;;  %v2739_v47 = vrot.slane %v2731_v53, 9  ;;  %v2792_v27 = vld [vmem:[%s3220_s20 + $0x20] sm:$0xf] }
  0x59   : > { %v1128_v48 = vrot.slane %v3458_v0, 5  ;;  %v2740_v5 = vrot.slane %v2732_v55, 9  ;;  %v1077_v59 = vsel %vm3301_vm5, %v1072_v44, %v1076_v11  ;;  %v446_v6 = vsel %vm3301_vm5, %v441_v62, %v445_v1  ;;  %v2799_v37 = vld [vmem:[%s3220_s20 + $0x1c] sm:$0x1]  ;;  %v2800_v44 = vld [vmem:[%s3220_s20 + $0x24] sm:$0x1] }
  0x5a   : > { %1202 = vrot.lane.b32.xlu1 %v2755_v63, %s3180_s23  ;;  %v1132_v7 = vrot.slane %v3464_v4, 5  ;;  %v1422_v10 = vshrl.u32 %v2789_v39, 16  ;;  %v2752_v60 = vcombine.low %v1063_v56, %v1077_v59  ;;  %v460_v0 = vsel %vm3301_vm5, %v455_v2, %v459_v3  ;;  %v2805_v2 = vld [vmem:[%s3220_s20 + $0x10] sm:$0xf] }
  0x5b   : > { %v1129_v61 = vsel %vm3240_vm2, %v2739_v47, %v1128_v48  ;;  %v1425_v51 = vshll.u32 %v2789_v39, 16  ;;  %v2682_v14 = vcombine.low %v446_v6, %v460_v0  ;;  %v1431_v18 = vshll.u32 %v2797_v52, 16  ;;  %v2806_v52 = vld [vmem:[%s3220_s20 + $0x18] sm:$0xf] }
  0x5c   : > { %v1133_v4 = vsel %vm3240_vm2, %v2740_v5, %v1132_v7  ;;  %v1424_v15 = vrot.slane %v1422_v10, 4  ;;  %1184 = vrot.lane.b32.xlu0 %v2752_v60, %s3178_s21  ;;  %v1436_v41 = vshrl.u32 %v2790_v8, 16  ;;  %v1439_v22 = vshll.u32 %v2790_v8, 16 }
  0x5d   : > { %v2756_v34 = vcombine.low %v1129_v61, %v1133_v4  ;;  %v1427_v21 = vrot.slane %v1425_v51, 5  ;;  %v1433_v11 = vrot.slane %v1431_v18, 5  ;;  %v1445_v23 = vshll.u32 %v2798_v33, 16  ;;  %v3537_v33 = vld [vmem:[%s4172_s1 + $0x40] sm:$0xff]   ;;  %v3540_v18 = vld [vmem:[%s3220_s20 + $0x1c] sm:$0x1] }
  0x5e   : > { %v1438_v16 = vrot.slane %v1436_v41, 4  ;;  %v1441_v30 = vrot.slane %v1439_v22, 5  ;;  %v2893_v32 = vrot.slane %v2885_v20, 9  ;;  %v2103_v45 = vrot.slane %v3505_v13, 5  ;;  %v2887_v20 = vld [vmem:[%s3220_s20 + $0x18] sm:$0xe]  ;;  %3080 = vmatprep.subr.bf16.mxu0 %v3537_v33 }
  0x5f   : > { %1204 = vrot.lane.b32.xlu1 %v2756_v34, %s3180_s23  ;;  %v1428_v35 = vor.u32 %v1427_v21, %v1424_v15  ;;  %v1447_v38 = vrot.slane %v1445_v23, 5  ;;  %v2894_v46 = vrot.slane %v2886_v40, 9  ;;  %v2107_v53 = vrot.slane %v3510_v19, 5  ;;  %v3544_v41 = vld [vmem:[%s3220_s20 + $0x24] sm:$0x1] }
  0x60   : > { %547 = vrot.lane.b32.xlu0 %v2682_v14, %s3180_s23  ;;  %v1442_v56 = vor.u32 %v1441_v30, %v1438_v16  ;;  %v1450_v58 = vshrl.u32 %v2791_v24, 16  ;;  %v1453_v62 = vshll.u32 %v2791_v24, 16  ;;  %v2104_v9 = vsel %vm3240_vm2, %v2893_v32, %v2103_v45  ;;  %v2888_v22 = vld [vmem:[%s3220_s20 + $0x20] sm:$0xe] }
  0x61   : > { %v1429_v55 = vrot.slane %v1428_v35, 4  ;;  %v2108_v39 = vsel %vm3240_vm2, %v2894_v46, %v2107_v53  ;;  %v1459_v63 = vshll.u32 %v2799_v37, 16  ;;  %v1464_v1 = vshrl.u32 %v2792_v27, 16  ;;  %v3553_v35 = vld [vmem:[%s3220_s20 + $0x14] sm:$0x1] }
  0x62   : > { %v1443_v47 = vrot.slane %v1442_v56, 4  ;;  %v2937_v48 = vcombine.low %v2104_v9, %v2108_v39  ;;  %v1452_v5 = vrot.slane %v1450_v58, 4  ;;  %v1455_v59 = vrot.slane %v1453_v62, 5  ;;  %v3567_v56 = vld [vmem:[%s4172_s1 + $0x60] sm:$0xff]  }
  0x63   : > { %v1434_v3 = vsel %vm3301_vm5, %v1429_v55, %v1433_v11  ;;  %v1461_v6 = vrot.slane %v1459_v63, 5  ;;  %v1466_v7 = vrot.slane %v1464_v1, 4  ;;  %v1467_v8 = vshll.u32 %v2792_v27, 16  ;;  %v2901_v27 = vld [vmem:[%s3220_s20 + $0x10] sm:$0xf]  ;;  %3096 = vmatprep.subr.bf16.mxu1 %v3567_v56 }
  0x64   : > { %v1448_v10 = vsel %vm3301_vm5, %v1443_v47, %v1447_v38  ;;  %2341 = vrot.lane.b32.xlu1 %v2937_v48, %s3179_s22  ;;  %v1473_v60 = vshll.u32 %v2800_v44, 16  ;;  %v1551_v0 = vshrl.u32 %v2805_v2, 16  ;;  %v1554_v61 = vshll.u32 %v2805_v2, 16  ;;  %v2903_v38 = vld [vmem:[%s3220_s20 + $0x18] sm:$0xf] }
  0x65   : > { %v2825_v51 = vcombine.low %v1434_v3, %v1448_v10  ;;  %v1456_v14 = vor.u32 %v1455_v59, %v1452_v5  ;;  %v1469_v4 = vrot.slane %v1467_v8, 5  ;;  %v1565_v15 = vshrl.u32 %v2806_v52, 16  ;;  %v3576_v1 = vld [vmem:[%s3220_s20 + $0x1c] sm:$0x1]  ;;  %v2807_v47 = vld [vmem:[%s3220_s20 + $0x20] sm:$0xf] }
  0x66   : > { %v1475_v34 = vrot.slane %v1473_v60, 5  ;;  %v1568_v21 = vshll.u32 %v2806_v52, 16  ;;  %v3549_v23 = vrot.slane %v1551_v0, 4  ;;  %v2829_v24 = vcombine.low %v2805_v2, %v2806_v52 }
  0x67   : > { %1694 = vrot.lane.b32.xlu0 %v2825_v51, %s3179_s22  ;;  %v1457_v40 = vrot.slane %v1456_v14, 4  ;;  %v1470_v11 = vor.u32 %v1469_v4, %v1466_v7  ;;  %v1556_v16 = vrot.slane %v1554_v61, 5  ;;  %v3555_v30 = vrot.slane %v1565_v15, 4 }
  0x68   : > { %v3557_v32 = vrot.slane %v1568_v21, 5  ;;  %v2895_v37 = vrot.slane %v2887_v20, 9  ;;  %1722 = vrot.lane.b32.xlu1 %v2829_v24, %s3178_s21  ;;  %v2111_v53 = vrot.slane %v3540_v18, 5  ;;  %v2896_v55 = vrot.slane %v2888_v22, 9  ;;  %v2813_v21 = vld [vmem:[%s3220_s20 + $0x14] sm:$0x1] }
  0x69   : > { %v1462_v45 = vsel %vm3301_vm5, %v1457_v40, %v1461_v6  ;;  %v1471_v46 = vrot.slane %v1470_v11, 4  ;;  %v2115_v58 = vrot.slane %v3544_v41, 5  ;;  %v2150_v62 = vshrl.u32 %v2901_v27, 16  ;;  %v2808_v6 = vld [vmem:[%s3220_s20 + $0x28] sm:$0xf] }
  0x6a   : > { %v2153_v9 = vshll.u32 %v2901_v27, 16  ;;  %v2159_v39 = vshll.u32 %v3553_v35, 16  ;;  %v2112_v63 = vsel %vm3240_vm2, %v2895_v37, %v2111_v53  ;;  %v2164_v2 = vshrl.u32 %v2903_v38, 16  ;;  %v2814_v22 = vld [vmem:[%s3220_s20 + $0x1c] sm:$0x1] }
  0x6b   : > { %v1476_v44 = vsel %vm3301_vm5, %v1471_v46, %v1475_v34  ;;  %v2167_v3 = vshll.u32 %v2903_v38, 16  ;;  %v2116_v5 = vsel %vm3240_vm2, %v2896_v55, %v2115_v58  ;;  %v2152_v52 = vrot.slane %v2150_v62, 4  ;;  %v2905_v37 = vld [vmem:[%s3220_s20 + $0x20] sm:$0xf] }
  0x6c   : > { %v2826_v48 = vcombine.low %v1462_v45, %v1476_v44  ;;  %v2155_v59 = vrot.slane %v2153_v9, 5  ;;  %v2938_v7 = vcombine.low %v2112_v63, %v2116_v5  ;;  %v2161_v8 = vrot.slane %v2159_v39, 5  ;;  %v3595_v39 = vld [vmem:[%s3220_s20 + $0x24] sm:$0x1]  ;;  %v2907_v44 = vld [vmem:[%s3220_s20 + $0x28] sm:$0xf] }
  0x6d   : > { %v2166_v10 = vrot.slane %v2164_v2, 4  ;;  %v2169_v60 = vrot.slane %v2167_v3, 5  ;;  %v2173_v61 = vshll.u32 %v3576_v1, 16  ;;  %v1579_v51 = vshrl.u32 %v2807_v47, 16  ;;  %v3601_v3 = vld [vmem:[%s3220_s20 + $0x2c] sm:$0x1] }
  0x6e   : > { %1696 = vrot.lane.b32.xlu0 %v2826_v48, %s3179_s22  ;;  %v2156_v0 = vor.u32 %v2155_v59, %v2152_v52  ;;  %v1582_v14 = vshll.u32 %v2807_v47, 16  ;;  %v1593_v15 = vshrl.u32 %v2808_v6, 16  ;;  %v1596_v20 = vshll.u32 %v2808_v6, 16 }
  0x6f   : > { %v2170_v4 = vor.u32 %v2169_v60, %v2166_v10  ;;  %v2830_v34 = vcombine.low %v2807_v47, %v2808_v6  ;;  %v2175_v11 = vrot.slane %v2173_v61, 5  ;;  %v1581_v24 = vrot.slane %v1579_v51, 4  ;;  %v2918_v61 = vld [vmem:[%s3220_s20 + $0x18] sm:$0xe] }
  0x70   : > { %v2157_v40 = vrot.slane %v2156_v0, 4  ;;  %v1584_v27 = vrot.slane %v1582_v14, 5  ;;  %v1595_v45 = vrot.slane %v1593_v15, 4  ;;  %v1598_v46 = vrot.slane %v1596_v20, 5  ;;  %v2815_v20 = vld [vmem:[%s3220_s20 + $0x24] sm:$0x1] }
  0x71   : > { %v2171_v38 = vrot.slane %v2170_v4, 4  ;;  %v1557_v53 = vor.u32 %v1556_v16, %v3549_v23  ;;  %v1560_v58 = vshll.u32 %v2813_v21, 16  ;;  %v1571_v62 = vor.u32 %v3557_v32, %v3555_v30 }
  0x72   : > { %2343 = vrot.lane.b32.xlu0 %v2938_v7, %s3179_s22  ;;  %v2162_v55 = vsel %vm3301_vm5, %v2157_v40, %v2161_v8  ;;  %v1574_v9 = vshll.u32 %v2814_v22, 16  ;;  %v2178_v23 = vshrl.u32 %v2905_v37, 16  ;;  %v2181_v16 = vshll.u32 %v2905_v37, 16  ;;  %v2917_v7 = vld [vmem:[%s3220_s20 + $0x10] sm:$0xe] }
  0x73   : > { %v2176_v63 = vsel %vm3301_vm5, %v2171_v38, %v2175_v11  ;;  %v1558_v2 = vrot.slane %v1557_v53, 4  ;;  %v1562_v48 = vrot.slane %v1560_v58, 5  ;;  %v1572_v5 = vrot.slane %v1571_v62, 4  ;;  %v2816_v11 = vld [vmem:[%s3220_s20 + $0x2c] sm:$0x1] }
  0x74   : > { %v2941_v47 = vcombine.low %v2162_v55, %v2176_v63  ;;  %v1576_v52 = vrot.slane %v1574_v9, 5  ;;  %v2180_v59 = vrot.slane %v2178_v23, 4  ;;  %v2183_v30 = vrot.slane %v2181_v16, 5  ;;  %v2919_v63 = vld [vmem:[%s3220_s20 + $0x20] sm:$0xe] }
  0x75   : > { %v2187_v32 = vshll.u32 %v3595_v39, 16  ;;  %v2192_v6 = vshrl.u32 %v2907_v44, 16  ;;  %v1563_v8 = vsel %vm3301_vm5, %v1558_v2, %v1562_v48  ;;  %v2195_v60 = vshll.u32 %v2907_v44, 16  ;;  %v2920_v2 = vld [vmem:[%s3220_s20 + $0x28] sm:$0xe] }
  0x76   : > { %2361 = vrot.lane.b32.xlu1 %v2941_v47, %s3178_s21  ;;  %1724 = vrot.lane.b32.xlu0 %v2830_v34, %s3178_s21  ;;  %v1577_v10 = vsel %vm3301_vm5, %v1572_v5, %v1576_v52  ;;  %v2201_v0 = vshll.u32 %v3601_v3, 16  ;;  %v2184_v14 = vor.u32 %v2183_v30, %v2180_v59  ;;  %v2925_v34 = vrot.slane %v2917_v7, 9 }
  0x77   : > { %v2833_v51 = vcombine.low %v1563_v8, %v1577_v10  ;;  %v2189_v4 = vrot.slane %v2187_v32, 5  ;;  %v2194_v15 = vrot.slane %v2192_v6, 4  ;;  %v2197_v21 = vrot.slane %v2195_v60, 5  ;;  %v3638_v8 = vld [vmem:[%s3220_s20 + $0x30] sm:$0xf] }
  0x78   : > { %v2203_v22 = vrot.slane %v2201_v0, 5  ;;  %v2287_v40 = vrot.slane %v3553_v35, 5  ;;  %v2185_v37 = vrot.slane %v2184_v14, 4  ;;  %v2926_v38 = vrot.slane %v2918_v61, 9  ;;  %v2802_v10 = vld [vmem:[%s3220_s20 + $0x34] sm:$0x1] }
  0x79   : > { %v2291_v53 = vrot.slane %v3576_v1, 5  ;;  %v1585_v55 = vor.u32 %v1584_v27, %v1581_v24  ;;  %v2198_v58 = vor.u32 %v2197_v21, %v2194_v15  ;;  %v1588_v9 = vshll.u32 %v2815_v20, 16  ;;  %v3627_v24 = vld [vmem:[%s3220_s20 + $0x28] sm:$0xf]  ;;  %v2801_v27 = vld [vmem:[%s3220_s20 + $0x2c] sm:$0x1] }
  0x7a   : > { %1742 = vrot.lane.b32.xlu1 %v2833_v51, %s3180_s23  ;;  %v2288_v62 = vsel %vm3240_vm2, %v2925_v34, %v2287_v40  ;;  %v1599_v44 = vor.u32 %v1598_v46, %v1595_v45  ;;  %v2190_v35 = vsel %vm3301_vm5, %v2185_v37, %v2189_v4  ;;  %v1602_v1 = vshll.u32 %v2816_v11, 16  ;;  %v3648_v14 = vld [vmem:[%s3220_s20 + $0x2c] sm:$0x1]  ;;  %v3651_v4 = vld [vmem:[%s3220_s20 + $0x34] sm:$0x1] }
  0x7b   : > { %v2292_v23 = vsel %vm3240_vm2, %v2926_v38, %v2291_v53  ;;  %v1586_v16 = vrot.slane %v1585_v55, 4  ;;  %v2199_v47 = vrot.slane %v2198_v58, 4  ;;  %v1590_v5 = vrot.slane %v1588_v9, 5  ;;  %v2890_v34 = vld [vmem:[%s3220_s20 + $0x30] sm:$0xe] }
  0x7c   : > { %v2945_v48 = vcombine.low %v2288_v62, %v2292_v23  ;;  %v1600_v52 = vrot.slane %v1599_v44, 4  ;;  %v1604_v45 = vrot.slane %v1602_v1, 5  ;;  %v2927_v46 = vrot.slane %v2919_v63, 9  ;;  %v3658_v40 = vld [vmem:[%s3220_s20 + $0x38] sm:$0xf] }
  0x7d   : > { %v2295_v59 = vrot.slane %v3595_v39, 5  ;;  %v2928_v30 = vrot.slane %v2920_v2, 9  ;;  %v2204_v32 = vsel %vm3301_vm5, %v2199_v47, %v2203_v22  ;;  %v1591_v6 = vsel %vm3301_vm5, %v1586_v16, %v1590_v5  ;;  %v3664_v55 = vld [vmem:[%s3220_s20 + $0x40] sm:$0xf]  ;;  %v2803_v9 = vld [vmem:[%s3220_s20 + $0x3c] sm:$0x1] }
  0x7e   : > { %2381 = vrot.lane.b32.xlu1 %v2945_v48, %s3180_s23  ;;  %v2299_v7 = vrot.slane %v3601_v3, 5  ;;  %v1478_v60 = vshrl.u32 %v3627_v24, 16  ;;  %v2942_v0 = vcombine.low %v2190_v35, %v2204_v32  ;;  %v1605_v39 = vsel %vm3301_vm5, %v1600_v52, %v1604_v45  ;;  %v2889_v3 = vld [vmem:[%s3220_s20 + $0x28] sm:$0xe]  ;;  %v2804_v47 = vld [vmem:[%s3220_s20 + $0x44] sm:$0x1] }
  0x7f   : > { %v2296_v61 = vsel %vm3240_vm2, %v2927_v46, %v2295_v59  ;;  %v1481_v51 = vshll.u32 %v3627_v24, 16  ;;  %v2834_v15 = vcombine.low %v1591_v6, %v1605_v39  ;;  %v1487_v22 = vshll.u32 %v2801_v27, 16  ;;  %v2809_v46 = vld [vmem:[%s3220_s20 + $0x30] sm:$0xf] }
  0x80   : > { %v2300_v20 = vsel %vm3240_vm2, %v2928_v30, %v2299_v7  ;;  %v1480_v21 = vrot.slane %v1478_v60, 4  ;;  %2363 = vrot.lane.b32.xlu0 %v2942_v0, %s3178_s21  ;;  %v1492_v38 = vshrl.u32 %v3638_v8, 16  ;;  %v1495_v53 = vshll.u32 %v3638_v8, 16  ;;  %v2810_v7 = vld [vmem:[%s3220_s20 + $0x38] sm:$0xf] }
  0x81   : > { %v2946_v11 = vcombine.low %v2296_v61, %v2300_v20  ;;  %v1483_v37 = vrot.slane %v1481_v51, 5  ;;  %v1489_v58 = vrot.slane %v1487_v22, 5  ;;  %v1501_v62 = vshll.u32 %v2802_v10, 16  ;;  %v2891_v20 = vld [vmem:[%s3220_s20 + $0x38] sm:$0xe] }
  0x82   : > { %v1494_v63 = vrot.slane %v1492_v38, 4  ;;  %v1497_v2 = vrot.slane %v1495_v53, 5  ;;  %v2897_v35 = vrot.slane %v2889_v3, 9  ;;  %v2119_v16 = vrot.slane %v3648_v14, 5  ;;  %v2892_v38 = vld [vmem:[%s3220_s20 + $0x40] sm:$0xe] }
  0x83   : > { %2383 = vrot.lane.b32.xlu1 %v2946_v11, %s3180_s23  ;;  %v1484_v44 = vor.u32 %v1483_v37, %v1480_v21  ;;  %v1503_v23 = vrot.slane %v1501_v62, 5  ;;  %v2898_v1 = vrot.slane %v2890_v34, 9  ;;  %v2123_v27 = vrot.slane %v3651_v4, 5  ;;  %v3689_v37 = vld [vmem:[%s3220_s20 + $0x3c] sm:$0x1] }
  0x84   : > { %1744 = vrot.lane.b32.xlu0 %v2834_v15, %s3180_s23  ;;  %v1498_v5 = vor.u32 %v1497_v2, %v1494_v63  ;;  %v1506_v52 = vshrl.u32 %v3658_v40, 16  ;;  %v1509_v45 = vshll.u32 %v3658_v40, 16  ;;  %v2120_v59 = vsel %vm3240_vm2, %v2897_v35, %v2119_v16  ;;  %v2909_v63 = vld [vmem:[%s3220_s20 + $0x30] sm:$0xf]  ;;  %v3697_v2 = vld [vmem:[%s3220_s20 + $0x34] sm:$0x1] }
  0x85   : > { %v1485_v48 = vrot.slane %v1484_v44, 4  ;;  %v2124_v30 = vsel %vm3240_vm2, %v2898_v1, %v2123_v27  ;;  %v1515_v32 = vshll.u32 %v2803_v9, 16  ;;  %v1520_v6 = vshrl.u32 %v3664_v55, 16  ;;  %v3693_v44 = vld [vmem:[%s3220_s20 + $0x44] sm:$0x1] }
  0x86   : > { %v1499_v60 = vrot.slane %v1498_v5, 4  ;;  %v2939_v0 = vcombine.low %v2120_v59, %v2124_v30  ;;  %v1508_v39 = vrot.slane %v1506_v52, 4  ;;  %v1511_v61 = vrot.slane %v1509_v45, 5  ;;  %v2911_v16 = vld [vmem:[%s3220_s20 + $0x38] sm:$0xf] }
  0x87   : > { %v1490_v10 = vsel %vm3301_vm5, %v1485_v48, %v1489_v58  ;;  %v1517_v51 = vrot.slane %v1515_v32, 5  ;;  %v1522_v3 = vrot.slane %v1520_v6, 4  ;;  %v1523_v15 = vshll.u32 %v3664_v55, 16 }
  0x88   : > { %v1504_v21 = vsel %vm3301_vm5, %v1499_v60, %v1503_v23  ;;  %2345 = vrot.lane.b32.xlu1 %v2939_v0, %s3179_s22  ;;  %v1529_v22 = vshll.u32 %v2804_v47, 16  ;;  %v1607_v34 = vshrl.u32 %v2809_v46, 16  ;;  %v1610_v11 = vshll.u32 %v2809_v46, 16 }
  0x89   : > { %v2827_v53 = vcombine.low %v1490_v10, %v1504_v21  ;;  %v1512_v58 = vor.u32 %v1511_v61, %v1508_v39  ;;  %v1525_v62 = vrot.slane %v1523_v15, 5  ;;  %v1621_v9 = vshrl.u32 %v2810_v7, 16 }
  0x8a   : > { %v1531_v35 = vrot.slane %v1529_v22, 5  ;;  %v1624_v23 = vshll.u32 %v2810_v7, 16  ;;  %v1609_v47 = vrot.slane %v1607_v34, 4  ;;  %v2831_v48 = vcombine.low %v2809_v46, %v2810_v7 }
  0x8b   : > { %1698 = vrot.lane.b32.xlu0 %v2827_v53, %s3179_s22  ;;  %v1513_v1 = vrot.slane %v1512_v58, 4  ;;  %v1526_v27 = vor.u32 %v1525_v62, %v1522_v3  ;;  %v1612_v5 = vrot.slane %v1610_v11, 5  ;;  %v3701_v52 = vrot.slane %v1621_v9, 4  ;;  %v3722_v53 = vpop.permute.xlu0 %523 }
  0x8c   : > { %v3703_v45 = vrot.slane %v1624_v23, 5  ;;  %v2899_v59 = vrot.slane %v2891_v20, 9  ;;  %1726 = vrot.lane.b32.xlu1 %v2831_v48, %s3178_s21  ;;  %v2127_v6 = vrot.slane %v3689_v37, 5  ;;  %v2900_v10 = vrot.slane %v2892_v38, 9  ;;  %v2811_v20 = vld [vmem:[%s3220_s20 + $0x40] sm:$0xf] }
  0x8d   : > { %v1518_v30 = vsel %vm3301_vm5, %v1513_v1, %v1517_v51  ;;  %v1527_v32 = vrot.slane %v1526_v27, 4  ;;  %v2131_v46 = vrot.slane %v3693_v44, 5  ;;  %v2206_v7 = vshrl.u32 %v2909_v63, 16  ;;  %v3716_v51 = vld [vmem:[%s3220_s20 + $0x3c] sm:$0x1]  ;;  %v3726_v27 = vpop.permute.xlu1 %521 }
  0x8e   : > { %v2209_v60 = vshll.u32 %v2909_v63, 16  ;;  %v2215_v0 = vshll.u32 %v3697_v2, 16  ;;  %v2128_v61 = vsel %vm3240_vm2, %v2899_v59, %v2127_v6  ;;  %v2220_v3 = vshrl.u32 %v2911_v16, 16  ;;  %v2812_v38 = vld [vmem:[%s3220_s20 + $0x48] sm:$0xf] }
  0x8f   : > { %v1532_v39 = vsel %vm3301_vm5, %v1527_v32, %v1531_v35  ;;  %v2223_v15 = vshll.u32 %v2911_v16, 16  ;;  %v2132_v22 = vsel %vm3240_vm2, %v2900_v10, %v2131_v46  ;;  %v2208_v34 = vrot.slane %v2206_v7, 4  ;;  %v2817_v6 = vld [vmem:[%s3220_s20 + $0x34] sm:$0x1]  ;;  %v2818_v10 = vld [vmem:[%s3220_s20 + $0x3c] sm:$0x1] }
  0x90   : > { %v2828_v21 = vcombine.low %v1518_v30, %v1532_v39  ;;  %v2211_v11 = vrot.slane %v2209_v60, 5  ;;  %v2940_v58 = vcombine.low %v2128_v61, %v2132_v22  ;;  %v2217_v62 = vrot.slane %v2215_v0, 5  ;;  %v2913_v39 = vld [vmem:[%s3220_s20 + $0x40] sm:$0xf] }
  0x91   : > { %v2222_v9 = vrot.slane %v2220_v3, 4  ;;  %v2225_v63 = vrot.slane %v2223_v15, 5  ;;  %v2229_v23 = vshll.u32 %v3716_v51, 16  ;;  %v1635_v16 = vshrl.u32 %v2811_v20, 16 }
  0x92   : > { %1700 = vrot.lane.b32.xlu0 %v2828_v21, %s3179_s22  ;;  %v2212_v35 = vor.u32 %v2211_v11, %v2208_v34  ;;  %v1638_v1 = vshll.u32 %v2811_v20, 16  ;;  %v1649_v59 = vshrl.u32 %v2812_v38, 16  ;;  %v1652_v30 = vshll.u32 %v2812_v38, 16 }
  0x93   : > { %v2226_v48 = vor.u32 %v2225_v63, %v2222_v9  ;;  %v2832_v32 = vcombine.low %v2811_v20, %v2812_v38  ;;  %v2231_v7 = vrot.slane %v2229_v23, 5  ;;  %v3730_v60 = vrot.slane %v1635_v16, 4  ;;  %v3741_v38 = vld [vmem:[%s3220_s20 + $0x44] sm:$0x1]  ;;  %v2915_v9 = vld [vmem:[%s3220_s20 + $0x48] sm:$0xf]  ;;  %v3744_v63 = vpop.permute.xlu0 %1158 }
  0x94   : > { %v2213_v46 = vrot.slane %v2212_v35, 4  ;;  %v1640_v0 = vrot.slane %v1638_v1, 5  ;;  %v3733_v3 = vrot.slane %v1649_v59, 4  ;;  %v1654_v15 = vrot.slane %v1652_v30, 5 }
  0x95   : > { %v2227_v61 = vrot.slane %v2226_v48, 4  ;;  %v1613_v21 = vor.u32 %v1612_v5, %v1609_v47  ;;  %v1616_v22 = vshll.u32 %v2817_v6, 16  ;;  %v1627_v34 = vor.u32 %v3703_v45, %v3701_v52  ;;  %v3749_v5 = vld [vmem:[%s3220_s20 + $0x4c] sm:$0x1]  ;;  %v3751_v45 = vpop.permute.xlu1 %1198 }
  0x96   : > { %2347 = vrot.lane.b32.xlu0 %v2940_v58, %s3179_s22  ;;  %v2218_v20 = vsel %vm3301_vm5, %v2213_v46, %v2217_v62  ;;  %v1630_v11 = vshll.u32 %v2818_v10, 16  ;;  %v2234_v58 = vshrl.u32 %v2913_v39, 16  ;;  %v2237_v23 = vshll.u32 %v2913_v39, 16  ;;  %v2921_v10 = vld [vmem:[%s3220_s20 + $0x30] sm:$0xe] }
  0x97   : > { %v2232_v35 = vsel %vm3301_vm5, %v2227_v61, %v2231_v7  ;;  %v1614_v47 = vrot.slane %v1613_v21, 4  ;;  %v1618_v16 = vrot.slane %v1616_v22, 5  ;;  %v1628_v1 = vrot.slane %v1627_v34, 4  ;;  %v2922_v21 = vld [vmem:[%s3220_s20 + $0x38] sm:$0xe] }
  0x98   : > { %v2943_v62 = vcombine.low %v2218_v20, %v2232_v35  ;;  %v1632_v52 = vrot.slane %v1630_v11, 5  ;;  %v2236_v48 = vrot.slane %v2234_v58, 4  ;;  %v2239_v59 = vrot.slane %v2237_v23, 5  ;;  %v2819_v35 = vld [vmem:[%s3220_s20 + $0x44] sm:$0x1] }
  0x99   : > { %v2243_v30 = vshll.u32 %v3741_v38, 16  ;;  %v2248_v6 = vshrl.u32 %v2915_v9, 16  ;;  %v1619_v46 = vsel %vm3301_vm5, %v1614_v47, %v1618_v16  ;;  %v2251_v39 = vshll.u32 %v2915_v9, 16  ;;  %v2820_v47 = vld [vmem:[%s3220_s20 + $0x4c] sm:$0x1]  ;;  %v3766_v16 = vpop.permute.xlu0 %1160 }
  0x9a   : > { %2365 = vrot.lane.b32.xlu1 %v2943_v62, %s3178_s21  ;;  %1728 = vrot.lane.b32.xlu0 %v2832_v32, %s3178_s21  ;;  %v1633_v7 = vsel %vm3301_vm5, %v1628_v1, %v1632_v52  ;;  %v2257_v61 = vshll.u32 %v3749_v5, 16  ;;  %v2240_v22 = vor.u32 %v2239_v59, %v2236_v48  ;;  %v2929_v32 = vrot.slane %v2921_v10, 9  ;;  %v2924_v10 = vld [vmem:[%s3220_s20 + $0x48] sm:$0xe] }
  0x9b   : > { %v2835_v20 = vcombine.low %v1619_v46, %v1633_v7  ;;  %v2245_v34 = vrot.slane %v2243_v30, 5  ;;  %v2250_v11 = vrot.slane %v2248_v6, 4  ;;  %v2253_v58 = vrot.slane %v2251_v39, 5 }
  0x9c   : > { %v2259_v23 = vrot.slane %v2257_v61, 5  ;;  %v2303_v62 = vrot.slane %v3697_v2, 5  ;;  %v2241_v1 = vrot.slane %v2240_v22, 4  ;;  %v2930_v9 = vrot.slane %v2922_v21, 9  ;;  %v2923_v2 = vld [vmem:[%s3220_s20 + $0x40] sm:$0xe]  ;;  %v3776_v7 = vpop.permute.xlu1 %495 }
  0x9d   : > { %v2307_v52 = vrot.slane %v3716_v51, 5  ;;  %v1641_v46 = vor.u32 %v1640_v0, %v3730_v60  ;;  %v2254_v48 = vor.u32 %v2253_v58, %v2250_v11  ;;  %v1644_v30 = vshll.u32 %v2819_v35, 16  ;;  %v763_v11 = vld [vmem:[%s3220_s20] sm:$0xf] }
  0x9e   : > { %1746 = vrot.lane.b32.xlu1 %v2835_v20, %s3180_s23  ;;  %v2304_v59 = vsel %vm3240_vm2, %v2929_v32, %v2303_v62  ;;  %v1655_v6 = vor.u32 %v1654_v15, %v3733_v3  ;;  %v2246_v39 = vsel %vm3301_vm5, %v2241_v1, %v2245_v34  ;;  %v1658_v0 = vshll.u32 %v2820_v47, 16  ;;  %v765_v47 = vld [vmem:[%s3220_s20 + $0x8] sm:$0xf] }
  0x9f   : > { %v2308_v51 = vsel %vm3240_vm2, %v2930_v9, %v2307_v52  ;;  %v1642_v60 = vrot.slane %v1641_v46, 4  ;;  %v2255_v61 = vrot.slane %v2254_v48, 4  ;;  %v1646_v20 = vrot.slane %v1644_v30, 5 }
  0xa0   : > { %v2947_v21 = vcombine.low %v2304_v59, %v2308_v51  ;;  %v1656_v22 = vrot.slane %v1655_v6, 4  ;;  %v1660_v3 = vrot.slane %v1658_v0, 5  ;;  %v2931_v15 = vrot.slane %v2923_v2, 9  ;;  %v494_v1 = vpop.permute.xlu0 %493  ;;  %v769_v6 = vld [vmem:[%s3220_s20 + $0x18] sm:$0xf] }
  0xa1   : > { %v2311_v35 = vrot.slane %v3741_v38, 5  ;;  %v2932_v58 = vrot.slane %v2924_v10, 9  ;;  %v2260_v34 = vsel %vm3301_vm5, %v2255_v61, %v2259_v23  ;;  %v1647_v32 = vsel %vm3301_vm5, %v1642_v60, %v1646_v20  ;;  %v767_v23 = vld [vmem:[%s3220_s20 + $0x10] sm:$0xf] }
  0xa2   : > { %2385 = vrot.lane.b32.xlu1 %v2947_v21, %s3180_s23  ;;  %v2315_v62 = vrot.slane %v3749_v5, 5  ;;  %v2944_v9 = vcombine.low %v2246_v39, %v2260_v34  ;;  %v1661_v52 = vsel %vm3301_vm5, %v1656_v22, %v1660_v3  ;;  %v780_v46 = vshrl.u32 %v763_v11, 16 }
  0xa3   : > { %v2312_v38 = vsel %vm3240_vm2, %v2931_v15, %v2311_v35  ;;  %v2836_v48 = vcombine.low %v1647_v32, %v1661_v52  ;;  %v783_v30 = vshll.u32 %v763_v11, 16  ;;  %v791_v5 = vrot.slane %v789_v25, 5  ;;  %v3156_v32 = vld [vmem:[%s3220_s20 + $0x10] sm:$0xf]  ;;  %v3158_v52 = vld [vmem:[%s3220_s20] sm:$0xf] }
  0xa4   : > { %v2316_v59 = vsel %vm3240_vm2, %v2932_v58, %v2315_v62  ;;  %2367 = vrot.lane.b32.xlu0 %v2944_v9, %s3178_s21  ;;  %v782_v39 = vrot.slane %v780_v46, 4  ;;  %v794_v51 = vshrl.u32 %v765_v47, 16  ;;  %v797_v60 = vshll.u32 %v765_v47, 16  ;;  %v3157_v62 = vld [vmem:[%s3220_s20 + $0x18] sm:$0xf] }
  0xa5   : > { %v2948_v10 = vcombine.low %v2312_v38, %v2316_v59  ;;  %v785_v0 = vrot.slane %v783_v30, 5  ;;  %v805_v61 = vrot.slane %v803_v26, 5  ;;  %v808_v21 = vshrl.u32 %v767_v23, 16  ;;  %v3159_v38 = vld [vmem:[%s3220_s20 + $0x8] sm:$0xf] }
  0xa6   : > { %v3801_v2 = vpop.permute.xlu1 %1178  ;;  %v811_v31 = vshll.u32 %v767_v23, 16  ;;  %v796_v12 = vrot.slane %v794_v51, 4  ;;  %v799_v25 = vrot.slane %v797_v60, 5  ;;  %v819_v20 = vrot.slane %v817_v54, 5 }
  0xa7   : > { %2387 = vrot.lane.b32.xlu1 %v2948_v10, %s3180_s23  ;;  %v822_v22 = vshrl.u32 %v769_v6, 16  ;;  %v786_v11 = vor.u32 %v785_v0, %v782_v39  ;;  %v810_v3 = vrot.slane %v808_v21, 4  ;;  %v825_v35 = vshll.u32 %v769_v6, 16  ;;  %v771_v39 = vld [vmem:[%s3220_s20 + $0x20] sm:$0xf] }
  0xa8   : > { %v813_v15 = vrot.slane %v811_v31, 5  ;;  %1748 = vrot.lane.b32.xlu0 %v2836_v48, %s3180_s23  ;;  %v800_v26 = vor.u32 %v799_v25, %v796_v12  ;;  %v833_v34 = vrot.slane %v831_v57, 5  ;;  %v2668_v49 = vcombine.low %v3156_v32, %v3157_v62  ;;  %v773_v0 = vld [vmem:[%s3220_s20 + $0x28] sm:$0xf]  ;;  %v3838_v12 = vld [vmem:[%s3220_s20 + $0x34] sm:$0x1] }
  0xa9   : > { %v824_v58 = vrot.slane %v822_v22, 4  ;;  %v787_v54 = vrot.slane %v786_v11, 4  ;;  %v827_v9 = vrot.slane %v825_v35, 5  ;;  %v2667_v46 = vcombine.low %v3158_v52, %v3159_v38  ;;  %v3844_v11 = vld [vmem:[%s3220_s20 + $0x3c] sm:$0x1]  ;;  %v3150_v52 = vld [vmem:[%s4172_s1 + $0x50] sm:$0xff]  }
  0xaa   : > { %v3809_v17 = vpop.permute.xlu0 %1180  ;;  %v814_v47 = vor.u32 %v813_v15, %v810_v3  ;;  %v542_v23 = vpop.permute.xlu1 %541  ;;  %v801_v59 = vrot.slane %v800_v26, 4  ;;  %v555_v48 = vsel %vm549_vm6, %v2668_v49, %v3776_v7  ;;  %v836_v25 = vshrl.u32 %v771_v39, 16 }
  0xab   : > { %v792_v50 = vsel %vm3301_vm5, %v787_v54, %v791_v5  ;;  %v828_v30 = vor.u32 %v827_v9, %v824_v58  ;;  %v552_v6 = vsel %vm549_vm6, %v2667_v46, %v494_v1  ;;  %v566_v60 = vsel %vm562_vm7, %v555_v48, %v3722_v53  ;;  %v775_v58 = vld [vmem:[%s3220_s20 + $0x30] sm:$0xf]  ;;  %v777_v46 = vld [vmem:[%s3220_s20 + $0x38] sm:$0xf] }
  0xac   : > { %v815_v57 = vrot.slane %v814_v47, 4  ;;  %v806_v51 = vsel %vm3301_vm5, %v801_v59, %v805_v61  ;;  %v564_v7 = vsel %vm562_vm7, %v552_v6, %v3726_v27  ;;  %v3148_v61 = vld [vmem:[%s4172_s1 + $0x48] sm:$0xff]   ;;  %v873_v27 = vshll.u32 %v3838_v12, 16 }
  0xad   : > { %v2741_v5 = vcombine.low %v792_v50, %v806_v51  ;;  %v829_v31 = vrot.slane %v828_v30, 4  ;;  %v573_v1 = vsel %vm571_vm8, %v564_v7, %v542_v23  ;;  %v839_v22 = vshll.u32 %v771_v39, 16 }
  0xae   : > { %v544_v10 = vpop.permute.xlu0 %543  ;;  %v820_v21 = vsel %vm3301_vm5, %v815_v57, %v819_v20  ;;  %3056 = vmatprep.mubr.msk.bf16.mxu0 %vm612_vm9, %v573_v1  ;;  %v887_v20 = vshll.u32 %v3844_v11, 16  ;;  %v1201_v35 = vpop.permute.xlu1 %1200  ;;  %v850_v26 = vshrl.u32 %v773_v0, 16  ;;  %v838_v49 = vrot.slane %v836_v25, 4  ;;  %v3151_v25 = vld [vmem:[%s4172_s1 + $0x70] sm:$0xff]  }
  0xaf   : > { %v575_v53 = vsel %vm571_vm8, %v566_v60, %v544_v10  ;;  %v1208_v3 = vsel %vm549_vm6, %v2741_v5, %v3744_v63  ;;  %v834_v15 = vsel %vm3301_vm5, %v829_v31, %v833_v34  ;;  %v841_v54 = vrot.slane %v839_v22, 5  ;;  %v2869_v10 = vld [vmem:[%s3220_s20 + $0x8] sm:$0xf]  ;;  %v3152_v5 = vld [vmem:[%s4172_s1 + $0x58] sm:$0xff]  }
  0xb0   : > { %3057 = vmatmul.mubr.msk.bf16.vlgmr.msra.gmra.mrb[0].mxu0 %vm612_vm9, %v575_v53  ;;  %v2742_v32 = vcombine.low %v820_v21, %v834_v15  ;;  %v1219_v62 = vsel %vm562_vm7, %v1208_v3, %v3801_v2  ;;  %v1975_v47 = vshll.u32 %v3505_v13, 16  ;;  %v852_v34 = vrot.slane %v850_v26, 4 }
  0xb1   : > { %3081 = vmatpush3.bf16.msra.mxu0 %v3537_v33  ;;  %v1227_v63 = vsel %vm571_vm8, %v1219_v62, %v3751_v45  ;;  %v853_v9 = vshll.u32 %v773_v0, 16  ;;  %v842_v2 = vor.u32 %v841_v54, %v838_v49  ;;  %v847_v33 = vrot.slane %v845_v42, 5  ;;  %v2871_v0 = vld [vmem:[%s3220_s20 + $0x10] sm:$0xf] }
  0xb2   : > { %3082 = vmatprep.subr.bf16.mxu0 %v3148_v61  ;;  %v1211_v38 = vsel %vm549_vm6, %v2742_v32, %v3766_v16  ;;  %3072 = vmatprep.mubr.msk.bf16.mxu1 %vm612_vm9, %v1227_v63  ;;  %v864_v23 = vshrl.u32 %v775_v58, 16  ;;  %v1989_v45 = vshll.u32 %v3510_v19, 16  ;;  %v867_v50 = vshll.u32 %v775_v58, 16  ;;  %v3149_v16 = vld [vmem:[%s4172_s1 + $0x68] sm:$0xff]   ;;  %v3882_v51 = vpop.permute.xlu1 %1162 }
  0xb3   : > { %v1221_v59 = vsel %vm562_vm7, %v1211_v38, %v3809_v17  ;;  %v855_v48 = vrot.slane %v853_v9, 5  ;;  %v2003_v57 = vshll.u32 %v3540_v18, 16  ;;  %v843_v42 = vrot.slane %v842_v2, 4  ;;  %v3163_v38 = vld [vmem:[%s3220_s20 + $0x28] sm:$0xf] }
  0xb4   : > { %v1229_v30 = vsel %vm571_vm8, %v1221_v59, %v1201_v35  ;;  %v866_v6 = vrot.slane %v864_v23, 4  ;;  %v861_v39 = vrot.slane %v859_v43, 5  ;;  %v869_v7 = vrot.slane %v867_v50, 5  ;;  %v2875_v59 = vld [vmem:[%s3220_s20 + $0x20] sm:$0xf] }
  0xb5   : > { %v3876_v28 = vpop.permute.xlu0 %497  ;;  %3083 = vmatpush3.bf16.msra.mxu0 %v3148_v61  ;;  %3073 = vmatmul.mubr.msk.bf16.vlgmr.msra.gmra.mrb[0].mxu1 %vm612_vm9, %v1229_v30  ;;  %v856_v17 = vor.u32 %v855_v48, %v852_v34  ;;  %v878_v60 = vshrl.u32 %v777_v46, 16  ;;  %v2017_v21 = vshll.u32 %v3544_v41, 16  ;;  %v2031_v31 = vshll.u32 %v3648_v14, 16  ;;  %v2873_v34 = vld [vmem:[%s3220_s20 + $0x18] sm:$0xf] }
  0xb6   : > { %3084 = vmatprep.subr.bf16.mxu0 %v3150_v52  ;;  %v848_v1 = vsel %vm3301_vm5, %v843_v42, %v847_v33  ;;  %v881_v61 = vshll.u32 %v777_v46, 16  ;;  %3097 = vmatpush3.bf16.msra.mxu1 %v3567_v56  ;;  %v870_v43 = vor.u32 %v869_v7, %v866_v6  ;;  %v1966_v53 = vshrl.u32 %v2869_v10, 16  ;;  %v3153_v48 = vld [vmem:[%s4172_s1 + $0x78] sm:$0xff]  }
  0xb7   : > { %v857_v29 = vrot.slane %v856_v17, 4  ;;  %v880_v12 = vrot.slane %v878_v60, 4  ;;  %3098 = vmatprep.subr.bf16.mxu1 %v3149_v16  ;;  %v875_v22 = vrot.slane %v873_v27, 5  ;;  %v1969_v15 = vshll.u32 %v2869_v10, 16  ;;  %v526_v33 = vpop.permute.xlu1 %525 }
  0xb8   : > { %v883_v3 = vrot.slane %v881_v61, 5  ;;  %v1980_v35 = vshrl.u32 %v2871_v0, 16  ;;  %v871_v26 = vrot.slane %v870_v43, 4  ;;  %v1968_v58 = vrot.slane %v1966_v53, 4  ;;  %v2877_v43 = vld [vmem:[%s3220_s20 + $0x28] sm:$0xf] }
  0xb9   : > { %3085 = vmatpush3.bf16.msra.mxu0 %v3150_v52  ;;  %v862_v56 = vsel %vm3301_vm5, %v857_v29, %v861_v39  ;;  %v1983_v32 = vshll.u32 %v2871_v0, 16  ;;  %v889_v27 = vrot.slane %v887_v20, 5  ;;  %v1971_v63 = vrot.slane %v1969_v15, 5  ;;  %v3162_v52 = vld [vmem:[%s3220_s20 + $0x20] sm:$0xf] }
  0xba   : > { %3086 = vmatprep.subr.bf16.mxu0 %v3152_v5  ;;  %v2743_v62 = vcombine.low %v848_v1, %v862_v56  ;;  %v884_v54 = vor.u32 %v883_v3, %v880_v12  ;;  %3099 = vmatpush3.bf16.msra.mxu1 %v3149_v16  ;;  %v2045_v9 = vshll.u32 %v3651_v4, 16  ;;  %v2669_v2 = vcombine.low %v3162_v52, %v3163_v38 }
  0xbb   : > { %v1982_v46 = vrot.slane %v1980_v35, 4  ;;  %v1985_v23 = vrot.slane %v1983_v32, 5  ;;  %3100 = vmatprep.subr.bf16.mxu1 %v3151_v25  ;;  %v876_v11 = vsel %vm3301_vm5, %v871_v26, %v875_v22  ;;  %v1972_v50 = vor.u32 %v1971_v63, %v1968_v58 }
  0xbc   : > { %v3898_v49 = vpop.permute.xlu0 %499  ;;  %v885_v20 = vrot.slane %v884_v54, 4  ;;  %v1977_v16 = vrot.slane %v1975_v47, 5  ;;  %v1991_v42 = vrot.slane %v1989_v45, 5  ;;  %v1994_v6 = vshrl.u32 %v2873_v34, 16 }
  0xbd   : > { %3087 = vmatpush3.bf16.msra.mxu0 %v3152_v5  ;;  %v1986_v30 = vor.u32 %v1985_v23, %v1982_v46  ;;  %v1997_v10 = vshll.u32 %v2873_v34, 16  ;;  %v1973_v39 = vrot.slane %v1972_v50, 4  ;;  %v2008_v7 = vshrl.u32 %v2875_v59, 16 }
  0xbe   : > { %v890_v17 = vsel %vm3301_vm5, %v885_v20, %v889_v27  ;;  %v2011_v60 = vshll.u32 %v2875_v59, 16  ;;  %3101 = vmatpush3.bf16.msra.mxu1 %v3151_v25  ;;  %v1996_v47 = vrot.slane %v1994_v6, 4  ;;  %v2059_v19 = vshll.u32 %v3689_v37, 16  ;;  %v2879_v37 = vld [vmem:[%s3220_s20 + $0x30] sm:$0xf] }
  0xbf   : > { %v3918_v0 = vcombine.low %v876_v11, %v890_v17  ;;  %v1987_v13 = vrot.slane %v1986_v30, 4  ;;  %v1999_v5 = vrot.slane %v1997_v10, 5  ;;  %3102 = vmatprep.subr.bf16.mxu1 %v3153_v48  ;;  %v1978_v1 = vsel %vm3301_vm5, %v1973_v39, %v1977_v16 }
  0xc0   : > { %v3921_v45 = vpop.permute.xlu0 %1164  ;;  %v2010_v61 = vrot.slane %v2008_v7, 4  ;;  %v2013_v29 = vrot.slane %v2011_v60, 5  ;;  %v2073_v12 = vshll.u32 %v3693_v44, 16  ;;  %v2005_v3 = vrot.slane %v2003_v57, 5 }
  0xc1   : > { %v1992_v25 = vsel %vm3301_vm5, %v1987_v13, %v1991_v42  ;;  %v2000_v22 = vor.u32 %v1999_v5, %v1996_v47  ;;  %v558_v15 = vsel %vm549_vm6, %v2669_v2, %v3876_v28  ;;  %v2019_v26 = vrot.slane %v2017_v21, 5  ;;  %v2881_v28 = vld [vmem:[%s3220_s20 + $0x38] sm:$0xf]  ;;  %v2883_v2 = vld [vmem:[%s3220_s20 + $0x40] sm:$0xf] }
  0xc2   : > { %v3934_v35 = vcombine.low %v1978_v1, %v1992_v25  ;;  %v2014_v56 = vor.u32 %v2013_v29, %v2010_v61  ;;  %3103 = vmatpush3.bf16.msra.mxu1 %v3153_v48  ;;  %v568_v44 = vsel %vm562_vm7, %v558_v15, %v526_v33  ;;  %v2022_v32 = vshrl.u32 %v2877_v43, 16  ;;  %v3164_v47 = vld [vmem:[%s3220_s20 + $0x30] sm:$0xf]  ;;  %v3165_v5 = vld [vmem:[%s3220_s20 + $0x38] sm:$0xf] }
  0xc3   : > { %v2001_v58 = vrot.slane %v2000_v22, 4  ;;  %v2025_v54 = vshll.u32 %v2877_v43, 16  ;;  %v1214_v18 = vsel %vm549_vm6, %v2743_v62, %v3882_v51  ;;  %v2036_v27 = vshrl.u32 %v2879_v37, 16 }
  0xc4   : > { %v1183_v53 = vpop.permute.xlu1 %1182  ;;  %v2015_v57 = vrot.slane %v2014_v56, 4  ;;  %v2039_v63 = vshll.u32 %v2879_v37, 16  ;;  %v2024_v41 = vrot.slane %v2022_v32, 4  ;;  %v2033_v38 = vrot.slane %v2031_v31, 5  ;;  %v528_v33 = vpop.permute.xlu0 %527 }
  0xc5   : > { %v2006_v52 = vsel %vm3301_vm5, %v2001_v58, %v2005_v3  ;;  %v2027_v21 = vrot.slane %v2025_v54, 5  ;;  %v2038_v62 = vrot.slane %v2036_v27, 4  ;;  %v2050_v11 = vshrl.u32 %v2881_v28, 16 }
  0xc6   : > { %v2020_v51 = vsel %vm3301_vm5, %v2015_v57, %v2019_v26  ;;  %v2041_v23 = vrot.slane %v2039_v63, 5  ;;  %v2053_v20 = vshll.u32 %v2881_v28, 16  ;;  %v2047_v31 = vrot.slane %v2045_v9, 5  ;;  %v3166_v63 = vld [vmem:[%s3220_s20 + $0x8] sm:$0xf] }
  0xc7   : > { %v3951_v59 = vcombine.low %v2006_v52, %v2020_v51  ;;  %v2028_v48 = vor.u32 %v2027_v21, %v2024_v41  ;;  %v2064_v50 = vshrl.u32 %v2883_v2, 16  ;;  %v2067_v16 = vshll.u32 %v2883_v2, 16  ;;  %v3167_v28 = vld [vmem:[%s3220_s20 + $0x10] sm:$0xf] }
  0xc8   : > { %v546_v34 = vpop.permute.xlu1 %545  ;;  %v2042_v14 = vor.u32 %v2041_v23, %v2038_v62  ;;  %v1223_v30 = vsel %vm562_vm7, %v1214_v18, %v1183_v53  ;;  %v2052_v10 = vrot.slane %v2050_v11, 4  ;;  %v2055_v17 = vrot.slane %v2053_v20, 5  ;;  %v3169_v11 = vld [vmem:[%s3220_s20 + $0x20] sm:$0xf] }
  0xc9   : > { %v577_v46 = vsel %vm571_vm8, %v568_v44, %v546_v34  ;;  %v2029_v6 = vrot.slane %v2028_v48, 4  ;;  %v2066_v60 = vrot.slane %v2064_v50, 4  ;;  %v2069_v13 = vrot.slane %v2067_v16, 5  ;;  %v3168_v48 = vld [vmem:[%s3220_s20 + $0x18] sm:$0xf] }
  0xca   : > { %3060 = vmatprep.mubr.msk.bf16.mxu0 %vm612_vm9, %v577_v46  ;;  %v2043_v7 = vrot.slane %v2042_v14, 4  ;;  %v2670_v1 = vcombine.low %v3164_v47, %v3165_v5  ;;  %v2056_v9 = vor.u32 %v2055_v17, %v2052_v10  ;;  %v2061_v61 = vrot.slane %v2059_v19, 5 }
  0xcb   : > { %v2034_v4 = vsel %vm3301_vm5, %v2029_v6, %v2033_v38  ;;  %v2070_v53 = vor.u32 %v2069_v13, %v2066_v60  ;;  %v2075_v25 = vrot.slane %v2073_v12, 5  ;;  %v1217_v22 = vsel %vm549_vm6, %v3918_v0, %v3921_v45 }
  0xcc   : > { %v1203_v42 = vpop.permute.xlu1 %1202  ;;  %v2048_v43 = vsel %vm3301_vm5, %v2043_v7, %v2047_v31  ;;  %v2057_v37 = vrot.slane %v2056_v9, 4  ;;  %v561_v19 = vsel %vm549_vm6, %v2670_v1, %v3898_v49  ;;  %v2821_v34 = vcombine.low %v3166_v63, %v3167_v28 }
  0xcd   : > { %v1231_v39 = vsel %vm571_vm8, %v1223_v30, %v1203_v42  ;;  %v3967_v3 = vcombine.low %v2034_v4, %v2048_v43  ;;  %v2071_v26 = vrot.slane %v2070_v53, 4  ;;  %v570_v58 = vsel %vm562_vm7, %v561_v19, %v528_v33 }
  0xce   : > { %3076 = vmatprep.mubr.msk.bf16.mxu1 %vm612_vm9, %v1231_v39  ;;  %v1185_v29 = vpop.permute.xlu0 %1184  ;;  %v2062_v12 = vsel %vm3301_vm5, %v2057_v37, %v2061_v61  ;;  %v2822_v20 = vcombine.low %v3168_v48, %v3169_v11  ;;  %v2823_v60 = vcombine.low %v3627_v24, %v3638_v8  ;;  %v2824_v8 = vcombine.low %v3658_v40, %v3664_v55  ;;  %v4027_v55 = vld [vmem:[%s4173_s2] ss:$0 sm:$0xff] }
  0xcf   : > { %v1225_v15 = vsel %vm562_vm7, %v1217_v22, %v1185_v29  ;;  %v2076_v45 = vsel %vm3301_vm5, %v2071_v26, %v2075_v25 }
  0xd0   : > { %v2936_v54 = vcombine.low %v2062_v12, %v2076_v45 }
  0xd1   : > { %v1205_v56 = vpop.permute.xlu1 %1204 }
  0xd2   : > { %v1233_v44 = vsel %vm571_vm8, %v1225_v15, %v1205_v56  ;;  %v548_v0 = vpop.permute.xlu0 %547 }
  0xd3   : > { %3077 = vmatmul.mubr.msk.bf16.gmra.mrb[4].mxu1 %vm612_vm9, %v1233_v44  ;;  %v579_v32 = vsel %vm571_vm8, %v570_v58, %v548_v0  ;;  %v4032_v44 = vld [vmem:[%s4174_s3] ss:$0 sm:$0xff] }
  0xd4   : > { %3061 = vmatmul.mubr.msk.bf16.gmra.mrb[4].mxu0 %vm612_vm9, %v579_v32 }
  0xd6   : > { %v2342_v49 = vpop.permute.xlu1 %2341 }
  0xd7   : > { %v2391_v46 = vsel %vm549_vm6, %v3934_v35, %v2342_v49 }
  0xd9   : > { %v1695_v18 = vpop.permute.xlu0 %1694 }
  0xda   : > { %v1723_v27 = vpop.permute.xlu1 %1722  ;;  %v1752_v21 = vsel %vm549_vm6, %v2821_v34, %v1695_v18 }
  0xdb   : > { %v1763_v36 = vsel %vm562_vm7, %v1752_v21, %v1723_v27 }
  0xe0   : > { %v1697_v57 = vpop.permute.xlu0 %1696 }
  0xe1   : > { %v1755_v30 = vsel %vm549_vm6, %v2822_v20, %v1697_v57 }
  0xe4   : > { %v2344_v52 = vpop.permute.xlu0 %2343 }
  0xe5   : > { %v2394_v31 = vsel %vm549_vm6, %v3951_v59, %v2344_v52 }
  0xe8   : > { %v2362_v41 = vpop.permute.xlu1 %2361  ;;  %v1725_v2 = vpop.permute.xlu0 %1724 }
  0xe9   : > { %v2402_v51 = vsel %vm562_vm7, %v2391_v46, %v2362_v41  ;;  %v1765_v42 = vsel %vm562_vm7, %v1755_v30, %v1725_v2 }
  0xec   : > { %v1743_v38 = vpop.permute.xlu1 %1742 }
  0xed   : > { %v1771_v33 = vsel %vm571_vm8, %v1763_v36, %v1743_v38 }
  0xee   : > { %3088 = vmatprep.mubr.msk.bf16.mxu0 %vm612_vm9, %v1771_v33 }
  0xf0   : > { %v2382_v62 = vpop.permute.xlu1 %2381 }
  0xf1   : > { %v2410_v23 = vsel %vm571_vm8, %v2402_v51, %v2382_v62 }
  0xf2   : > { %3104 = vmatprep.mubr.msk.bf16.mxu1 %vm612_vm9, %v2410_v23  ;;  %v2364_v14 = vpop.permute.xlu0 %2363 }
  0xf3   : > { %v2404_v50 = vsel %vm562_vm7, %v2394_v31, %v2364_v14 }
  0xf5   : > { %v2384_v16 = vpop.permute.xlu1 %2383 }
  0xf6   : > { %v2412_v35 = vsel %vm571_vm8, %v2404_v50, %v2384_v16  ;;  %v1745_v6 = vpop.permute.xlu0 %1744 }
  0xf7   : > { %3105 = vmatmul.mubr.msk.bf16.vlgmr.msra.gmra.mrb[8].mxu1 %vm612_vm9, %v2412_v35  ;;  %v1773_v10 = vsel %vm571_vm8, %v1765_v42, %v1745_v6 }
  0xf8   : > { %3089 = vmatmul.mubr.msk.bf16.vlgmr.msra.gmra.mrb[8].mxu0 %vm612_vm9, %v1773_v10 }
  0xfa   : > { %v2346_v39 = vpop.permute.xlu1 %2345 }
  0xfb   : > { %v2397_v29 = vsel %vm549_vm6, %v3967_v3, %v2346_v39 }
  0xfd   : > { %v1699_v17 = vpop.permute.xlu0 %1698 }
  0xfe   : > { %v1727_v59 = vpop.permute.xlu1 %1726  ;;  %v1758_v5 = vsel %vm549_vm6, %v2823_v60, %v1699_v17 }
  0xff   : > { %v1767_v1 = vsel %vm562_vm7, %v1758_v5, %v1727_v59 }
 0x104   : > { %v1701_v7 = vpop.permute.xlu0 %1700 }
 0x105   : > { %v1761_v56 = vsel %vm549_vm6, %v2824_v8, %v1701_v7 }
 0x108   : > { %v2348_v13 = vpop.permute.xlu0 %2347 }
 0x109   : > { %v2400_v22 = vsel %vm549_vm6, %v2936_v54, %v2348_v13 }
 0x10c   : > { %v2366_v47 = vpop.permute.xlu1 %2365  ;;  %v1729_v9 = vpop.permute.xlu0 %1728 }
 0x10d   : > { %v2406_v43 = vsel %vm562_vm7, %v2397_v29, %v2366_v47  ;;  %v1769_v26 = vsel %vm562_vm7, %v1761_v56, %v1729_v9 }
 0x110   : > { %v1747_v4 = vpop.permute.xlu1 %1746 }
 0x111   : > { %v1775_v61 = vsel %vm571_vm8, %v1767_v1, %v1747_v4 }
 0x112   : > { %3092 = vmatprep.mubr.msk.bf16.mxu0 %vm612_vm9, %v1775_v61 }
 0x114   : > { %v2386_v53 = vpop.permute.xlu1 %2385 }
 0x115   : > { %v2414_v24 = vsel %vm571_vm8, %v2406_v43, %v2386_v53 }
 0x116   : > { %3108 = vmatprep.mubr.msk.bf16.mxu1 %vm612_vm9, %v2414_v24  ;;  %v2368_v25 = vpop.permute.xlu0 %2367 }
 0x117   : > { %v2408_v37 = vsel %vm562_vm7, %v2400_v22, %v2368_v25 }
 0x119   : > { %v2388_v15 = vpop.permute.xlu1 %2387 }
 0x11a   : > { %v2416_v3 = vsel %vm571_vm8, %v2408_v37, %v2388_v15  ;;  %v1749_v19 = vpop.permute.xlu0 %1748 }
 0x11b   : > { %3109 = vmatmul.mubr.msk.bf16.gmra.mrb[12].mxu1 %vm612_vm9, %v2416_v3  ;;  %v1777_v40 = vsel %vm571_vm8, %v1769_v26, %v1749_v19 }
 0x11c   : > { %3093 = vmatmul.mubr.msk.bf16.gmra.mrb[12].mxu0 %vm612_vm9, %v1777_v40 }
 0x183   : > { %v3058_v12 = vpop.f32.mrb[0].mxu0 }
 0x184   : > { %v694_v58 = vmul.f32 %v3058_v12, %v4027_v55  ;;  %v655_v0 = vpop.f32.mrb[1].mxu0 }
 0x185   : > { %v692_v45 = vmul.f32 %v4027_v55, %v655_v0  ;;  %v3059_v32 = vpop.f32.mrb[2].mxu0 }
 0x186   : > { %v708_v54 = vadd.f32 %v4032_v44, %v694_v58  ;;  %v695_v18 = vmul.f32 %v3059_v32, %v4027_v55  ;;  %v658_v49 = vpop.f32.mrb[3].mxu0 }
 0x187   : > { %v706_v57 = vadd.f32 %v4032_v44, %v692_v45  ;;  %v693_v27 = vmul.f32 %v4027_v55, %v658_v49 }
 0x188   : > { %v716_v63 = vmax.f32 %v708_v54, 0.0  ;;  %v709_v28 = vadd.f32 %v4032_v44, %v695_v18  ;;  %v3074_v52 = vpop.f32.mrb[0].mxu1 }
 0x189   : > { %v714_v34 = vmax.f32 %v706_v57, 0.0  ;;  %v707_v41 = vadd.f32 %v4032_v44, %v693_v27  ;;  %v1342_v36 = vmul.f32 %v3074_v52, %v4027_v55  ;;  %v1309_v2 = vpop.f32.mrb[1].mxu1 }
 0x18a   : > { %v2986_v21 = vpack.c.bf16 %v716_v63, %v716_v63  ;;  %v717_v38 = vmax.f32 %v709_v28, 0.0  ;;  %v1340_v46 = vmul.f32 %v4027_v55, %v1309_v2  ;;  %v3075_v62 = vpop.f32.mrb[2].mxu1 }
 0x18b   : > { %v2984_v33 = vpack.c.bf16 %v714_v34, %v714_v34  ;;  %v715_v51 = vmax.f32 %v707_v41, 0.0  ;;  %v1350_v23 = vadd.f32 %v4032_v44, %v1342_v36  ;;  %v1343_v11 = vmul.f32 %v3075_v62, %v4027_v55  ;;  %v1312_v20 = vpop.f32.mrb[3].mxu1 }
 0x18c   : > { %757 = vst.msk [vmem:[%s4045_s13 + $0x8] sm:$0xf] %vm754_vm10, %v2986_v21  ;;  %v2987_v48 = vpack.c.bf16 %v717_v38, %v717_v38  ;;  %v1348_v14 = vadd.f32 %v4032_v44, %v1340_v46  ;;  %v1341_v50 = vmul.f32 %v4027_v55, %v1312_v20 }
 0x18d   : > { %755 = vst.msk [vmem:[%s4045_s13] sm:$0xf] %vm754_vm10, %v2984_v33  ;;  %v2985_v31 = vpack.c.bf16 %v715_v51, %v715_v51  ;;  %v1358_v16 = vmax.f32 %v1350_v23, 0.0  ;;  %v1351_v30 = vadd.f32 %v4032_v44, %v1343_v11 }
 0x18e   : > { %758 = vst.msk [vmem:[%s4045_s13 + $0xc] sm:$0xf] %vm754_vm10, %v2987_v48  ;;  %v1356_v35 = vmax.f32 %v1348_v14, 0.0  ;;  %v1349_v42 = vadd.f32 %v4032_v44, %v1341_v50 }
 0x18f   : > { %756 = vst.msk [vmem:[%s4045_s13 + $0x4] sm:$0xf] %vm754_vm10, %v2985_v31  ;;  %v2994_v6 = vpack.c.bf16 %v1358_v16, %v1358_v16  ;;  %v1359_v10 = vmax.f32 %v1351_v30, 0.0 }
 0x190   : > { %v2992_v17 = vpack.c.bf16 %v1356_v35, %v1356_v35  ;;  %v1357_v39 = vmax.f32 %v1349_v42, 0.0 }
 0x191   : > { %2783 = vst.msk [vmem:[%s4045_s13 + $0x28] sm:$0xf] %vm754_vm10, %v2994_v6  ;;  %v2995_v7 = vpack.c.bf16 %v1359_v10, %v1359_v10 }
 0x192   : > { %2781 = vst.msk [vmem:[%s4045_s13 + $0x20] sm:$0xf] %vm754_vm10, %v2992_v17  ;;  %v2993_v59 = vpack.c.bf16 %v1357_v39, %v1357_v39 }
 0x193   : > { %2784 = vst.msk [vmem:[%s4045_s13 + $0x2c] sm:$0xf] %vm754_vm10, %v2995_v7 }
 0x194   : > { %2782 = vst.msk [vmem:[%s4045_s13 + $0x24] sm:$0xf] %vm754_vm10, %v2993_v59 }
 0x1a6   : > { %v3078_v60 = vpop.f32.mrb[4].mxu1 }
 0x1a7   : > { %v1346_v13 = vmul.f32 %v3078_v60, %v4027_v55  ;;  %v1325_v47 = vpop.f32.mrb[5].mxu1  ;;  %v3062_v5 = vpop.f32.mrb[4].mxu0 }
 0x1a8   : > { %v1344_v1 = vmul.f32 %v4027_v55, %v1325_v47  ;;  %v3079_v4 = vpop.f32.mrb[6].mxu1  ;;  %v698_v9 = vmul.f32 %v3062_v5, %v4027_v55  ;;  %v671_v61 = vpop.f32.mrb[5].mxu0 }
 0x1a9   : > { %v1354_v29 = vadd.f32 %v4032_v44, %v1346_v13  ;;  %v1347_v43 = vmul.f32 %v3079_v4, %v4027_v55  ;;  %v1328_v53 = vpop.f32.mrb[7].mxu1  ;;  %v696_v24 = vmul.f32 %v4027_v55, %v671_v61  ;;  %v3063_v8 = vpop.f32.mrb[6].mxu0 }
 0x1aa   : > { %v1352_v25 = vadd.f32 %v4032_v44, %v1344_v1  ;;  %v1345_v22 = vmul.f32 %v4027_v55, %v1328_v53  ;;  %v712_v37 = vadd.f32 %v4032_v44, %v698_v9  ;;  %v699_v56 = vmul.f32 %v3063_v8, %v4027_v55  ;;  %v674_v3 = vpop.f32.mrb[7].mxu0 }
 0x1ab   : > { %v1362_v15 = vmax.f32 %v1354_v29, 0.0  ;;  %v1355_v26 = vadd.f32 %v4032_v44, %v1347_v43  ;;  %v710_v19 = vadd.f32 %v4032_v44, %v696_v24  ;;  %v697_v12 = vmul.f32 %v4027_v55, %v674_v3 }
 0x1ac   : > { %v1360_v40 = vmax.f32 %v1352_v25, 0.0  ;;  %v1353_v58 = vadd.f32 %v4032_v44, %v1345_v22  ;;  %v720_v0 = vmax.f32 %v712_v37, 0.0  ;;  %v713_v32 = vadd.f32 %v4032_v44, %v699_v56 }
 0x1ad   : > { %v2998_v45 = vpack.c.bf16 %v1362_v15, %v1362_v15  ;;  %v1363_v54 = vmax.f32 %v1355_v26, 0.0  ;;  %v718_v18 = vmax.f32 %v710_v19, 0.0  ;;  %v711_v57 = vadd.f32 %v4032_v44, %v697_v12 }
 0x1ae   : > { %v2996_v49 = vpack.c.bf16 %v1360_v40, %v1360_v40  ;;  %v1361_v27 = vmax.f32 %v1353_v58, 0.0  ;;  %v2990_v63 = vpack.c.bf16 %v720_v0, %v720_v0  ;;  %v721_v28 = vmax.f32 %v713_v32, 0.0 }
 0x1af   : > { %2787 = vst.msk [vmem:[%s4045_s13 + $0x38] sm:$0xf] %vm754_vm10, %v2998_v45  ;;  %v2999_v34 = vpack.c.bf16 %v1363_v54, %v1363_v54  ;;  %v2988_v52 = vpack.c.bf16 %v718_v18, %v718_v18  ;;  %v719_v41 = vmax.f32 %v711_v57, 0.0 }
 0x1b0   : > { %2785 = vst.msk [vmem:[%s4045_s13 + $0x30] sm:$0xf] %vm754_vm10, %v2996_v49  ;;  %v2997_v21 = vpack.c.bf16 %v1361_v27, %v1361_v27  ;;  %761 = vst.msk [vmem:[%s4045_s13 + $0x18] sm:$0xf] %vm754_vm10, %v2990_v63  ;;  %v2991_v36 = vpack.c.bf16 %v721_v28, %v721_v28 }
 0x1b1   : > { %2788 = vst.msk [vmem:[%s4045_s13 + $0x3c] sm:$0xf] %vm754_vm10, %v2999_v34  ;;  %759 = vst.msk [vmem:[%s4045_s13 + $0x10] sm:$0xf] %vm754_vm10, %v2988_v52  ;;  %v2989_v38 = vpack.c.bf16 %v719_v41, %v719_v41 }
 0x1b2   : > { %2786 = vst.msk [vmem:[%s4045_s13 + $0x34] sm:$0xf] %vm754_vm10, %v2997_v21  ;;  %762 = vst.msk [vmem:[%s4045_s13 + $0x1c] sm:$0xf] %vm754_vm10, %v2991_v36 }
 0x1b3   : > { %760 = vst.msk [vmem:[%s4045_s13 + $0x14] sm:$0xf] %vm754_vm10, %v2989_v38 }
 0x1ca   : > { %v3106_v2 = vpop.f32.mrb[8].mxu1 }
 0x1cb   : > { %v2525_v33 = vmul.f32 %v3106_v2, %v4027_v55  ;;  %v2492_v46 = vpop.f32.mrb[9].mxu1  ;;  %v3090_v51 = vpop.f32.mrb[8].mxu0 }
 0x1cc   : > { %v2523_v62 = vmul.f32 %v4027_v55, %v2492_v46  ;;  %v3107_v23 = vpop.f32.mrb[10].mxu1  ;;  %v1886_v48 = vmul.f32 %v3090_v51, %v4027_v55  ;;  %v1853_v11 = vpop.f32.mrb[9].mxu0 }
 0x1cd   : > { %v2533_v20 = vadd.f32 %v4032_v44, %v2525_v33  ;;  %v2526_v14 = vmul.f32 %v3107_v23, %v4027_v55  ;;  %v2495_v31 = vpop.f32.mrb[11].mxu1  ;;  %v1884_v50 = vmul.f32 %v4027_v55, %v1853_v11  ;;  %v3091_v16 = vpop.f32.mrb[10].mxu0 }
 0x1ce   : > { %v2531_v30 = vadd.f32 %v4032_v44, %v2523_v62  ;;  %v2524_v35 = vmul.f32 %v4027_v55, %v2495_v31  ;;  %v1894_v42 = vadd.f32 %v4032_v44, %v1886_v48  ;;  %v1887_v10 = vmul.f32 %v3091_v16, %v4027_v55  ;;  %v1856_v17 = vpop.f32.mrb[11].mxu0 }
 0x1cf   : > { %v2541_v6 = vmax.f32 %v2533_v20, 0.0  ;;  %v2534_v39 = vadd.f32 %v4032_v44, %v2526_v14  ;;  %v1892_v7 = vadd.f32 %v4032_v44, %v1884_v50  ;;  %v1885_v60 = vmul.f32 %v4027_v55, %v1856_v17 }
 0x1d0   : > { %v2539_v59 = vmax.f32 %v2531_v30, 0.0  ;;  %v2532_v13 = vadd.f32 %v4032_v44, %v2524_v35  ;;  %v1902_v47 = vmax.f32 %v1894_v42, 0.0  ;;  %v1895_v1 = vadd.f32 %v4032_v44, %v1887_v10 }
 0x1d1   : > { %v3010_v5 = vpack.c.bf16 %v2541_v6, %v2541_v6  ;;  %v2542_v4 = vmax.f32 %v2534_v39, 0.0  ;;  %v1900_v9 = vmax.f32 %v1892_v7, 0.0  ;;  %v1893_v29 = vadd.f32 %v4032_v44, %v1885_v60 }
 0x1d2   : > { %v3008_v61 = vpack.c.bf16 %v2539_v59, %v2539_v59  ;;  %v2540_v43 = vmax.f32 %v2532_v13, 0.0  ;;  %v3002_v53 = vpack.c.bf16 %v1902_v47, %v1902_v47  ;;  %v1903_v24 = vmax.f32 %v1895_v1, 0.0 }
 0x1d3   : > { %2975 = vst.msk [vmem:[%s4045_s13 + $0x68] sm:$0xf] %vm754_vm10, %v3010_v5  ;;  %v3011_v8 = vpack.c.bf16 %v2542_v4, %v2542_v4  ;;  %v3000_v25 = vpack.c.bf16 %v1900_v9, %v1900_v9  ;;  %v1901_v22 = vmax.f32 %v1893_v29, 0.0 }
 0x1d4   : > { %2973 = vst.msk [vmem:[%s4045_s13 + $0x60] sm:$0xf] %vm754_vm10, %v3008_v61  ;;  %v3009_v37 = vpack.c.bf16 %v2540_v43, %v2540_v43  ;;  %2863 = vst.msk [vmem:[%s4045_s13 + $0x48] sm:$0xf] %vm754_vm10, %v3002_v53  ;;  %v3003_v15 = vpack.c.bf16 %v1903_v24, %v1903_v24 }
 0x1d5   : > { %2976 = vst.msk [vmem:[%s4045_s13 + $0x6c] sm:$0xf] %vm754_vm10, %v3011_v8  ;;  %2861 = vst.msk [vmem:[%s4045_s13 + $0x40] sm:$0xf] %vm754_vm10, %v3000_v25  ;;  %v3001_v56 = vpack.c.bf16 %v1901_v22, %v1901_v22 }
 0x1d6   : > { %2974 = vst.msk [vmem:[%s4045_s13 + $0x64] sm:$0xf] %vm754_vm10, %v3009_v37  ;;  %2864 = vst.msk [vmem:[%s4045_s13 + $0x4c] sm:$0xf] %vm754_vm10, %v3003_v15 }
 0x1d7   : > { %2862 = vst.msk [vmem:[%s4045_s13 + $0x44] sm:$0xf] %vm754_vm10, %v3001_v56 }
 0x1ee   : > { %v3110_v3 = vpop.f32.mrb[12].mxu1 }
 0x1ef   : > { %v2529_v26 = vmul.f32 %v3110_v3, %v4027_v55  ;;  %v2508_v19 = vpop.f32.mrb[13].mxu1  ;;  %v3094_v40 = vpop.f32.mrb[12].mxu0 }
 0x1f0   : > { %v2527_v12 = vmul.f32 %v4027_v55, %v2508_v19  ;;  %v3111_v58 = vpop.f32.mrb[14].mxu1  ;;  %v1890_v0 = vmul.f32 %v3094_v40, %v4027_v55  ;;  %v1869_v45 = vpop.f32.mrb[13].mxu0 }
 0x1f1   : > { %v2537_v32 = vadd.f32 %v4032_v44, %v2529_v26  ;;  %v2530_v54 = vmul.f32 %v3111_v58, %v4027_v55  ;;  %v2511_v18 = vpop.f32.mrb[15].mxu1  ;;  %v1888_v49 = vmul.f32 %v4027_v55, %v1869_v45  ;;  %v3095_v57 = vpop.f32.mrb[14].mxu0 }
 0x1f2   : > { %v2535_v27 = vadd.f32 %v4032_v44, %v2527_v12  ;;  %v2528_v63 = vmul.f32 %v4027_v55, %v2511_v18  ;;  %v1898_v28 = vadd.f32 %v4032_v44, %v1890_v0  ;;  %v1891_v52 = vmul.f32 %v3095_v57, %v4027_v55  ;;  %v1872_v41 = vpop.f32.mrb[15].mxu0 }
 0x1f3   : > { %v2545_v34 = vmax.f32 %v2537_v32, 0.0  ;;  %v2538_v21 = vadd.f32 %v4032_v44, %v2530_v54  ;;  %v1896_v36 = vadd.f32 %v4032_v44, %v1888_v49  ;;  %v1889_v2 = vmul.f32 %v4027_v55, %v1872_v41 }
 0x1f4   : > { %v2543_v38 = vmax.f32 %v2535_v27, 0.0  ;;  %v2536_v33 = vadd.f32 %v4032_v44, %v2528_v63  ;;  %v1906_v46 = vmax.f32 %v1898_v28, 0.0  ;;  %v1899_v62 = vadd.f32 %v4032_v44, %v1891_v52 }
 0x1f5   : > { %v3014_v51 = vpack.c.bf16 %v2545_v34, %v2545_v34  ;;  %v2546_v23 = vmax.f32 %v2538_v21, 0.0  ;;  %v1904_v48 = vmax.f32 %v1896_v36, 0.0  ;;  %v1897_v20 = vadd.f32 %v4032_v44, %v1889_v2 }
 0x1f6   : > { %v3012_v11 = vpack.c.bf16 %v2543_v38, %v2543_v38  ;;  %v2544_v14 = vmax.f32 %v2536_v33, 0.0  ;;  %v3006_v31 = vpack.c.bf16 %v1906_v46, %v1906_v46  ;;  %v1907_v55 = vmax.f32 %v1899_v62, 0.0 }
 0x1f7   : > { %2979 = vst.msk [vmem:[%s4045_s13 + $0x78] sm:$0xf] %vm754_vm10, %v3014_v51  ;;  %v3015_v50 = vpack.c.bf16 %v2546_v23, %v2546_v23  ;;  %v3004_v16 = vpack.c.bf16 %v1904_v48, %v1904_v48  ;;  %v1905_v30 = vmax.f32 %v1897_v20, 0.0 }
 0x1f8   : > { %2977 = vst.msk [vmem:[%s4045_s13 + $0x70] sm:$0xf] %vm754_vm10, %v3012_v11  ;;  %v3013_v35 = vpack.c.bf16 %v2544_v14, %v2544_v14  ;;  %2867 = vst.msk [vmem:[%s4045_s13 + $0x58] sm:$0xf] %vm754_vm10, %v3006_v31  ;;  %v3007_v42 = vpack.c.bf16 %v1907_v55, %v1907_v55 }
 0x1f9   : > { %2980 = vst.msk [vmem:[%s4045_s13 + $0x7c] sm:$0xf] %vm754_vm10, %v3015_v50  ;;  %2865 = vst.msk [vmem:[%s4045_s13 + $0x50] sm:$0xf] %vm754_vm10, %v3004_v16  ;;  %v3005_v44 = vpack.c.bf16 %v1905_v30, %v1905_v30 }
 0x1fa   : > { %2978 = vst.msk [vmem:[%s4045_s13 + $0x74] sm:$0xf] %vm754_vm10, %v3013_v35  ;;  %2868 = vst.msk [vmem:[%s4045_s13 + $0x5c] sm:$0xf] %vm754_vm10, %v3007_v42 }
 0x1fb   : > { %2866 = vst.msk [vmem:[%s4045_s13 + $0x54] sm:$0xf] %vm754_vm10, %v3005_v44 }
 0x1fc PF: > { %s14_s15 = sadd.s32 1, %s3176_s15  }
 0x1fd   : > { %p11_p4 = scmp.ge.s32.totalorder %s14_s15, 4  }
 0x1ff   :  { %13 = sbr.rel (!%p11_p4) target bundleno = 1 (0x1), region = 74 }

// kernel: ewm_convG_forward.5
= control target key start
LH: loop header
LB: loop body
LE: loop exit
PB: predicated region body
PF: predicated region fallthrough
CT: control target
= control target key end

     0   :  { %s9077_s19 = smov 0   ;;  %s12888_s0 = inlined_call_operand.vmem [shape: bf16[2,18,18,8], index: 0, kind: input, shape index: {}]   ;;  %s12889_s1 = inlined_call_operand.vmem [shape: bf16[2,2,32,1], index: 1, kind: input, shape index: {}]   ;;  %s12890_s2 = inlined_call_operand.<no memory space> [shape: f32[1,1], index: 2, kind: input, shape index: {}]   ;;  %s12891_s4 = inlined_call_operand.vmem [shape: f32[2,2,2,256,1], index: 4, kind: output, shape index: {}]   ;;  %s12892_s3 = inlined_call_operand.<no memory space> [shape: f32[1,1], index: 3, kind: input, shape index: {}]  }
   0x1   :  { %v9_v0 = vstv %s12890_s2  ;;  %v11_v1 = vstv %s12892_s3 }
   0x2   :  { %10 = vst [vmem:[#allocation2] sm:$0x1] %v9_v0  ;;  %12 = vst [vmem:[#allocation3] sm:$0x1] %v11_v1 }
   0x3 LB: > { %s7527_s20 = sadd.s32 4294967295, %s9041_s19   ;;  %p7531_p0 = scmp.ge.s32.totalorder %s9041_s19, 1  ;;  %s9041_s19 = sphi %s9077_s19, %s18_s19  }
   0x4   : > { %p166_p1 = scmp.lt.s32.totalorder %s9041_s19, 3 }
   0x6   : > { %p167_p2 = pnand %p7531_p0, %p166_p1 }
   0x8   : > { %170 = sbr.rel (%p167_p2) target bundleno = 1052 (0x41c), region = 36 }
   0xf   : > { %p192_p3 = scmp.lt.s32.totalorder %s7527_s20, 1  ;;  %vm2387_vm0 = vcmask 1042432   ;;  %vm2388_vm1 = vcmask 1046532   ;;  %s9043_s23 = smov 16   ;;  %vm253_vm3 = vsmask.f32 3328 }
  0x10   : > { %vm9119_vm2 = vmor %vm2387_vm0, %vm2388_vm1  ;;  %vm254_vm4 = vsmask.f32 7440  ;;  %s9044_s24 = smov 8   ;;  %s9045_s25 = smov 24   ;;  %vm1425_vm6 = vcmask 64512   ;;  %vm1474_vm7 = vcmask 130048  }
  0x11   : > { %s12982_s20 = smov (!%p192_p3, %s7527_s20), 1  ;;  %vm9170_vm5 = vmor %vm253_vm3, %vm254_vm4  ;;  %vm1507_vm8 = vcmask 195584   ;;  %vm1556_vm9 = vcmask 261120   ;;  %vm1858_vm10 = vcmask 7168  }
  0x12   : > { %s8592_s2 = smul.u32 216, %s12982_s20  ;;  %s8375_s16 = sshll.u32 %s12982_s20, 10 }
  0x13   : > { %s11731_s20 = scalar_lea.vmem %s12891_s4, %s8375_s16 }
  0x14   : > { %s9091_s22 = scalar_lea.vmem %s12888_s0, %s8592_s2 }
  0x15   : > { %v7537_v2 = vld [vmem:[%s9091_s22 + $0x18] sm:$0xf]  ;;  %v7538_v3 = vld [vmem:[%s9091_s22 + $0x1c] sm:$0xf]  ;;  %v7535_v4 = vld [vmem:[%s9091_s22 + $0xc] sm:$0xf] }
  0x16   : > { %v723_v5 = vshll.u32 %v7538_v3, 16  ;;  %v727_v6 = vshrl.u32 %v7538_v3, 16  ;;  %v7616_v7 = vcombine.low %v7537_v2, %v7538_v3  ;;  %v714_v8 = vshrl.u32 %v7537_v2, 16  ;;  %v7536_v9 = vld [vmem:[%s9091_s22 + $0x10] sm:$0xf] }
  0x17   : > { %v717_v10 = vshll.u32 %v7537_v2, 16  ;;  %v699_v11 = vshll.u32 %v7536_v9, 16  ;;  %v703_v12 = vshrl.u32 %v7536_v9, 16  ;;  %v7615_v13 = vcombine.low %v7535_v4, %v7536_v9  ;;  %v9098_v14 = vld [vmem:[%s9091_s22 + $0x4] sm:$0xf] }
  0x18   : > { %v9100_v15 = vrot.slane %v723_v5, 5  ;;  %v729_v16 = vrot.slane %v727_v6, 4  ;;  %1315 = vrot.lane.b32.xlu0 %v7616_v7, %s9043_s23  ;;  %v716_v17 = vrot.slane %v714_v8, 4  ;;  %v690_v18 = vshrl.u32 %v7535_v4, 16  ;;  %v9104_v19 = vld [vmem:[%s9091_s22 + $0x8] sm:$0x1] }
  0x19   : > { %v719_v20 = vrot.slane %v717_v10, 5  ;;  %v9106_v21 = vrot.slane %v699_v11, 5  ;;  %v705_v22 = vrot.slane %v703_v12, 4  ;;  %1313 = vrot.lane.b32.xlu1 %v7615_v13, %s9043_s23  ;;  %v693_v23 = vshll.u32 %v7535_v4, 16  ;;  %v2323_v24 = vld [vmem:[%s9091_s22] sm:$0xe] }
  0x1a   : > { %v730_v25 = vor.u32 %v729_v16, %v9100_v15  ;;  %v692_v26 = vrot.slane %v690_v18, 4  ;;  %v1953_v27 = vshrl.u32 %v9098_v14, 16  ;;  %v1959_v28 = vshll.u32 %v9104_v19, 16  ;;  %v9114_v29 = vld [vmem:[%s9091_s22 + $0x10] sm:$0xf] }
  0x1b   : > { %v720_v30 = vor.u32 %v719_v20, %v716_v17  ;;  %v706_v31 = vor.u32 %v705_v22, %v9106_v21  ;;  %v695_v32 = vrot.slane %v693_v23, 5  ;;  %v7667_v34 = vrot.slane %v2323_v24, 9  ;;  %v9124_v35 = vld [vmem:[%s9091_s22 + $0x14] sm:$0x1]  ;;  %v7731_v36 = vld [vmem:[%s9091_s22 + $0xc] sm:$0xe] }
  0x1c   : > { %v9127_v37 = vrot.slane %v730_v25, 4  ;;  %v2392_v38 = vrot.slane %v9098_v14, 5  ;;  %v2395_v39 = vrot.slane %v9104_v19, 5  ;;  %v7747_v40 = vrot.slane %v7731_v36, 9  ;;  %v9135_v44 = vld [vmem:[%s9091_s22 + $0x10] sm:$0xf] }
  0x1d   : > { %v9131_v41 = vrot.slane %v720_v30, 4  ;;  %v696_v42 = vor.u32 %v695_v32, %v692_v26  ;;  %v3000_v43 = vrot.slane %v9114_v29, 5  ;;  %v9138_v45 = vld [vmem:[%s9091_s22 + $0x14] sm:$0x1]  ;;  %v9140_v46 = vrot.slane %v706_v31, 4 }
  0x1e   : > { %v2393_v47 = vsel %vm9119_vm2, %v7667_v34, %v2392_v38  ;;  %v2394_v48 = vrot.slane %v2392_v38, 4  ;;  %v3003_v49 = vrot.slane %v9124_v35, 5  ;;  %v2324_v50 = vld [vmem:[%s9091_s22 + $0xc] sm:$0xe]  ;;  %v1977_v54 = vshrl.u32 %v9135_v44, 16 }
  0x1f   : > { %v9146_v51 = vrot.slane %v696_v42, 4  ;;  %v3001_v52 = vsel %vm9119_vm2, %v7747_v40, %v3000_v43  ;;  %v3002_v53 = vrot.slane %v3000_v43, 4  ;;  %v207_v55 = vld [vmem:[%s9091_s22 + $0xc] sm:$0xf]  ;;  %v7668_v57 = vrot.slane %v2324_v50, 9 }
  0x20   : > { %v2396_v56 = vsel %vm9119_vm2, %v2394_v48, %v2395_v39  ;;  %v2399_v58 = vrot.slane %v9135_v44, 5  ;;  %v2402_v59 = vrot.slane %v9138_v45, 5  ;;  %v208_v60 = vld [vmem:[%s9091_s22 + $0x10] sm:$0xf]  ;;  %v238_v63 = vld [vmem:[%s9091_s22 + $0x14] sm:$0x1] }
  0x21   : > { %v7779_v61 = vcombine.low %v2393_v47, %v2396_v56  ;;  %v3004_v62 = vsel %vm9119_vm2, %v3002_v53, %v3003_v49  ;;  %v281_v0 = vshrl.u32 %v207_v55, 16  ;;  %v284_v1 = vshll.u32 %v207_v55, 16  ;;  %v7683_v2 = vld [vmem:[%s9091_s22 + $0xc] sm:$0xf]  ;;  %v205_v17 = vld [vmem:[%s9091_s22] sm:$0xf] }
  0x22   : > { %v7811_v3 = vcombine.low %v3001_v52, %v3004_v62  ;;  %v2400_v4 = vsel %vm9119_vm2, %v7668_v57, %v2399_v58  ;;  %v2401_v5 = vrot.slane %v2399_v58, 4  ;;  %v290_v6 = vshll.u32 %v208_v60, 16  ;;  %v206_v38 = vld [vmem:[%s9091_s22 + $0x4] sm:$0xf]  ;;  %v237_v47 = vld [vmem:[%s9091_s22 + $0x8] sm:$0x1] }
  0x23   : > { %3206 = vrot.lane.b32.xlu0 %v7779_v61, %s9044_s24  ;;  %v283_v7 = vrot.slane %v281_v0, 4  ;;  %v286_v8 = vrot.slane %v284_v1, 5  ;;  %v294_v9 = vshrl.u32 %v208_v60, 16  ;;  %v300_v10 = vshll.u32 %v238_v63, 16  ;;  %v7567_v57 = vld [vmem:[%s9091_s22 + $0x14] sm:$0x1] }
  0x24   : > { %3366 = vrot.lane.b32.xlu1 %v7811_v3, %s9045_s25  ;;  %v2403_v11 = vsel %vm9119_vm2, %v2401_v5, %v2402_v59  ;;  %v292_v12 = vrot.slane %v290_v6, 5  ;;  %v2551_v13 = vshrl.u32 %v7683_v2, 16  ;;  %v2554_v16 = vshll.u32 %v7683_v2, 16  ;;  %v7686_v62 = vld [vmem:[%s9091_s22 + $0x18] sm:$0xf] }
  0x25   : > { %v7780_v18 = vcombine.low %v2400_v4, %v2403_v11  ;;  %v287_v20 = vor.u32 %v286_v8, %v283_v7  ;;  %v296_v22 = vrot.slane %v294_v9, 4  ;;  %v302_v23 = vrot.slane %v300_v10, 5  ;;  %v7687_v3 = vld [vmem:[%s9091_s22 + $0x1c] sm:$0xf] }
  0x26   : > { %v2553_v25 = vrot.slane %v2551_v13, 4  ;;  %v2556_v26 = vrot.slane %v2554_v16, 5  ;;  %v2560_v30 = vshll.u32 %v9114_v29, 16  ;;  %v2564_v31 = vshrl.u32 %v9114_v29, 16 }
  0x27   : > { %3208 = vrot.lane.b32.xlu0 %v7780_v18, %s9044_s24  ;;  %v288_v32 = vrot.slane %v287_v20, 4  ;;  %v297_v34 = vor.u32 %v296_v22, %v292_v12  ;;  %v2570_v36 = vshll.u32 %v9124_v35, 16  ;;  %v257_v39 = vshrl.u32 %v205_v17, 16 }
  0x28   : > { %v2557_v40 = vor.u32 %v2556_v26, %v2553_v25  ;;  %v2562_v42 = vrot.slane %v2560_v30, 5  ;;  %v2566_v43 = vrot.slane %v2564_v31, 4  ;;  %v260_v48 = vshll.u32 %v205_v17, 16  ;;  %v7732_v17 = vld [vmem:[%s9091_s22 + $0x18] sm:$0xe] }
  0x29   : > { %v293_v49 = vsel %vm9170_vm5, %v288_v32, %v292_v12  ;;  %v298_v50 = vrot.slane %v297_v34, 4  ;;  %v2572_v29 = vrot.slane %v2570_v36, 5  ;;  %v259_v52 = vrot.slane %v257_v39, 4  ;;  %v7568_v39 = vld [vmem:[%s9091_s22 + $0x20] sm:$0x1] }
  0x2a   : > { %v2558_v53 = vrot.slane %v2557_v40, 4  ;;  %v2567_v55 = vor.u32 %v2566_v43, %v2562_v42  ;;  %v262_v56 = vrot.slane %v260_v48, 5  ;;  %v266_v35 = vshll.u32 %v206_v38, 16 }
  0x2b   : > { %v303_v58 = vsel %vm9170_vm5, %v298_v50, %v302_v23  ;;  %v270_v59 = vshrl.u32 %v206_v38, 16  ;;  %v276_v60 = vshll.u32 %v237_v47, 16  ;;  %v702_v61 = vsel %vm9170_vm5, %v9146_v51, %v9106_v21  ;;  %v7688_v21 = vld [vmem:[%s9091_s22 + $0x20] sm:$0x1] }
  0x2c   : > { %v7600_v63 = vcombine.low %v293_v49, %v303_v58  ;;  %v2563_v0 = vsel %vm9170_vm5, %v2558_v53, %v2562_v42  ;;  %v2568_v1 = vrot.slane %v2567_v55, 4  ;;  %v263_v2 = vor.u32 %v262_v56, %v259_v52  ;;  %v9210_v52 = vld [vmem:[%s9091_s22 + $0x1c] sm:$0xf]  ;;  %v9213_v53 = vld [vmem:[%s9091_s22 + $0x20] sm:$0x1] }
  0x2d   : > { %v268_v4 = vrot.slane %v266_v35, 5  ;;  %v272_v5 = vrot.slane %v270_v59, 4  ;;  %v278_v6 = vrot.slane %v276_v60, 5  ;;  %v709_v7 = vshll.u32 %v7567_v57, 16  ;;  %v209_v58 = vld [vmem:[%s9091_s22 + $0x18] sm:$0xf] }
  0x2e   : > { %1203 = vrot.lane.b32.xlu1 %v7600_v63, %s9044_s24  ;;  %v2573_v8 = vsel %vm9170_vm5, %v2568_v1, %v2572_v29  ;;  %v264_v9 = vrot.slane %v263_v2, 4  ;;  %v2575_v51 = vshrl.u32 %v7686_v62, 16  ;;  %v2578_v10 = vshll.u32 %v7686_v62, 16  ;;  %v210_v1 = vld [vmem:[%s9091_s22 + $0x1c] sm:$0xf] }
  0x2f   : > { %v7795_v11 = vcombine.low %v2563_v0, %v2573_v8  ;;  %v273_v12 = vor.u32 %v272_v5, %v268_v4  ;;  %v711_v13 = vrot.slane %v709_v7, 5  ;;  %v2584_v16 = vshll.u32 %v7687_v3, 16  ;;  %v7539_v7 = vld [vmem:[%s9091_s22 + $0x24] sm:$0xf] }
  0x30   : > { %v269_v18 = vsel %vm9170_vm5, %v264_v9, %v268_v4  ;;  %v2577_v20 = vrot.slane %v2575_v51, 4  ;;  %v2580_v22 = vrot.slane %v2578_v10, 5  ;;  %v2588_v23 = vshrl.u32 %v7687_v3, 16  ;;  %v239_v4 = vld [vmem:[%s9091_s22 + $0x20] sm:$0x1] }
  0x31   : > { %v274_v25 = vrot.slane %v273_v12, 4  ;;  %v712_v26 = vsel %vm9170_vm5, %v9140_v46, %v711_v13  ;;  %v2586_v30 = vrot.slane %v2584_v16, 5  ;;  %v2594_v31 = vshll.u32 %v7688_v21, 16  ;;  %v2325_v46 = vld [vmem:[%s9091_s22 + $0x18] sm:$0xe] }
  0x32   : > { %3286 = vrot.lane.b32.xlu1 %v7795_v11, %s9043_s23  ;;  %v7631_v32 = vcombine.low %v702_v61, %v712_v26  ;;  %v2581_v34 = vor.u32 %v2580_v22, %v2577_v20  ;;  %v2590_v36 = vrot.slane %v2588_v23, 4  ;;  %v7748_v38 = vrot.slane %v7732_v17, 9  ;;  %v7540_v16 = vld [vmem:[%s9091_s22 + $0x28] sm:$0xf] }
  0x33   : > { %v1983_v40 = vshll.u32 %v9138_v45, 16  ;;  %v279_v42 = vsel %vm9170_vm5, %v274_v25, %v278_v6  ;;  %v3007_v43 = vrot.slane %v7687_v3, 5  ;;  %v3010_v47 = vrot.slane %v7688_v21, 5 }
  0x34   : > { %v7599_v48 = vcombine.low %v269_v18, %v279_v42  ;;  %v2582_v49 = vrot.slane %v2581_v34, 4  ;;  %v2591_v50 = vor.u32 %v2590_v36, %v2586_v30  ;;  %v2596_v29 = vrot.slane %v2594_v31, 5 }
  0x35   : > { %v3008_v55 = vsel %vm9119_vm2, %v7748_v38, %v3007_v43  ;;  %v3009_v56 = vrot.slane %v3007_v43, 4  ;;  %v726_v35 = vsel %vm9170_vm5, %v9131_v41, %v9100_v15  ;;  %v733_v57 = vshll.u32 %v7568_v39, 16  ;;  %v212_v38 = vld [vmem:[%s9091_s22 + $0x28] sm:$0xf] }
  0x36   : > { %1201 = vrot.lane.b32.xlu0 %v7599_v48, %s9044_s24  ;;  %1393 = vrot.lane.b32.xlu1 %v7631_v32, %s9045_s25  ;;  %v2587_v59 = vsel %vm9170_vm5, %v2582_v49, %v2586_v30  ;;  %v2592_v60 = vrot.slane %v2591_v50, 4  ;;  %v2001_v61 = vshrl.u32 %v9210_v52, 16  ;;  %v7669_v62 = vrot.slane %v2325_v46, 9  ;;  %v211_v30 = vld [vmem:[%s9091_s22 + $0x24] sm:$0xf] }
  0x37   : > { %v3011_v63 = vsel %vm9119_vm2, %v3009_v56, %v3010_v47  ;;  %v735_v0 = vrot.slane %v733_v57, 5  ;;  %v2406_v15 = vrot.slane %v9210_v52, 5  ;;  %v2409_v41 = vrot.slane %v9213_v53, 5  ;;  %v240_v46 = vld [vmem:[%s9091_s22 + $0x2c] sm:$0x1] }
  0x38   : > { %v2597_v2 = vsel %vm9170_vm5, %v2592_v60, %v2596_v29  ;;  %v7812_v3 = vcombine.low %v3008_v55, %v3011_v63  ;;  %v305_v5 = vshrl.u32 %v209_v58, 16  ;;  %v308_v6 = vshll.u32 %v209_v58, 16  ;;  %v7689_v55 = vld [vmem:[%s9091_s22 + $0x24] sm:$0xf] }
  0x39   : > { %v7796_v8 = vcombine.low %v2587_v59, %v2597_v2  ;;  %v736_v9 = vsel %vm9170_vm5, %v9127_v37, %v735_v0  ;;  %v2407_v21 = vsel %vm9119_vm2, %v7669_v62, %v2406_v15  ;;  %v2408_v51 = vrot.slane %v2406_v15, 4  ;;  %v9261_v59 = vld [vmem:[%s9091_s22 + $0x28] sm:$0xf] }
  0x3a   : > { %3368 = vrot.lane.b32.xlu1 %v7812_v3, %s9045_s25  ;;  %v7632_v10 = vcombine.low %v726_v35, %v736_v9  ;;  %v307_v11 = vrot.slane %v305_v5, 4  ;;  %v310_v12 = vrot.slane %v308_v6, 5  ;;  %v314_v13 = vshll.u32 %v210_v1, 16 }
  0x3b   : > { %3288 = vrot.lane.b32.xlu0 %v7796_v8, %s9043_s23  ;;  %v2410_v17 = vsel %vm9119_vm2, %v2408_v51, %v2409_v41  ;;  %v318_v18 = vshrl.u32 %v210_v1, 16  ;;  %v324_v37 = vshll.u32 %v239_v4, 16  ;;  %v738_v20 = vshrl.u32 %v7539_v7, 16  ;;  %v9265_v1 = vld [vmem:[%s9091_s22 + $0x2c] sm:$0x1] }
  0x3c   : > { %v7781_v22 = vcombine.low %v2407_v21, %v2410_v17  ;;  %v311_v23 = vor.u32 %v310_v12, %v307_v11  ;;  %v316_v25 = vrot.slane %v314_v13, 5  ;;  %v741_v26 = vshll.u32 %v7539_v7, 16  ;;  %v2326_v11 = vld [vmem:[%s9091_s22 + $0x24] sm:$0xe] }
  0x3d   : > { %v320_v31 = vrot.slane %v318_v18, 4  ;;  %v326_v32 = vrot.slane %v324_v37, 5  ;;  %v9247_v34 = vrot.slane %v738_v20, 4  ;;  %v747_v36 = vshll.u32 %v7540_v16, 16  ;;  %v9277_v18 = vld [vmem:[%s9091_s22 + $0x2c] sm:$0x1] }
  0x3e   : > { %3210 = vrot.lane.b32.xlu1 %v7781_v22, %s9044_s24  ;;  %v312_v39 = vrot.slane %v311_v23, 4  ;;  %v9251_v42 = vrot.slane %v741_v26, 5  ;;  %v751_v43 = vshrl.u32 %v7540_v16, 16  ;;  %v7617_v47 = vcombine.low %v7539_v7, %v7540_v16 }
  0x3f   : > { %1395 = vrot.lane.b32.xlu0 %v7632_v10, %s9045_s25  ;;  %v321_v48 = vor.u32 %v320_v31, %v316_v25  ;;  %v9255_v49 = vrot.slane %v747_v36, 5  ;;  %v329_v50 = vshrl.u32 %v211_v30, 16  ;;  %v332_v29 = vshll.u32 %v211_v30, 16  ;;  %v9271_v10 = vld [vmem:[%s9091_s22 + $0x28] sm:$0xf] }
  0x40   : > { %v317_v56 = vsel %vm9170_vm5, %v312_v39, %v316_v25  ;;  %v753_v35 = vrot.slane %v751_v43, 4  ;;  %v338_v57 = vshll.u32 %v212_v38, 16  ;;  %v342_v58 = vshrl.u32 %v212_v38, 16 }
  0x41   : > { %v322_v60 = vrot.slane %v321_v48, 4  ;;  %v331_v62 = vrot.slane %v329_v50, 4  ;;  %v334_v63 = vrot.slane %v332_v29, 5  ;;  %v348_v0 = vshll.u32 %v240_v46, 16 }
  0x42   : > { %1317 = vrot.lane.b32.xlu1 %v7617_v47, %s9043_s23  ;;  %v340_v15 = vrot.slane %v338_v57, 5  ;;  %v344_v41 = vrot.slane %v342_v58, 4  ;;  %v2599_v2 = vshrl.u32 %v7689_v55, 16  ;;  %v2602_v3 = vshll.u32 %v7689_v55, 16  ;;  %v7541_v47 = vld [vmem:[%s9091_s22 + $0x30] sm:$0xf] }
  0x43   : > { %v327_v4 = vsel %vm9170_vm5, %v322_v60, %v326_v32  ;;  %v335_v5 = vor.u32 %v334_v63, %v331_v62  ;;  %v350_v6 = vrot.slane %v348_v0, 5  ;;  %v2608_v7 = vshll.u32 %v9261_v59, 16  ;;  %v7569_v32 = vld [vmem:[%s9091_s22 + $0x2c] sm:$0x1]  ;;  %v7542_v55 = vld [vmem:[%s9091_s22 + $0x34] sm:$0xf] }
  0x44   : > { %v7601_v8 = vcombine.low %v317_v56, %v327_v4  ;;  %v345_v9 = vor.u32 %v344_v41, %v340_v15  ;;  %v2601_v21 = vrot.slane %v2599_v2, 4  ;;  %v2604_v51 = vrot.slane %v2602_v3, 5  ;;  %v7733_v2 = vld [vmem:[%s9091_s22 + $0x24] sm:$0xe] }
  0x45   : > { %v336_v12 = vrot.slane %v335_v5, 4  ;;  %v2610_v13 = vrot.slane %v2608_v7, 5  ;;  %v2612_v16 = vshrl.u32 %v9261_v59, 16  ;;  %v2618_v17 = vshll.u32 %v9265_v1, 16  ;;  %v7692_v7 = vld [vmem:[%s9091_s22 + $0x30] sm:$0xf] }
  0x46   : > { %v2007_v37 = vshll.u32 %v9213_v53, 16  ;;  %1205 = vrot.lane.b32.xlu0 %v7601_v8, %s9044_s24  ;;  %v346_v20 = vrot.slane %v345_v9, 4  ;;  %v2605_v22 = vor.u32 %v2604_v51, %v2601_v21  ;;  %v2025_v23 = vshrl.u32 %v9271_v10, 16 }
  0x47   : > { %v341_v25 = vsel %vm9170_vm5, %v336_v12, %v340_v15  ;;  %v2614_v26 = vrot.slane %v2612_v16, 4  ;;  %v2620_v30 = vrot.slane %v2618_v17, 5  ;;  %v7670_v31 = vrot.slane %v2326_v11, 9  ;;  %v7693_v11 = vld [vmem:[%s9091_s22 + $0x34] sm:$0xf] }
  0x48   : > { %v351_v36 = vsel %vm9170_vm5, %v346_v20, %v350_v6  ;;  %v2606_v38 = vrot.slane %v2605_v22, 4  ;;  %v2413_v39 = vrot.slane %v9271_v10, 5  ;;  %v2416_v43 = vrot.slane %v9277_v18, 5  ;;  %v7694_v12 = vld [vmem:[%s9091_s22 + $0x38] sm:$0x1] }
  0x49   : > { %v7602_v46 = vcombine.low %v341_v25, %v351_v36  ;;  %v2615_v48 = vor.u32 %v2614_v26, %v2610_v13  ;;  %v744_v50 = vor.u32 %v9251_v42, %v9247_v34  ;;  %v754_v29 = vor.u32 %v753_v35, %v9255_v49 }
  0x4a   : > { %v2611_v56 = vsel %vm9170_vm5, %v2606_v38, %v2610_v13  ;;  %v2414_v57 = vsel %vm9119_vm2, %v7670_v31, %v2413_v39  ;;  %v2415_v58 = vrot.slane %v2413_v39, 4  ;;  %v757_v60 = vshll.u32 %v7569_v32, 16 }
  0x4b   : > { %1207 = vrot.lane.b32.xlu0 %v7602_v46, %s9044_s24  ;;  %v2616_v62 = vrot.slane %v2615_v48, 4  ;;  %v745_v63 = vrot.slane %v744_v50, 4  ;;  %v755_v0 = vrot.slane %v754_v29, 4  ;;  %v762_v34 = vshrl.u32 %v7541_v47, 16  ;;  %v7570_v29 = vld [vmem:[%s9091_s22 + $0x38] sm:$0x1] }
  0x4c   : > { %v2417_v42 = vsel %vm9119_vm2, %v2415_v58, %v2416_v43  ;;  %v759_v35 = vrot.slane %v757_v60, 5  ;;  %v765_v15 = vshll.u32 %v7541_v47, 16  ;;  %v771_v41 = vshll.u32 %v7542_v55, 16 }
  0x4d   : > { %v2621_v3 = vsel %vm9170_vm5, %v2616_v62, %v2620_v30  ;;  %v7782_v4 = vcombine.low %v2414_v57, %v2417_v42  ;;  %v750_v5 = vsel %vm9170_vm5, %v745_v63, %v9255_v49  ;;  %v764_v6 = vrot.slane %v762_v34, 4  ;;  %v7734_v30 = vld [vmem:[%s9091_s22 + $0x30] sm:$0xe]  ;;  %v9328_v34 = vld [vmem:[%s9091_s22 + $0x34] sm:$0xf] }
  0x4e   : > { %v7797_v8 = vcombine.low %v2611_v56, %v2621_v3  ;;  %v760_v9 = vsel %vm9170_vm5, %v755_v0, %v759_v35  ;;  %v767_v21 = vrot.slane %v765_v15, 5  ;;  %v9310_v51 = vrot.slane %v771_v41, 5 }
  0x4f   : > { %3212 = vrot.lane.b32.xlu0 %v7782_v4, %s9044_s24  ;;  %v7633_v13 = vcombine.low %v750_v5, %v760_v9  ;;  %v775_v16 = vshrl.u32 %v7542_v55, 16  ;;  %v7618_v17 = vcombine.low %v7541_v47, %v7542_v55  ;;  %v7749_v20 = vrot.slane %v7733_v2, 9  ;;  %v2327_v2 = vld [vmem:[%s9091_s22 + $0x30] sm:$0xe] }
  0x50   : > { %3290 = vrot.lane.b32.xlu1 %v7797_v8, %s9043_s23  ;;  %v3014_v49 = vrot.slane %v9261_v59, 5  ;;  %v3017_v22 = vrot.slane %v9265_v1, 5  ;;  %v2623_v25 = vshrl.u32 %v7692_v7, 16  ;;  %v2626_v26 = vshll.u32 %v7692_v7, 16 }
  0x51   : > { %v777_v31 = vrot.slane %v775_v16, 4  ;;  %v2632_v32 = vshll.u32 %v7693_v11, 16  ;;  %v2636_v36 = vshrl.u32 %v7693_v11, 16  ;;  %v2642_v38 = vshll.u32 %v7694_v12, 16 }
  0x52   : > { %v3015_v39 = vsel %vm9119_vm2, %v7749_v20, %v3014_v49  ;;  %v3016_v43 = vrot.slane %v3014_v49, 4  ;;  %v2625_v47 = vrot.slane %v2623_v25, 4  ;;  %v2628_v46 = vrot.slane %v2626_v26, 5 }
  0x53   : > { %1319 = vrot.lane.b32.xlu0 %v7618_v17, %s9043_s23  ;;  %v2634_v59 = vrot.slane %v2632_v32, 5  ;;  %v2638_v48 = vrot.slane %v2636_v36, 4  ;;  %v2644_v1 = vrot.slane %v2642_v38, 5  ;;  %v7750_v50 = vrot.slane %v7734_v30, 9  ;;  %v7543_v32 = vld [vmem:[%s9091_s22 + $0x3c] sm:$0xf] }
  0x54   : > { %1397 = vrot.lane.b32.xlu1 %v7633_v13, %s9045_s25  ;;  %v3018_v55 = vsel %vm9119_vm2, %v3016_v43, %v3017_v22  ;;  %v2629_v56 = vor.u32 %v2628_v46, %v2625_v47  ;;  %v3021_v57 = vrot.slane %v7693_v11, 5  ;;  %v3024_v58 = vrot.slane %v7694_v12, 5  ;;  %v213_v12 = vld [vmem:[%s9091_s22 + $0x30] sm:$0xf]  ;;  %v214_v13 = vld [vmem:[%s9091_s22 + $0x34] sm:$0xf] }
  0x55   : > { %v7813_v60 = vcombine.low %v3015_v39, %v3018_v55  ;;  %v2639_v62 = vor.u32 %v2638_v48, %v2634_v59  ;;  %v768_v63 = vor.u32 %v767_v21, %v764_v6  ;;  %v778_v0 = vor.u32 %v777_v31, %v9310_v51  ;;  %v9335_v6 = vld [vmem:[%s9091_s22 + $0x38] sm:$0x1]  ;;  %v9361_v48 = vld [vmem:[%s9091_s22 + $0x40] sm:$0xf] }
  0x56   : > { %v2630_v42 = vrot.slane %v2629_v56, 4  ;;  %v3022_v35 = vsel %vm9119_vm2, %v7750_v50, %v3021_v57  ;;  %v3023_v15 = vrot.slane %v3021_v57, 4  ;;  %v781_v41 = vshll.u32 %v7570_v29, 16  ;;  %v241_v22 = vld [vmem:[%s9091_s22 + $0x38] sm:$0x1] }
  0x57   : > { %v2031_v3 = vshll.u32 %v9277_v18, 16  ;;  %v2640_v4 = vrot.slane %v2639_v62, 4  ;;  %v769_v5 = vrot.slane %v768_v63, 4  ;;  %v779_v7 = vrot.slane %v778_v0, 4  ;;  %v215_v63 = vld [vmem:[%s9091_s22 + $0x3c] sm:$0xf] }
  0x58   : > { %3370 = vrot.lane.b32.xlu1 %v7813_v60, %s9045_s25  ;;  %v2635_v8 = vsel %vm9170_vm5, %v2630_v42, %v2634_v59  ;;  %v3025_v9 = vsel %vm9119_vm2, %v3023_v15, %v3024_v58  ;;  %v783_v21 = vrot.slane %v781_v41, 5  ;;  %v2049_v11 = vshrl.u32 %v9328_v34, 16  ;;  %v8618_v0 = vld [vmem:[%s12889_s1 + $0x10] sm:$0xff]  }
  0x59   : > { %v2645_v16 = vsel %vm9170_vm5, %v2640_v4, %v2644_v1  ;;  %v7814_v17 = vcombine.low %v3022_v35, %v3025_v9  ;;  %v774_v20 = vsel %vm9170_vm5, %v769_v5, %v9310_v51  ;;  %v7671_v49 = vrot.slane %v2327_v2, 9  ;;  %v8617_v1 = vld [vmem:[%s12889_s1] sm:$0xff]   ;;  %8484 = vmatprep.subr.bf16.mxu1 %v8618_v0 }
  0x5a   : > { %v7798_v25 = vcombine.low %v2635_v8, %v2645_v16  ;;  %v784_v26 = vsel %vm9170_vm5, %v779_v7, %v783_v21  ;;  %v2420_v30 = vrot.slane %v9328_v34, 5  ;;  %v2423_v31 = vrot.slane %v9335_v6, 5  ;;  %8448 = vmatprep.subr.bf16.mxu0 %v8617_v1  ;;  %v216_v2 = vld [vmem:[%s9091_s22 + $0x40] sm:$0xf]  ;;  %v242_v9 = vld [vmem:[%s9091_s22 + $0x44] sm:$0x1]  ;;  %8485 = vmatpush3.bf16.msra.mxu1 %v8618_v0 }
  0x5b   : > { %v7634_v36 = vcombine.low %v774_v20, %v784_v26  ;;  %v353_v38 = vshrl.u32 %v213_v12, 16  ;;  %v356_v39 = vshll.u32 %v213_v12, 16  ;;  %v362_v43 = vshll.u32 %v214_v13, 16  ;;  %8449 = vmatpush3.bf16.msra.mxu0 %v8617_v1 }
  0x5c   : > { %3292 = vrot.lane.b32.xlu0 %v7798_v25, %s9043_s23  ;;  %3372 = vrot.lane.b32.xlu1 %v7814_v17, %s9045_s25  ;;  %v2421_v51 = vsel %vm9119_vm2, %v7671_v49, %v2420_v30  ;;  %v2422_v47 = vrot.slane %v2420_v30, 4  ;;  %v366_v46 = vshrl.u32 %v214_v13, 16  ;;  %v372_v59 = vshll.u32 %v241_v22, 16  ;;  %v7695_v17 = vld [vmem:[%s9091_s22 + $0x3c] sm:$0xf] }
  0x5d   : > { %v355_v50 = vrot.slane %v353_v38, 4  ;;  %v358_v29 = vrot.slane %v356_v39, 5  ;;  %v364_v55 = vrot.slane %v362_v43, 5  ;;  %v786_v56 = vshrl.u32 %v7543_v32, 16  ;;  %v9390_v38 = vld [vmem:[%s9091_s22 + $0x40] sm:$0xf] }
  0x5e   : > { %v2424_v58 = vsel %vm9119_vm2, %v2422_v47, %v2423_v31  ;;  %v368_v60 = vrot.slane %v366_v46, 4  ;;  %v789_v62 = vshll.u32 %v7543_v32, 16  ;;  %v374_v15 = vrot.slane %v372_v59, 5  ;;  %v9398_v47 = vld [vmem:[%s9091_s22 + $0x44] sm:$0x1]  ;;  %v8620_v59 = vld [vmem:[%s12889_s1 + $0x18] sm:$0xff]  }
  0x5f   : > { %v7783_v42 = vcombine.low %v2421_v51, %v2424_v58  ;;  %v359_v35 = vor.u32 %v358_v29, %v355_v50  ;;  %v795_v41 = vshll.u32 %v9361_v48, 16  ;;  %v9376_v5 = vrot.slane %v786_v56, 4  ;;  %8486 = vmatprep.subr.bf16.mxu1 %v8620_v59 }
  0x60   : > { %1399 = vrot.lane.b32.xlu0 %v7634_v36, %s9045_s25  ;;  %v369_v4 = vor.u32 %v368_v60, %v364_v55  ;;  %v9378_v7 = vrot.slane %v789_v62, 5  ;;  %v799_v8 = vshrl.u32 %v9361_v48, 16  ;;  %v7619_v12 = vcombine.low %v7543_v32, %v9361_v48  ;;  %v8619_v32 = vld [vmem:[%s12889_s1 + $0x8] sm:$0xff]   ;;  %8487 = vmatpush3.bf16.msra.mxu1 %v8620_v59 }
  0x61   : > { %3214 = vrot.lane.b32.xlu1 %v7783_v42, %s9044_s24  ;;  %v360_v21 = vrot.slane %v359_v35, 4  ;;  %v377_v13 = vshrl.u32 %v215_v63, 16  ;;  %v380_v16 = vshll.u32 %v215_v63, 16  ;;  %v9385_v49 = vrot.slane %v795_v41, 5  ;;  %8450 = vmatprep.subr.bf16.mxu0 %v8619_v32  ;;  %v2328_v63 = vld [vmem:[%s9091_s22 + $0x3c] sm:$0xe] }
  0x62   : > { %v370_v20 = vrot.slane %v369_v4, 4  ;;  %v386_v22 = vshll.u32 %v216_v2, 16  ;;  %v390_v25 = vshrl.u32 %v216_v2, 16  ;;  %v396_v36 = vshll.u32 %v242_v9, 16  ;;  %8451 = vmatpush3.bf16.msra.mxu0 %v8619_v32  ;;  %v9413_v41 = vld [vmem:[%s9091_s22 + $0x44] sm:$0x1] }
  0x63   : > { %v365_v26 = vsel %vm9170_vm5, %v360_v21, %v364_v55  ;;  %v379_v30 = vrot.slane %v377_v13, 4  ;;  %v382_v31 = vrot.slane %v380_v16, 5  ;;  %v2647_v46 = vshrl.u32 %v7695_v17, 16  ;;  %v9405_v55 = vld [vmem:[%s9091_s22 + $0x40] sm:$0xf] }
  0x64   : > { %v375_v39 = vsel %vm9170_vm5, %v370_v20, %v374_v15  ;;  %v388_v43 = vrot.slane %v386_v22, 5  ;;  %v392_v51 = vrot.slane %v390_v25, 4  ;;  %v398_v50 = vrot.slane %v396_v36, 5 }
  0x65   : > { %v7603_v48 = vcombine.low %v365_v26, %v375_v39  ;;  %1321 = vrot.lane.b32.xlu1 %v7619_v12, %s9043_s23  ;;  %v383_v1 = vor.u32 %v382_v31, %v379_v30  ;;  %v2650_v29 = vshll.u32 %v7695_v17, 16  ;;  %v2649_v58 = vrot.slane %v2647_v46, 4  ;;  %v7545_v30 = vld [vmem:[%s9091_s22 + $0x48] sm:$0xf] }
  0x66   : > { %v393_v56 = vor.u32 %v392_v51, %v388_v43  ;;  %v2656_v60 = vshll.u32 %v9390_v38, 16  ;;  %v2660_v62 = vshrl.u32 %v9390_v38, 16  ;;  %v801_v0 = vrot.slane %v799_v8, 4  ;;  %v7571_v8 = vld [vmem:[%s9091_s22 + $0x44] sm:$0x1] }
  0x67   : > { %1209 = vrot.lane.b32.xlu0 %v7603_v48, %s9044_s24  ;;  %v384_v42 = vrot.slane %v383_v1, 4  ;;  %v2652_v35 = vrot.slane %v2650_v29, 5  ;;  %v2666_v15 = vshll.u32 %v9398_v47, 16  ;;  %v7672_v17 = vrot.slane %v2328_v63, 9  ;;  %v7546_v29 = vld [vmem:[%s9091_s22 + $0x4c] sm:$0xf] }
  0x68   : > { %v394_v2 = vrot.slane %v393_v56, 4  ;;  %v2658_v4 = vrot.slane %v2656_v60, 5  ;;  %v2662_v9 = vrot.slane %v2660_v62, 4  ;;  %v2427_v25 = vrot.slane %v9405_v55, 5  ;;  %v7735_v62 = vld [vmem:[%s9091_s22 + $0x3c] sm:$0xe] }
  0x69   : > { %v389_v12 = vsel %vm9170_vm5, %v384_v42, %v388_v43  ;;  %v2653_v13 = vor.u32 %v2652_v35, %v2649_v58  ;;  %v2668_v16 = vrot.slane %v2666_v15, 5  ;;  %v2430_v26 = vrot.slane %v9413_v41, 5  ;;  %v7698_v15 = vld [vmem:[%s9091_s22 + $0x48] sm:$0xf] }
  0x6a   : > { %v399_v20 = vsel %vm9170_vm5, %v394_v2, %v398_v50  ;;  %v2663_v22 = vor.u32 %v2662_v9, %v2658_v4  ;;  %v792_v32 = vor.u32 %v9378_v7, %v9376_v5  ;;  %v802_v39 = vor.u32 %v801_v0, %v9385_v49 }
  0x6b   : > { %v7604_v31 = vcombine.low %v389_v12, %v399_v20  ;;  %v2654_v36 = vrot.slane %v2653_v13, 4  ;;  %v2428_v51 = vsel %vm9119_vm2, %v7672_v17, %v2427_v25  ;;  %v2429_v46 = vrot.slane %v2427_v25, 4  ;;  %v7699_v13 = vld [vmem:[%s9091_s22 + $0x4c] sm:$0xf] }
  0x6c   : > { %v2664_v43 = vrot.slane %v2663_v22, 4  ;;  %v805_v59 = vshll.u32 %v7571_v8, 16  ;;  %v793_v1 = vrot.slane %v792_v32, 4  ;;  %v803_v50 = vrot.slane %v802_v39, 4  ;;  %v7700_v22 = vld [vmem:[%s9091_s22 + $0x50] sm:$0x1] }
  0x6d   : > { %1211 = vrot.lane.b32.xlu0 %v7604_v31, %s9044_s24  ;;  %v2659_v48 = vsel %vm9170_vm5, %v2654_v36, %v2658_v4  ;;  %v810_v5 = vshrl.u32 %v7545_v30, 16  ;;  %v2431_v56 = vsel %vm9119_vm2, %v2429_v46, %v2430_v26  ;;  %v813_v60 = vshll.u32 %v7545_v30, 16 }
  0x6e   : > { %v2669_v7 = vsel %vm9170_vm5, %v2664_v43, %v2668_v16  ;;  %v807_v58 = vrot.slane %v805_v59, 5  ;;  %v7784_v0 = vcombine.low %v2428_v51, %v2431_v56  ;;  %v798_v42 = vsel %vm9170_vm5, %v793_v1, %v9385_v49  ;;  %v7736_v49 = vld [vmem:[%s9091_s22 + $0x48] sm:$0xe] }
  0x6f   : > { %v7799_v63 = vcombine.low %v2659_v48, %v2669_v7  ;;  %v812_v35 = vrot.slane %v810_v5, 4  ;;  %v815_v4 = vrot.slane %v813_v60, 5  ;;  %v819_v9 = vshll.u32 %v7546_v29, 16 }
  0x70   : > { %v808_v2 = vsel %vm9170_vm5, %v803_v50, %v807_v58  ;;  %v823_v12 = vshrl.u32 %v7546_v29, 16  ;;  %v7620_v17 = vcombine.low %v7545_v30, %v7546_v29  ;;  %v7751_v8 = vrot.slane %v7735_v62, 9  ;;  %v7572_v29 = vld [vmem:[%s9091_s22 + $0x50] sm:$0x1] }
  0x71   : > { %3294 = vrot.lane.b32.xlu1 %v7799_v63, %s9043_s23  ;;  %3216 = vrot.lane.b32.xlu0 %v7784_v0, %s9044_s24  ;;  %v7635_v16 = vcombine.low %v798_v42, %v808_v2  ;;  %v3028_v20 = vrot.slane %v9390_v38, 5  ;;  %v821_v25 = vrot.slane %v819_v9, 5  ;;  %v3031_v31 = vrot.slane %v9398_v47, 5  ;;  %v9462_v42 = vld [vmem:[%s9091_s22 + $0x4c] sm:$0xf] }
  0x72   : > { %v825_v26 = vrot.slane %v823_v12, 4  ;;  %v2671_v36 = vshrl.u32 %v7698_v15, 16  ;;  %v2674_v43 = vshll.u32 %v7698_v15, 16  ;;  %v2680_v51 = vshll.u32 %v7699_v13, 16 }
  0x73   : > { %v3029_v32 = vsel %vm9119_vm2, %v7751_v8, %v3028_v20  ;;  %v3030_v39 = vrot.slane %v3028_v20, 4  ;;  %v2684_v59 = vshrl.u32 %v7699_v13, 16  ;;  %v2690_v30 = vshll.u32 %v7700_v22, 16 }
  0x74   : > { %v2673_v46 = vrot.slane %v2671_v36, 4  ;;  %v7752_v48 = vrot.slane %v7736_v49, 9  ;;  %v2676_v47 = vrot.slane %v2674_v43, 5  ;;  %v2682_v1 = vrot.slane %v2680_v51, 5  ;;  %v218_v51 = vld [vmem:[%s9091_s22 + $0x4c] sm:$0xf] }
  0x75   : > { %1401 = vrot.lane.b32.xlu1 %v7635_v16, %s9045_s25  ;;  %1323 = vrot.lane.b32.xlu0 %v7620_v17, %s9043_s23  ;;  %v3032_v38 = vsel %vm9119_vm2, %v3030_v39, %v3031_v31  ;;  %v3035_v50 = vrot.slane %v7699_v13, 5  ;;  %v2686_v56 = vrot.slane %v2684_v59, 4  ;;  %v3038_v58 = vrot.slane %v7700_v22, 5  ;;  %v9465_v13 = vld [vmem:[%s9091_s22 + $0x50] sm:$0x1] }
  0x76   : > { %v7815_v7 = vcombine.low %v3029_v32, %v3032_v38  ;;  %v2677_v60 = vor.u32 %v2676_v47, %v2673_v46  ;;  %v816_v0 = vor.u32 %v815_v4, %v812_v35  ;;  %v2692_v2 = vrot.slane %v2690_v30, 5  ;;  %v2329_v16 = vld [vmem:[%s9091_s22 + $0x48] sm:$0xe]  ;;  %v7547_v47 = vld [vmem:[%s9091_s22 + $0x54] sm:$0xf] }
  0x77   : > { %v3036_v62 = vsel %vm9119_vm2, %v7752_v48, %v3035_v50  ;;  %v3037_v63 = vrot.slane %v3035_v50, 4  ;;  %v2687_v15 = vor.u32 %v2686_v56, %v2682_v1  ;;  %v826_v9 = vor.u32 %v825_v26, %v821_v25  ;;  %v217_v4 = vld [vmem:[%s9091_s22 + $0x48] sm:$0xf]  ;;  %v243_v48 = vld [vmem:[%s9091_s22 + $0x50] sm:$0x1] }
  0x78   : > { %v829_v12 = vshll.u32 %v7572_v29, 16  ;;  %v2678_v17 = vrot.slane %v2677_v60, 4  ;;  %v817_v20 = vrot.slane %v816_v0, 4  ;;  %v7673_v39 = vrot.slane %v2329_v16, 9 }
  0x79   : > { %3374 = vrot.lane.b32.xlu1 %v7815_v7, %s9045_s25  ;;  %v3039_v8 = vsel %vm9119_vm2, %v3037_v63, %v3038_v58  ;;  %v2688_v22 = vrot.slane %v2687_v15, 4  ;;  %v827_v26 = vrot.slane %v826_v9, 4  ;;  %v2434_v43 = vrot.slane %v9462_v42, 5  ;;  %v219_v9 = vld [vmem:[%s9091_s22 + $0x54] sm:$0xf] }
  0x7a   : > { %v7816_v49 = vcombine.low %v3036_v62, %v3039_v8  ;;  %v831_v31 = vrot.slane %v829_v12, 5  ;;  %v2683_v36 = vsel %vm9170_vm5, %v2678_v17, %v2682_v1  ;;  %v822_v32 = vsel %vm9170_vm5, %v817_v20, %v821_v25  ;;  %v7548_v62 = vld [vmem:[%s9091_s22 + $0x58] sm:$0xf] }
  0x7b   : > { %v2693_v46 = vsel %vm9170_vm5, %v2688_v22, %v2692_v2  ;;  %v2437_v30 = vrot.slane %v9465_v13, 5  ;;  %v401_v38 = vshrl.u32 %v217_v4, 16  ;;  %v2435_v50 = vsel %vm9119_vm2, %v7673_v39, %v2434_v43  ;;  %v220_v20 = vld [vmem:[%s9091_s22 + $0x58] sm:$0xf] }
  0x7c   : > { %v832_v59 = vsel %vm9170_vm5, %v827_v26, %v831_v31  ;;  %v7800_v1 = vcombine.low %v2683_v36, %v2693_v46  ;;  %v2436_v29 = vrot.slane %v2434_v43, 4  ;;  %v404_v56 = vshll.u32 %v217_v4, 16  ;;  %v244_v43 = vld [vmem:[%s9091_s22 + $0x5c] sm:$0x1] }
  0x7d   : > { %3376 = vrot.lane.b32.xlu1 %v7816_v49, %s9045_s25  ;;  %v7636_v25 = vcombine.low %v822_v32, %v832_v59  ;;  %v403_v7 = vrot.slane %v401_v38, 4  ;;  %v410_v58 = vshll.u32 %v218_v51, 16  ;;  %v414_v60 = vshrl.u32 %v218_v51, 16 }
  0x7e   : > { %3296 = vrot.lane.b32.xlu0 %v7800_v1, %s9043_s23  ;;  %v2438_v63 = vsel %vm9119_vm2, %v2436_v29, %v2437_v30  ;;  %v420_v0 = vshll.u32 %v243_v48, 16  ;;  %v834_v15 = vshrl.u32 %v7547_v47, 16  ;;  %v837_v2 = vshll.u32 %v7547_v47, 16  ;;  %v7701_v48 = vld [vmem:[%s9091_s22 + $0x54] sm:$0xf] }
  0x7f   : > { %v7785_v12 = vcombine.low %v2435_v50, %v2438_v63  ;;  %v406_v16 = vrot.slane %v404_v56, 5  ;;  %v412_v17 = vrot.slane %v410_v58, 5  ;;  %v416_v8 = vrot.slane %v414_v60, 4  ;;  %v9507_v60 = vld [vmem:[%s9091_s22 + $0x58] sm:$0xf] }
  0x80   : > { %v422_v22 = vrot.slane %v420_v0, 5  ;;  %v9496_v49 = vrot.slane %v834_v15, 4  ;;  %v843_v26 = vshll.u32 %v7548_v62, 16  ;;  %v9499_v32 = vrot.slane %v837_v2, 5  ;;  %v9515_v0 = vld [vmem:[%s9091_s22 + $0x5c] sm:$0x1] }
  0x81   : > { %3218 = vrot.lane.b32.xlu1 %v7785_v12, %s9044_s24  ;;  %v407_v31 = vor.u32 %v406_v16, %v403_v7  ;;  %v417_v36 = vor.u32 %v416_v8, %v412_v17  ;;  %v7621_v39 = vcombine.low %v7547_v47, %v7548_v62  ;;  %v847_v51 = vshrl.u32 %v7548_v62, 16  ;;  %v9518_v8 = vld [vmem:[%s9091_s22 + $0x58] sm:$0xf] }
  0x82   : > { %1403 = vrot.lane.b32.xlu0 %v7636_v25, %s9045_s25  ;;  %v425_v46 = vshrl.u32 %v219_v9, 16  ;;  %v428_v59 = vshll.u32 %v219_v9, 16  ;;  %v434_v30 = vshll.u32 %v220_v20, 16  ;;  %v9504_v50 = vrot.slane %v843_v26, 5 }
  0x83   : > { %v408_v38 = vrot.slane %v407_v31, 4  ;;  %v418_v1 = vrot.slane %v417_v36, 4  ;;  %v438_v29 = vshrl.u32 %v220_v20, 16  ;;  %v444_v47 = vshll.u32 %v244_v43, 16 }
  0x84   : > { %v427_v7 = vrot.slane %v425_v46, 4  ;;  %v430_v56 = vrot.slane %v428_v59, 5  ;;  %v436_v58 = vrot.slane %v434_v30, 5  ;;  %v2695_v15 = vshrl.u32 %v7701_v48, 16  ;;  %v9526_v59 = vld [vmem:[%s9091_s22 + $0x5c] sm:$0x1] }
  0x85   : > { %v413_v25 = vsel %vm9170_vm5, %v408_v38, %v412_v17  ;;  %v423_v62 = vsel %vm9170_vm5, %v418_v1, %v422_v22  ;;  %1325 = vrot.lane.b32.xlu1 %v7621_v39, %s9043_s23  ;;  %v440_v63 = vrot.slane %v438_v29, 4  ;;  %v446_v12 = vrot.slane %v444_v47, 5  ;;  %v2330_v22 = vld [vmem:[%s9091_s22 + $0x54] sm:$0xe] }
  0x86   : > { %v7605_v2 = vcombine.low %v413_v25, %v423_v62  ;;  %v431_v9 = vor.u32 %v430_v56, %v427_v7  ;;  %v2698_v16 = vshll.u32 %v7701_v48, 16  ;;  %v2697_v26 = vrot.slane %v2695_v15, 4  ;;  %v7573_v25 = vld [vmem:[%s9091_s22 + $0x5c] sm:$0x1] }
  0x87   : > { %v441_v20 = vor.u32 %v440_v63, %v436_v58  ;;  %v2704_v17 = vshll.u32 %v9507_v60, 16  ;;  %v2708_v31 = vshrl.u32 %v9507_v60, 16  ;;  %v849_v36 = vrot.slane %v847_v51, 4 }
  0x88   : > { %1213 = vrot.lane.b32.xlu0 %v7605_v2, %s9044_s24  ;;  %v432_v39 = vrot.slane %v431_v9, 4  ;;  %v2700_v43 = vrot.slane %v2698_v16, 5  ;;  %v2714_v46 = vshll.u32 %v9515_v0, 16  ;;  %v7674_v47 = vrot.slane %v2330_v22, 9  ;;  %v7549_v2 = vld [vmem:[%s9091_s22 + $0x60] sm:$0xf] }
  0x89   : > { %v442_v30 = vrot.slane %v441_v20, 4  ;;  %v2706_v48 = vrot.slane %v2704_v17, 5  ;;  %v2710_v38 = vrot.slane %v2708_v31, 4  ;;  %v2441_v63 = vrot.slane %v9518_v8, 5 }
  0x8a   : > { %v437_v29 = vsel %vm9170_vm5, %v432_v39, %v436_v58  ;;  %v2701_v7 = vor.u32 %v2700_v43, %v2697_v26  ;;  %v2716_v56 = vrot.slane %v2714_v46, 5  ;;  %v2444_v15 = vrot.slane %v9526_v59, 5  ;;  %v7550_v46 = vld [vmem:[%s9091_s22 + $0x64] sm:$0xf] }
  0x8b   : > { %v447_v51 = vsel %vm9170_vm5, %v442_v30, %v446_v12  ;;  %v2711_v62 = vor.u32 %v2710_v38, %v2706_v48  ;;  %v840_v20 = vor.u32 %v9499_v32, %v9496_v49  ;;  %v850_v58 = vor.u32 %v849_v36, %v9504_v50 }
  0x8c   : > { %v7606_v9 = vcombine.low %v437_v29, %v447_v51  ;;  %v2702_v16 = vrot.slane %v2701_v7, 4  ;;  %v2442_v17 = vsel %vm9119_vm2, %v7674_v47, %v2441_v63  ;;  %v2443_v12 = vrot.slane %v2441_v63, 4  ;;  %v7737_v29 = vld [vmem:[%s9091_s22 + $0x54] sm:$0xe]  ;;  %v7704_v51 = vld [vmem:[%s9091_s22 + $0x60] sm:$0xf] }
  0x8d   : > { %v2712_v26 = vrot.slane %v2711_v62, 4  ;;  %v853_v31 = vshll.u32 %v7573_v25, 16  ;;  %v841_v39 = vrot.slane %v840_v20, 4  ;;  %v851_v43 = vrot.slane %v850_v58, 4 }
  0x8e   : > { %1215 = vrot.lane.b32.xlu0 %v7606_v9, %s9044_s24  ;;  %v2707_v22 = vsel %vm9170_vm5, %v2702_v16, %v2706_v48  ;;  %v858_v49 = vshrl.u32 %v7549_v2, 16  ;;  %v2445_v36 = vsel %vm9119_vm2, %v2443_v12, %v2444_v15  ;;  %v861_v38 = vshll.u32 %v7549_v2, 16  ;;  %v7705_v15 = vld [vmem:[%s9091_s22 + $0x64] sm:$0xf] }
  0x8f   : > { %v2717_v32 = vsel %vm9170_vm5, %v2712_v26, %v2716_v56  ;;  %v855_v30 = vrot.slane %v853_v31, 5  ;;  %v7786_v47 = vcombine.low %v2442_v17, %v2445_v36  ;;  %v846_v48 = vsel %vm9170_vm5, %v841_v39, %v9504_v50  ;;  %v7706_v17 = vld [vmem:[%s9091_s22 + $0x68] sm:$0x1]  ;;  %v7738_v50 = vld [vmem:[%s9091_s22 + $0x60] sm:$0xe] }
  0x90   : > { %v7801_v7 = vcombine.low %v2707_v22, %v2717_v32  ;;  %v860_v25 = vrot.slane %v858_v49, 4  ;;  %v863_v56 = vrot.slane %v861_v38, 5  ;;  %v867_v63 = vshll.u32 %v7550_v46, 16 }
  0x91   : > { %v856_v62 = vsel %vm9170_vm5, %v851_v43, %v855_v30  ;;  %v871_v9 = vshrl.u32 %v7550_v46, 16  ;;  %v7622_v20 = vcombine.low %v7549_v2, %v7550_v46  ;;  %v7753_v58 = vrot.slane %v7737_v29, 9 }
  0x92   : > { %3298 = vrot.lane.b32.xlu1 %v7801_v7, %s9043_s23  ;;  %3220 = vrot.lane.b32.xlu0 %v7786_v47, %s9044_s24  ;;  %v7637_v16 = vcombine.low %v846_v48, %v856_v62  ;;  %v3042_v26 = vrot.slane %v9507_v60, 5  ;;  %v869_v12 = vrot.slane %v867_v63, 5  ;;  %v3045_v22 = vrot.slane %v9515_v0, 5  ;;  %v7574_v47 = vld [vmem:[%s9091_s22 + $0x68] sm:$0x1] }
  0x93   : > { %v873_v31 = vrot.slane %v871_v9, 4  ;;  %v2719_v39 = vshrl.u32 %v7704_v51, 16  ;;  %v2722_v32 = vshll.u32 %v7704_v51, 16  ;;  %v2728_v36 = vshll.u32 %v7705_v15, 16 }
  0x94   : > { %v3043_v43 = vsel %vm9119_vm2, %v7753_v58, %v3042_v26  ;;  %v3044_v49 = vrot.slane %v3042_v26, 4  ;;  %v2732_v38 = vshrl.u32 %v7705_v15, 16  ;;  %v2738_v2 = vshll.u32 %v7706_v17, 16  ;;  %v9575_v26 = vld [vmem:[%s9091_s22 + $0x64] sm:$0xf] }
  0x95   : > { %v2721_v30 = vrot.slane %v2719_v39, 4  ;;  %v7754_v46 = vrot.slane %v7738_v50, 9  ;;  %v2724_v0 = vrot.slane %v2722_v32, 5  ;;  %v2730_v29 = vrot.slane %v2728_v36, 5  ;;  %v9578_v50 = vld [vmem:[%s9091_s22 + $0x68] sm:$0x1] }
  0x96   : > { %1405 = vrot.lane.b32.xlu1 %v7637_v16, %s9045_s25  ;;  %1327 = vrot.lane.b32.xlu0 %v7622_v20, %s9043_s23  ;;  %v3046_v60 = vsel %vm9119_vm2, %v3044_v49, %v3045_v22  ;;  %v3049_v7 = vrot.slane %v7705_v15, 5  ;;  %v2734_v62 = vrot.slane %v2732_v38, 4  ;;  %v3052_v63 = vrot.slane %v7706_v17, 5  ;;  %v2331_v32 = vld [vmem:[%s9091_s22 + $0x60] sm:$0xe] }
  0x97   : > { %v7817_v51 = vcombine.low %v3043_v43, %v3046_v60  ;;  %v2725_v9 = vor.u32 %v2724_v0, %v2721_v30  ;;  %v864_v20 = vor.u32 %v863_v56, %v860_v25  ;;  %v2740_v15 = vrot.slane %v2738_v2, 5  ;;  %v221_v56 = vld [vmem:[%s9091_s22 + $0x60] sm:$0xf] }
  0x98   : > { %v3050_v16 = vsel %vm9119_vm2, %v7754_v46, %v3049_v7  ;;  %v3051_v58 = vrot.slane %v3049_v7, 4  ;;  %v2735_v22 = vor.u32 %v2734_v62, %v2730_v29  ;;  %v874_v39 = vor.u32 %v873_v31, %v869_v12 }
  0x99   : > { %v877_v49 = vshll.u32 %v7574_v47, 16  ;;  %v2726_v17 = vrot.slane %v2725_v9, 4  ;;  %v865_v36 = vrot.slane %v864_v20, 4  ;;  %v7675_v0 = vrot.slane %v2331_v32, 9  ;;  %v222_v47 = vld [vmem:[%s9091_s22 + $0x64] sm:$0xf] }
  0x9a   : > { %3378 = vrot.lane.b32.xlu1 %v7817_v51, %s9045_s25  ;;  %v3053_v43 = vsel %vm9119_vm2, %v3051_v58, %v3052_v63  ;;  %v2736_v30 = vrot.slane %v2735_v22, 4  ;;  %v875_v46 = vrot.slane %v874_v39, 4  ;;  %v2448_v7 = vrot.slane %v9575_v26, 5  ;;  %v245_v9 = vld [vmem:[%s9091_s22 + $0x68] sm:$0x1] }
  0x9b   : > { %v7818_v38 = vcombine.low %v3050_v16, %v3053_v43  ;;  %v879_v2 = vrot.slane %v877_v49, 5  ;;  %v2731_v31 = vsel %vm9170_vm5, %v2726_v17, %v2730_v29  ;;  %v870_v60 = vsel %vm9170_vm5, %v865_v36, %v869_v12  ;;  %v7551_v58 = vld [vmem:[%s9091_s22 + $0x6c] sm:$0xf]  ;;  %v7552_v17 = vld [vmem:[%s9091_s22 + $0x70] sm:$0xf] }
  0x9c   : > { %v2741_v51 = vsel %vm9170_vm5, %v2736_v30, %v2740_v15  ;;  %v2451_v63 = vrot.slane %v9578_v50, 5  ;;  %v449_v16 = vshrl.u32 %v221_v56, 16  ;;  %v2449_v20 = vsel %vm9119_vm2, %v7675_v0, %v2448_v7 }
  0x9d   : > { %v880_v62 = vsel %vm9170_vm5, %v875_v46, %v879_v2  ;;  %v7802_v29 = vcombine.low %v2731_v31, %v2741_v51  ;;  %v2450_v22 = vrot.slane %v2448_v7, 4  ;;  %v452_v15 = vshll.u32 %v221_v56, 16  ;;  %v224_v7 = vld [vmem:[%s9091_s22 + $0x70] sm:$0xf] }
  0x9e   : > { %3380 = vrot.lane.b32.xlu1 %v7818_v38, %s9045_s25  ;;  %v7638_v12 = vcombine.low %v870_v60, %v880_v62  ;;  %v451_v39 = vrot.slane %v449_v16, 4  ;;  %v458_v49 = vshll.u32 %v222_v47, 16  ;;  %v462_v32 = vshrl.u32 %v222_v47, 16  ;;  %v223_v38 = vld [vmem:[%s9091_s22 + $0x6c] sm:$0xf] }
  0x9f   : > { %3300 = vrot.lane.b32.xlu0 %v7802_v29, %s9043_s23  ;;  %v2452_v43 = vsel %vm9119_vm2, %v2450_v22, %v2451_v63  ;;  %v468_v36 = vshll.u32 %v245_v9, 16  ;;  %v882_v30 = vshrl.u32 %v7551_v58, 16  ;;  %v885_v46 = vshll.u32 %v7551_v58, 16 }
  0xa0   : > { %v7787_v2 = vcombine.low %v2449_v20, %v2452_v43  ;;  %v454_v31 = vrot.slane %v452_v15, 5  ;;  %v460_v60 = vrot.slane %v458_v49, 5  ;;  %v464_v0 = vrot.slane %v462_v32, 4  ;;  %v246_v20 = vld [vmem:[%s9091_s22 + $0x74] sm:$0x1] }
  0xa1   : > { %v470_v47 = vrot.slane %v468_v36, 5  ;;  %v9609_v51 = vrot.slane %v882_v30, 4  ;;  %v891_v62 = vshll.u32 %v7552_v17, 16  ;;  %v9612_v16 = vrot.slane %v885_v46, 5  ;;  %v7707_v43 = vld [vmem:[%s9091_s22 + $0x6c] sm:$0xf] }
  0xa2   : > { %3222 = vrot.lane.b32.xlu1 %v7787_v2, %s9044_s24  ;;  %v455_v63 = vor.u32 %v454_v31, %v451_v39  ;;  %v465_v9 = vor.u32 %v464_v0, %v460_v60  ;;  %v7623_v29 = vcombine.low %v7551_v58, %v7552_v17  ;;  %v895_v22 = vshrl.u32 %v7552_v17, 16  ;;  %v9620_v0 = vld [vmem:[%s9091_s22 + $0x70] sm:$0xf] }
  0xa3   : > { %1407 = vrot.lane.b32.xlu0 %v7638_v12, %s9045_s25  ;;  %v473_v15 = vshrl.u32 %v223_v38, 16  ;;  %v476_v49 = vshll.u32 %v223_v38, 16  ;;  %v482_v32 = vshll.u32 %v224_v7, 16  ;;  %v9617_v56 = vrot.slane %v891_v62, 5  ;;  %v9628_v62 = vld [vmem:[%s9091_s22 + $0x74] sm:$0x1] }
  0xa4   : > { %v456_v36 = vrot.slane %v455_v63, 4  ;;  %v466_v30 = vrot.slane %v465_v9, 4  ;;  %v486_v2 = vshrl.u32 %v224_v7, 16  ;;  %v492_v58 = vshll.u32 %v246_v20, 16 }
  0xa5   : > { %v475_v39 = vrot.slane %v473_v15, 4  ;;  %v478_v46 = vrot.slane %v476_v49, 5  ;;  %v484_v31 = vrot.slane %v482_v32, 5  ;;  %v2743_v7 = vshrl.u32 %v7707_v43, 16  ;;  %v9631_v49 = vld [vmem:[%s9091_s22 + $0x70] sm:$0xf] }
  0xa6   : > { %v461_v12 = vsel %vm9170_vm5, %v456_v36, %v460_v60  ;;  %v471_v17 = vsel %vm9170_vm5, %v466_v30, %v470_v47  ;;  %1329 = vrot.lane.b32.xlu1 %v7623_v29, %s9043_s23  ;;  %v488_v38 = vrot.slane %v486_v2, 4  ;;  %v494_v15 = vrot.slane %v492_v58, 5  ;;  %v2332_v47 = vld [vmem:[%s9091_s22 + $0x6c] sm:$0xe] }
  0xa7   : > { %v7607_v63 = vcombine.low %v461_v12, %v471_v17  ;;  %v479_v9 = vor.u32 %v478_v46, %v475_v39  ;;  %v2746_v20 = vshll.u32 %v7707_v43, 16  ;;  %v2745_v25 = vrot.slane %v2743_v7, 4  ;;  %v9639_v46 = vld [vmem:[%s9091_s22 + $0x74] sm:$0x1] }
  0xa8   : > { %v489_v32 = vor.u32 %v488_v38, %v484_v31  ;;  %v2752_v60 = vshll.u32 %v9620_v0, 16  ;;  %v2756_v36 = vshrl.u32 %v9620_v0, 16  ;;  %v897_v29 = vrot.slane %v895_v22, 4 }
  0xa9   : > { %1217 = vrot.lane.b32.xlu0 %v7607_v63, %s9044_s24  ;;  %v480_v30 = vrot.slane %v479_v9, 4  ;;  %v2748_v2 = vrot.slane %v2746_v20, 5  ;;  %v2762_v39 = vshll.u32 %v9628_v62, 16  ;;  %v7676_v1 = vrot.slane %v2332_v47, 9  ;;  %v7575_v63 = vld [vmem:[%s9091_s22 + $0x74] sm:$0x1] }
  0xaa   : > { %v490_v43 = vrot.slane %v489_v32, 4  ;;  %v2754_v58 = vrot.slane %v2752_v60, 5  ;;  %v2758_v12 = vrot.slane %v2756_v36, 4  ;;  %v2455_v20 = vrot.slane %v9631_v49, 5  ;;  %v7553_v60 = vld [vmem:[%s9091_s22 + $0x78] sm:$0xf] }
  0xab   : > { %v485_v38 = vsel %vm9170_vm5, %v480_v30, %v484_v31  ;;  %v2749_v7 = vor.u32 %v2748_v2, %v2745_v25  ;;  %v2764_v48 = vrot.slane %v2762_v39, 5  ;;  %v2458_v32 = vrot.slane %v9639_v46, 5 }
  0xac   : > { %v495_v22 = vsel %vm9170_vm5, %v490_v43, %v494_v15  ;;  %v2759_v9 = vor.u32 %v2758_v12, %v2754_v58  ;;  %v888_v17 = vor.u32 %v9612_v16, %v9609_v51  ;;  %v898_v25 = vor.u32 %v897_v29, %v9617_v56  ;;  %v7554_v12 = vld [vmem:[%s9091_s22 + $0x7c] sm:$0xf] }
  0xad   : > { %v7608_v36 = vcombine.low %v485_v38, %v495_v22  ;;  %v2750_v4 = vrot.slane %v2749_v7, 4  ;;  %v2456_v47 = vsel %vm9119_vm2, %v7676_v1, %v2455_v20  ;;  %v2457_v15 = vrot.slane %v2455_v20, 4  ;;  %v7739_v7 = vld [vmem:[%s9091_s22 + $0x6c] sm:$0xe] }
  0xae   : > { %v2760_v31 = vrot.slane %v2759_v9, 4  ;;  %v901_v30 = vshll.u32 %v7575_v63, 16  ;;  %v889_v39 = vrot.slane %v888_v17, 4  ;;  %v899_v43 = vrot.slane %v898_v25, 4  ;;  %v7710_v17 = vld [vmem:[%s9091_s22 + $0x78] sm:$0xf] }
  0xaf   : > { %1219 = vrot.lane.b32.xlu0 %v7608_v36, %s9044_s24  ;;  %v2755_v2 = vsel %vm9170_vm5, %v2750_v4, %v2754_v58  ;;  %v906_v51 = vshrl.u32 %v7553_v60, 16  ;;  %v2459_v29 = vsel %vm9119_vm2, %v2457_v15, %v2458_v32  ;;  %v909_v38 = vshll.u32 %v7553_v60, 16  ;;  %v7711_v32 = vld [vmem:[%s9091_s22 + $0x7c] sm:$0xf] }
  0xb0   : > { %v2765_v16 = vsel %vm9170_vm5, %v2760_v31, %v2764_v48  ;;  %v903_v1 = vrot.slane %v901_v30, 5  ;;  %v7788_v22 = vcombine.low %v2456_v47, %v2459_v29  ;;  %v894_v4 = vsel %vm9170_vm5, %v889_v39, %v9617_v56  ;;  %v7712_v30 = vld [vmem:[%s9091_s22 + $0x80] sm:$0x1]  ;;  %v7740_v56 = vld [vmem:[%s9091_s22 + $0x78] sm:$0xe] }
  0xb1   : > { %v7803_v63 = vcombine.low %v2755_v2, %v2765_v16  ;;  %v908_v58 = vrot.slane %v906_v51, 4  ;;  %v911_v48 = vrot.slane %v909_v38, 5  ;;  %v915_v20 = vshll.u32 %v7554_v12, 16 }
  0xb2   : > { %v904_v9 = vsel %vm9170_vm5, %v899_v43, %v903_v1  ;;  %v919_v36 = vshrl.u32 %v7554_v12, 16  ;;  %v7624_v31 = vcombine.low %v7553_v60, %v7554_v12  ;;  %v7755_v47 = vrot.slane %v7739_v7, 9 }
  0xb3   : > { %3302 = vrot.lane.b32.xlu1 %v7803_v63, %s9043_s23  ;;  %3224 = vrot.lane.b32.xlu0 %v7788_v22, %s9044_s24  ;;  %v7639_v25 = vcombine.low %v894_v4, %v904_v9  ;;  %v3056_v15 = vrot.slane %v9620_v0, 5  ;;  %v917_v2 = vrot.slane %v915_v20, 5  ;;  %v3059_v51 = vrot.slane %v9628_v62, 5  ;;  %v7576_v9 = vld [vmem:[%s9091_s22 + $0x80] sm:$0x1] }
  0xb4   : > { %v921_v39 = vrot.slane %v919_v36, 4  ;;  %v2767_v43 = vshrl.u32 %v7710_v17, 16  ;;  %v2770_v1 = vshll.u32 %v7710_v17, 16  ;;  %v2776_v38 = vshll.u32 %v7711_v32, 16 }
  0xb5   : > { %v3057_v16 = vsel %vm9119_vm2, %v7755_v47, %v3056_v15  ;;  %v3058_v29 = vrot.slane %v3056_v15, 4  ;;  %v2780_v60 = vshrl.u32 %v7711_v32, 16  ;;  %v2786_v12 = vshll.u32 %v7712_v30, 16  ;;  %v1891_v15 = vld [vmem:[%s9091_s22] sm:$0xf] }
  0xb6   : > { %v2769_v63 = vrot.slane %v2767_v43, 4  ;;  %v7756_v7 = vrot.slane %v7740_v56, 9  ;;  %v2772_v62 = vrot.slane %v2770_v1, 5  ;;  %v2778_v22 = vrot.slane %v2776_v38, 5 }
  0xb7   : > { %1409 = vrot.lane.b32.xlu1 %v7639_v25, %s9045_s25  ;;  %1331 = vrot.lane.b32.xlu0 %v7624_v31, %s9043_s23  ;;  %v3060_v0 = vsel %vm9119_vm2, %v3058_v29, %v3059_v51  ;;  %v3063_v4 = vrot.slane %v7711_v32, 5  ;;  %v2782_v36 = vrot.slane %v2780_v60, 4  ;;  %v3066_v47 = vrot.slane %v7712_v30, 5 }
  0xb8   : > { %v7819_v17 = vcombine.low %v3057_v16, %v3060_v0  ;;  %v2773_v43 = vor.u32 %v2772_v62, %v2769_v63  ;;  %v912_v35 = vor.u32 %v911_v48, %v908_v58  ;;  %v2788_v5 = vrot.slane %v2786_v12, 5  ;;  %v9693_v63 = vpop.permute.xlu1 %1313  ;;  %v9698_v0 = vld [vmem:[%s9091_s22 + $0x7c] sm:$0xf] }
  0xb9   : > { %v3064_v56 = vsel %vm9119_vm2, %v7756_v7, %v3063_v4  ;;  %v3065_v25 = vrot.slane %v3063_v4, 4  ;;  %v2783_v31 = vor.u32 %v2782_v36, %v2778_v22  ;;  %v922_v21 = vor.u32 %v921_v39, %v917_v2  ;;  %v8920_v4 = vld [vmem:[%s9091_s22 + $0x4] sm:$0xf] }
  0xba   : > { %v925_v51 = vshll.u32 %v7576_v9, 16  ;;  %v2774_v32 = vrot.slane %v2773_v43, 4  ;;  %v913_v30 = vrot.slane %v912_v35, 4  ;;  %v1940_v29 = vshrl.u32 %v1891_v15, 16  ;;  %v2333_v35 = vld [vmem:[%s9091_s22 + $0x78] sm:$0xe] }
  0xbb   : > { %3382 = vrot.lane.b32.xlu1 %v7819_v17, %s9045_s25  ;;  %v3067_v16 = vsel %vm9119_vm2, %v3065_v25, %v3066_v47  ;;  %v2784_v1 = vrot.slane %v2783_v31, 4  ;;  %v923_v58 = vrot.slane %v922_v21, 4  ;;  %v1943_v7 = vshll.u32 %v1891_v15, 16  ;;  %v9709_v17 = vld [vmem:[%s9091_s22 + $0x80] sm:$0x1] }
  0xbc   : > { %v7820_v38 = vcombine.low %v3064_v56, %v3067_v16  ;;  %v927_v48 = vrot.slane %v925_v51, 5  ;;  %v2779_v39 = vsel %vm9170_vm5, %v2774_v32, %v2778_v22  ;;  %v918_v60 = vsel %vm9170_vm5, %v913_v30, %v917_v2  ;;  %v225_v2 = vld [vmem:[%s9091_s22 + $0x78] sm:$0xf]  ;;  %v226_v43 = vld [vmem:[%s9091_s22 + $0x7c] sm:$0xf]  ;;  %v9724_v19 = vpop.permute.xlu1 %3366 }
  0xbd   : > { %v1942_v12 = vrot.slane %v1940_v29, 4  ;;  %v2789_v62 = vsel %vm9170_vm5, %v2784_v1, %v2788_v5  ;;  %v1949_v9 = vshll.u32 %v8920_v4, 16  ;;  %v1955_v22 = vrot.slane %v1953_v27, 4  ;;  %v9714_v5 = vpop.permute.xlu0 %1315  ;;  %v247_v16 = vld [vmem:[%s9091_s22 + $0x80] sm:$0x1] }
  0xbe   : > { %v928_v21 = vsel %vm9170_vm5, %v923_v58, %v927_v48  ;;  %v7804_v36 = vcombine.low %v2779_v39, %v2789_v62  ;;  %v1945_v15 = vrot.slane %v1943_v7, 5  ;;  %v1961_v25 = vrot.slane %v1959_v28, 5  ;;  %v1894_v48 = vld [vmem:[%s9091_s22 + $0xc] sm:$0xf] }
  0xbf   : > { %3384 = vrot.lane.b32.xlu1 %v7820_v38, %s9045_s25  ;;  %v7640_v47 = vcombine.low %v918_v60, %v928_v21  ;;  %v1951_v56 = vrot.slane %v1949_v9, 5  ;;  %v7677_v27 = vrot.slane %v2333_v35, 9  ;;  %v2462_v51 = vrot.slane %v9698_v0, 5 }
  0xc0   : > { %3304 = vrot.lane.b32.xlu0 %v7804_v36, %s9043_s23  ;;  %v1946_v31 = vor.u32 %v1945_v15, %v1942_v12  ;;  %v2465_v32 = vrot.slane %v9709_v17, 5  ;;  %v497_v30 = vshrl.u32 %v225_v2, 16  ;;  %v500_v1 = vshll.u32 %v225_v2, 16 }
  0xc1   : > { %v1956_v29 = vor.u32 %v1955_v22, %v1951_v56  ;;  %v506_v38 = vshll.u32 %v226_v43, 16  ;;  %v510_v58 = vshrl.u32 %v226_v43, 16  ;;  %v2463_v28 = vsel %vm9119_vm2, %v7677_v27, %v2462_v51  ;;  %v3207_v15 = vpop.permute.xlu0 %3206 }
  0xc2   : > { %v1947_v39 = vrot.slane %v1946_v31, 4  ;;  %v2464_v60 = vrot.slane %v2462_v51, 4  ;;  %v499_v7 = vrot.slane %v497_v30, 4  ;;  %v502_v35 = vrot.slane %v500_v1, 5  ;;  %v8921_v1 = vld [vmem:[%s9091_s22 + $0x10] sm:$0xf] }
  0xc3   : > { %v1957_v12 = vrot.slane %v1956_v29, 4  ;;  %v508_v62 = vrot.slane %v506_v38, 5  ;;  %v512_v21 = vrot.slane %v510_v58, 4  ;;  %v516_v22 = vshll.u32 %v247_v16, 16  ;;  %v7555_v29 = vld [vmem:[%s9091_s22 + $0x84] sm:$0xf] }
  0xc4   : > { %1411 = vrot.lane.b32.xlu0 %v7640_v47, %s9045_s25  ;;  %v1952_v4 = vsel %vm9170_vm5, %v1947_v39, %v1951_v56  ;;  %v2466_v9 = vsel %vm9119_vm2, %v2464_v60, %v2465_v32  ;;  %v1964_v2 = vshrl.u32 %v1894_v48, 16  ;;  %v503_v27 = vor.u32 %v502_v35, %v499_v7  ;;  %v8922_v60 = vld [vmem:[%s9091_s22 + $0xc] sm:$0xf]  ;;  %v8923_v7 = vld [vmem:[%s9091_s22 + $0x10] sm:$0xf] }
  0xc5   : > { %v1962_v36 = vsel %vm9170_vm5, %v1957_v12, %v1961_v25  ;;  %v7789_v43 = vcombine.low %v2463_v28, %v2466_v9  ;;  %v513_v31 = vor.u32 %v512_v21, %v508_v62  ;;  %v518_v47 = vrot.slane %v516_v22, 5  ;;  %v7556_v35 = vld [vmem:[%s9091_s22 + $0x88] sm:$0xf] }
  0xc6   : > { %v7763_v51 = vcombine.low %v1952_v4, %v1962_v36  ;;  %v1966_v30 = vrot.slane %v1964_v2, 4  ;;  %v1967_v56 = vshll.u32 %v1894_v48, 16  ;;  %v504_v32 = vrot.slane %v503_v27, 4  ;;  %v1204_v48 = vpop.permute.xlu1 %1203 }
  0xc7   : > { %3226 = vrot.lane.b32.xlu1 %v7789_v43, %s9044_s24  ;;  %v514_v16 = vrot.slane %v513_v31, 4  ;;  %v1973_v38 = vshll.u32 %v8921_v1, 16  ;;  %v1979_v25 = vrot.slane %v1977_v54, 4  ;;  %v7584_v12 = vcombine.low %v8922_v60, %v8923_v7  ;;  %v227_v54 = vld [vmem:[%s9091_s22 + $0x84] sm:$0xf] }
  0xc8   : > { %v3400_v58 = vsel %vm1425_vm6, %v7763_v51, %v3207_v15  ;;  %v1969_v28 = vrot.slane %v1967_v56, 5  ;;  %v509_v21 = vsel %vm9170_vm5, %v504_v32, %v508_v62  ;;  %v930_v44 = vshrl.u32 %v7555_v29, 16  ;;  %v228_v62 = vld [vmem:[%s9091_s22 + $0x88] sm:$0xf]  ;;  %v3209_v56 = vpop.permute.xlu0 %3208 }
  0xc9   : > { %v519_v4 = vsel %vm9170_vm5, %v514_v16, %v518_v47  ;;  %v1975_v9 = vrot.slane %v1973_v38, 5  ;;  %v1985_v36 = vrot.slane %v1983_v40, 5  ;;  %v933_v15 = vshll.u32 %v7555_v29, 16 }
  0xca   : > { %v7609_v22 = vcombine.low %v509_v21, %v519_v4  ;;  %v1970_v2 = vor.u32 %v1969_v28, %v1966_v30  ;;  %v9753_v27 = vsel %vm1425_vm6, %v7584_v12, %v1204_v48  ;;  %v939_v31 = vshll.u32 %v7556_v35, 16  ;;  %v248_v30 = vld [vmem:[%s9091_s22 + $0x8c] sm:$0x1]  ;;  %v7713_v48 = vld [vmem:[%s9091_s22 + $0x84] sm:$0xf] }
  0xcb   : > { %v1980_v43 = vor.u32 %v1979_v25, %v1975_v9  ;;  %v943_v51 = vshrl.u32 %v7556_v35, 16  ;;  %v9757_v32 = vrot.slane %v930_v44, 4  ;;  %v7625_v16 = vcombine.low %v7555_v29, %v7556_v35  ;;  %v3287_v29 = vpop.permute.xlu1 %3286 }
  0xcc   : > { %1221 = vrot.lane.b32.xlu0 %v7609_v22, %s9044_s24  ;;  %v1971_v47 = vrot.slane %v1970_v2, 4  ;;  %v521_v1 = vshrl.u32 %v227_v54, 16  ;;  %v9760_v40 = vrot.slane %v933_v15, 5  ;;  %v9762_v38 = vrot.slane %v939_v31, 5  ;;  %v8924_v31 = vld [vmem:[%s9091_s22] sm:$0xf] }
  0xcd   : > { %v1981_v45 = vrot.slane %v1980_v43, 4  ;;  %v524_v25 = vshll.u32 %v227_v54, 16  ;;  %1333 = vrot.lane.b32.xlu1 %v7625_v16, %s9043_s23  ;;  %v530_v7 = vshll.u32 %v228_v62, 16  ;;  %v534_v12 = vshrl.u32 %v228_v62, 16  ;;  %v9773_v54 = vld [vmem:[%s9091_s22 + $0x88] sm:$0xf] }
  0xce   : > { %v1976_v28 = vsel %vm9170_vm5, %v1971_v47, %v1975_v9  ;;  %v523_v60 = vrot.slane %v521_v1, 4  ;;  %v9770_v21 = vrot.slane %v943_v51, 4  ;;  %v540_v44 = vshll.u32 %v248_v30, 16  ;;  %v8925_v62 = vld [vmem:[%s9091_s22 + $0x4] sm:$0xf]  ;;  %v1202_v1 = vpop.permute.xlu0 %1201 }
  0xcf   : > { %v1986_v35 = vsel %vm9170_vm5, %v1981_v45, %v1985_v36  ;;  %v526_v4 = vrot.slane %v524_v25, 5  ;;  %v532_v22 = vrot.slane %v530_v7, 5  ;;  %v536_v2 = vrot.slane %v534_v12, 4  ;;  %v9779_v16 = vld [vmem:[%s9091_s22 + $0x8c] sm:$0x1] }
  0xd0   : > { %v7764_v9 = vcombine.low %v1976_v28, %v1986_v35  ;;  %v3447_v43 = vsel %vm1474_vm7, %v3400_v58, %v3287_v29  ;;  %v7583_v47 = vcombine.low %v8924_v31, %v8925_v62  ;;  %v2791_v36 = vshrl.u32 %v7713_v48, 16  ;;  %v9783_v28 = vld [vmem:[%s9091_s22 + $0x88] sm:$0xf]  ;;  %v2334_v29 = vld [vmem:[%s9091_s22 + $0x84] sm:$0xe] }
  0xd1   : > { %v527_v15 = vor.u32 %v526_v4, %v523_v60  ;;  %v537_v51 = vor.u32 %v536_v2, %v532_v22  ;;  %v542_v30 = vrot.slane %v540_v44, 5  ;;  %v2794_v45 = vshll.u32 %v7713_v48, 16  ;;  %v9790_v44 = vld [vmem:[%s9091_s22 + $0x8c] sm:$0x1] }
  0xd2   : > { %v2800_v25 = vshll.u32 %v9773_v54, 16  ;;  %v3403_v60 = vsel %vm1425_vm6, %v7764_v9, %v3209_v56  ;;  %v2793_v58 = vrot.slane %v2791_v36, 4  ;;  %v2804_v12 = vshrl.u32 %v9773_v54, 16 }
  0xd3   : > { %v528_v7 = vrot.slane %v527_v15, 4  ;;  %v538_v35 = vrot.slane %v537_v51, 4  ;;  %v2796_v4 = vrot.slane %v2794_v45, 5  ;;  %v2810_v2 = vshll.u32 %v9779_v16, 16  ;;  %v1394_v45 = vpop.permute.xlu1 %1393 }
  0xd4   : > { %v2802_v31 = vrot.slane %v2800_v25, 5  ;;  %v1428_v62 = vsel %vm1425_vm6, %v7583_v47, %v1202_v1  ;;  %v2806_v39 = vrot.slane %v2804_v12, 4  ;;  %v2217_v56 = vshrl.u32 %v9783_v28, 16  ;;  %v3289_v1 = vpop.permute.xlu0 %3288  ;;  %v7557_v12 = vld [vmem:[%s9091_s22 + $0x90] sm:$0xf] }
  0xd5   : > { %v533_v48 = vsel %vm9170_vm5, %v528_v7, %v532_v22  ;;  %v543_v9 = vsel %vm9170_vm5, %v538_v35, %v542_v30  ;;  %v2797_v15 = vor.u32 %v2796_v4, %v2793_v58  ;;  %v2812_v36 = vrot.slane %v2810_v2, 5  ;;  %v7577_v22 = vld [vmem:[%s9091_s22 + $0x8c] sm:$0x1] }
  0xd6   : > { %v7678_v51 = vrot.slane %v2334_v29, 9  ;;  %v7610_v25 = vcombine.low %v533_v48, %v543_v9  ;;  %v2807_v14 = vor.u32 %v2806_v39, %v2802_v31  ;;  %v2469_v20 = vrot.slane %v9783_v28, 5  ;;  %v9816_v48 = vld [vmem:[%s9091_s22 + $0x94] sm:$0xf] }
  0xd7   : > { %v2472_v57 = vrot.slane %v9790_v44, 5  ;;  %v2798_v7 = vrot.slane %v2797_v15, 4  ;;  %v2223_v47 = vshll.u32 %v9790_v44, 16  ;;  %v3479_v29 = vsel %vm1507_vm8, %v3447_v43, %v9724_v19 }
  0xd8   : > { %1223 = vrot.lane.b32.xlu0 %v7610_v25, %s9044_s24  ;;  %v2808_v30 = vrot.slane %v2807_v14, 4  ;;  %v2470_v58 = vsel %vm9119_vm2, %v7678_v51, %v2469_v20  ;;  %v2471_v39 = vrot.slane %v2469_v20, 4  ;;  %8488 = vmatprep.mubr.msk.bf16.mxu1 %vm1556_vm9, %v3479_v29  ;;  %v936_v4 = vor.u32 %v9760_v40, %v9757_v32  ;;  %v3369_v40 = vpop.permute.xlu1 %3368 }
  0xd9   : > { %v2803_v35 = vsel %vm9170_vm5, %v2798_v7, %v2802_v31  ;;  %v946_v2 = vor.u32 %v9770_v21, %v9762_v38  ;;  %v949_v14 = vshll.u32 %v7577_v22, 16  ;;  %v954_v43 = vshrl.u32 %v7557_v12, 16  ;;  %v7741_v7 = vld [vmem:[%s9091_s22 + $0x84] sm:$0xe] }
  0xda   : > { %v2813_v20 = vsel %vm9170_vm5, %v2808_v30, %v2812_v36  ;;  %v2473_v19 = vsel %vm9119_vm2, %v2471_v39, %v2472_v57  ;;  %v957_v31 = vshll.u32 %v7557_v12, 16  ;;  %v937_v51 = vrot.slane %v936_v4, 4  ;;  %v7716_v39 = vld [vmem:[%s9091_s22 + $0x90] sm:$0xf] }
  0xdb   : > { %v7805_v9 = vcombine.low %v2803_v35, %v2813_v20  ;;  %v7790_v15 = vcombine.low %v2470_v58, %v2473_v19  ;;  %v947_v32 = vrot.slane %v946_v2, 4  ;;  %v3449_v21 = vsel %vm1474_vm7, %v3403_v60, %v3289_v1  ;;  %v1396_v58 = vpop.permute.xlu0 %1395 }
  0xdc   : > { %v951_v25 = vrot.slane %v949_v14, 5  ;;  %v9823_v22 = vrot.slane %v954_v43, 4  ;;  %v963_v36 = vshll.u32 %v9816_v48, 16  ;;  %v942_v57 = vsel %vm9170_vm5, %v937_v51, %v9762_v38  ;;  %v7717_v38 = vld [vmem:[%s9091_s22 + $0x94] sm:$0xf] }
  0xdd   : > { %3306 = vrot.lane.b32.xlu1 %v7805_v9, %s9043_s23  ;;  %3228 = vrot.lane.b32.xlu0 %v7790_v15, %s9044_s24  ;;  %v9832_v30 = vrot.slane %v957_v31, 5  ;;  %v7626_v60 = vcombine.low %v7557_v12, %v9816_v48  ;;  %v1476_v1 = vsel %vm1474_vm7, %v1428_v62, %v9693_v63  ;;  %v967_v35 = vshrl.u32 %v9816_v48, 16  ;;  %v9845_v14 = vld [vmem:[%s9091_s22 + $0x98] sm:$0x1] }
  0xde   : > { %v952_v29 = vsel %vm9170_vm5, %v947_v32, %v951_v25  ;;  %v1509_v4 = vsel %vm1507_vm8, %v1476_v1, %v1394_v45  ;;  %v3481_v2 = vsel %vm1507_vm8, %v3449_v21, %v3369_v40  ;;  %v9847_v12 = vrot.slane %v963_v36, 5  ;;  %v1897_v48 = vld [vmem:[%s9091_s22 + $0x18] sm:$0xf]  ;;  %v8926_v1 = vld [vmem:[%s9091_s22 + $0x1c] sm:$0xf] }
  0xdf   : > { %v7641_v20 = vcombine.low %v942_v57, %v952_v29  ;;  %8452 = vmatprep.mubr.msk.bf16.mxu0 %vm1556_vm9, %v1509_v4  ;;  %v1478_v63 = vsel %vm1474_vm7, %v9753_v27, %v9714_v5  ;;  %v7757_v62 = vrot.slane %v7741_v7, 9  ;;  %8489 = vmatmul.mubr.msk.bf16.vlgmr.msra.gmra.mrb[0].mxu1 %vm1556_vm9, %v3481_v2  ;;  %v3070_v19 = vrot.slane %v9773_v54, 5  ;;  %v7742_v29 = vld [vmem:[%s9091_s22 + $0x90] sm:$0xe]  ;;  %v1206_v52 = vpop.permute.xlu0 %1205 }
  0xe0   : > { %v1511_v45 = vsel %vm1507_vm8, %v1478_v63, %v1396_v58  ;;  %v3073_v43 = vrot.slane %v9779_v16, 5  ;;  %v2815_v31 = vshrl.u32 %v7716_v39, 16  ;;  %v2818_v9 = vshll.u32 %v7716_v39, 16  ;;  %v3211_v39 = vpop.permute.xlu1 %3210 }
  0xe1   : > { %1413 = vrot.lane.b32.xlu1 %v7641_v20, %s9045_s25  ;;  %1335 = vrot.lane.b32.xlu0 %v7626_v60, %s9043_s23  ;;  %v2824_v15 = vshll.u32 %v7717_v38, 16  ;;  %v2828_v51 = vshrl.u32 %v7717_v38, 16  ;;  %v2834_v5 = vshll.u32 %v9845_v14, 16  ;;  %v3071_v27 = vsel %vm9119_vm2, %v7757_v62, %v3070_v19 }
  0xe2   : > { %v3072_v32 = vrot.slane %v3070_v19, 4  ;;  %v2817_v40 = vrot.slane %v2815_v31, 4  ;;  %8453 = vmatmul.mubr.msk.bf16.vlgmr.msra.gmra.mrb[0].mxu0 %vm1556_vm9, %v1511_v45  ;;  %v1988_v54 = vshrl.u32 %v1897_v48, 16  ;;  %v2820_v16 = vrot.slane %v2818_v9, 5  ;;  %v8927_v31 = vld [vmem:[%s9091_s22 + $0x18] sm:$0xf] }
  0xe3   : > { %v2826_v21 = vrot.slane %v2824_v15, 5  ;;  %v2830_v25 = vrot.slane %v2828_v51, 4  ;;  %v2836_v36 = vrot.slane %v2834_v5, 5  ;;  %v1991_v60 = vshll.u32 %v1897_v48, 16  ;;  %v8928_v9 = vld [vmem:[%s9091_s22 + $0x1c] sm:$0xf] }
  0xe4   : > { %v3074_v7 = vsel %vm9119_vm2, %v3072_v32, %v3073_v43  ;;  %v1990_v57 = vrot.slane %v1988_v54, 4  ;;  %v1997_v58 = vshll.u32 %v8926_v1, 16  ;;  %v2821_v2 = vor.u32 %v2820_v16, %v2817_v40 }
  0xe5   : > { %v7821_v4 = vcombine.low %v3071_v27, %v3074_v7  ;;  %v2831_v20 = vor.u32 %v2830_v25, %v2826_v21  ;;  %v2003_v63 = vrot.slane %v2001_v61, 4  ;;  %v969_v62 = vrot.slane %v967_v35, 4  ;;  %v7578_v35 = vld [vmem:[%s9091_s22 + $0x98] sm:$0x1] }
  0xe6   : > { %v1993_v45 = vrot.slane %v1991_v60, 5  ;;  %v1999_v19 = vrot.slane %v1997_v58, 5  ;;  %v7585_v15 = vcombine.low %v8927_v31, %v8928_v9  ;;  %v2822_v48 = vrot.slane %v2821_v2, 4  ;;  %v1318_v60 = vpop.permute.xlu1 %1317  ;;  %v2335_v58 = vld [vmem:[%s9091_s22 + $0x90] sm:$0xe] }
  0xe7   : > { %3386 = vrot.lane.b32.xlu1 %v7821_v4, %s9045_s25  ;;  %v2832_v43 = vrot.slane %v2831_v20, 4  ;;  %v7758_v51 = vrot.slane %v7742_v29, 9  ;;  %v3077_v5 = vrot.slane %v7717_v38, 5  ;;  %v2009_v40 = vrot.slane %v2007_v37, 5  ;;  %v9896_v2 = vld [vmem:[%s9091_s22 + $0x94] sm:$0xf] }
  0xe8   : > { %v1994_v32 = vor.u32 %v1993_v45, %v1990_v57  ;;  %v2004_v27 = vor.u32 %v2003_v63, %v1999_v19  ;;  %v3080_v61 = vrot.slane %v9845_v14, 5  ;;  %v2827_v54 = vsel %vm9170_vm5, %v2822_v48, %v2826_v21  ;;  %v9902_v31 = vld [vmem:[%s9091_s22 + $0x98] sm:$0x1]  ;;  %v229_v9 = vld [vmem:[%s9091_s22 + $0x90] sm:$0xf] }
  0xe9   : > { %v2837_v16 = vsel %vm9170_vm5, %v2832_v43, %v2836_v36  ;;  %v3078_v25 = vsel %vm9119_vm2, %v7758_v51, %v3077_v5  ;;  %v3079_v38 = vrot.slane %v3077_v5, 4  ;;  %v960_v37 = vor.u32 %v9832_v30, %v9823_v22  ;;  %v8930_v48 = vld [vmem:[%s9091_s22 + $0x28] sm:$0xf] }
  0xea   : > { %v7806_v7 = vcombine.low %v2827_v54, %v2837_v16  ;;  %v1995_v57 = vrot.slane %v1994_v32, 4  ;;  %v2005_v53 = vrot.slane %v2004_v27, 4  ;;  %v1434_v14 = vsel %vm1425_vm6, %v7585_v15, %v1206_v52  ;;  %v8929_v15 = vld [vmem:[%s9091_s22 + $0x24] sm:$0xf]  ;;  %v230_v32 = vld [vmem:[%s9091_s22 + $0x94] sm:$0xf]  ;;  %v1208_v52 = vpop.permute.xlu0 %1207 }
  0xeb   : > { %v3081_v21 = vsel %vm9119_vm2, %v3079_v38, %v3080_v61  ;;  %v970_v36 = vor.u32 %v969_v62, %v9847_v12  ;;  %v973_v1 = vshll.u32 %v7578_v35, 16  ;;  %v961_v4 = vrot.slane %v960_v37, 4  ;;  %v249_v54 = vld [vmem:[%s9091_s22 + $0x98] sm:$0x1] }
  0xec   : > { %3308 = vrot.lane.b32.xlu0 %v7806_v7, %s9043_s23  ;;  %v2000_v29 = vsel %vm9170_vm5, %v1995_v57, %v1999_v19  ;;  %v2010_v22 = vsel %vm9170_vm5, %v2005_v53, %v2009_v40  ;;  %v7822_v30 = vcombine.low %v3078_v25, %v3081_v21  ;;  %v9899_v45 = vsel %vm1474_vm7, %v1434_v14, %v1318_v60  ;;  %v1900_v7 = vld [vmem:[%s9091_s22 + $0x24] sm:$0xf] }
  0xed   : > { %v7765_v20 = vcombine.low %v2000_v29, %v2010_v22  ;;  %v971_v63 = vrot.slane %v970_v36, 4  ;;  %v975_v62 = vrot.slane %v973_v1, 5  ;;  %v966_v19 = vsel %vm9170_vm5, %v961_v4, %v9847_v12  ;;  %v3291_v22 = vpop.permute.xlu1 %3290  ;;  %v7559_v4 = vld [vmem:[%s9091_s22 + $0x9c] sm:$0xf] }
  0xee   : > { %3388 = vrot.lane.b32.xlu1 %v7822_v30, %s9045_s25  ;;  %v7586_v43 = vcombine.low %v8929_v15, %v8930_v48  ;;  %v2241_v51 = vshrl.u32 %v9896_v2, 16  ;;  %v7679_v5 = vrot.slane %v2335_v58, 9  ;;  %v2247_v61 = vshll.u32 %v9902_v31, 16 }
  0xef   : > { %v3406_v27 = vsel %vm1425_vm6, %v7765_v20, %v3211_v39  ;;  %v976_v40 = vsel %vm9170_vm5, %v971_v63, %v975_v62  ;;  %v2476_v35 = vrot.slane %v9896_v2, 5  ;;  %v2479_v16 = vrot.slane %v9902_v31, 5 }
  0xf0   : > { %v7642_v12 = vcombine.low %v966_v19, %v976_v40  ;;  %v545_v25 = vshrl.u32 %v229_v9, 16  ;;  %v548_v38 = vshll.u32 %v229_v9, 16  ;;  %v554_v53 = vshll.u32 %v230_v32, 16  ;;  %v7560_v19 = vld [vmem:[%s9091_s22 + $0xa0] sm:$0xf] }
  0xf1   : > { %v2477_v57 = vsel %vm9119_vm2, %v7679_v5, %v2476_v35  ;;  %v2478_v39 = vrot.slane %v2476_v35, 4  ;;  %v558_v37 = vshrl.u32 %v230_v32, 16  ;;  %v9925_v60 = vsel %vm1425_vm6, %v7586_v43, %v1208_v52  ;;  %v8931_v43 = vld [vmem:[%s9091_s22 + $0x28] sm:$0xf] }
  0xf2   : > { %1415 = vrot.lane.b32.xlu0 %v7642_v12, %s9045_s25  ;;  %v547_v14 = vrot.slane %v545_v25, 4  ;;  %v550_v21 = vrot.slane %v548_v38, 5  ;;  %v564_v36 = vshll.u32 %v249_v54, 16  ;;  %v556_v58 = vrot.slane %v554_v53, 5  ;;  %v3213_v25 = vpop.permute.xlu0 %3212  ;;  %v231_v53 = vld [vmem:[%s9091_s22 + $0x9c] sm:$0xf] }
  0xf3   : > { %v2480_v1 = vsel %vm9119_vm2, %v2478_v39, %v2479_v16  ;;  %v560_v29 = vrot.slane %v558_v37, 4  ;;  %v2012_v30 = vshrl.u32 %v1900_v7, 16  ;;  %v2015_v9 = vshll.u32 %v1900_v7, 16 }
  0xf4   : > { %v7791_v20 = vcombine.low %v2477_v57, %v2480_v1  ;;  %v551_v63 = vor.u32 %v550_v21, %v547_v14  ;;  %v566_v62 = vrot.slane %v564_v36, 5  ;;  %v2021_v5 = vshll.u32 %v8931_v43, 16  ;;  %v250_v1 = vld [vmem:[%s9091_s22 + $0xa4] sm:$0x1] }
  0xf5   : > { %v561_v15 = vor.u32 %v560_v29, %v556_v58  ;;  %v2014_v48 = vrot.slane %v2012_v30, 4  ;;  %v2027_v32 = vrot.slane %v2025_v23, 4  ;;  %v9936_v52 = vsel %vm1474_vm7, %v3406_v27, %v3291_v22  ;;  %v232_v27 = vld [vmem:[%s9091_s22 + $0xa0] sm:$0xf]  ;;  %v1398_v29 = vpop.permute.xlu1 %1397 }
  0xf6   : > { %3230 = vrot.lane.b32.xlu1 %v7791_v20, %s9044_s24  ;;  %v552_v40 = vrot.slane %v551_v63, 4  ;;  %v2017_v35 = vrot.slane %v2015_v9, 5  ;;  %v978_v54 = vshrl.u32 %v7559_v4, 16  ;;  %v2023_v16 = vrot.slane %v2021_v5, 5  ;;  %v7719_v5 = vld [vmem:[%s9091_s22 + $0x9c] sm:$0xf] }
  0xf7   : > { %v562_v12 = vrot.slane %v561_v15, 4  ;;  %v981_v38 = vshll.u32 %v7559_v4, 16  ;;  %v987_v7 = vshll.u32 %v7560_v19, 16  ;;  %v2033_v23 = vrot.slane %v2031_v3, 5 }
  0xf8   : > { %v557_v10 = vsel %vm9170_vm5, %v552_v40, %v556_v58  ;;  %v2018_v57 = vor.u32 %v2017_v35, %v2014_v48  ;;  %v9942_v39 = vrot.slane %v978_v54, 4  ;;  %v2028_v14 = vor.u32 %v2027_v32, %v2023_v16  ;;  %v9961_v32 = vld [vmem:[%s9091_s22 + $0xa0] sm:$0xf]  ;;  %v1320_v54 = vpop.permute.xlu0 %1319 }
  0xf9   : > { %v567_v37 = vsel %vm9170_vm5, %v562_v12, %v566_v62  ;;  %v9948_v21 = vrot.slane %v981_v38, 5  ;;  %v991_v36 = vshrl.u32 %v7560_v19, 16  ;;  %v9951_v30 = vrot.slane %v987_v7, 5  ;;  %v9966_v12 = vld [vmem:[%s9091_s22 + $0xa4] sm:$0x1] }
  0xfa   : > { %v7611_v58 = vcombine.low %v557_v10, %v567_v37  ;;  %v2019_v22 = vrot.slane %v2018_v57, 4  ;;  %v7627_v18 = vcombine.low %v7559_v4, %v7560_v19  ;;  %v2029_v3 = vrot.slane %v2028_v14, 4 }
  0xfb   : > { %v569_v20 = vshrl.u32 %v231_v53, 16  ;;  %v572_v63 = vshll.u32 %v231_v53, 16  ;;  %v578_v9 = vshll.u32 %v232_v27, 16  ;;  %v582_v15 = vshrl.u32 %v232_v27, 16 }
  0xfc   : > { %1225 = vrot.lane.b32.xlu0 %v7611_v58, %s9044_s24  ;;  %v2024_v62 = vsel %vm9170_vm5, %v2019_v22, %v2023_v16  ;;  %1337 = vrot.lane.b32.xlu1 %v7627_v18, %s9043_s23  ;;  %v588_v48 = vshll.u32 %v250_v1, 16  ;;  %v1513_v43 = vsel %vm1507_vm8, %v9899_v45, %v1398_v29  ;;  %v2034_v4 = vsel %vm9170_vm5, %v2029_v3, %v2033_v23  ;;  %v9977_v29 = vld [vmem:[%s9091_s22 + $0xa0] sm:$0xf] }
  0xfd   : > { %v571_v19 = vrot.slane %v569_v20, 4  ;;  %v574_v40 = vrot.slane %v572_v63, 5  ;;  %v580_v35 = vrot.slane %v578_v9, 5  ;;  %8456 = vmatprep.mubr.msk.bf16.mxu0 %vm1556_vm9, %v1513_v43  ;;  %v7766_v16 = vcombine.low %v2024_v62, %v2034_v4  ;;  %v9981_v20 = vld [vmem:[%s9091_s22 + $0xa4] sm:$0x1] }
  0xfe   : > { %v993_v38 = vrot.slane %v991_v36, 4  ;;  %v584_v7 = vrot.slane %v582_v15, 4  ;;  %v590_v45 = vrot.slane %v588_v48, 5  ;;  %v2839_v57 = vshrl.u32 %v7719_v5, 16  ;;  %v2336_v36 = vld [vmem:[%s9091_s22 + $0x9c] sm:$0xe]  ;;  %v3371_v15 = vpop.permute.xlu1 %3370 }
  0xff   : > { %v575_v10 = vor.u32 %v574_v40, %v571_v19  ;;  %v2842_v53 = vshll.u32 %v7719_v5, 16  ;;  %v2848_v23 = vshll.u32 %v9961_v32, 16  ;;  %v9972_v37 = vsel %vm1474_vm7, %v9925_v60, %v1320_v54  ;;  %v3293_v19 = vpop.permute.xlu0 %3292 }
 0x100   : > { %v585_v27 = vor.u32 %v584_v7, %v580_v35  ;;  %v2852_v14 = vshrl.u32 %v9961_v32, 16  ;;  %v2858_v1 = vshll.u32 %v9966_v12, 16  ;;  %v2841_v22 = vrot.slane %v2839_v57, 4 }
 0x101   : > { %v576_v58 = vrot.slane %v575_v10, 4  ;;  %v2844_v18 = vrot.slane %v2842_v53, 5  ;;  %v2850_v3 = vrot.slane %v2848_v23, 5  ;;  %v3409_v63 = vsel %vm1425_vm6, %v7766_v16, %v3213_v25  ;;  %v7579_v16 = vld [vmem:[%s9091_s22 + $0xa4] sm:$0x1] }
 0x102   : > { %v586_v9 = vrot.slane %v585_v27, 4  ;;  %v2854_v60 = vrot.slane %v2852_v14, 4  ;;  %v2860_v62 = vrot.slane %v2858_v1, 5  ;;  %v2265_v5 = vshrl.u32 %v9977_v29, 16  ;;  %v7561_v10 = vld [vmem:[%s9091_s22 + $0xa8] sm:$0xf] }
 0x103   : > { %v581_v48 = vsel %vm9170_vm5, %v576_v58, %v580_v35  ;;  %v2845_v43 = vor.u32 %v2844_v18, %v2841_v22  ;;  %v7680_v4 = vrot.slane %v2336_v36, 9  ;;  %v2483_v7 = vrot.slane %v9977_v29, 5 }
 0x104   : > { %v591_v40 = vsel %vm9170_vm5, %v586_v9, %v590_v45  ;;  %v2855_v54 = vor.u32 %v2854_v60, %v2850_v3  ;;  %v2486_v25 = vrot.slane %v9981_v20, 5  ;;  %v2271_v35 = vshll.u32 %v9981_v20, 16 }
 0x105   : > { %v7612_v57 = vcombine.low %v581_v48, %v591_v40  ;;  %v2846_v53 = vrot.slane %v2845_v43, 4  ;;  %v3483_v23 = vsel %vm1507_vm8, %v9936_v52, %v3371_v15  ;;  %v2484_v14 = vsel %vm9119_vm2, %v7680_v4, %v2483_v7  ;;  %v7562_v52 = vld [vmem:[%s9091_s22 + $0xac] sm:$0xf]  ;;  %v3373_v15 = vpop.permute.xlu1 %3372  ;;  %v7743_v40 = vld [vmem:[%s9091_s22 + $0x9c] sm:$0xe] }
 0x106   : > { %v2856_v27 = vrot.slane %v2855_v54, 4  ;;  %v2485_v45 = vrot.slane %v2483_v7, 4  ;;  %v984_v1 = vor.u32 %v9948_v21, %v9942_v39  ;;  %8492 = vmatprep.mubr.msk.bf16.mxu1 %vm1556_vm9, %v3483_v23  ;;  %v994_v58 = vor.u32 %v993_v38, %v9951_v30  ;;  %v1400_v38 = vpop.permute.xlu0 %1399 }
 0x107   : > { %1227 = vrot.lane.b32.xlu0 %v7612_v57, %s9044_s24  ;;  %v2851_v36 = vsel %vm9170_vm5, %v2846_v53, %v2850_v3  ;;  %v997_v22 = vshll.u32 %v7579_v16, 16  ;;  %v1002_v18 = vshrl.u32 %v7561_v10, 16  ;;  %v1005_v60 = vshll.u32 %v7561_v10, 16  ;;  %v7722_v16 = vld [vmem:[%s9091_s22 + $0xa8] sm:$0xf] }
 0x108   : > { %v2861_v9 = vsel %vm9170_vm5, %v2856_v27, %v2860_v62  ;;  %v2487_v39 = vsel %vm9119_vm2, %v2485_v45, %v2486_v25  ;;  %v985_v21 = vrot.slane %v984_v1, 4  ;;  %v995_v4 = vrot.slane %v994_v58, 4  ;;  %v10027_v27 = vld [vmem:[%s9091_s22 + $0xb0] sm:$0x1] }
 0x109   : > { %v7807_v48 = vcombine.low %v2851_v36, %v2861_v9  ;;  %v7792_v43 = vcombine.low %v2484_v14, %v2487_v39  ;;  %v999_v3 = vrot.slane %v997_v22, 5  ;;  %v3453_v54 = vsel %vm1474_vm7, %v3409_v63, %v3293_v19  ;;  %v7723_v19 = vld [vmem:[%s9091_s22 + $0xac] sm:$0xf]  ;;  %v1903_v36 = vld [vmem:[%s9091_s22 + $0x30] sm:$0xf] }
 0x10a   : > { %v990_v62 = vsel %vm9170_vm5, %v985_v21, %v9951_v30  ;;  %v10015_v7 = vrot.slane %v1002_v18, 4  ;;  %v1011_v25 = vshll.u32 %v7562_v52, 16  ;;  %v10022_v53 = vrot.slane %v1005_v60, 5  ;;  %v1210_v34 = vpop.permute.xlu0 %1209 }
 0x10b   : > { %3310 = vrot.lane.b32.xlu1 %v7807_v48, %s9043_s23  ;;  %3232 = vrot.lane.b32.xlu0 %v7792_v43, %s9044_s24  ;;  %v1000_v57 = vsel %vm9170_vm5, %v995_v4, %v999_v3  ;;  %v7628_v23 = vcombine.low %v7561_v10, %v7562_v52  ;;  %v3485_v63 = vsel %vm1507_vm8, %v3453_v54, %v3373_v15  ;;  %v1015_v14 = vshrl.u32 %v7562_v52, 16  ;;  %v8932_v54 = vld [vmem:[%s9091_s22 + $0x34] sm:$0xf] }
 0x10c   : > { %v7643_v30 = vcombine.low %v990_v62, %v1000_v57  ;;  %v1515_v45 = vsel %vm1507_vm8, %v9972_v37, %v1400_v38  ;;  %v7759_v1 = vrot.slane %v7743_v40, 9  ;;  %8493 = vmatmul.mubr.msk.bf16.gmra.mrb[4].mxu1 %vm1556_vm9, %v3485_v63  ;;  %v10033_v58 = vrot.slane %v1011_v25, 5  ;;  %v3215_v25 = vpop.permute.xlu1 %3214 }
 0x10d   : > { %v3084_v22 = vrot.slane %v9961_v32, 5  ;;  %v3087_v10 = vrot.slane %v9966_v12, 5  ;;  %v2863_v18 = vshrl.u32 %v7722_v16, 16  ;;  %8457 = vmatmul.mubr.msk.bf16.gmra.mrb[4].mxu0 %vm1556_vm9, %v1515_v45  ;;  %v2866_v9 = vshll.u32 %v7722_v16, 16  ;;  %v7744_v16 = vld [vmem:[%s9091_s22 + $0xa8] sm:$0xe] }
 0x10e   : > { %v2872_v39 = vshll.u32 %v7723_v19, 16  ;;  %v2876_v52 = vshrl.u32 %v7723_v19, 16  ;;  %v2882_v21 = vshll.u32 %v10027_v27, 16  ;;  %v2036_v12 = vshrl.u32 %v1903_v36, 16 }
 0x10f   : > { %1417 = vrot.lane.b32.xlu1 %v7643_v30, %s9045_s25  ;;  %1339 = vrot.lane.b32.xlu0 %v7628_v23, %s9043_s23  ;;  %v3085_v37 = vsel %vm9119_vm2, %v7759_v1, %v3084_v22  ;;  %v3086_v32 = vrot.slane %v3084_v22, 4  ;;  %v2865_v60 = vrot.slane %v2863_v18, 4  ;;  %v2868_v15 = vrot.slane %v2866_v9, 5  ;;  %v8933_v18 = vld [vmem:[%s9091_s22 + $0x30] sm:$0xf] }
 0x110   : > { %v2874_v48 = vrot.slane %v2872_v39, 5  ;;  %v2878_v43 = vrot.slane %v2876_v52, 4  ;;  %v2884_v4 = vrot.slane %v2882_v21, 5  ;;  %v2038_v38 = vrot.slane %v2036_v12, 4  ;;  %v8934_v9 = vld [vmem:[%s9091_s22 + $0x34] sm:$0xf] }
 0x111   : > { %v3088_v3 = vsel %vm9119_vm2, %v3086_v32, %v3087_v10  ;;  %v2039_v40 = vshll.u32 %v1903_v36, 16  ;;  %v2045_v62 = vshll.u32 %v8932_v54, 16  ;;  %v2869_v23 = vor.u32 %v2868_v15, %v2865_v60 }
 0x112   : > { %v7823_v57 = vcombine.low %v3085_v37, %v3088_v3  ;;  %v2879_v63 = vor.u32 %v2878_v43, %v2874_v48  ;;  %v2051_v30 = vrot.slane %v2049_v11, 4  ;;  %v1017_v45 = vrot.slane %v1015_v14, 4  ;;  %v7580_v14 = vld [vmem:[%s9091_s22 + $0xb0] sm:$0x1] }
 0x113   : > { %v2041_v1 = vrot.slane %v2039_v40, 5  ;;  %v2047_v22 = vrot.slane %v2045_v62, 5  ;;  %v7587_v39 = vcombine.low %v8933_v18, %v8934_v9  ;;  %v2870_v36 = vrot.slane %v2869_v23, 4  ;;  %v1322_v62 = vpop.permute.xlu1 %1321 }
 0x114   : > { %3390 = vrot.lane.b32.xlu1 %v7823_v57, %s9045_s25  ;;  %v2880_v10 = vrot.slane %v2879_v63, 4  ;;  %v7760_v52 = vrot.slane %v7744_v16, 9  ;;  %v3091_v21 = vrot.slane %v7723_v19, 5  ;;  %v12897_v60 = vshll.u32 %v9335_v6, 16  ;;  %v2337_v57 = vld [vmem:[%s9091_s22 + $0xa8] sm:$0xe] }
 0x115   : > { %v2042_v32 = vor.u32 %v2041_v1, %v2038_v38  ;;  %v2052_v37 = vor.u32 %v2051_v30, %v2047_v22  ;;  %v3094_v11 = vrot.slane %v10027_v27, 5  ;;  %v2875_v15 = vsel %vm9170_vm5, %v2870_v36, %v2874_v48  ;;  %v10075_v30 = vld [vmem:[%s9091_s22 + $0xac] sm:$0xf]  ;;  %v233_v36 = vld [vmem:[%s9091_s22 + $0xa8] sm:$0xf] }
 0x116   : > { %v2057_v12 = vrot.slane %v12897_v60, 5  ;;  %v2885_v43 = vsel %vm9170_vm5, %v2880_v10, %v2884_v4  ;;  %v3092_v3 = vsel %vm9119_vm2, %v7760_v52, %v3091_v21  ;;  %v3093_v19 = vrot.slane %v3091_v21, 4  ;;  %v8935_v10 = vld [vmem:[%s9091_s22 + $0x3c] sm:$0xf]  ;;  %v8936_v52 = vld [vmem:[%s9091_s22 + $0x40] sm:$0xf] }
 0x117   : > { %v7808_v38 = vcombine.low %v2875_v15, %v2885_v43  ;;  %v2043_v40 = vrot.slane %v2042_v32, 4  ;;  %v2053_v6 = vrot.slane %v2052_v37, 4  ;;  %v1008_v54 = vor.u32 %v10022_v53, %v10015_v7  ;;  %v234_v60 = vld [vmem:[%s9091_s22 + $0xac] sm:$0xf]  ;;  %v251_v43 = vld [vmem:[%s9091_s22 + $0xb0] sm:$0x1] }
 0x118   : > { %v1440_v27 = vsel %vm1425_vm6, %v7587_v39, %v1210_v34  ;;  %v3095_v48 = vsel %vm9119_vm2, %v3093_v19, %v3094_v11  ;;  %v1018_v4 = vor.u32 %v1017_v45, %v10033_v58  ;;  %v1021_v16 = vshll.u32 %v7580_v14, 16  ;;  %v10081_v39 = vld [vmem:[%s9091_s22 + $0xb0] sm:$0x1]  ;;  %v1212_v11 = vpop.permute.xlu0 %1211  ;;  %v7961_v14 = vld [vmem:[%s9091_s22 + $0x20] sm:$0x1] }
 0x119   : > { %3312 = vrot.lane.b32.xlu0 %v7808_v38, %s9043_s23  ;;  %v2048_v23 = vsel %vm9170_vm5, %v2043_v40, %v2047_v22  ;;  %v2058_v7 = vsel %vm9170_vm5, %v2053_v6, %v2057_v12  ;;  %v7824_v53 = vcombine.low %v3092_v3, %v3095_v48  ;;  %v1009_v63 = vrot.slane %v1008_v54, 4  ;;  %v1906_v40 = vld [vmem:[%s9091_s22 + $0x3c] sm:$0xf] }
 0x11a   : > { %v7767_v1 = vcombine.low %v2048_v23, %v2058_v7  ;;  %v1019_v18 = vrot.slane %v1018_v4, 4  ;;  %v1023_v45 = vrot.slane %v1021_v16, 5  ;;  %v10078_v9 = vsel %vm1474_vm7, %v1440_v27, %v1322_v62 }
 0x11b   : > { %3392 = vrot.lane.b32.xlu1 %v7824_v53, %s9045_s25  ;;  %v1014_v22 = vsel %vm9170_vm5, %v1009_v63, %v10033_v58  ;;  %v7588_v21 = vcombine.low %v8935_v10, %v8936_v52  ;;  %v2289_v32 = vshrl.u32 %v10075_v30, 16  ;;  %v7681_v37 = vrot.slane %v2337_v57, 9  ;;  %v3295_v53 = vpop.permute.xlu1 %3294  ;;  %v7564_v10 = vld [vmem:[%s9091_s22 + $0xb8] sm:$0xf] }
 0x11c   : > { %v3412_v12 = vsel %vm1425_vm6, %v7767_v1, %v3215_v25  ;;  %v1024_v34 = vsel %vm9170_vm5, %v1019_v18, %v1023_v45  ;;  %v2490_v15 = vrot.slane %v10075_v30, 5  ;;  %v2493_v3 = vrot.slane %v10081_v39, 5  ;;  %v7563_v1 = vld [vmem:[%s9091_s22 + $0xb4] sm:$0xf] }
 0x11d   : > { %v7644_v58 = vcombine.low %v1014_v22, %v1024_v34  ;;  %v593_v19 = vshrl.u32 %v233_v36, 16  ;;  %v596_v38 = vshll.u32 %v233_v36, 16  ;;  %v602_v54 = vshll.u32 %v234_v60, 16 }
 0x11e   : > { %v2491_v6 = vsel %vm9119_vm2, %v7681_v37, %v2490_v15  ;;  %v2492_v25 = vrot.slane %v2490_v15, 4  ;;  %v606_v62 = vshrl.u32 %v234_v60, 16  ;;  %v10104_v27 = vsel %vm1425_vm6, %v7588_v21, %v1212_v11  ;;  %v8937_v37 = vld [vmem:[%s9091_s22 + $0x40] sm:$0xf] }
 0x11f   : > { %1419 = vrot.lane.b32.xlu0 %v7644_v58, %s9045_s25  ;;  %v595_v48 = vrot.slane %v593_v19, 4  ;;  %v598_v4 = vrot.slane %v596_v38, 5  ;;  %v612_v16 = vshll.u32 %v251_v43, 16  ;;  %v604_v23 = vrot.slane %v602_v54, 5 }
 0x120   : > { %v2494_v57 = vsel %vm9119_vm2, %v2492_v25, %v2493_v3  ;;  %v608_v7 = vrot.slane %v606_v62, 4  ;;  %v2060_v63 = vshrl.u32 %v1906_v40, 16  ;;  %v2063_v22 = vshll.u32 %v1906_v40, 16  ;;  %v3217_v40 = vpop.permute.xlu0 %3216 }
 0x121   : > { %v7793_v18 = vcombine.low %v2491_v6, %v2494_v57  ;;  %v599_v45 = vor.u32 %v598_v4, %v595_v48  ;;  %v614_v36 = vrot.slane %v612_v16, 5  ;;  %v2069_v60 = vshll.u32 %v8937_v37, 16  ;;  %v235_v16 = vld [vmem:[%s9091_s22 + $0xb4] sm:$0xf] }
 0x122   : > { %v609_v52 = vor.u32 %v608_v7, %v604_v23  ;;  %v2062_v21 = vrot.slane %v2060_v63, 4  ;;  %v12898_v34 = vshrl.u32 %v9405_v55, 16  ;;  %v10115_v43 = vsel %vm1474_vm7, %v3412_v12, %v3295_v53  ;;  %v236_v12 = vld [vmem:[%s9091_s22 + $0xb8] sm:$0xf] }
 0x123   : > { %3234 = vrot.lane.b32.xlu1 %v7793_v18, %s9044_s24  ;;  %v600_v15 = vrot.slane %v599_v45, 4  ;;  %v2065_v58 = vrot.slane %v2063_v22, 5  ;;  %v1026_v3 = vshrl.u32 %v7563_v1, 16  ;;  %v2071_v38 = vrot.slane %v2069_v60, 5  ;;  %v252_v18 = vld [vmem:[%s9091_s22 + $0xbc] sm:$0x1]  ;;  %v1402_v45 = vpop.permute.xlu1 %1401 }
 0x124   : > { %v2075_v11 = vrot.slane %v12898_v34, 4  ;;  %v610_v19 = vrot.slane %v609_v52, 4  ;;  %v1029_v6 = vshll.u32 %v7563_v1, 16  ;;  %v1035_v25 = vshll.u32 %v7564_v10, 16 }
 0x125   : > { %v605_v55 = vsel %vm9170_vm5, %v600_v15, %v604_v23  ;;  %v2066_v54 = vor.u32 %v2065_v58, %v2062_v21  ;;  %v12899_v62 = vshll.u32 %v9413_v41, 16  ;;  %v10121_v4 = vrot.slane %v1026_v3, 4  ;;  %v7725_v3 = vld [vmem:[%s9091_s22 + $0xb4] sm:$0xf] }
 0x126   : > { %v615_v57 = vsel %vm9170_vm5, %v610_v19, %v614_v36  ;;  %v2076_v7 = vor.u32 %v2075_v11, %v2071_v38  ;;  %v10127_v53 = vrot.slane %v1029_v6, 5  ;;  %v1039_v63 = vshrl.u32 %v7564_v10, 16  ;;  %v10140_v19 = vld [vmem:[%s9091_s22 + $0xb8] sm:$0xf] }
 0x127   : > { %v2081_v48 = vrot.slane %v12899_v62, 5  ;;  %v7613_v23 = vcombine.low %v605_v55, %v615_v57  ;;  %v2067_v22 = vrot.slane %v2066_v54, 4  ;;  %v10130_v52 = vrot.slane %v1035_v25, 5  ;;  %v1324_v55 = vpop.permute.xlu0 %1323 }
 0x128   : > { %v7629_v41 = vcombine.low %v7563_v1, %v7564_v10  ;;  %v2077_v21 = vrot.slane %v2076_v7, 4  ;;  %v617_v37 = vshrl.u32 %v235_v16, 16  ;;  %v620_v60 = vshll.u32 %v235_v16, 16 }
 0x129   : > { %v626_v34 = vshll.u32 %v236_v12, 16  ;;  %1229 = vrot.lane.b32.xlu0 %v7613_v23, %s9044_s24  ;;  %v2072_v36 = vsel %vm9170_vm5, %v2067_v22, %v2071_v38  ;;  %v630_v11 = vshrl.u32 %v236_v12, 16  ;;  %v636_v15 = vshll.u32 %v252_v18, 16  ;;  %v10145_v38 = vld [vmem:[%s9091_s22 + $0xbc] sm:$0x1] }
 0x12a   : > { %1341 = vrot.lane.b32.xlu1 %v7629_v41, %s9043_s23  ;;  %v1517_v58 = vsel %vm1507_vm8, %v10078_v9, %v1402_v45  ;;  %v2082_v1 = vsel %vm9170_vm5, %v2077_v21, %v2081_v48  ;;  %v619_v10 = vrot.slane %v617_v37, 4  ;;  %v622_v6 = vrot.slane %v620_v60, 5  ;;  %v10156_v41 = vld [vmem:[%s9091_s22 + $0xb8] sm:$0xf] }
 0x12b   : > { %v628_v25 = vrot.slane %v626_v34, 5  ;;  %8460 = vmatprep.mubr.msk.bf16.mxu0 %vm1556_vm9, %v1517_v58  ;;  %v7768_v54 = vcombine.low %v2072_v36, %v2082_v1  ;;  %v1041_v62 = vrot.slane %v1039_v63, 4  ;;  %v632_v16 = vrot.slane %v630_v11, 4  ;;  %v2338_v63 = vld [vmem:[%s9091_s22 + $0xb4] sm:$0xe] }
 0x12c   : > { %v638_v9 = vrot.slane %v636_v15, 5  ;;  %v623_v12 = vor.u32 %v622_v6, %v619_v10  ;;  %v2887_v57 = vshrl.u32 %v7725_v3, 16  ;;  %v2890_v7 = vshll.u32 %v7725_v3, 16  ;;  %v10160_v36 = vld [vmem:[%s9091_s22 + $0xbc] sm:$0x1]  ;;  %v3375_v3 = vpop.permute.xlu1 %3374 }
 0x12d   : > { %v2896_v48 = vshll.u32 %v10140_v19, 16  ;;  %v633_v18 = vor.u32 %v632_v16, %v628_v25  ;;  %v10151_v45 = vsel %vm1474_vm7, %v10104_v27, %v1324_v55  ;;  %v2900_v23 = vshrl.u32 %v10140_v19, 16  ;;  %v3297_v16 = vpop.permute.xlu0 %3296 }
 0x12e   : > { %v2906_v22 = vshll.u32 %v10145_v38, 16  ;;  %v624_v21 = vrot.slane %v623_v12, 4  ;;  %v2889_v37 = vrot.slane %v2887_v57, 4  ;;  %v2892_v60 = vrot.slane %v2890_v7, 5 }
 0x12f   : > { %v2898_v34 = vrot.slane %v2896_v48, 5  ;;  %v3415_v11 = vsel %vm1425_vm6, %v7768_v54, %v3217_v40  ;;  %v634_v15 = vrot.slane %v633_v18, 4  ;;  %v2902_v27 = vrot.slane %v2900_v23, 4  ;;  %v7581_v54 = vld [vmem:[%s9091_s22 + $0xbc] sm:$0x1] }
 0x130   : > { %v2908_v58 = vrot.slane %v2906_v22, 5  ;;  %v629_v1 = vsel %vm9170_vm5, %v624_v21, %v628_v25  ;;  %v2893_v10 = vor.u32 %v2892_v60, %v2889_v37  ;;  %v7682_v55 = vrot.slane %v2338_v63, 9  ;;  %v7565_v48 = vld [vmem:[%s9091_s22 + $0xc0] sm:$0xf]  ;;  %v8940_v25 = vld [vmem:[%s9091_s22 + $0x4c] sm:$0xf] }
 0x131   : > { %v639_v12 = vsel %vm9170_vm5, %v634_v15, %v638_v9  ;;  %v2903_v57 = vor.u32 %v2902_v27, %v2898_v34  ;;  %v2497_v7 = vrot.slane %v10156_v41, 5  ;;  %v2500_v40 = vrot.slane %v10160_v36, 5 }
 0x132   : > { %v7614_v18 = vcombine.low %v629_v1, %v639_v12  ;;  %v2894_v23 = vrot.slane %v2893_v10, 4  ;;  %v3487_v22 = vsel %vm1507_vm8, %v10115_v43, %v3375_v3  ;;  %v1032_v37 = vor.u32 %v10127_v53, %v10121_v4  ;;  %v7566_v43 = vld [vmem:[%s9091_s22 + $0xc4] sm:$0xf] }
 0x133   : > { %v2904_v63 = vrot.slane %v2903_v57, 4  ;;  %v2498_v21 = vsel %vm9119_vm2, %v7682_v55, %v2497_v7  ;;  %v2499_v9 = vrot.slane %v2497_v7, 4  ;;  %8496 = vmatprep.mubr.msk.bf16.mxu1 %vm1556_vm9, %v3487_v22  ;;  %v1042_v15 = vor.u32 %v1041_v62, %v10130_v52  ;;  %v3377_v55 = vpop.permute.xlu1 %3376  ;;  %v1404_v62 = vpop.permute.xlu0 %1403  ;;  %v7728_v22 = vld [vmem:[%s9091_s22 + $0xc0] sm:$0xf] }
 0x134   : > { %1231 = vrot.lane.b32.xlu0 %v7614_v18, %s9044_s24  ;;  %v2899_v60 = vsel %vm9170_vm5, %v2894_v23, %v2898_v34  ;;  %v1045_v27 = vshll.u32 %v7581_v54, 16  ;;  %v1050_v3 = vshrl.u32 %v7565_v48, 16  ;;  %v1033_v53 = vrot.slane %v1032_v37, 4  ;;  %v7745_v54 = vld [vmem:[%s9091_s22 + $0xb4] sm:$0xe] }
 0x135   : > { %v2909_v1 = vsel %vm9170_vm5, %v2904_v63, %v2908_v58  ;;  %v2501_v4 = vsel %vm9119_vm2, %v2499_v9, %v2500_v40  ;;  %v1053_v10 = vshll.u32 %v7565_v48, 16  ;;  %v1043_v7 = vrot.slane %v1042_v15, 4  ;;  %v10206_v37 = vld [vmem:[%s9091_s22 + $0xc8] sm:$0x1] }
 0x136   : > { %v7809_v12 = vcombine.low %v2899_v60, %v2909_v1  ;;  %v7794_v57 = vcombine.low %v2498_v21, %v2501_v4  ;;  %v1047_v34 = vrot.slane %v1045_v27, 5  ;;  %v3457_v18 = vsel %vm1474_vm7, %v3415_v11, %v3297_v16  ;;  %v7729_v16 = vld [vmem:[%s9091_s22 + $0xc4] sm:$0xf] }
 0x137   : > { %v1038_v58 = vsel %vm9170_vm5, %v1033_v53, %v10130_v52  ;;  %v10194_v23 = vrot.slane %v1050_v3, 4  ;;  %v1059_v40 = vshll.u32 %v7566_v43, 16  ;;  %v10201_v21 = vrot.slane %v1053_v10, 5  ;;  %v1909_v3 = vld [vmem:[%s9091_s22 + $0x48] sm:$0xf] }
 0x138   : > { %3314 = vrot.lane.b32.xlu1 %v7809_v12, %s9043_s23  ;;  %3236 = vrot.lane.b32.xlu0 %v7794_v57, %s9044_s24  ;;  %v1048_v63 = vsel %vm9170_vm5, %v1043_v7, %v1047_v34  ;;  %v7630_v9 = vcombine.low %v7565_v48, %v7566_v43  ;;  %v3489_v11 = vsel %vm1507_vm8, %v3457_v18, %v3377_v55  ;;  %v1063_v60 = vshrl.u32 %v7566_v43, 16 }
 0x139   : > { %v7645_v52 = vcombine.low %v1038_v58, %v1048_v63  ;;  %v1519_v15 = vsel %vm1507_vm8, %v10151_v45, %v1404_v62  ;;  %v7761_v27 = vrot.slane %v7745_v54, 9  ;;  %8497 = vmatmul.mubr.msk.bf16.gmra.mrb[8].mxu1 %vm1556_vm9, %v3489_v11  ;;  %v10212_v1 = vrot.slane %v1059_v40, 5  ;;  %v7746_v11 = vld [vmem:[%s9091_s22 + $0xc0] sm:$0xe] }
 0x13a   : > { %v3098_v4 = vrot.slane %v10140_v19, 5  ;;  %v3101_v48 = vrot.slane %v10145_v38, 5  ;;  %v2911_v53 = vshrl.u32 %v7728_v22, 16  ;;  %8461 = vmatmul.mubr.msk.bf16.gmra.mrb[8].mxu0 %vm1556_vm9, %v1519_v15  ;;  %v2914_v10 = vshll.u32 %v7728_v22, 16  ;;  %v8938_v22 = vld [vmem:[%s9091_s22 + $0x4c] sm:$0xf] }
 0x13b   : > { %v2920_v55 = vshll.u32 %v7729_v16, 16  ;;  %v2924_v43 = vshrl.u32 %v7729_v16, 16  ;;  %v2930_v12 = vshll.u32 %v10206_v37, 16  ;;  %v2084_v38 = vshrl.u32 %v1909_v3, 16 }
 0x13c   : > { %1421 = vrot.lane.b32.xlu1 %v7645_v52, %s9045_s25  ;;  %1343 = vrot.lane.b32.xlu0 %v7630_v9, %s9043_s23  ;;  %v3099_v45 = vsel %vm9119_vm2, %v7761_v27, %v3098_v4  ;;  %v3100_v19 = vrot.slane %v3098_v4, 4  ;;  %v2913_v57 = vrot.slane %v2911_v53, 4  ;;  %v2916_v7 = vrot.slane %v2914_v10, 5  ;;  %v3219_v9 = vpop.permute.xlu1 %3218 }
 0x13d   : > { %v2922_v34 = vrot.slane %v2920_v55, 5  ;;  %v2926_v62 = vrot.slane %v2924_v43, 4  ;;  %v2932_v54 = vrot.slane %v2930_v12, 5  ;;  %v2086_v58 = vrot.slane %v2084_v38, 4  ;;  %v8939_v12 = vld [vmem:[%s9091_s22 + $0x48] sm:$0xf] }
 0x13e   : > { %v3102_v18 = vsel %vm9119_vm2, %v3100_v19, %v3101_v48  ;;  %v2087_v40 = vshll.u32 %v1909_v3, 16  ;;  %v2093_v63 = vshll.u32 %v8938_v22, 16  ;;  %v2917_v15 = vor.u32 %v2916_v7, %v2913_v57 }
 0x13f   : > { %v7825_v52 = vcombine.low %v3099_v45, %v3102_v18  ;;  %v2927_v27 = vor.u32 %v2926_v62, %v2922_v34  ;;  %v12900_v4 = vshrl.u32 %v9462_v42, 16  ;;  %v1065_v10 = vrot.slane %v1063_v60, 4  ;;  %v1214_v42 = vpop.permute.xlu0 %1213  ;;  %v7582_v62 = vld [vmem:[%s9091_s22 + $0xc8] sm:$0x1] }
 0x140   : > { %v2089_v55 = vrot.slane %v2087_v40, 5  ;;  %v2095_v43 = vrot.slane %v2093_v63, 5  ;;  %v7589_v6 = vcombine.low %v8939_v12, %v8940_v25  ;;  %v2918_v3 = vrot.slane %v2917_v15, 4 }
 0x141   : > { %v2099_v53 = vrot.slane %v12900_v4, 4  ;;  %3394 = vrot.lane.b32.xlu1 %v7825_v52, %s9045_s25  ;;  %v2928_v48 = vrot.slane %v2927_v27, 4  ;;  %v7762_v19 = vrot.slane %v7746_v11, 9  ;;  %v3105_v38 = vrot.slane %v7729_v16, 5  ;;  %v1326_v52 = vpop.permute.xlu1 %1325  ;;  %v8143_v27 = vld [vmem:[%s9091_s22 + $0xc] sm:$0xe] }
 0x142   : > { %v2090_v22 = vor.u32 %v2089_v55, %v2086_v58  ;;  %v12901_v57 = vshll.u32 %v9465_v13, 16  ;;  %v3108_v60 = vrot.slane %v10206_v37, 5  ;;  %v2923_v18 = vsel %vm9170_vm5, %v2918_v3, %v2922_v34 }
 0x143   : > { %v2100_v45 = vor.u32 %v2099_v53, %v2095_v43  ;;  %v2933_v25 = vsel %vm9170_vm5, %v2928_v48, %v2932_v54  ;;  %v3106_v40 = vsel %vm9119_vm2, %v7762_v19, %v3105_v38  ;;  %v3107_v16 = vrot.slane %v3105_v38, 4  ;;  %v10254_v53 = vld [vmem:[%s9091_s22 + $0x10] sm:$0xf]  ;;  %v10260_v48 = vld [vmem:[%s9091_s22 + $0x14] sm:$0x1] }
 0x144   : > { %v2105_v7 = vrot.slane %v12901_v57, 5  ;;  %v7810_v58 = vcombine.low %v2923_v18, %v2933_v25  ;;  %v2091_v63 = vrot.slane %v2090_v22, 4  ;;  %v1056_v11 = vor.u32 %v10201_v21, %v10194_v23  ;;  %v7881_v19 = vld [vmem:[%s9091_s22 + $0xc] sm:$0xf]  ;;  %v8941_v38 = vld [vmem:[%s9091_s22 + $0x54] sm:$0xf]  ;;  %v1216_v18 = vpop.permute.xlu0 %1215 }
 0x145   : > { %v2101_v13 = vrot.slane %v2100_v45, 4  ;;  %v1446_v37 = vsel %vm1425_vm6, %v7589_v6, %v1214_v42  ;;  %v3109_v34 = vsel %vm9119_vm2, %v3107_v16, %v3108_v60  ;;  %v1066_v54 = vor.u32 %v1065_v10, %v10212_v1  ;;  %v8942_v22 = vld [vmem:[%s9091_s22 + $0x58] sm:$0xf]  ;;  %v7882_v42 = vld [vmem:[%s9091_s22 + $0x10] sm:$0xf] }
 0x146   : > { %v1069_v15 = vshll.u32 %v7582_v62, 16  ;;  %3316 = vrot.lane.b32.xlu0 %v7810_v58, %s9043_s23  ;;  %v2096_v4 = vsel %vm9170_vm5, %v2091_v63, %v2095_v43  ;;  %v7826_v21 = vcombine.low %v3106_v40, %v3109_v34  ;;  %v1057_v6 = vrot.slane %v1056_v11, 4  ;;  %v7913_v16 = vld [vmem:[%s9091_s22 + $0x14] sm:$0x1] }
 0x147   : > { %v2106_v23 = vsel %vm9170_vm5, %v2101_v13, %v2105_v7  ;;  %v1067_v12 = vrot.slane %v1066_v54, 4  ;;  %v10257_v3 = vsel %vm1474_vm7, %v1446_v37, %v1326_v52  ;;  %v7590_v45 = vcombine.low %v8941_v38, %v8942_v22  ;;  %v1912_v11 = vld [vmem:[%s9091_s22 + $0x54] sm:$0xf] }
 0x148   : > { %v7769_v55 = vcombine.low %v2096_v4, %v2106_v23  ;;  %v1071_v10 = vrot.slane %v1069_v15, 5  ;;  %3396 = vrot.lane.b32.xlu1 %v7826_v21, %s9045_s25  ;;  %v1062_v43 = vsel %vm9170_vm5, %v1057_v6, %v10212_v1  ;;  %v8159_v7 = vrot.slane %v8143_v27, 9 }
 0x149   : > { %v6015_v40 = vrot.slane %v10254_v53, 5  ;;  %v6018_v58 = vrot.slane %v10260_v48, 5  ;;  %v3898_v63 = vshrl.u32 %v7881_v19, 16  ;;  %v3901_v13 = vshll.u32 %v7881_v19, 16 }
 0x14a   : > { %v3418_v60 = vsel %vm1425_vm6, %v7769_v55, %v3219_v9  ;;  %v1072_v62 = vsel %vm9170_vm5, %v1067_v12, %v1071_v10  ;;  %v3907_v37 = vshll.u32 %v7882_v42, 16  ;;  %v3911_v34 = vshrl.u32 %v7882_v42, 16  ;;  %v3299_v55 = vpop.permute.xlu1 %3298  ;;  %v7929_v10 = vld [vmem:[%s9091_s22 + $0x18] sm:$0xf] }
 0x14b   : > { %v7646_v1 = vcombine.low %v1062_v43, %v1072_v62  ;;  %v6016_v52 = vsel %vm9119_vm2, %v8159_v7, %v6015_v40  ;;  %v6017_v9 = vrot.slane %v6015_v40, 4  ;;  %v10283_v54 = vsel %vm1425_vm6, %v7590_v45, %v1216_v18  ;;  %v7930_v7 = vld [vmem:[%s9091_s22 + $0x1c] sm:$0xf]  ;;  %v8943_v62 = vld [vmem:[%s9091_s22 + $0x58] sm:$0xf] }
 0x14c   : > { %v3900_v15 = vrot.slane %v3898_v63, 4  ;;  %v3903_v27 = vrot.slane %v3901_v13, 5  ;;  %v3917_v4 = vshll.u32 %v7913_v16, 16  ;;  %v3909_v21 = vrot.slane %v3907_v37, 5  ;;  %v3221_v13 = vpop.permute.xlu0 %3220 }
 0x14d   : > { %1423 = vrot.lane.b32.xlu0 %v7646_v1, %s9045_s25  ;;  %v6019_v23 = vsel %vm9119_vm2, %v6017_v9, %v6018_v58  ;;  %v3913_v6 = vrot.slane %v3911_v34, 4  ;;  %v2108_v12 = vshrl.u32 %v1912_v11, 16  ;;  %v2111_v22 = vshll.u32 %v1912_v11, 16 }
 0x14e   : > { %v8271_v19 = vcombine.low %v6016_v52, %v6019_v23  ;;  %v3904_v43 = vor.u32 %v3903_v27, %v3900_v15  ;;  %v3919_v38 = vrot.slane %v3917_v4, 5  ;;  %v2117_v18 = vshll.u32 %v8943_v62, 16 }
 0x14f   : > { %v3914_v42 = vor.u32 %v3913_v6, %v3909_v21  ;;  %v2110_v45 = vrot.slane %v2108_v12, 4  ;;  %v12902_v40 = vshrl.u32 %v9518_v8, 16  ;;  %v10294_v58 = vsel %vm1474_vm7, %v3418_v60, %v3299_v55  ;;  %v7883_v6 = vld [vmem:[%s9091_s22 + $0x18] sm:$0xf]  ;;  %v7884_v60 = vld [vmem:[%s9091_s22 + $0x1c] sm:$0xf] }
 0x150   : > { %6829 = vrot.lane.b32.xlu1 %v8271_v19, %s9044_s24  ;;  %v3905_v1 = vrot.slane %v3904_v43, 4  ;;  %v2113_v63 = vrot.slane %v2111_v22, 5  ;;  %v4331_v11 = vshrl.u32 %v7929_v10, 16  ;;  %v2119_v9 = vrot.slane %v2117_v18, 5  ;;  %v7914_v22 = vld [vmem:[%s9091_s22 + $0x20] sm:$0x1] }
 0x151   : > { %v2123_v16 = vrot.slane %v12902_v40, 4  ;;  %v3915_v52 = vrot.slane %v3914_v42, 4  ;;  %v4334_v37 = vshll.u32 %v7929_v10, 16  ;;  %v4340_v34 = vshll.u32 %v7930_v7, 16  ;;  %v1406_v42 = vpop.permute.xlu1 %1405 }
 0x152   : > { %v3910_v8 = vsel %vm9170_vm5, %v3905_v1, %v3909_v21  ;;  %v2114_v15 = vor.u32 %v2113_v63, %v2110_v45  ;;  %v12903_v27 = vshll.u32 %v9526_v59, 16  ;;  %v10300_v23 = vrot.slane %v4331_v11, 4 }
 0x153   : > { %v3920_v55 = vsel %vm9170_vm5, %v3915_v52, %v3919_v38  ;;  %v2124_v12 = vor.u32 %v2123_v16, %v2119_v9  ;;  %v10306_v19 = vrot.slane %v4334_v37, 5  ;;  %v4344_v43 = vshrl.u32 %v7930_v7, 16  ;;  %v1328_v37 = vpop.permute.xlu0 %1327 }
 0x154   : > { %v2129_v4 = vrot.slane %v12903_v27, 5  ;;  %v7993_v62 = vcombine.low %v3910_v8, %v3920_v55  ;;  %v2115_v21 = vrot.slane %v2114_v15, 4  ;;  %v10309_v45 = vrot.slane %v4340_v34, 5  ;;  %v8175_v34 = vld [vmem:[%s9091_s22 + $0x18] sm:$0xf] }
 0x155   : > { %v8009_v59 = vcombine.low %v7929_v10, %v7930_v7  ;;  %v2125_v18 = vrot.slane %v2124_v12, 4  ;;  %v3922_v40 = vshrl.u32 %v7883_v6, 16  ;;  %v3925_v1 = vshll.u32 %v7883_v6, 16  ;;  %v10319_v10 = vld [vmem:[%s9091_s22 + $0x1c] sm:$0xf] }
 0x156   : > { %v3931_v63 = vshll.u32 %v7884_v60, 16  ;;  %4842 = vrot.lane.b32.xlu0 %v7993_v62, %s9044_s24  ;;  %v2120_v38 = vsel %vm9170_vm5, %v2115_v21, %v2119_v9  ;;  %v3935_v16 = vshrl.u32 %v7884_v60, 16  ;;  %v3941_v11 = vshll.u32 %v7914_v22, 16  ;;  %v10324_v9 = vld [vmem:[%s9091_s22 + $0x20] sm:$0x1] }
 0x157   : > { %4954 = vrot.lane.b32.xlu1 %v8009_v59, %s9043_s23  ;;  %v1521_v52 = vsel %vm1507_vm8, %v10257_v3, %v1406_v42  ;;  %v2130_v7 = vsel %vm9170_vm5, %v2125_v18, %v2129_v4  ;;  %v3924_v8 = vrot.slane %v3922_v40, 4  ;;  %v3927_v15 = vrot.slane %v3925_v1, 5  ;;  %v8144_v21 = vld [vmem:[%s9091_s22 + $0x18] sm:$0xe]  ;;  %v8099_v1 = vld [vmem:[%s9091_s22 + $0x1c] sm:$0xf] }
 0x158   : > { %v3933_v27 = vrot.slane %v3931_v63, 5  ;;  %8464 = vmatprep.mubr.msk.bf16.mxu0 %vm1556_vm9, %v1521_v52  ;;  %v7770_v6 = vcombine.low %v2120_v38, %v2130_v7  ;;  %v4346_v60 = vrot.slane %v4344_v43, 4  ;;  %v3937_v3 = vrot.slane %v3935_v16, 4  ;;  %v8100_v63 = vld [vmem:[%s9091_s22 + $0x20] sm:$0x1]  ;;  %v3379_v52 = vpop.permute.xlu1 %3378 }
 0x159   : > { %v3943_v55 = vrot.slane %v3941_v11, 5  ;;  %v3928_v12 = vor.u32 %v3927_v15, %v3924_v8  ;;  %v6174_v22 = vshrl.u32 %v8175_v34, 16  ;;  %v6177_v42 = vshll.u32 %v8175_v34, 16 }
 0x15a   : > { %v6183_v62 = vshll.u32 %v10319_v10, 16  ;;  %v3938_v4 = vor.u32 %v3937_v3, %v3933_v27  ;;  %v1490_v59 = vsel %vm1474_vm7, %v10283_v54, %v1328_v37  ;;  %v6187_v18 = vshrl.u32 %v10319_v10, 16  ;;  %v3301_v3 = vpop.permute.xlu0 %3300 }
 0x15b   : > { %v6193_v40 = vshll.u32 %v10324_v9, 16  ;;  %v3929_v43 = vrot.slane %v3928_v12, 4  ;;  %v6176_v38 = vrot.slane %v6174_v22, 4  ;;  %v6179_v16 = vrot.slane %v6177_v42, 5 }
 0x15c   : > { %v6185_v11 = vrot.slane %v6183_v62, 5  ;;  %v3421_v34 = vsel %vm1425_vm6, %v7770_v6, %v3221_v13  ;;  %v3939_v7 = vrot.slane %v3938_v4, 4  ;;  %v6189_v8 = vrot.slane %v6187_v18, 4  ;;  %v7931_v6 = vld [vmem:[%s9091_s22 + $0x24] sm:$0xf] }
 0x15d   : > { %v8160_v15 = vrot.slane %v8144_v21, 9  ;;  %v3934_v54 = vsel %vm9170_vm5, %v3929_v43, %v3933_v27  ;;  %v6180_v37 = vor.u32 %v6179_v16, %v6176_v38  ;;  %v6022_v25 = vrot.slane %v8099_v1, 5  ;;  %v7932_v43 = vld [vmem:[%s9091_s22 + $0x28] sm:$0xf] }
 0x15e   : > { %v6025_v57 = vrot.slane %v8100_v63, 5  ;;  %v3944_v12 = vsel %vm9170_vm5, %v3939_v7, %v3943_v55  ;;  %v6190_v22 = vor.u32 %v6189_v8, %v6185_v11  ;;  %v6195_v42 = vrot.slane %v6193_v40, 5  ;;  %v8223_v7 = vld [vmem:[%s9091_s22 + $0x18] sm:$0xe] }
 0x15f   : > { %v3491_v13 = vsel %vm1507_vm8, %v10294_v58, %v3379_v52  ;;  %v7994_v62 = vcombine.low %v3934_v54, %v3944_v12  ;;  %v6181_v21 = vrot.slane %v6180_v37, 4  ;;  %v6023_v4 = vsel %vm9119_vm2, %v8160_v15, %v6022_v25  ;;  %v1408_v52 = vpop.permute.xlu0 %1407 }
 0x160   : > { %v6024_v27 = vrot.slane %v6022_v25, 4  ;;  %8500 = vmatprep.mubr.msk.bf16.mxu1 %vm1556_vm9, %v3491_v13  ;;  %v6191_v18 = vrot.slane %v6190_v22, 4  ;;  %v4337_v55 = vor.u32 %v10306_v19, %v10300_v23  ;;  %v4347_v1 = vor.u32 %v4346_v60, %v10309_v45  ;;  %v10369_v13 = vld [vmem:[%s9091_s22 + $0x28] sm:$0xf] }
 0x161   : > { %v4350_v40 = vshll.u32 %v7961_v14, 16  ;;  %4844 = vrot.lane.b32.xlu0 %v7994_v62, %s9044_s24  ;;  %v6186_v58 = vsel %vm9170_vm5, %v6181_v21, %v6185_v11  ;;  %v4355_v25 = vshrl.u32 %v7931_v6, 16  ;;  %v4358_v38 = vshll.u32 %v7931_v6, 16  ;;  %v3381_v14 = vpop.permute.xlu1 %3380  ;;  %v10378_v21 = vld [vmem:[%s9091_s22 + $0x2c] sm:$0x1] }
 0x162   : > { %v6026_v63 = vsel %vm9119_vm2, %v6024_v27, %v6025_v57  ;;  %v6196_v16 = vsel %vm9170_vm5, %v6191_v18, %v6195_v42  ;;  %v4338_v19 = vrot.slane %v4337_v55, 4  ;;  %v4348_v60 = vrot.slane %v4347_v1, 4  ;;  %v8178_v42 = vld [vmem:[%s9091_s22 + $0x24] sm:$0xf]  ;;  %v1915_v55 = vld [vmem:[%s9091_s22 + $0x60] sm:$0xf] }
 0x163   : > { %v8272_v23 = vcombine.low %v6023_v4, %v6026_v63  ;;  %v8287_v8 = vcombine.low %v6186_v58, %v6196_v16  ;;  %v3461_v11 = vsel %vm1474_vm7, %v3421_v34, %v3301_v3  ;;  %v4352_v15 = vrot.slane %v4350_v40, 5 }
 0x164   : > { %v10360_v57 = vrot.slane %v4355_v25, 4  ;;  %v4343_v54 = vsel %vm9170_vm5, %v4338_v19, %v10309_v45  ;;  %v10365_v37 = vrot.slane %v4358_v38, 5  ;;  %v4364_v12 = vshll.u32 %v7932_v43, 16 }
 0x165   : > { %v8010_v22 = vcombine.low %v7931_v6, %v7932_v43  ;;  %6909 = vrot.lane.b32.xlu1 %v8287_v8, %s9043_s23  ;;  %6831 = vrot.lane.b32.xlu0 %v8272_v23, %s9044_s24  ;;  %v4353_v34 = vsel %vm9170_vm5, %v4348_v60, %v4352_v15  ;;  %v3493_v3 = vsel %vm1507_vm8, %v3461_v11, %v3381_v14  ;;  %v8239_v45 = vrot.slane %v8223_v7, 9  ;;  %v10392_v38 = vpop.permute.xlu1 %3222  ;;  %v8224_v8 = vld [vmem:[%s9091_s22 + $0x24] sm:$0xe] }
 0x166   : > { %v1523_v62 = vsel %vm1507_vm8, %v1490_v59, %v1408_v52  ;;  %v8025_v4 = vcombine.low %v4343_v54, %v4353_v34  ;;  %v10380_v6 = vrot.slane %v4364_v12, 5  ;;  %v4368_v27 = vshrl.u32 %v7932_v43, 16  ;;  %8501 = vmatmul.mubr.msk.bf16.gmra.mrb[12].mxu1 %vm1556_vm9, %v3493_v3  ;;  %v8944_v12 = vld [vmem:[%s9091_s22 + $0x64] sm:$0xf]  ;;  %v1218_v34 = vpop.permute.xlu0 %1217 }
 0x167   : > { %v6623_v18 = vrot.slane %v10319_v10, 5  ;;  %8465 = vmatmul.mubr.msk.bf16.gmra.mrb[12].mxu0 %vm1556_vm9, %v1523_v62  ;;  %v6626_v1 = vrot.slane %v10324_v9, 5  ;;  %v6198_v40 = vshrl.u32 %v8178_v42, 16  ;;  %v6201_v58 = vshll.u32 %v8178_v42, 16 }
 0x168   : > { %v6207_v59 = vshll.u32 %v10369_v13, 16  ;;  %v6211_v43 = vshrl.u32 %v10369_v13, 16  ;;  %v6217_v10 = vshll.u32 %v10378_v21, 16  ;;  %v2132_v19 = vshrl.u32 %v1915_v55, 16 }
 0x169   : > { %v6624_v63 = vsel %vm9119_vm2, %v8239_v45, %v6623_v18  ;;  %v6625_v25 = vrot.slane %v6623_v18, 4  ;;  %5034 = vrot.lane.b32.xlu1 %v8025_v4, %s9045_s25  ;;  %4956 = vrot.lane.b32.xlu0 %v8010_v22, %s9043_s23  ;;  %v6200_v9 = vrot.slane %v6198_v40, 4  ;;  %v6203_v16 = vrot.slane %v6201_v58, 5 }
 0x16a   : > { %v6209_v23 = vrot.slane %v6207_v59, 5  ;;  %v4370_v60 = vrot.slane %v4368_v27, 4  ;;  %v6213_v52 = vrot.slane %v6211_v43, 4  ;;  %v2135_v7 = vshll.u32 %v1915_v55, 16  ;;  %v8945_v55 = vld [vmem:[%s9091_s22 + $0x60] sm:$0xf] }
 0x16b   : > { %v6627_v14 = vsel %vm9119_vm2, %v6625_v25, %v6626_v1  ;;  %v6204_v15 = vor.u32 %v6203_v16, %v6200_v9  ;;  %v2134_v54 = vrot.slane %v2132_v19, 4  ;;  %v2141_v42 = vshll.u32 %v8944_v12, 16  ;;  %v8946_v1 = vld [vmem:[%s9091_s22 + $0x64] sm:$0xf] }
 0x16c   : > { %v8303_v11 = vcombine.low %v6624_v63, %v6627_v14  ;;  %v6214_v22 = vor.u32 %v6213_v52, %v6209_v23  ;;  %v6219_v3 = vrot.slane %v6217_v10, 5  ;;  %v2137_v62 = vrot.slane %v2135_v7, 5  ;;  %v1330_v10 = vpop.permute.xlu1 %1329  ;;  %v7962_v14 = vld [vmem:[%s9091_s22 + $0x2c] sm:$0x1]  ;;  %v8145_v12 = vld [vmem:[%s9091_s22 + $0x24] sm:$0xe] }
 0x16d   : > { %v12904_v45 = vshrl.u32 %v9575_v26, 16  ;;  %v6205_v27 = vrot.slane %v6204_v15, 4  ;;  %v2143_v18 = vrot.slane %v2141_v42, 5  ;;  %v7591_v40 = vcombine.low %v8945_v55, %v8946_v1  ;;  %v7886_v55 = vld [vmem:[%s9091_s22 + $0x28] sm:$0xf] }
 0x16e   : > { %6989 = vrot.lane.b32.xlu1 %v8303_v11, %s9045_s25  ;;  %v8240_v58 = vrot.slane %v8224_v8, 9  ;;  %v6215_v59 = vrot.slane %v6214_v22, 4  ;;  %v2138_v63 = vor.u32 %v2137_v62, %v2134_v54  ;;  %v6630_v25 = vrot.slane %v10369_v13, 5  ;;  %v1220_v54 = vpop.permute.xlu0 %1219  ;;  %v8102_v62 = vld [vmem:[%s9091_s22 + $0x28] sm:$0xf] }
 0x16f   : > { %v2147_v4 = vrot.slane %v12904_v45, 4  ;;  %v6633_v43 = vrot.slane %v10378_v21, 5  ;;  %v6210_v26 = vsel %vm9170_vm5, %v6205_v27, %v6209_v23  ;;  %v12905_v16 = vshll.u32 %v9578_v50, 16  ;;  %v8103_v45 = vld [vmem:[%s9091_s22 + $0x2c] sm:$0x1] }
 0x170   : > { %v4361_v52 = vor.u32 %v10365_v37, %v10360_v57  ;;  %v6220_v13 = vsel %vm9170_vm5, %v6215_v59, %v6219_v3  ;;  %v2139_v21 = vrot.slane %v2138_v63, 4  ;;  %v6631_v7 = vsel %vm9119_vm2, %v8240_v58, %v6630_v25  ;;  %v7885_v57 = vld [vmem:[%s9091_s22 + $0x24] sm:$0xf]  ;;  %v8948_v58 = vld [vmem:[%s9091_s22 + $0x70] sm:$0xf] }
 0x171   : > { %v2148_v9 = vor.u32 %v2147_v4, %v2143_v18  ;;  %v2153_v19 = vrot.slane %v12905_v16, 5  ;;  %v6632_v8 = vrot.slane %v6630_v25, 4  ;;  %v8288_v11 = vcombine.low %v6210_v26, %v6220_v13  ;;  %v3303_v25 = vpop.permute.xlu1 %3302 }
 0x172   : > { %v4362_v15 = vrot.slane %v4361_v52, 4  ;;  %v4371_v50 = vor.u32 %v4370_v60, %v10380_v6  ;;  %v2144_v37 = vsel %vm9170_vm5, %v2139_v21, %v2143_v18  ;;  %v1452_v42 = vsel %vm1425_vm6, %v7591_v40, %v1218_v34  ;;  %v8947_v40 = vld [vmem:[%s9091_s22 + $0x6c] sm:$0xf] }
 0x173   : > { %v2149_v23 = vrot.slane %v2148_v9, 4  ;;  %v6634_v22 = vsel %vm9119_vm2, %v6632_v8, %v6633_v43  ;;  %v4374_v3 = vshll.u32 %v7962_v14, 16  ;;  %6911 = vrot.lane.b32.xlu0 %v8288_v11, %s9043_s23  ;;  %v7592_v59 = vcombine.low %v8947_v40, %v8948_v58  ;;  %v7915_v9 = vld [vmem:[%s9091_s22 + $0x2c] sm:$0x1] }
 0x174   : > { %v8304_v4 = vcombine.low %v6631_v7, %v6634_v22  ;;  %v4367_v27 = vsel %vm9170_vm5, %v4362_v15, %v10380_v6  ;;  %v4372_v18 = vrot.slane %v4371_v50, 4  ;;  %v8161_v63 = vrot.slane %v8145_v12, 9  ;;  %v1918_v21 = vld [vmem:[%s9091_s22 + $0x6c] sm:$0xf]  ;;  %v10449_v15 = vpop.permute.xlu0 %3224 }
 0x175   : > { %v2154_v60 = vsel %vm9170_vm5, %v2149_v23, %v2153_v19  ;;  %v4376_v1 = vrot.slane %v4374_v3, 5  ;;  %v6029_v43 = vrot.slane %v8102_v62, 5  ;;  %v6032_v26 = vrot.slane %v8103_v45, 5  ;;  %v7933_v3 = vld [vmem:[%s9091_s22 + $0x30] sm:$0xf] }
 0x176   : > { %v7771_v34 = vcombine.low %v2144_v37, %v2154_v60  ;;  %6991 = vrot.lane.b32.xlu1 %v8304_v4, %s9045_s25  ;;  %v3946_v16 = vshrl.u32 %v7885_v57, 16  ;;  %v3949_v19 = vshll.u32 %v7885_v57, 16  ;;  %v10444_v52 = vsel %vm1474_vm7, %v1452_v42, %v1330_v10 }
 0x177   : > { %v4377_v14 = vsel %vm9170_vm5, %v4372_v18, %v4376_v1  ;;  %v3955_v13 = vshll.u32 %v7886_v55, 16  ;;  %v6030_v8 = vsel %vm9119_vm2, %v8161_v63, %v6029_v43  ;;  %v6031_v11 = vrot.slane %v6029_v43, 4  ;;  %v1410_v18 = vpop.permute.xlu1 %1409  ;;  %v8949_v1 = vld [vmem:[%s9091_s22 + $0x70] sm:$0xf] }
 0x178   : > { %v3424_v6 = vsel %vm1425_vm6, %v7771_v34, %v10392_v38  ;;  %v8026_v7 = vcombine.low %v4367_v27, %v4377_v14  ;;  %v3948_v23 = vrot.slane %v3946_v16, 4  ;;  %v3951_v50 = vrot.slane %v3949_v19, 5  ;;  %v7934_v27 = vld [vmem:[%s9091_s22 + $0x34] sm:$0xf]  ;;  %v1332_v14 = vpop.permute.xlu0 %1331 }
 0x179   : > { %v3957_v38 = vrot.slane %v3955_v13, 5  ;;  %v3959_v12 = vshrl.u32 %v7886_v55, 16  ;;  %v3965_v57 = vshll.u32 %v7915_v9, 16  ;;  %v10453_v10 = vsel %vm1425_vm6, %v7592_v59, %v1220_v54 }
 0x17a   : > { %5036 = vrot.lane.b32.xlu0 %v8026_v7, %s9045_s25  ;;  %v6033_v37 = vsel %vm9119_vm2, %v6031_v11, %v6032_v26  ;;  %v2156_v42 = vshrl.u32 %v1918_v21, 16  ;;  %v2159_v22 = vshll.u32 %v1918_v21, 16  ;;  %v3952_v45 = vor.u32 %v3951_v50, %v3948_v23  ;;  %v7888_v11 = vld [vmem:[%s9091_s22 + $0x34] sm:$0xf] }
 0x17b   : > { %v8273_v62 = vcombine.low %v6030_v8, %v6033_v37  ;;  %v3961_v60 = vrot.slane %v3959_v12, 4  ;;  %v10459_v4 = vsel %vm1474_vm7, %v3424_v6, %v3303_v25  ;;  %v2165_v54 = vshll.u32 %v8949_v1, 16  ;;  %v7887_v6 = vld [vmem:[%s9091_s22 + $0x30] sm:$0xf]  ;;  %v7916_v37 = vld [vmem:[%s9091_s22 + $0x38] sm:$0x1] }
 0x17c   : > { %v2158_v55 = vrot.slane %v2156_v42, 4  ;;  %v2161_v34 = vrot.slane %v2159_v22, 5  ;;  %v12906_v40 = vshrl.u32 %v9631_v49, 16  ;;  %v3953_v59 = vrot.slane %v3952_v45, 4  ;;  %v8181_v1 = vld [vmem:[%s9091_s22 + $0x30] sm:$0xf] }
 0x17d   : > { %6833 = vrot.lane.b32.xlu1 %v8273_v62, %s9044_s24  ;;  %v3962_v63 = vor.u32 %v3961_v60, %v3957_v38  ;;  %v3967_v43 = vrot.slane %v3965_v57, 5  ;;  %v4379_v26 = vshrl.u32 %v7933_v3, 16  ;;  %v2167_v9 = vrot.slane %v2165_v54, 5 }
 0x17e   : > { %v2171_v58 = vrot.slane %v12906_v40, 4  ;;  %v2162_v25 = vor.u32 %v2161_v34, %v2158_v55  ;;  %v4382_v16 = vshll.u32 %v7933_v3, 16  ;;  %v4388_v19 = vshll.u32 %v7934_v27, 16 }
 0x17f   : > { %v3958_v13 = vsel %vm9170_vm5, %v3953_v59, %v3957_v38  ;;  %v3963_v21 = vrot.slane %v3962_v63, 4  ;;  %v12907_v49 = vshll.u32 %v9639_v46, 16  ;;  %v10471_v8 = vrot.slane %v4379_v26, 4  ;;  %v3383_v46 = vpop.permute.xlu1 %3382  ;;  %v10486_v63 = vld [vmem:[%s9091_s22 + $0x34] sm:$0xf] }
 0x180   : > { %v2163_v23 = vrot.slane %v2162_v25, 4  ;;  %v2172_v50 = vor.u32 %v2171_v58, %v2167_v9  ;;  %v10474_v12 = vrot.slane %v4382_v16, 5  ;;  %v4392_v57 = vshrl.u32 %v7934_v27, 16  ;;  %v10494_v25 = vld [vmem:[%s9091_s22 + $0x38] sm:$0x1] }
 0x181   : > { %v2177_v7 = vrot.slane %v12907_v49, 5  ;;  %v3968_v42 = vsel %vm9170_vm5, %v3963_v21, %v3967_v43  ;;  %v10479_v22 = vrot.slane %v4388_v19, 5  ;;  %v8011_v38 = vcombine.low %v7933_v3, %v7934_v27  ;;  %v8105_v21 = vld [vmem:[%s9091_s22 + $0x34] sm:$0xf] }
 0x182   : > { %v3970_v62 = vshrl.u32 %v7887_v6, 16  ;;  %v7995_v45 = vcombine.low %v3958_v13, %v3968_v42  ;;  %v2168_v60 = vsel %vm9170_vm5, %v2163_v23, %v2167_v9  ;;  %v2173_v55 = vrot.slane %v2172_v50, 4  ;;  %v3305_v9 = vpop.permute.xlu0 %3304  ;;  %v8106_v42 = vld [vmem:[%s9091_s22 + $0x38] sm:$0x1] }
 0x183   : > { %v3973_v34 = vshll.u32 %v7887_v6, 16  ;;  %4958 = vrot.lane.b32.xlu1 %v8011_v38, %s9043_s23  ;;  %v3979_v40 = vshll.u32 %v7888_v11, 16  ;;  %v3983_v58 = vshrl.u32 %v7888_v11, 16  ;;  %v3989_v59 = vshll.u32 %v7916_v37, 16  ;;  %v3385_v38 = vpop.permute.xlu1 %3384 }
 0x184   : > { %v3972_v54 = vrot.slane %v3970_v62, 4  ;;  %4846 = vrot.lane.b32.xlu0 %v7995_v45, %s9044_s24  ;;  %v2178_v3 = vsel %vm9170_vm5, %v2173_v55, %v2177_v7  ;;  %v4394_v27 = vrot.slane %v4392_v57, 4  ;;  %v1525_v26 = vsel %vm1507_vm8, %v10444_v52, %v1410_v18  ;;  %v8146_v52 = vld [vmem:[%s9091_s22 + $0x30] sm:$0xe] }
 0x185   : > { %v3975_v43 = vrot.slane %v3973_v34, 5  ;;  %v7772_v16 = vcombine.low %v2168_v60, %v2178_v3  ;;  %v3981_v19 = vrot.slane %v3979_v40, 5  ;;  %v3985_v6 = vrot.slane %v3983_v58, 4  ;;  %8468 = vmatprep.mubr.msk.bf16.mxu0 %vm1556_vm9, %v1525_v26  ;;  %v7963_v3 = vld [vmem:[%s9091_s22 + $0x38] sm:$0x1] }
 0x186   : > { %v10498_v13 = vsel %vm1474_vm7, %v10453_v10, %v1332_v14  ;;  %v6222_v7 = vshrl.u32 %v8181_v1, 16  ;;  %v6225_v11 = vshll.u32 %v8181_v1, 16  ;;  %v6231_v23 = vshll.u32 %v10486_v63, 16 }
 0x187   : > { %v3976_v49 = vor.u32 %v3975_v43, %v3972_v54  ;;  %v3986_v18 = vor.u32 %v3985_v6, %v3981_v19  ;;  %v3991_v50 = vrot.slane %v3989_v59, 5  ;;  %v6235_v57 = vshrl.u32 %v10486_v63, 16  ;;  %v1412_v43 = vpop.permute.xlu0 %1411 }
 0x188   : > { %v6241_v37 = vshll.u32 %v10494_v25, 16  ;;  %v6224_v14 = vrot.slane %v6222_v7, 4  ;;  %v6227_v62 = vrot.slane %v6225_v11, 5  ;;  %v6233_v45 = vrot.slane %v6231_v23, 5 }
 0x189   : > { %v3977_v10 = vrot.slane %v3976_v49, 4  ;;  %v3427_v60 = vsel %vm1425_vm6, %v7772_v16, %v10449_v15  ;;  %v3987_v55 = vrot.slane %v3986_v18, 4  ;;  %v6237_v34 = vrot.slane %v6235_v57, 4  ;;  %v7935_v16 = vld [vmem:[%s9091_s22 + $0x3c] sm:$0xf]  ;;  %v10523_v57 = vpop.permute.xlu1 %3226 }
 0x18a   : > { %v8162_v1 = vrot.slane %v8146_v52, 9  ;;  %v6228_v40 = vor.u32 %v6227_v62, %v6224_v14  ;;  %v6036_v58 = vrot.slane %v8105_v21, 5  ;;  %v6039_v59 = vrot.slane %v8106_v42, 5  ;;  %v8225_v62 = vld [vmem:[%s9091_s22 + $0x30] sm:$0xe] }
 0x18b   : > { %v3982_v54 = vsel %vm9170_vm5, %v3977_v10, %v3981_v19  ;;  %v3992_v26 = vsel %vm9170_vm5, %v3987_v55, %v3991_v50  ;;  %v6238_v6 = vor.u32 %v6237_v34, %v6233_v45  ;;  %v6243_v49 = vrot.slane %v6241_v37, 5  ;;  %v7936_v37 = vld [vmem:[%s9091_s22 + $0x40] sm:$0xf] }
 0x18c   : > { %v3495_v15 = vsel %vm1507_vm8, %v10459_v4, %v3383_v46  ;;  %v7996_v7 = vcombine.low %v3982_v54, %v3992_v26  ;;  %v6229_v11 = vrot.slane %v6228_v40, 4  ;;  %v6037_v19 = vsel %vm9119_vm2, %v8162_v1, %v6036_v58  ;;  %v10537_v54 = vpop.permute.xlu0 %1221  ;;  %v8184_v26 = vld [vmem:[%s9091_s22 + $0x3c] sm:$0xf] }
 0x18d   : > { %v6038_v23 = vrot.slane %v6036_v58, 4  ;;  %8504 = vmatprep.mubr.msk.bf16.mxu1 %vm1556_vm9, %v3495_v15  ;;  %v6239_v21 = vrot.slane %v6238_v6, 4  ;;  %v4385_v52 = vor.u32 %v10474_v12, %v10471_v8  ;;  %v4395_v18 = vor.u32 %v4394_v27, %v10479_v22  ;;  %v10546_v6 = vld [vmem:[%s9091_s22 + $0x40] sm:$0xf]  ;;  %v10556_v15 = vld [vmem:[%s9091_s22 + $0x44] sm:$0x1] }
 0x18e   : > { %v4398_v50 = vshll.u32 %v7963_v3, 16  ;;  %4848 = vrot.lane.b32.xlu0 %v7996_v7, %s9044_s24  ;;  %v6234_v4 = vsel %vm9170_vm5, %v6229_v11, %v6233_v45  ;;  %v4403_v42 = vshrl.u32 %v7935_v16, 16  ;;  %v4406_v10 = vshll.u32 %v7935_v16, 16 }
 0x18f   : > { %v6040_v46 = vsel %vm9119_vm2, %v6038_v23, %v6039_v59  ;;  %v6244_v8 = vsel %vm9170_vm5, %v6239_v21, %v6243_v49  ;;  %v4386_v27 = vrot.slane %v4385_v52, 4  ;;  %v4396_v14 = vrot.slane %v4395_v18, 4  ;;  %v1921_v23 = vld [vmem:[%s9091_s22 + $0x78] sm:$0xf]  ;;  %v10564_v21 = vpop.permute.xlu1 %1333 }
 0x190   : > { %v8274_v12 = vcombine.low %v6037_v19, %v6040_v46  ;;  %v8289_v55 = vcombine.low %v6234_v4, %v6244_v8  ;;  %v3465_v34 = vsel %vm1474_vm7, %v3427_v60, %v3305_v9  ;;  %v4400_v45 = vrot.slane %v4398_v50, 5 }
 0x191   : > { %v10535_v1 = vrot.slane %v4403_v42, 4  ;;  %v4391_v40 = vsel %vm9170_vm5, %v4386_v27, %v10479_v22  ;;  %v10542_v58 = vrot.slane %v4406_v10, 5  ;;  %v4412_v59 = vshll.u32 %v7936_v37, 16  ;;  %v10574_v10 = vpop.permute.xlu0 %1223 }
 0x192   : > { %v8012_v3 = vcombine.low %v7935_v16, %v7936_v37  ;;  %6913 = vrot.lane.b32.xlu1 %v8289_v55, %s9043_s23  ;;  %6835 = vrot.lane.b32.xlu0 %v8274_v12, %s9044_s24  ;;  %v4401_v9 = vsel %vm9170_vm5, %v4396_v14, %v4400_v45  ;;  %v3497_v60 = vsel %vm1507_vm8, %v3465_v34, %v3385_v38  ;;  %v8241_v49 = vrot.slane %v8225_v62, 9  ;;  %v8226_v62 = vld [vmem:[%s9091_s22 + $0x3c] sm:$0xe] }
 0x193   : > { %v1527_v22 = vsel %vm1507_vm8, %v10498_v13, %v1412_v43  ;;  %v8027_v16 = vcombine.low %v4391_v40, %v4401_v9  ;;  %v10558_v7 = vrot.slane %v4412_v59, 5  ;;  %v4416_v11 = vshrl.u32 %v7936_v37, 16  ;;  %8505 = vmatmul.mubr.msk.bf16.gmra.mrb[16].mxu1 %vm1556_vm9, %v3497_v60  ;;  %v8950_v40 = vld [vmem:[%s9091_s22 + $0x7c] sm:$0xf] }
 0x194   : > { %v6637_v19 = vrot.slane %v10486_v63, 5  ;;  %8469 = vmatmul.mubr.msk.bf16.gmra.mrb[16].mxu0 %vm1556_vm9, %v1527_v22  ;;  %v6640_v38 = vrot.slane %v10494_v25, 5  ;;  %v6246_v52 = vshrl.u32 %v8184_v26, 16  ;;  %v6249_v13 = vshll.u32 %v8184_v26, 16 }
 0x195   : > { %v6255_v43 = vshll.u32 %v10546_v6, 16  ;;  %v6259_v63 = vshrl.u32 %v10546_v6, 16  ;;  %v6265_v4 = vshll.u32 %v10556_v15, 16  ;;  %v2180_v42 = vshrl.u32 %v1921_v23, 16 }
 0x196   : > { %v6638_v18 = vsel %vm9119_vm2, %v8241_v49, %v6637_v19  ;;  %v6639_v50 = vrot.slane %v6637_v19, 4  ;;  %5038 = vrot.lane.b32.xlu1 %v8027_v16, %s9045_s25  ;;  %4960 = vrot.lane.b32.xlu0 %v8012_v3, %s9043_s23  ;;  %v6248_v46 = vrot.slane %v6246_v52, 4  ;;  %v6251_v25 = vrot.slane %v6249_v13, 5  ;;  %v10582_v49 = vpop.permute.xlu1 %3306  ;;  %v8951_v19 = vld [vmem:[%s9091_s22 + $0x78] sm:$0xf] }
 0x197   : > { %v6257_v37 = vrot.slane %v6255_v43, 5  ;;  %v4418_v8 = vrot.slane %v4416_v11, 4  ;;  %v6261_v27 = vrot.slane %v6259_v63, 4  ;;  %v2183_v14 = vshll.u32 %v1921_v23, 16  ;;  %v8952_v23 = vld [vmem:[%s9091_s22 + $0x7c] sm:$0xf] }
 0x198   : > { %v6641_v12 = vsel %vm9119_vm2, %v6639_v50, %v6640_v38  ;;  %v6252_v34 = vor.u32 %v6251_v25, %v6248_v46  ;;  %v2182_v45 = vrot.slane %v2180_v42, 4  ;;  %v2189_v59 = vshll.u32 %v8950_v40, 16  ;;  %v7964_v25 = vld [vmem:[%s9091_s22 + $0x44] sm:$0x1] }
 0x199   : > { %v8305_v55 = vcombine.low %v6638_v18, %v6641_v12  ;;  %v6262_v3 = vor.u32 %v6261_v27, %v6257_v37  ;;  %v6267_v26 = vrot.slane %v6265_v4, 5  ;;  %v2185_v9 = vrot.slane %v2183_v14, 5  ;;  %v10596_v12 = vpop.permute.xlu0 %3228 }
 0x19a   : > { %v12908_v60 = vshrl.u32 %v9698_v0, 16  ;;  %v6253_v16 = vrot.slane %v6252_v34, 4  ;;  %v2191_v11 = vrot.slane %v2189_v59, 5  ;;  %v7593_v38 = vcombine.low %v8951_v19, %v8952_v23  ;;  %v8147_v34 = vld [vmem:[%s9091_s22 + $0x3c] sm:$0xe] }
 0x19b   : > { %6993 = vrot.lane.b32.xlu1 %v8305_v55, %s9045_s25  ;;  %v8242_v52 = vrot.slane %v8226_v62, 9  ;;  %v6263_v13 = vrot.slane %v6262_v3, 4  ;;  %v2186_v43 = vor.u32 %v2185_v9, %v2182_v45  ;;  %v6644_v18 = vrot.slane %v10546_v6, 5  ;;  %v8108_v3 = vld [vmem:[%s9091_s22 + $0x40] sm:$0xf]  ;;  %v10613_v9 = vpop.permute.xlu1 %1413 }
 0x19c   : > { %v2195_v22 = vrot.slane %v12908_v60, 4  ;;  %v6647_v50 = vrot.slane %v10556_v15, 5  ;;  %v6258_v0 = vsel %vm9170_vm5, %v6253_v16, %v6257_v37  ;;  %v12909_v4 = vshll.u32 %v9709_v17, 16  ;;  %v7890_v16 = vld [vmem:[%s9091_s22 + $0x40] sm:$0xf] }
 0x19d   : > { %v4409_v42 = vor.u32 %v10542_v58, %v10535_v1  ;;  %v6268_v6 = vsel %vm9170_vm5, %v6263_v13, %v6267_v26  ;;  %v2187_v15 = vrot.slane %v2186_v43, 4  ;;  %v6645_v27 = vsel %vm9119_vm2, %v8242_v52, %v6644_v18  ;;  %v7889_v1 = vld [vmem:[%s9091_s22 + $0x3c] sm:$0xf]  ;;  %v8109_v26 = vld [vmem:[%s9091_s22 + $0x44] sm:$0x1] }
 0x19e   : > { %v2196_v63 = vor.u32 %v2195_v22, %v2191_v11  ;;  %v2201_v46 = vrot.slane %v12909_v4, 5  ;;  %v6646_v37 = vrot.slane %v6644_v18, 4  ;;  %v8290_v14 = vcombine.low %v6258_v0, %v6268_v6  ;;  %v8953_v23 = vld [vmem:[%s9091_s22 + $0x84] sm:$0xf]  ;;  %v10626_v4 = vpop.permute.xlu0 %1335 }
 0x19f   : > { %v4410_v17 = vrot.slane %v4409_v42, 4  ;;  %v4419_v55 = vor.u32 %v4418_v8, %v10558_v7  ;;  %v2192_v58 = vsel %vm9170_vm5, %v2187_v15, %v2191_v11  ;;  %v1458_v45 = vsel %vm1425_vm6, %v7593_v38, %v10537_v54  ;;  %v8954_v38 = vld [vmem:[%s9091_s22 + $0x88] sm:$0xf]  ;;  %v1924_v6 = vld [vmem:[%s9091_s22 + $0x84] sm:$0xf] }
 0x1a0   : > { %v2197_v62 = vrot.slane %v2196_v63, 4  ;;  %v6648_v40 = vsel %vm9119_vm2, %v6646_v37, %v6647_v50  ;;  %v4422_v59 = vshll.u32 %v7964_v25, 16  ;;  %6915 = vrot.lane.b32.xlu0 %v8290_v14, %s9043_s23  ;;  %v7594_v52 = vcombine.low %v8953_v23, %v8954_v38  ;;  %v7917_v50 = vld [vmem:[%s9091_s22 + $0x44] sm:$0x1] }
 0x1a1   : > { %v8306_v60 = vcombine.low %v6645_v27, %v6648_v40  ;;  %v4415_v22 = vsel %vm9170_vm5, %v4410_v17, %v10558_v7  ;;  %v4420_v54 = vrot.slane %v4419_v55, 4  ;;  %v8163_v13 = vrot.slane %v8147_v34, 9  ;;  %v10639_v34 = vpop.permute.xlu1 %3386  ;;  %v7937_v40 = vld [vmem:[%s9091_s22 + $0x48] sm:$0xf] }
 0x1a2   : > { %v2202_v8 = vsel %vm9170_vm5, %v2197_v62, %v2201_v46  ;;  %v4424_v19 = vrot.slane %v4422_v59, 5  ;;  %v6043_v43 = vrot.slane %v8108_v3, 5  ;;  %v6046_v18 = vrot.slane %v8109_v26, 5 }
 0x1a3   : > { %v7773_v11 = vcombine.low %v2192_v58, %v2202_v8  ;;  %6995 = vrot.lane.b32.xlu1 %v8306_v60, %s9045_s25  ;;  %v3994_v0 = vshrl.u32 %v7889_v1, 16  ;;  %v3997_v63 = vshll.u32 %v7889_v1, 16  ;;  %v10634_v25 = vsel %vm1474_vm7, %v1458_v45, %v10564_v21  ;;  %v7938_v60 = vld [vmem:[%s9091_s22 + $0x4c] sm:$0xf] }
 0x1a4   : > { %v4425_v46 = vsel %vm9170_vm5, %v4420_v54, %v4424_v19  ;;  %v4003_v42 = vshll.u32 %v7890_v16, 16  ;;  %v6044_v27 = vsel %vm9119_vm2, %v8163_v13, %v6043_v43  ;;  %v6045_v37 = vrot.slane %v6043_v43, 4  ;;  %v10657_v19 = vpop.permute.xlu0 %3308 }
 0x1a5   : > { %v3430_v7 = vsel %vm1425_vm6, %v7773_v11, %v10523_v57  ;;  %v8028_v15 = vcombine.low %v4415_v22, %v4425_v46  ;;  %v3996_v14 = vrot.slane %v3994_v0, 4  ;;  %v3999_v62 = vrot.slane %v3997_v63, 5  ;;  %v7891_v0 = vld [vmem:[%s9091_s22 + $0x48] sm:$0xf]  ;;  %v7892_v46 = vld [vmem:[%s9091_s22 + $0x4c] sm:$0xf] }
 0x1a6   : > { %v4005_v17 = vrot.slane %v4003_v42, 5  ;;  %v4007_v57 = vshrl.u32 %v7890_v16, 16  ;;  %v4013_v55 = vshll.u32 %v7917_v50, 16  ;;  %v10644_v21 = vsel %vm1425_vm6, %v7594_v52, %v10574_v10  ;;  %v8955_v16 = vld [vmem:[%s9091_s22 + $0x88] sm:$0xf]  ;;  %v10668_v42 = vpop.permute.xlu1 %3388 }
 0x1a7   : > { %5040 = vrot.lane.b32.xlu0 %v8028_v15, %s9045_s25  ;;  %v6047_v1 = vsel %vm9119_vm2, %v6045_v37, %v6046_v18  ;;  %v2204_v58 = vshrl.u32 %v1924_v6, 16  ;;  %v2207_v45 = vshll.u32 %v1924_v6, 16  ;;  %v4000_v3 = vor.u32 %v3999_v62, %v3996_v14  ;;  %v7918_v14 = vld [vmem:[%s9091_s22 + $0x50] sm:$0x1] }
 0x1a8   : > { %v8275_v59 = vcombine.low %v6044_v27, %v6047_v1  ;;  %v4009_v26 = vrot.slane %v4007_v57, 4  ;;  %v10651_v8 = vsel %vm1474_vm7, %v3430_v7, %v10582_v49  ;;  %v2213_v10 = vshll.u32 %v8955_v16, 16  ;;  %v10684_v16 = vld [vmem:[%s9091_s22 + $0x4c] sm:$0xf] }
 0x1a9   : > { %v2206_v22 = vrot.slane %v2204_v58, 4  ;;  %v2209_v54 = vrot.slane %v2207_v45, 5  ;;  %v2219_v11 = vrot.slane %v2217_v56, 4  ;;  %v4001_v23 = vrot.slane %v4000_v3, 4  ;;  %v8187_v45 = vld [vmem:[%s9091_s22 + $0x48] sm:$0xf] }
 0x1aa   : > { %6837 = vrot.lane.b32.xlu1 %v8275_v59, %s9044_s24  ;;  %v4010_v38 = vor.u32 %v4009_v26, %v4005_v17  ;;  %v4015_v52 = vrot.slane %v4013_v55, 5  ;;  %v4427_v13 = vshrl.u32 %v7937_v40, 16  ;;  %v2215_v43 = vrot.slane %v2213_v10, 5  ;;  %v10680_v59 = vpop.permute.xlu0 %1415 }
 0x1ab   : > { %v2210_v49 = vor.u32 %v2209_v54, %v2206_v22  ;;  %v4430_v18 = vshll.u32 %v7937_v40, 16  ;;  %v4436_v50 = vshll.u32 %v7938_v60, 16  ;;  %v4006_v63 = vsel %vm9170_vm5, %v4001_v23, %v4005_v17  ;;  %v10693_v23 = vld [vmem:[%s9091_s22 + $0x50] sm:$0x1] }
 0x1ac   : > { %v4011_v28 = vrot.slane %v4010_v38, 4  ;;  %v2225_v56 = vrot.slane %v2223_v47, 5  ;;  %v10665_v7 = vrot.slane %v4427_v13, 4  ;;  %v2220_v15 = vor.u32 %v2219_v11, %v2215_v43 }
 0x1ad   : > { %v2211_v6 = vrot.slane %v2210_v49, 4  ;;  %v10670_v27 = vrot.slane %v4430_v18, 5  ;;  %v4440_v37 = vshrl.u32 %v7938_v60, 16  ;;  %v10675_v17 = vrot.slane %v4436_v50, 5  ;;  %v10702_v18 = vpop.permute.xlu1 %3230 }
 0x1ae   : > { %v4016_v62 = vsel %vm9170_vm5, %v4011_v28, %v4015_v52  ;;  %v8013_v44 = vcombine.low %v7937_v40, %v7938_v60  ;;  %v4018_v47 = vshrl.u32 %v7891_v0, 16  ;;  %v2221_v1 = vrot.slane %v2220_v15, 4 }
 0x1af   : > { %v7997_v57 = vcombine.low %v4006_v63, %v4016_v62  ;;  %v2216_v55 = vsel %vm9170_vm5, %v2211_v6, %v2215_v43  ;;  %v4021_v58 = vshll.u32 %v7891_v0, 16  ;;  %v4027_v26 = vshll.u32 %v7892_v46, 16  ;;  %v8111_v43 = vld [vmem:[%s9091_s22 + $0x4c] sm:$0xf]  ;;  %v10709_v62 = vpop.permute.xlu0 %1225 }
 0x1b0   : > { %4962 = vrot.lane.b32.xlu1 %v8013_v44, %s9043_s23  ;;  %v4020_v3 = vrot.slane %v4018_v47, 4  ;;  %v4031_v22 = vshrl.u32 %v7892_v46, 16  ;;  %v4037_v54 = vshll.u32 %v7918_v14, 16  ;;  %v2226_v40 = vsel %vm9170_vm5, %v2221_v1, %v2225_v56 }
 0x1b1   : > { %4850 = vrot.lane.b32.xlu0 %v7997_v57, %s9044_s24  ;;  %v4442_v60 = vrot.slane %v4440_v37, 4  ;;  %v4023_v10 = vrot.slane %v4021_v58, 5  ;;  %v1529_v11 = vsel %vm1507_vm8, %v10634_v25, %v10613_v9  ;;  %v7774_v38 = vcombine.low %v2216_v55, %v2226_v40  ;;  %v8148_v25 = vld [vmem:[%s9091_s22 + $0x48] sm:$0xe] }
 0x1b2   : > { %v4029_v52 = vrot.slane %v4027_v26, 5  ;;  %v4033_v13 = vrot.slane %v4031_v22, 4  ;;  %v10698_v49 = vsel %vm1474_vm7, %v10644_v21, %v10626_v4  ;;  %8472 = vmatprep.mubr.msk.bf16.mxu0 %vm1556_vm9, %v1529_v11  ;;  %v6270_v0 = vshrl.u32 %v8187_v45, 16  ;;  %v8112_v4 = vld [vmem:[%s9091_s22 + $0x50] sm:$0x1]  ;;  %v10722_v11 = vpop.permute.xlu1 %1337  ;;  %v11023_v30 = vpop.f32.mrb[0].mxu1 }
 0x1b3   : > { %v4024_v50 = vor.u32 %v4023_v10, %v4020_v3  ;;  %v6273_v63 = vshll.u32 %v8187_v45, 16  ;;  %v6279_v9 = vshll.u32 %v10684_v16, 16  ;;  %v4039_v56 = vrot.slane %v4037_v54, 5  ;;  %v7965_v26 = vld [vmem:[%s9091_s22 + $0x50] sm:$0x1] }
 0x1b4   : > { %v4034_v28 = vor.u32 %v4033_v13, %v4029_v52  ;;  %v6283_v46 = vshrl.u32 %v10684_v16, 16  ;;  %v6289_v6 = vshll.u32 %v10693_v23, 16  ;;  %v6272_v15 = vrot.slane %v6270_v0, 4  ;;  %v7939_v10 = vld [vmem:[%s9091_s22 + $0x54] sm:$0xf] }
 0x1b5   : > { %v4025_v21 = vrot.slane %v4024_v50, 4  ;;  %v6275_v37 = vrot.slane %v6273_v63, 5  ;;  %v6281_v14 = vrot.slane %v6279_v9, 5  ;;  %v3433_v44 = vsel %vm1425_vm6, %v7774_v38, %v10596_v12 }
 0x1b6   : > { %v4035_v47 = vrot.slane %v4034_v28, 4  ;;  %v6285_v57 = vrot.slane %v6283_v46, 4  ;;  %v8164_v55 = vrot.slane %v8148_v25, 9  ;;  %v6050_v45 = vrot.slane %v8111_v43, 5  ;;  %v7940_v25 = vld [vmem:[%s9091_s22 + $0x58] sm:$0xf]  ;;  %v10736_v46 = vpop.permute.xlu0 %1227 }
 0x1b7   : > { %v4030_v1 = vsel %vm9170_vm5, %v4025_v21, %v4029_v52  ;;  %v6276_v58 = vor.u32 %v6275_v37, %v6272_v15  ;;  %v6053_v3 = vrot.slane %v8112_v4, 5  ;;  %v6291_v40 = vrot.slane %v6289_v6, 5  ;;  %v8227_v4 = vld [vmem:[%s9091_s22 + $0x48] sm:$0xe] }
 0x1b8   : > { %v4040_v22 = vsel %vm9170_vm5, %v4035_v47, %v4039_v56  ;;  %v6286_v54 = vor.u32 %v6285_v57, %v6281_v14  ;;  %v3499_v12 = vsel %vm1507_vm8, %v10651_v8, %v10639_v34  ;;  %v6051_v52 = vsel %vm9119_vm2, %v8164_v55, %v6050_v45 }
 0x1b9   : > { %v7998_v38 = vcombine.low %v4030_v1, %v4040_v22  ;;  %v6277_v13 = vrot.slane %v6276_v58, 4  ;;  %v6052_v43 = vrot.slane %v6050_v45, 4  ;;  %8508 = vmatprep.mubr.msk.bf16.mxu1 %vm1556_vm9, %v3499_v12  ;;  %v4433_v0 = vor.u32 %v10670_v27, %v10665_v7  ;;  %v8190_v58 = vld [vmem:[%s9091_s22 + $0x54] sm:$0xf]  ;;  %v10752_v45 = vld [vmem:[%s9091_s22 + $0x58] sm:$0xf] }
 0x1ba   : > { %v6287_v50 = vrot.slane %v6286_v54, 4  ;;  %v4443_v63 = vor.u32 %v4442_v60, %v10675_v17  ;;  %v4446_v9 = vshll.u32 %v7965_v26, 16  ;;  %v4451_v28 = vshrl.u32 %v7939_v10, 16  ;;  %v10766_v22 = vld [vmem:[%s9091_s22 + $0x5c] sm:$0x1] }
 0x1bb   : > { %4852 = vrot.lane.b32.xlu0 %v7998_v38, %s9044_s24  ;;  %v6282_v34 = vsel %vm9170_vm5, %v6277_v13, %v6281_v14  ;;  %v6054_v8 = vsel %vm9119_vm2, %v6052_v43, %v6053_v3  ;;  %v4454_v56 = vshll.u32 %v7939_v10, 16  ;;  %v4434_v60 = vrot.slane %v4433_v0, 4  ;;  %v10754_v3 = vpop.permute.xlu1 %3310  ;;  %v1927_v54 = vld [vmem:[%s9091_s22 + $0x90] sm:$0xf] }
 0x1bc   : > { %v6292_v7 = vsel %vm9170_vm5, %v6287_v50, %v6291_v40  ;;  %v8276_v27 = vcombine.low %v6051_v52, %v6054_v8  ;;  %v4444_v6 = vrot.slane %v4443_v63, 4  ;;  %v3469_v15 = vsel %vm1474_vm7, %v3433_v44, %v10657_v19  ;;  %v10782_v50 = vpop.permute.xlu0 %3232 }
 0x1bd   : > { %v8291_v21 = vcombine.low %v6282_v34, %v6292_v7  ;;  %v4448_v37 = vrot.slane %v4446_v9, 5  ;;  %v10743_v14 = vrot.slane %v4451_v28, 4  ;;  %v4439_v47 = vsel %vm9170_vm5, %v4434_v60, %v10675_v17  ;;  %v8228_v60 = vld [vmem:[%s9091_s22 + $0x54] sm:$0xe] }
 0x1be   : > { %v10748_v57 = vrot.slane %v4454_v56, 5  ;;  %v4460_v55 = vshll.u32 %v7940_v25, 16  ;;  %v8014_v1 = vcombine.low %v7939_v10, %v7940_v25  ;;  %v3501_v44 = vsel %vm1507_vm8, %v3469_v15, %v10668_v42  ;;  %v8653_v42 = vld [vmem:[%s12889_s1 + $0x20] sm:$0xff]  }
 0x1bf   : > { %6917 = vrot.lane.b32.xlu1 %v8291_v21, %s9043_s23  ;;  %6839 = vrot.lane.b32.xlu0 %v8276_v27, %s9044_s24  ;;  %v4449_v19 = vsel %vm9170_vm5, %v4444_v6, %v4448_v37  ;;  %v1531_v17 = vsel %vm1507_vm8, %v10698_v49, %v10680_v59  ;;  %v8243_v26 = vrot.slane %v8227_v4, 9  ;;  %v4464_v10 = vshrl.u32 %v7940_v25, 16  ;;  %v8654_v59 = vld [vmem:[%s12889_s1 + $0x30] sm:$0xff]   ;;  %v10793_v6 = vpop.permute.xlu1 %1417 }
 0x1c0   : > { %v8029_v40 = vcombine.low %v4439_v47, %v4449_v19  ;;  %v10769_v12 = vrot.slane %v4460_v55, 5  ;;  %v6651_v38 = vrot.slane %v10684_v16, 5  ;;  %8473 = vmatmul.mubr.msk.bf16.gmra.mrb[20].mxu0 %vm1556_vm9, %v1531_v17  ;;  %8509 = vmatmul.mubr.msk.bf16.gmra.mrb[20].mxu1 %vm1556_vm9, %v3501_v44  ;;  %v6654_v49 = vrot.slane %v10693_v23, 5  ;;  %v8956_v37 = vld [vmem:[%s9091_s22 + $0x94] sm:$0xf]  ;;  %v8655_v44 = vld [vmem:[%s12889_s1 + $0x28] sm:$0xff]  }
 0x1c1   : > { %v6294_v13 = vshrl.u32 %v8190_v58, 16  ;;  %v6297_v52 = vshll.u32 %v8190_v58, 16  ;;  %v6303_v43 = vshll.u32 %v10752_v45, 16  ;;  %v6307_v63 = vshrl.u32 %v10752_v45, 16  ;;  %8520 = vmatprep.subr.bf16.mxu0 %v8653_v42  ;;  %8556 = vmatprep.subr.bf16.mxu1 %v8654_v59  ;;  %v8656_v17 = vld [vmem:[%s12889_s1 + $0x38] sm:$0xff]  }
 0x1c2   : > { %v6652_v16 = vsel %vm9119_vm2, %v8243_v26, %v6651_v38  ;;  %v6653_v0 = vrot.slane %v6651_v38, 4  ;;  %v6313_v9 = vshll.u32 %v10766_v22, 16  ;;  %v2228_v25 = vshrl.u32 %v1927_v54, 16  ;;  %8521 = vmatpush3.bf16.msra.mxu0 %v8653_v42  ;;  %8557 = vmatpush3.bf16.msra.mxu1 %v8654_v59  ;;  %v10807_v59 = vpop.permute.xlu0 %1339 }
 0x1c3   : > { %5042 = vrot.lane.b32.xlu1 %v8029_v40, %s9045_s25  ;;  %4964 = vrot.lane.b32.xlu0 %v8014_v1, %s9043_s23  ;;  %v6296_v23 = vrot.slane %v6294_v13, 4  ;;  %v6299_v34 = vrot.slane %v6297_v52, 5  ;;  %v6305_v8 = vrot.slane %v6303_v43, 5  ;;  %v4466_v28 = vrot.slane %v4464_v10, 4  ;;  %v8957_v40 = vld [vmem:[%s9091_s22 + $0x90] sm:$0xf] }
 0x1c4   : > { %v6655_v56 = vsel %vm9119_vm2, %v6653_v0, %v6654_v49  ;;  %v6309_v7 = vrot.slane %v6307_v63, 4  ;;  %v2231_v27 = vshll.u32 %v1927_v54, 16  ;;  %v2230_v15 = vrot.slane %v2228_v25, 4  ;;  %v8958_v10 = vld [vmem:[%s9091_s22 + $0x94] sm:$0xf]  ;;  %8522 = vmatprep.subr.bf16.mxu0 %v8655_v44  ;;  %8558 = vmatprep.subr.bf16.mxu1 %v8656_v17 }
 0x1c5   : > { %v8307_v4 = vcombine.low %v6652_v16, %v6655_v56  ;;  %v6300_v21 = vor.u32 %v6299_v34, %v6296_v23  ;;  %v2237_v47 = vshll.u32 %v8956_v37, 16  ;;  %v6315_v1 = vrot.slane %v6313_v9, 5  ;;  %v7966_v0 = vld [vmem:[%s9091_s22 + $0x5c] sm:$0x1]  ;;  %v10822_v34 = vpop.permute.xlu1 %3390  ;;  %v7893_v25 = vld [vmem:[%s9091_s22 + $0x54] sm:$0xf] }
 0x1c6   : > { %v6310_v55 = vor.u32 %v6309_v7, %v6305_v8  ;;  %v2233_v58 = vrot.slane %v2231_v27, 5  ;;  %v2243_v19 = vrot.slane %v2241_v51, 4  ;;  %v7595_v38 = vcombine.low %v8957_v40, %v8958_v10  ;;  %8523 = vmatpush3.bf16.msra.mxu0 %v8655_v44  ;;  %8559 = vmatpush3.bf16.msra.mxu1 %v8656_v17  ;;  %v8960_v44 = vld [vmem:[%s9091_s22 + $0xa0] sm:$0xf]  ;;  %v7919_v10 = vld [vmem:[%s9091_s22 + $0x5c] sm:$0x1] }
 0x1c7   : > { %6997 = vrot.lane.b32.xlu1 %v8307_v4, %s9045_s25  ;;  %v6301_v26 = vrot.slane %v6300_v21, 4  ;;  %v2239_v54 = vrot.slane %v2237_v47, 5  ;;  %v8244_v42 = vrot.slane %v8228_v60, 9  ;;  %v6658_v49 = vrot.slane %v10752_v45, 5  ;;  %v8114_v4 = vld [vmem:[%s9091_s22 + $0x58] sm:$0xf] }
 0x1c8   : > { %v6311_v2 = vrot.slane %v6310_v55, 4  ;;  %v2234_v51 = vor.u32 %v2233_v58, %v2230_v15  ;;  %v6661_v13 = vrot.slane %v10766_v22, 5  ;;  %v2249_v16 = vrot.slane %v2247_v61, 5  ;;  %v8115_v21 = vld [vmem:[%s9091_s22 + $0x5c] sm:$0x1] }
 0x1c9   : > { %v6306_v52 = vsel %vm9170_vm5, %v6301_v26, %v6305_v8  ;;  %v2244_v43 = vor.u32 %v2243_v19, %v2239_v54  ;;  %v4457_v63 = vor.u32 %v10748_v57, %v10743_v14  ;;  %v6659_v9 = vsel %vm9119_vm2, %v8244_v42, %v6658_v49  ;;  %v8149_v57 = vld [vmem:[%s9091_s22 + $0x54] sm:$0xe]  ;;  %v7894_v55 = vld [vmem:[%s9091_s22 + $0x58] sm:$0xf]  ;;  %v8959_v19 = vld [vmem:[%s9091_s22 + $0x9c] sm:$0xf] }
 0x1ca   : > { %v6316_v45 = vsel %vm9170_vm5, %v6311_v2, %v6315_v1  ;;  %v2235_v22 = vrot.slane %v2234_v51, 4  ;;  %v6660_v23 = vrot.slane %v6658_v49, 4  ;;  %v4467_v14 = vor.u32 %v4466_v28, %v10769_v12 }
 0x1cb   : > { %v8292_v31 = vcombine.low %v6306_v52, %v6316_v45  ;;  %v2245_v61 = vrot.slane %v2244_v43, 4  ;;  %v4458_v8 = vrot.slane %v4457_v63, 4  ;;  %v1464_v7 = vsel %vm1425_vm6, %v7595_v38, %v10709_v62  ;;  %v10842_v62 = vpop.permute.xlu0 %3312  ;;  %v10857_v52 = vpop.permute.xlu1 %3392 }
 0x1cc   : > { %v2240_v56 = vsel %vm9170_vm5, %v2235_v22, %v2239_v54  ;;  %v6662_v27 = vsel %vm9119_vm2, %v6660_v23, %v6661_v13  ;;  %v4470_v60 = vshll.u32 %v7966_v0, 16  ;;  %v4468_v47 = vrot.slane %v4467_v14, 4  ;;  %v1930_v13 = vld [vmem:[%s9091_s22 + $0x9c] sm:$0xf] }
 0x1cd   : > { %6919 = vrot.lane.b32.xlu0 %v8292_v31, %s9043_s23  ;;  %v2250_v28 = vsel %vm9170_vm5, %v2245_v61, %v2249_v16  ;;  %v8308_v15 = vcombine.low %v6659_v9, %v6662_v27  ;;  %v4463_v37 = vsel %vm9170_vm5, %v4458_v8, %v10769_v12  ;;  %v7596_v17 = vcombine.low %v8959_v19, %v8960_v44  ;;  %v7941_v8 = vld [vmem:[%s9091_s22 + $0x60] sm:$0xf]  ;;  %v7942_v27 = vld [vmem:[%s9091_s22 + $0x64] sm:$0xf] }
 0x1ce   : > { %v7775_v1 = vcombine.low %v2240_v56, %v2250_v28  ;;  %v4472_v58 = vrot.slane %v4470_v60, 5  ;;  %v8165_v26 = vrot.slane %v8149_v57, 9  ;;  %v6057_v54 = vrot.slane %v8114_v4, 5  ;;  %v8961_v4 = vld [vmem:[%s9091_s22 + $0xa0] sm:$0xf] }
 0x1cf   : > { %6999 = vrot.lane.b32.xlu1 %v8308_v15, %s9045_s25  ;;  %v6060_v40 = vrot.slane %v8115_v21, 5  ;;  %v4042_v38 = vshrl.u32 %v7893_v25, 16  ;;  %v4045_v42 = vshll.u32 %v7893_v25, 16  ;;  %v10854_v51 = vsel %vm1474_vm7, %v1464_v7, %v10722_v11  ;;  %v10869_v14 = vpop.permute.xlu0 %1419 }
 0x1d0   : > { %v3436_v12 = vsel %vm1425_vm6, %v7775_v1, %v10702_v18  ;;  %v4473_v2 = vsel %vm9170_vm5, %v4468_v47, %v4472_v58  ;;  %v4051_v49 = vshll.u32 %v7894_v55, 16  ;;  %v6058_v16 = vsel %vm9119_vm2, %v8165_v26, %v6057_v54  ;;  %v10880_v1 = vpop.permute.xlu1 %3234 }
 0x1d1   : > { %v8030_v43 = vcombine.low %v4463_v37, %v4473_v2  ;;  %v6059_v0 = vrot.slane %v6057_v54, 4  ;;  %v4044_v63 = vrot.slane %v4042_v38, 4  ;;  %v4047_v18 = vrot.slane %v4045_v42, 5  ;;  %v7920_v2 = vld [vmem:[%s9091_s22 + $0x68] sm:$0x1] }
 0x1d2   : > { %v4053_v45 = vrot.slane %v4051_v49, 5  ;;  %v4055_v22 = vshrl.u32 %v7894_v55, 16  ;;  %v4061_v9 = vshll.u32 %v7919_v10, 16  ;;  %v10864_v11 = vsel %vm1425_vm6, %v7596_v17, %v10736_v46  ;;  %v7895_v17 = vld [vmem:[%s9091_s22 + $0x60] sm:$0xf] }
 0x1d3   : > { %5044 = vrot.lane.b32.xlu0 %v8030_v43, %s9045_s25  ;;  %v6061_v23 = vsel %vm9119_vm2, %v6059_v0, %v6060_v40  ;;  %v2252_v31 = vshrl.u32 %v1930_v13, 16  ;;  %v2255_v61 = vshll.u32 %v1930_v13, 16  ;;  %v4048_v25 = vor.u32 %v4047_v18, %v4044_v63  ;;  %v7896_v40 = vld [vmem:[%s9091_s22 + $0x64] sm:$0xf]  ;;  %v10893_v49 = vpop.permute.xlu0 %1229 }
 0x1d4   : > { %v8277_v57 = vcombine.low %v6058_v16, %v6061_v23  ;;  %v4057_v56 = vrot.slane %v4055_v22, 4  ;;  %v10873_v7 = vsel %vm1474_vm7, %v3436_v12, %v10754_v3  ;;  %v2261_v21 = vshll.u32 %v8961_v4, 16 }
 0x1d5   : > { %v2254_v60 = vrot.slane %v2252_v31, 4  ;;  %v2257_v46 = vrot.slane %v2255_v61, 5  ;;  %v2267_v28 = vrot.slane %v2265_v5, 4  ;;  %v4049_v15 = vrot.slane %v4048_v25, 4  ;;  %v10904_v61 = vld [vmem:[%s9091_s22 + $0x64] sm:$0xf] }
 0x1d6   : > { %6841 = vrot.lane.b32.xlu1 %v8277_v57, %s9044_s24  ;;  %v4058_v37 = vor.u32 %v4057_v56, %v4053_v45  ;;  %v4063_v47 = vrot.slane %v4061_v9, 5  ;;  %v4475_v55 = vshrl.u32 %v7941_v8, 16  ;;  %v2263_v58 = vrot.slane %v2261_v21, 5  ;;  %v10906_v57 = vpop.permute.xlu1 %1341 }
 0x1d7   : > { %v2258_v3 = vor.u32 %v2257_v46, %v2254_v60  ;;  %v4478_v19 = vshll.u32 %v7941_v8, 16  ;;  %v4484_v44 = vshll.u32 %v7942_v27, 16  ;;  %v4054_v26 = vsel %vm9170_vm5, %v4049_v15, %v4053_v45  ;;  %v8193_v45 = vld [vmem:[%s9091_s22 + $0x60] sm:$0xf]  ;;  %v10915_v60 = vld [vmem:[%s9091_s22 + $0x68] sm:$0x1] }
 0x1d8   : > { %v4059_v29 = vrot.slane %v4058_v37, 4  ;;  %v2273_v5 = vrot.slane %v2271_v35, 5  ;;  %v10887_v54 = vrot.slane %v4475_v55, 4  ;;  %v2268_v38 = vor.u32 %v2267_v28, %v2263_v58  ;;  %v8117_v15 = vld [vmem:[%s9091_s22 + $0x64] sm:$0xf] }
 0x1d9   : > { %v2259_v10 = vrot.slane %v2258_v3, 4  ;;  %v10890_v42 = vrot.slane %v4478_v19, 5  ;;  %v4488_v12 = vshrl.u32 %v7942_v27, 16  ;;  %v10897_v43 = vrot.slane %v4484_v44, 5 }
 0x1da   : > { %v4064_v13 = vsel %vm9170_vm5, %v4059_v29, %v4063_v47  ;;  %v8015_v20 = vcombine.low %v7941_v8, %v7942_v27  ;;  %v4066_v35 = vshrl.u32 %v7895_v17, 16  ;;  %v2269_v63 = vrot.slane %v2268_v38, 4 }
 0x1db   : > { %v7999_v16 = vcombine.low %v4054_v26, %v4064_v13  ;;  %v2264_v0 = vsel %vm9170_vm5, %v2259_v10, %v2263_v58  ;;  %v4069_v18 = vshll.u32 %v7895_v17, 16  ;;  %v4075_v9 = vshll.u32 %v7896_v40, 16 }
 0x1dc   : > { %4966 = vrot.lane.b32.xlu1 %v8015_v20, %s9043_s23  ;;  %v4068_v22 = vrot.slane %v4066_v35, 4  ;;  %v4079_v23 = vshrl.u32 %v7896_v40, 16  ;;  %v4085_v31 = vshll.u32 %v7920_v2, 16  ;;  %v2274_v8 = vsel %vm9170_vm5, %v2269_v63, %v2273_v5  ;;  %v10933_v2 = vpop.permute.xlu1 %3314 }
 0x1dd   : > { %4854 = vrot.lane.b32.xlu0 %v7999_v16, %s9044_s24  ;;  %v4490_v25 = vrot.slane %v4488_v12, 4  ;;  %v4071_v56 = vrot.slane %v4069_v18, 5  ;;  %v1533_v27 = vsel %vm1507_vm8, %v10854_v51, %v10793_v6  ;;  %v7776_v46 = vcombine.low %v2264_v0, %v2274_v8  ;;  %v8150_v6 = vld [vmem:[%s9091_s22 + $0x60] sm:$0xe]  ;;  %v10926_v51 = vpop.permute.xlu0 %1231  ;;  %v7967_v0 = vld [vmem:[%s9091_s22 + $0x68] sm:$0x1] }
 0x1de   : > { %v4077_v4 = vrot.slane %v4075_v9, 5  ;;  %v4081_v21 = vrot.slane %v4079_v23, 4  ;;  %v10920_v28 = vsel %vm1474_vm7, %v10864_v11, %v10807_v59  ;;  %8476 = vmatprep.mubr.msk.bf16.mxu0 %vm1556_vm9, %v1533_v27  ;;  %v6318_v47 = vshrl.u32 %v8193_v45, 16  ;;  %v8118_v59 = vld [vmem:[%s9091_s22 + $0x68] sm:$0x1] }
 0x1df   : > { %v4072_v37 = vor.u32 %v4071_v56, %v4068_v22  ;;  %v6321_v55 = vshll.u32 %v8193_v45, 16  ;;  %v6327_v3 = vshll.u32 %v10904_v61, 16  ;;  %v4087_v19 = vrot.slane %v4085_v31, 5  ;;  %v7943_v22 = vld [vmem:[%s9091_s22 + $0x6c] sm:$0xf] }
 0x1e0   : > { %v4082_v58 = vor.u32 %v4081_v21, %v4077_v4  ;;  %v6331_v44 = vshrl.u32 %v10904_v61, 16  ;;  %v6337_v17 = vshll.u32 %v10915_v60, 16  ;;  %v6320_v26 = vrot.slane %v6318_v47, 4 }
 0x1e1   : > { %v4073_v11 = vrot.slane %v4072_v37, 4  ;;  %v6323_v29 = vrot.slane %v6321_v55, 5  ;;  %v6329_v5 = vrot.slane %v6327_v3, 5  ;;  %v3439_v40 = vsel %vm1425_vm6, %v7776_v46, %v10782_v50  ;;  %v10947_v56 = vpop.permute.xlu0 %3236  ;;  %v8229_v3 = vld [vmem:[%s9091_s22 + $0x60] sm:$0xe] }
 0x1e2   : > { %v4083_v10 = vrot.slane %v4082_v58, 4  ;;  %v6333_v38 = vrot.slane %v6331_v44, 4  ;;  %v8166_v12 = vrot.slane %v8150_v6, 9  ;;  %v6064_v35 = vrot.slane %v8117_v15, 5  ;;  %v7944_v15 = vld [vmem:[%s9091_s22 + $0x70] sm:$0xf]  ;;  %v10961_v6 = vpop.permute.xlu1 %1421 }
 0x1e3   : > { %v4078_v13 = vsel %vm9170_vm5, %v4073_v11, %v4077_v4  ;;  %v6324_v20 = vor.u32 %v6323_v29, %v6320_v26  ;;  %v6067_v16 = vrot.slane %v8118_v59, 5  ;;  %v6339_v45 = vrot.slane %v6337_v17, 5 }
 0x1e4   : > { %v4088_v63 = vsel %vm9170_vm5, %v4083_v10, %v4087_v19  ;;  %v6334_v18 = vor.u32 %v6333_v38, %v6329_v5  ;;  %v3503_v50 = vsel %vm1507_vm8, %v10873_v7, %v10822_v34  ;;  %v6065_v31 = vsel %vm9119_vm2, %v8166_v12, %v6064_v35  ;;  %v10974_v10 = vld [vmem:[%s9091_s22 + $0x70] sm:$0xf]  ;;  %v10986_v12 = vld [vmem:[%s9091_s22 + $0x74] sm:$0x1] }
 0x1e5   : > { %v8000_v9 = vcombine.low %v4078_v13, %v4088_v63  ;;  %v6325_v23 = vrot.slane %v6324_v20, 4  ;;  %v6066_v8 = vrot.slane %v6064_v35, 4  ;;  %8512 = vmatprep.mubr.msk.bf16.mxu1 %vm1556_vm9, %v3503_v50  ;;  %v4481_v46 = vor.u32 %v10890_v42, %v10887_v54  ;;  %v10988_v13 = vpop.permute.xlu0 %1343 }
 0x1e6   : > { %v6335_v27 = vrot.slane %v6334_v18, 4  ;;  %v4491_v4 = vor.u32 %v4490_v25, %v10897_v43  ;;  %v4494_v21 = vshll.u32 %v7967_v0, 16  ;;  %v4499_v37 = vshrl.u32 %v7943_v22, 16 }
 0x1e7   : > { %4856 = vrot.lane.b32.xlu0 %v8000_v9, %s9044_s24  ;;  %v6330_v34 = vsel %vm9170_vm5, %v6325_v23, %v6329_v5  ;;  %v6068_v7 = vsel %vm9119_vm2, %v6066_v8, %v6067_v16  ;;  %v4502_v47 = vshll.u32 %v7943_v22, 16  ;;  %v4482_v42 = vrot.slane %v4481_v46, 4  ;;  %v8196_v5 = vld [vmem:[%s9091_s22 + $0x6c] sm:$0xf]  ;;  %v11002_v9 = vpop.permute.xlu1 %3394 }
 0x1e8   : > { %v6340_v55 = vsel %vm9170_vm5, %v6335_v27, %v6339_v45  ;;  %v8278_v54 = vcombine.low %v6065_v31, %v6068_v7  ;;  %v4492_v25 = vrot.slane %v4491_v4, 4  ;;  %v3473_v19 = vsel %vm1474_vm7, %v3439_v40, %v10842_v62 }
 0x1e9   : > { %v8293_v58 = vcombine.low %v6330_v34, %v6340_v55  ;;  %v4496_v44 = vrot.slane %v4494_v21, 5  ;;  %v10965_v17 = vrot.slane %v4499_v37, 4  ;;  %v4487_v59 = vsel %vm9170_vm5, %v4482_v42, %v10897_v43  ;;  %v8230_v34 = vld [vmem:[%s9091_s22 + $0x6c] sm:$0xe]  ;;  %v11012_v42 = vpop.f32.mrb[0].mxu0 }
 0x1ea   : > { %v10970_v11 = vrot.slane %v4502_v47, 5  ;;  %v4508_v26 = vshll.u32 %v7944_v15, 16  ;;  %v8016_v29 = vcombine.low %v7943_v22, %v7944_v15  ;;  %v3505_v40 = vsel %vm1507_vm8, %v3473_v19, %v10857_v52  ;;  %v1933_v52 = vld [vmem:[%s9091_s22 + $0xa8] sm:$0xf]  ;;  %v8962_v47 = vld [vmem:[%s9091_s22 + $0xac] sm:$0xf] }
 0x1eb   : > { %6921 = vrot.lane.b32.xlu1 %v8293_v58, %s9043_s23  ;;  %6843 = vrot.lane.b32.xlu0 %v8278_v54, %s9044_s24  ;;  %v4497_v62 = vsel %vm9170_vm5, %v4492_v25, %v4496_v44  ;;  %v1535_v43 = vsel %vm1507_vm8, %v10920_v28, %v10869_v14  ;;  %v8245_v38 = vrot.slane %v8229_v3, 9  ;;  %v4512_v16 = vshrl.u32 %v7944_v15, 16  ;;  %v11010_v54 = vpop.permute.xlu0 %3316 }
 0x1ec   : > { %v8031_v20 = vcombine.low %v4487_v59, %v4497_v62  ;;  %v10990_v35 = vrot.slane %v4508_v26, 5  ;;  %v6665_v0 = vrot.slane %v10904_v61, 5  ;;  %8477 = vmatmul.mubr.msk.bf16.gmra.mrb[24].mxu0 %vm1556_vm9, %v1535_v43  ;;  %8513 = vmatmul.mubr.msk.bf16.gmra.mrb[24].mxu1 %vm1556_vm9, %v3505_v40  ;;  %v6668_v63 = vrot.slane %v10915_v60, 5  ;;  %v8963_v26 = vld [vmem:[%s9091_s22 + $0xa8] sm:$0xf] }
 0x1ed   : > { %v6342_v18 = vshrl.u32 %v8196_v5, 16  ;;  %v6345_v14 = vshll.u32 %v8196_v5, 16  ;;  %v6351_v28 = vshll.u32 %v10974_v10, 16  ;;  %v6355_v22 = vshrl.u32 %v10974_v10, 16 }
 0x1ee   : > { %v6666_v45 = vsel %vm9119_vm2, %v8245_v38, %v6665_v0  ;;  %v6667_v50 = vrot.slane %v6665_v0, 4  ;;  %v6361_v61 = vshll.u32 %v10986_v12, 16  ;;  %v2276_v8 = vshrl.u32 %v1933_v52, 16 }
 0x1ef   : > { %5046 = vrot.lane.b32.xlu1 %v8031_v20, %s9045_s25  ;;  %4968 = vrot.lane.b32.xlu0 %v8016_v29, %s9043_s23  ;;  %v6344_v60 = vrot.slane %v6342_v18, 4  ;;  %v6347_v23 = vrot.slane %v6345_v14, 5  ;;  %v6353_v31 = vrot.slane %v6351_v28, 5  ;;  %v4514_v27 = vrot.slane %v4512_v16, 4  ;;  %v8964_v29 = vld [vmem:[%s9091_s22 + $0xac] sm:$0xf]  ;;  %v11021_v16 = vpop.permute.xlu1 %3396 }
 0x1f0   : > { %v6669_v46 = vsel %vm9119_vm2, %v6667_v50, %v6668_v63  ;;  %v6357_v4 = vrot.slane %v6355_v22, 4  ;;  %v2279_v21 = vshll.u32 %v1933_v52, 16  ;;  %v2278_v37 = vrot.slane %v2276_v8, 4  ;;  %v7968_v18 = vld [vmem:[%s9091_s22 + $0x74] sm:$0x1]  ;;  %v11034_v28 = vpop.f32.mrb[1].mxu1 }
 0x1f1   : > { %v8309_v7 = vcombine.low %v6666_v45, %v6669_v46  ;;  %v6348_v15 = vor.u32 %v6347_v23, %v6344_v60  ;;  %v2285_v55 = vshll.u32 %v8962_v47, 16  ;;  %v6363_v3 = vrot.slane %v6361_v61, 5  ;;  %v7897_v61 = vld [vmem:[%s9091_s22 + $0x6c] sm:$0xf]  ;;  %v11046_v46 = vpop.permute.xlu0 %1423 }
 0x1f2   : > { %v6358_v25 = vor.u32 %v6357_v4, %v6353_v31  ;;  %v2281_v58 = vrot.slane %v2279_v21, 5  ;;  %v2291_v19 = vrot.slane %v2289_v32, 4  ;;  %v7597_v5 = vcombine.low %v8963_v26, %v8964_v29  ;;  %v8151_v8 = vld [vmem:[%s9091_s22 + $0x6c] sm:$0xe]  ;;  %v11048_v4 = vpop.f32.mrb[2].mxu1 }
 0x1f3   : > { %7001 = vrot.lane.b32.xlu1 %v8309_v7, %s9045_s25  ;;  %v6349_v44 = vrot.slane %v6348_v15, 4  ;;  %v2287_v59 = vrot.slane %v2285_v55, 5  ;;  %v8246_v62 = vrot.slane %v8230_v34, 9  ;;  %v6672_v38 = vrot.slane %v10974_v10, 5  ;;  %v11032_v10 = vpop.f32.mrb[1].mxu0  ;;  %v11059_v47 = vpop.f32.mrb[3].mxu1 }
 0x1f4   : > { %v6359_v40 = vrot.slane %v6358_v25, 4  ;;  %v2282_v43 = vor.u32 %v2281_v58, %v2278_v37  ;;  %v6675_v20 = vrot.slane %v10986_v12, 5  ;;  %v12910_v52 = vshll.u32 %v10081_v39, 16  ;;  %v8120_v39 = vld [vmem:[%s9091_s22 + $0x70] sm:$0xf]  ;;  %v11042_v60 = vpop.f32.mrb[2].mxu0 }
 0x1f5   : > { %v6354_v32 = vsel %vm9170_vm5, %v6349_v44, %v6353_v31  ;;  %v2292_v0 = vor.u32 %v2291_v19, %v2287_v59  ;;  %v4505_v14 = vor.u32 %v10970_v11, %v10965_v17  ;;  %v6673_v50 = vsel %vm9119_vm2, %v8246_v62, %v6672_v38  ;;  %v8121_v37 = vld [vmem:[%s9091_s22 + $0x74] sm:$0x1]  ;;  %v7898_v58 = vld [vmem:[%s9091_s22 + $0x70] sm:$0xf]  ;;  %v8966_v26 = vld [vmem:[%s9091_s22 + $0xb8] sm:$0xf] }
 0x1f6   : > { %v2297_v63 = vrot.slane %v12910_v52, 5  ;;  %v6364_v12 = vsel %vm9170_vm5, %v6359_v40, %v6363_v3  ;;  %v2283_v45 = vrot.slane %v2282_v43, 4  ;;  %v6674_v22 = vrot.slane %v6672_v38, 4  ;;  %v7921_v43 = vld [vmem:[%s9091_s22 + $0x74] sm:$0x1] }
 0x1f7   : > { %v8294_v23 = vcombine.low %v6354_v32, %v6364_v12  ;;  %v2293_v31 = vrot.slane %v2292_v0, 4  ;;  %v4506_v17 = vrot.slane %v4505_v14, 4  ;;  %v4515_v11 = vor.u32 %v4514_v27, %v10990_v35  ;;  %v11057_v27 = vpop.f32.mrb[3].mxu0  ;;  %v11072_v32 = vpop.permute.xlu1 %6829 }
 0x1f8   : > { %v2288_v21 = vsel %vm9170_vm5, %v2283_v45, %v2287_v59  ;;  %v1470_v34 = vsel %vm1425_vm6, %v7597_v5, %v10893_v49  ;;  %v6676_v7 = vsel %vm9119_vm2, %v6674_v22, %v6675_v20  ;;  %v4518_v15 = vshll.u32 %v7968_v18, 16  ;;  %v8965_v59 = vld [vmem:[%s9091_s22 + $0xb4] sm:$0xf]  ;;  %v11085_v22 = vpop.permute.xlu0 %4842 }
 0x1f9   : > { %6923 = vrot.lane.b32.xlu0 %v8294_v23, %s9043_s23  ;;  %v2298_v55 = vsel %vm9170_vm5, %v2293_v31, %v2297_v63  ;;  %v8310_v25 = vcombine.low %v6673_v50, %v6676_v7  ;;  %v4511_v49 = vsel %vm9170_vm5, %v4506_v17, %v10990_v35  ;;  %v4516_v3 = vrot.slane %v4515_v11, 4  ;;  %v1936_v18 = vld [vmem:[%s9091_s22 + $0xb4] sm:$0xf] }
 0x1fa   : > { %v7777_v19 = vcombine.low %v2288_v21, %v2298_v55  ;;  %v4520_v44 = vrot.slane %v4518_v15, 5  ;;  %v7598_v29 = vcombine.low %v8965_v59, %v8966_v26  ;;  %v8167_v5 = vrot.slane %v8151_v8, 9  ;;  %v7945_v8 = vld [vmem:[%s9091_s22 + $0x78] sm:$0xf] }
 0x1fb   : > { %7003 = vrot.lane.b32.xlu1 %v8310_v25, %s9045_s25  ;;  %v6071_v62 = vrot.slane %v8120_v39, 5  ;;  %v6074_v40 = vrot.slane %v8121_v37, 5  ;;  %v4090_v38 = vshrl.u32 %v7897_v61, 16  ;;  %v4093_v20 = vshll.u32 %v7897_v61, 16  ;;  %v7946_v37 = vld [vmem:[%s9091_s22 + $0x7c] sm:$0xf] }
 0x1fc   : > { %v3442_v35 = vsel %vm1425_vm6, %v7777_v19, %v10880_v1  ;;  %v4521_v0 = vsel %vm9170_vm5, %v4516_v3, %v4520_v44  ;;  %v11080_v52 = vsel %vm1474_vm7, %v1470_v34, %v10906_v57  ;;  %v4099_v63 = vshll.u32 %v7898_v58, 16  ;;  %v11103_v19 = vpop.permute.xlu1 %4954 }
 0x1fd   : > { %v8032_v14 = vcombine.low %v4511_v49, %v4521_v0  ;;  %v6072_v12 = vsel %vm9119_vm2, %v8167_v5, %v6071_v62  ;;  %v6073_v45 = vrot.slane %v6071_v62, 4  ;;  %v4092_v50 = vrot.slane %v4090_v38, 4  ;;  %v8967_v49 = vld [vmem:[%s9091_s22 + $0xb8] sm:$0xf]  ;;  %v11107_v38 = vpop.permute.xlu0 %4844 }
 0x1fe   : > { %v4095_v1 = vrot.slane %v4093_v20, 5  ;;  %v4101_v39 = vrot.slane %v4099_v63, 5  ;;  %v4103_v61 = vshrl.u32 %v7898_v58, 16  ;;  %v4109_v23 = vshll.u32 %v7921_v43, 16  ;;  %v7899_v43 = vld [vmem:[%s9091_s22 + $0x78] sm:$0xf] }
 0x1ff   : > { %5048 = vrot.lane.b32.xlu0 %v8032_v14, %s9045_s25  ;;  %v11090_v57 = vsel %vm1425_vm6, %v7598_v29, %v10926_v51  ;;  %v6075_v31 = vsel %vm9119_vm2, %v6073_v45, %v6074_v40  ;;  %v2300_v17 = vshrl.u32 %v1936_v18, 16  ;;  %v2303_v11 = vshll.u32 %v1936_v18, 16  ;;  %v7900_v18 = vld [vmem:[%s9091_s22 + $0x7c] sm:$0xf] }
 0x200   : > { %v8279_v21 = vcombine.low %v6072_v12, %v6075_v31  ;;  %v4096_v34 = vor.u32 %v4095_v1, %v4092_v50  ;;  %v4105_v7 = vrot.slane %v4103_v61, 4  ;;  %v11097_v15 = vsel %vm1474_vm7, %v3442_v35, %v10933_v2  ;;  %v7922_v1 = vld [vmem:[%s9091_s22 + $0x80] sm:$0x1] }
 0x201   : > { %v2302_v55 = vrot.slane %v2300_v17, 4  ;;  %v2305_v25 = vrot.slane %v2303_v11, 5  ;;  %v2309_v51 = vshll.u32 %v8967_v49, 16  ;;  %v12911_v3 = vshrl.u32 %v10156_v41, 16 }
 0x202   : > { %6845 = vrot.lane.b32.xlu1 %v8279_v21, %s9044_s24  ;;  %v4097_v44 = vrot.slane %v4096_v34, 4  ;;  %v4106_v59 = vor.u32 %v4105_v7, %v4101_v39  ;;  %v4111_v26 = vrot.slane %v4109_v23, 5  ;;  %v4523_v29 = vshrl.u32 %v7945_v8, 16  ;;  %v8199_v34 = vld [vmem:[%s9091_s22 + $0x78] sm:$0xf]  ;;  %v11126_v7 = vpop.permute.xlu1 %6909 }
 0x203   : > { %v2315_v58 = vrot.slane %v12911_v3, 4  ;;  %v2306_v2 = vor.u32 %v2305_v25, %v2302_v55  ;;  %v2311_v5 = vrot.slane %v2309_v51, 5  ;;  %v4526_v62 = vshll.u32 %v7945_v8, 16  ;;  %v11130_v3 = vld [vmem:[%s9091_s22 + $0x7c] sm:$0xf] }
 0x204   : > { %v4532_v40 = vshll.u32 %v7946_v37, 16  ;;  %v4102_v41 = vsel %vm9170_vm5, %v4097_v44, %v4101_v39  ;;  %v4107_v20 = vrot.slane %v4106_v59, 4  ;;  %v12912_v35 = vshll.u32 %v10160_v36, 16  ;;  %v11139_v59 = vld [vmem:[%s9091_s22 + $0x80] sm:$0x1] }
 0x205   : > { %v11113_v63 = vrot.slane %v4523_v29, 4  ;;  %v2307_v14 = vrot.slane %v2306_v2, 4  ;;  %v2316_v12 = vor.u32 %v2315_v58, %v2311_v5  ;;  %v11116_v45 = vrot.slane %v4526_v62, 5 }
 0x206   : > { %v2321_v0 = vrot.slane %v12912_v35, 5  ;;  %v4536_v50 = vshrl.u32 %v7946_v37, 16  ;;  %v4112_v61 = vsel %vm9170_vm5, %v4107_v20, %v4111_v26  ;;  %v11121_v23 = vrot.slane %v4532_v40, 5  ;;  %v11141_v26 = vpop.permute.xlu0 %6831  ;;  %v8123_v40 = vld [vmem:[%s9091_s22 + $0x7c] sm:$0xf] }
 0x207   : > { %v8017_v39 = vcombine.low %v7945_v8, %v7946_v37  ;;  %v4114_v31 = vshrl.u32 %v7899_v43, 16  ;;  %v8001_v36 = vcombine.low %v4102_v41, %v4112_v61  ;;  %v2312_v17 = vsel %vm9170_vm5, %v2307_v14, %v2311_v5  ;;  %v11155_v61 = vpop.permute.xlu1 %5034 }
 0x208   : > { %v2317_v11 = vrot.slane %v2316_v12, 4  ;;  %v4117_v21 = vshll.u32 %v7899_v43, 16  ;;  %v4123_v25 = vshll.u32 %v7900_v18, 16  ;;  %v4127_v49 = vshrl.u32 %v7900_v18, 16  ;;  %v8124_v12 = vld [vmem:[%s9091_s22 + $0x80] sm:$0x1] }
 0x209   : > { %4970 = vrot.lane.b32.xlu1 %v8017_v39, %s9043_s23  ;;  %v4116_v55 = vrot.slane %v4114_v31, 4  ;;  %v4133_v51 = vshll.u32 %v7922_v1, 16  ;;  %4858 = vrot.lane.b32.xlu0 %v8001_v36, %s9044_s24  ;;  %v4538_v37 = vrot.slane %v4536_v50, 4  ;;  %v1537_v44 = vsel %vm1507_vm8, %v11080_v52, %v10961_v6  ;;  %v8152_v52 = vld [vmem:[%s9091_s22 + $0x78] sm:$0xe] }
 0x20a   : > { %v2322_v8 = vsel %vm9170_vm5, %v2317_v11, %v2321_v0  ;;  %v4119_v58 = vrot.slane %v4117_v21, 5  ;;  %v4125_v2 = vrot.slane %v4123_v25, 5  ;;  %v4129_v5 = vrot.slane %v4127_v49, 4  ;;  %8480 = vmatprep.mubr.msk.bf16.mxu0 %vm1556_vm9, %v1537_v44  ;;  %v7969_v25 = vld [vmem:[%s9091_s22 + $0x80] sm:$0x1]  ;;  %v11162_v49 = vpop.permute.xlu0 %4956 }
 0x20b   : > { %v7778_v29 = vcombine.low %v2312_v17, %v2322_v8  ;;  %v11146_v62 = vsel %vm1474_vm7, %v11090_v57, %v10988_v13  ;;  %v6366_v41 = vshrl.u32 %v8199_v34, 16  ;;  %v6369_v20 = vshll.u32 %v8199_v34, 16  ;;  %v7947_v44 = vld [vmem:[%s9091_s22 + $0x84] sm:$0xf] }
 0x20c   : > { %v4120_v43 = vor.u32 %v4119_v58, %v4116_v55  ;;  %v6375_v6 = vshll.u32 %v11130_v3, 16  ;;  %v4130_v35 = vor.u32 %v4129_v5, %v4125_v2  ;;  %v4135_v0 = vrot.slane %v4133_v51, 5 }
 0x20d   : > { %v6379_v18 = vshrl.u32 %v11130_v3, 16  ;;  %v6385_v14 = vshll.u32 %v11139_v59, 16  ;;  %v6368_v13 = vrot.slane %v6366_v41, 4  ;;  %v6371_v57 = vrot.slane %v6369_v20, 5 }
 0x20e   : > { %v4121_v50 = vrot.slane %v4120_v43, 4  ;;  %v6377_v1 = vrot.slane %v6375_v6, 5  ;;  %v3445_v39 = vsel %vm1425_vm6, %v7778_v29, %v10947_v56  ;;  %v4131_v31 = vrot.slane %v4130_v35, 4 }
 0x20f   : > { %v6381_v36 = vrot.slane %v6379_v18, 4  ;;  %v8168_v17 = vrot.slane %v8152_v52, 9  ;;  %v6372_v21 = vor.u32 %v6371_v57, %v6368_v13  ;;  %v6078_v34 = vrot.slane %v8123_v40, 5  ;;  %v7948_v52 = vld [vmem:[%s9091_s22 + $0x88] sm:$0xf]  ;;  %v11182_v18 = vpop.permute.xlu1 %6989 }
 0x210   : > { %v4126_v11 = vsel %vm9170_vm5, %v4121_v50, %v4125_v2  ;;  %v6081_v55 = vrot.slane %v8124_v12, 5  ;;  %v4136_v51 = vsel %vm9170_vm5, %v4131_v31, %v4135_v0  ;;  %v6387_v58 = vrot.slane %v6385_v14, 5  ;;  %v8231_v12 = vld [vmem:[%s9091_s22 + $0x78] sm:$0xe]  ;;  %v11191_v31 = vpop.permute.xlu0 %6911 }
 0x211   : > { %v6382_v8 = vor.u32 %v6381_v36, %v6377_v1  ;;  %v3507_v56 = vsel %vm1507_vm8, %v11097_v15, %v11002_v9  ;;  %v8002_v29 = vcombine.low %v4126_v11, %v4136_v51  ;;  %v6373_v5 = vrot.slane %v6372_v21, 4  ;;  %v11212_v51 = vld [vmem:[%s9091_s22 + $0x8c] sm:$0x1] }
 0x212   : > { %v6079_v2 = vsel %vm9119_vm2, %v8168_v17, %v6078_v34  ;;  %v6080_v40 = vrot.slane %v6078_v34, 4  ;;  %8516 = vmatprep.mubr.msk.bf16.mxu1 %vm1556_vm9, %v3507_v56  ;;  %v4529_v41 = vor.u32 %v11116_v45, %v11113_v63  ;;  %v4539_v20 = vor.u32 %v4538_v37, %v11121_v23  ;;  %v8202_v34 = vld [vmem:[%s9091_s22 + $0x84] sm:$0xf] }
 0x213   : > { %v6383_v43 = vrot.slane %v6382_v8, 4  ;;  %v4542_v6 = vshll.u32 %v7969_v25, 16  ;;  %4860 = vrot.lane.b32.xlu0 %v8002_v29, %s9044_s24  ;;  %v6378_v9 = vsel %vm9170_vm5, %v6373_v5, %v6377_v1  ;;  %v4547_v35 = vshrl.u32 %v7947_v44, 16  ;;  %v8095_v29 = vld [vmem:[%s9091_s22 + $0xc] sm:$0xf] }
 0x214   : > { %v6082_v15 = vsel %vm9119_vm2, %v6080_v40, %v6081_v55  ;;  %v4550_v0 = vshll.u32 %v7947_v44, 16  ;;  %v4530_v37 = vrot.slane %v4529_v41, 4  ;;  %v4540_v14 = vrot.slane %v4539_v20, 4  ;;  %v11200_v55 = vld [vmem:[%s9091_s22 + $0x88] sm:$0xf] }
 0x215   : > { %v6388_v63 = vsel %vm9170_vm5, %v6383_v43, %v6387_v58  ;;  %v8280_v45 = vcombine.low %v6079_v2, %v6082_v15  ;;  %v3477_v13 = vsel %vm1474_vm7, %v3445_v39, %v11010_v54  ;;  %v4544_v57 = vrot.slane %v4542_v6, 5  ;;  %v11230_v15 = vpop.permute.xlu0 %5036 }
 0x216   : > { %v8295_v50 = vcombine.low %v6378_v9, %v6388_v63  ;;  %v11189_v1 = vrot.slane %v4547_v35, 4  ;;  %v4535_v36 = vsel %vm9170_vm5, %v4530_v37, %v11121_v23  ;;  %v11196_v17 = vrot.slane %v4550_v0, 5 }
 0x217   : > { %v4556_v11 = vshll.u32 %v7948_v52, 16  ;;  %v8018_v21 = vcombine.low %v7947_v44, %v7948_v52  ;;  %6847 = vrot.lane.b32.xlu0 %v8280_v45, %s9044_s24  ;;  %v4545_v54 = vsel %vm9170_vm5, %v4540_v14, %v4544_v57  ;;  %v3509_v39 = vsel %vm1507_vm8, %v3477_v13, %v11021_v16  ;;  %v8232_v45 = vld [vmem:[%s9091_s22 + $0x84] sm:$0xe] }
 0x218   : > { %6925 = vrot.lane.b32.xlu1 %v8295_v50, %s9043_s23  ;;  %v1539_v23 = vsel %vm1507_vm8, %v11146_v62, %v11046_v46  ;;  %v8247_v25 = vrot.slane %v8231_v12, 9  ;;  %v8033_v8 = vcombine.low %v4535_v36, %v4545_v54  ;;  %v4560_v56 = vshrl.u32 %v7948_v52, 16  ;;  %8517 = vmatmul.mubr.msk.bf16.gmra.mrb[28].mxu1 %vm1556_vm9, %v3509_v39  ;;  %v11222_v62 = vpop.permute.xlu1 %6991  ;;  %v8968_v50 = vld [vmem:[%s9091_s22 + $0x10] sm:$0xf] }
 0x219   : > { %v11214_v58 = vrot.slane %v4556_v11, 5  ;;  %v6679_v44 = vrot.slane %v11130_v3, 5  ;;  %8481 = vmatmul.mubr.msk.bf16.gmra.mrb[28].mxu0 %vm1556_vm9, %v1539_v23  ;;  %v6682_v16 = vrot.slane %v11139_v59, 5  ;;  %v6390_v5 = vshrl.u32 %v8202_v34, 16  ;;  %v8969_v23 = vld [vmem:[%s9091_s22 + $0xc] sm:$0xf] }
 0x21a   : > { %v6393_v2 = vshll.u32 %v8202_v34, 16  ;;  %v6399_v46 = vshll.u32 %v11200_v55, 16  ;;  %v6403_v3 = vshrl.u32 %v11200_v55, 16  ;;  %v6409_v41 = vshll.u32 %v11212_v51, 16 }
 0x21b   : > { %v6680_v40 = vsel %vm9119_vm2, %v8247_v25, %v6679_v44  ;;  %v6681_v43 = vrot.slane %v6679_v44, 4  ;;  %4972 = vrot.lane.b32.xlu0 %v8018_v21, %s9043_s23  ;;  %v6392_v59 = vrot.slane %v6390_v5, 4  ;;  %v5566_v9 = vshrl.u32 %v8095_v29, 16  ;;  %v8970_v25 = vld [vmem:[%s9091_s22 + $0x10] sm:$0xf] }
 0x21c   : > { %5050 = vrot.lane.b32.xlu1 %v8033_v8, %s9045_s25  ;;  %v6395_v20 = vrot.slane %v6393_v2, 5  ;;  %v6401_v6 = vrot.slane %v6399_v46, 5  ;;  %v4562_v52 = vrot.slane %v4560_v56, 4  ;;  %v6405_v0 = vrot.slane %v6403_v3, 4  ;;  %v11241_v44 = vpop.permute.xlu1 %6833  ;;  %v7970_v3 = vld [vmem:[%s9091_s22 + $0x8c] sm:$0x1] }
 0x21d   : > { %v6683_v35 = vsel %vm9119_vm2, %v6681_v43, %v6682_v16  ;;  %v5569_v63 = vshll.u32 %v8095_v29, 16  ;;  %v5568_v12 = vrot.slane %v5566_v9, 4  ;;  %v5575_v13 = vshll.u32 %v8968_v50, 16  ;;  %v8127_v50 = vld [vmem:[%s9091_s22 + $0x8c] sm:$0x1] }
 0x21e   : > { %v8311_v37 = vcombine.low %v6680_v40, %v6683_v35  ;;  %v6396_v14 = vor.u32 %v6395_v20, %v6392_v59  ;;  %v6406_v57 = vor.u32 %v6405_v0, %v6401_v6  ;;  %v6411_v36 = vrot.slane %v6409_v41, 5  ;;  %v11252_v59 = vpop.permute.xlu0 %4846 }
 0x21f   : > { %v5571_v11 = vrot.slane %v5569_v63, 5  ;;  %v12913_v21 = vshrl.u32 %v10254_v53, 16  ;;  %v5577_v39 = vrot.slane %v5575_v13, 5  ;;  %v7977_v8 = vcombine.low %v8969_v23, %v8970_v25  ;;  %v8153_v63 = vld [vmem:[%s9091_s22 + $0x84] sm:$0xe]  ;;  %v11269_v13 = vpop.f32.mrb[4].mxu0 }
 0x220   : > { %7005 = vrot.lane.b32.xlu1 %v8311_v37, %s9045_s25  ;;  %v6397_v54 = vrot.slane %v6396_v14, 4  ;;  %v8248_v56 = vrot.slane %v8232_v45, 9  ;;  %v6407_v29 = vrot.slane %v6406_v57, 4  ;;  %v6686_v5 = vrot.slane %v11200_v55, 5  ;;  %v8972_v23 = vld [vmem:[%s9091_s22 + $0x1c] sm:$0xf] }
 0x221   : > { %v5581_v34 = vrot.slane %v12913_v21, 4  ;;  %v5572_v16 = vor.u32 %v5571_v11, %v5568_v12  ;;  %v6689_v2 = vrot.slane %v11212_v51, 5  ;;  %v12914_v40 = vshll.u32 %v10260_v48, 16  ;;  %v8126_v12 = vld [vmem:[%s9091_s22 + $0x88] sm:$0xf]  ;;  %v11278_v21 = vpop.permute.xlu1 %4958 }
 0x222   : > { %v6402_v53 = vsel %vm9170_vm5, %v6397_v54, %v6401_v6  ;;  %v4553_v41 = vor.u32 %v11196_v17, %v11189_v1  ;;  %v6412_v55 = vsel %vm9170_vm5, %v6407_v29, %v6411_v36  ;;  %v6687_v20 = vsel %vm9119_vm2, %v8248_v56, %v6686_v5  ;;  %v7901_v1 = vld [vmem:[%s9091_s22 + $0x84] sm:$0xf]  ;;  %v7902_v11 = vld [vmem:[%s9091_s22 + $0x88] sm:$0xf]  ;;  %v7923_v56 = vld [vmem:[%s9091_s22 + $0x8c] sm:$0x1] }
 0x223   : > { %v5582_v46 = vor.u32 %v5581_v34, %v5577_v39  ;;  %v5587_v43 = vrot.slane %v12914_v40, 5  ;;  %v5573_v51 = vrot.slane %v5572_v16, 4  ;;  %v6688_v6 = vrot.slane %v6686_v5, 4 }
 0x224   : > { %v8296_v9 = vcombine.low %v6402_v53, %v6412_v55  ;;  %v4554_v48 = vrot.slane %v4553_v41, 4  ;;  %v4563_v0 = vor.u32 %v4562_v52, %v11214_v58  ;;  %v5068_v45 = vsel %vm1425_vm6, %v7977_v8, %v11085_v22  ;;  %v11284_v53 = vpop.permute.xlu0 %4848  ;;  %v8098_v41 = vld [vmem:[%s9091_s22 + $0x18] sm:$0xf]  ;;  %v11297_v55 = vpop.f32.mrb[5].mxu0 }
 0x225   : > { %v5583_v35 = vrot.slane %v5582_v46, 4  ;;  %v5578_v17 = vsel %vm9170_vm5, %v5573_v51, %v5577_v39  ;;  %v6690_v37 = vsel %vm9119_vm2, %v6688_v6, %v6689_v2  ;;  %v4566_v14 = vshll.u32 %v7970_v3, 16  ;;  %v8971_v39 = vld [vmem:[%s9091_s22 + $0x18] sm:$0xf] }
 0x226   : > { %6927 = vrot.lane.b32.xlu0 %v8296_v9, %s9043_s23  ;;  %v8312_v57 = vcombine.low %v6687_v20, %v6690_v37  ;;  %v4559_v22 = vsel %vm9170_vm5, %v4554_v48, %v11214_v58  ;;  %v4564_v36 = vrot.slane %v4563_v0, 4  ;;  %v7978_v25 = vcombine.low %v8971_v39, %v8972_v23  ;;  %v11286_v58 = vpop.f32.mrb[4].mxu1  ;;  %v8973_v23 = vld [vmem:[%s9091_s22 + $0x1c] sm:$0xf] }
 0x227   : > { %v5588_v52 = vsel %vm9170_vm5, %v5583_v35, %v5587_v43  ;;  %v4568_v54 = vrot.slane %v4566_v14, 5  ;;  %v8169_v8 = vrot.slane %v8153_v63, 9  ;;  %v6085_v29 = vrot.slane %v8126_v12, 5  ;;  %v11299_v51 = vpop.f32.mrb[5].mxu1  ;;  %v11303_v35 = vpop.f32.mrb[6].mxu0 }
 0x228   : > { %v8255_v34 = vcombine.low %v5578_v17, %v5588_v52  ;;  %7007 = vrot.lane.b32.xlu1 %v8312_v57, %s9045_s25  ;;  %v6088_v16 = vrot.slane %v8127_v50, 5  ;;  %v4138_v5 = vshrl.u32 %v7901_v1, 16  ;;  %v4141_v2 = vshll.u32 %v7901_v1, 16  ;;  %12915 = vst [vmem:[#allocation4_spill] sm:$0xff] %v11303_v35  ;;  %v11305_v48 = vpop.f32.mrb[6].mxu1  ;;  %v11307_v17 = vpop.f32.mrb[7].mxu0 }
 0x229   : > { %v4569_v40 = vsel %vm9170_vm5, %v4564_v36, %v4568_v54  ;;  %v11294_v43 = vsel %vm1474_vm7, %v5068_v45, %v11103_v19  ;;  %v4147_v3 = vshll.u32 %v7902_v11, 16  ;;  %v6086_v6 = vsel %vm9119_vm2, %v8169_v8, %v6085_v29  ;;  %12916 = vst [vmem:[#allocation5_spill] sm:$0xff] %v11305_v48  ;;  %12917 = vst [vmem:[#allocation6_spill] sm:$0xff] %v11307_v17  ;;  %v11309_v45 = vpop.f32.mrb[7].mxu1  ;;  %v7949_v52 = vld [vmem:[%s9091_s22 + $0x90] sm:$0xf]  ;;  %v11319_v57 = vpop.permute.xlu1 %6913 }
 0x22a   : > { %v7023_v46 = vsel %vm1425_vm6, %v8255_v34, %v11072_v32  ;;  %v8034_v20 = vcombine.low %v4559_v22, %v4569_v40  ;;  %v6087_v9 = vrot.slane %v6085_v29, 4  ;;  %v4140_v32 = vrot.slane %v4138_v5, 4  ;;  %12918 = vst [vmem:[#allocation7_spill] sm:$0xff] %v11309_v45  ;;  %v8974_v29 = vld [vmem:[%s9091_s22 + $0x20] sm:$0x1] }
 0x22b   : > { %v4143_v0 = vrot.slane %v4141_v2, 5  ;;  %v4149_v19 = vrot.slane %v4147_v3, 5  ;;  %v4151_v63 = vshrl.u32 %v7902_v11, 16  ;;  %v4157_v1 = vshll.u32 %v7923_v56, 16  ;;  %v7950_v5 = vld [vmem:[%s9091_s22 + $0x94] sm:$0xf] }
 0x22c   : > { %5052 = vrot.lane.b32.xlu0 %v8034_v20, %s9045_s25  ;;  %v11314_v37 = vsel %vm1425_vm6, %v7978_v25, %v11107_v38  ;;  %v6089_v14 = vsel %vm9119_vm2, %v6087_v9, %v6088_v16  ;;  %v5590_v12 = vshrl.u32 %v8098_v41, 16  ;;  %v5593_v50 = vshll.u32 %v8098_v41, 16 }
 0x22d   : > { %v8281_v22 = vcombine.low %v6086_v6, %v6089_v14  ;;  %v4144_v36 = vor.u32 %v4143_v0, %v4140_v32  ;;  %v4153_v11 = vrot.slane %v4151_v63, 4  ;;  %v4159_v34 = vrot.slane %v4157_v1, 5  ;;  %v7903_v6 = vld [vmem:[%s9091_s22 + $0x90] sm:$0xf]  ;;  %v11332_v1 = vpop.permute.xlu0 %6835 }
 0x22e   : > { %v5592_v54 = vrot.slane %v5590_v12, 4  ;;  %v5595_v39 = vrot.slane %v5593_v50, 5  ;;  %v5599_v38 = vshll.u32 %v8973_v23, 16  ;;  %v5603_v25 = vshrl.u32 %v8973_v23, 16  ;;  %v7924_v23 = vld [vmem:[%s9091_s22 + $0x98] sm:$0x1] }
 0x22f   : > { %6849 = vrot.lane.b32.xlu1 %v8281_v22, %s9044_s24  ;;  %v4145_v8 = vrot.slane %v4144_v36, 4  ;;  %v4154_v56 = vor.u32 %v4153_v11, %v4149_v19  ;;  %v5609_v16 = vshll.u32 %v8974_v29, 16  ;;  %v4571_v2 = vshrl.u32 %v7949_v52, 16  ;;  %v7904_v36 = vld [vmem:[%s9091_s22 + $0x94] sm:$0xf]  ;;  %v11337_v11 = vpop.permute.xlu1 %5038 }
 0x230   : > { %v5596_v40 = vor.u32 %v5595_v39, %v5592_v54  ;;  %v5601_v3 = vrot.slane %v5599_v38, 5  ;;  %v5605_v41 = vrot.slane %v5603_v25, 4  ;;  %v4574_v20 = vshll.u32 %v7949_v52, 16 }
 0x231   : > { %v4150_v9 = vsel %vm9170_vm5, %v4145_v8, %v4149_v19  ;;  %v4155_v32 = vrot.slane %v4154_v56, 4  ;;  %v11330_v0 = vsel %vm1474_vm7, %v7023_v46, %v11126_v7  ;;  %v5611_v63 = vrot.slane %v5609_v16, 5 }
 0x232   : > { %v5597_v14 = vrot.slane %v5596_v40, 4  ;;  %v5606_v12 = vor.u32 %v5605_v41, %v5601_v3  ;;  %v11334_v50 = vrot.slane %v4571_v2, 4  ;;  %v4580_v22 = vshll.u32 %v7950_v5, 16  ;;  %v8205_v2 = vld [vmem:[%s9091_s22 + $0x90] sm:$0xf] }
 0x233   : > { %v4160_v19 = vsel %vm9170_vm5, %v4155_v32, %v4159_v34  ;;  %v4584_v54 = vshrl.u32 %v7950_v5, 16  ;;  %v8019_v39 = vcombine.low %v7949_v52, %v7950_v5  ;;  %v4162_v7 = vshrl.u32 %v7903_v6, 16  ;;  %v11357_v41 = vld [vmem:[%s9091_s22 + $0x94] sm:$0xf] }
 0x234   : > { %v8003_v46 = vcombine.low %v4150_v9, %v4160_v19  ;;  %v5602_v38 = vsel %vm9170_vm5, %v5597_v14, %v5601_v3  ;;  %v5607_v25 = vrot.slane %v5606_v12, 4  ;;  %v11344_v8 = vrot.slane %v4574_v20, 5  ;;  %v11360_v14 = vld [vmem:[%s9091_s22 + $0x98] sm:$0x1]  ;;  %v11363_v12 = vpop.permute.xlu0 %4960  ;;  %v11371_v19 = vpop.permute.xlu1 %6993 }
 0x235   : > { %v11346_v56 = vrot.slane %v4580_v22, 5  ;;  %4974 = vrot.lane.b32.xlu1 %v8019_v39, %s9043_s23  ;;  %v4164_v29 = vrot.slane %v4162_v7, 4  ;;  %v4165_v16 = vshll.u32 %v7903_v6, 16  ;;  %v4171_v34 = vshll.u32 %v7904_v36, 16 }
 0x236   : > { %4862 = vrot.lane.b32.xlu0 %v8003_v46, %s9044_s24  ;;  %v5612_v52 = vsel %vm9170_vm5, %v5607_v25, %v5611_v63  ;;  %v4175_v5 = vshrl.u32 %v7904_v36, 16  ;;  %v4181_v40 = vshll.u32 %v7924_v23, 16  ;;  %v5147_v3 = vsel %vm1507_vm8, %v11294_v43, %v11155_v61  ;;  %v8154_v36 = vld [vmem:[%s9091_s22 + $0x90] sm:$0xe]  ;;  %v8129_v46 = vld [vmem:[%s9091_s22 + $0x94] sm:$0xf] }
 0x237   : > { %v8256_v20 = vcombine.low %v5602_v38, %v5612_v52  ;;  %v4586_v9 = vrot.slane %v4584_v54, 4  ;;  %v4167_v6 = vrot.slane %v4165_v16, 5  ;;  %v4173_v32 = vrot.slane %v4171_v34, 5  ;;  %8524 = vmatprep.mubr.msk.bf16.mxu0 %vm1556_vm9, %v5147_v3 }
 0x238   : > { %v4177_v63 = vrot.slane %v4175_v5, 4  ;;  %v11368_v22 = vsel %vm1474_vm7, %v11314_v37, %v11162_v49  ;;  %v6414_v61 = vshrl.u32 %v8205_v2, 16  ;;  %v6417_v43 = vshll.u32 %v8205_v2, 16  ;;  %v8130_v49 = vld [vmem:[%s9091_s22 + $0x98] sm:$0x1]  ;;  %v11384_v48 = vpop.permute.xlu0 %6915 }
 0x239   : > { %v4168_v54 = vor.u32 %v4167_v6, %v4164_v29  ;;  %v4183_v39 = vrot.slane %v4181_v40, 5  ;;  %v6423_v23 = vshll.u32 %v11357_v41, 16  ;;  %v6427_v7 = vshrl.u32 %v11357_v41, 16 }
 0x23a   : > { %v4178_v38 = vor.u32 %v4177_v63, %v4173_v32  ;;  %v6416_v25 = vrot.slane %v6414_v61, 4  ;;  %v6419_v16 = vrot.slane %v6417_v43, 5  ;;  %v6433_v34 = vshll.u32 %v11360_v14, 16  ;;  %v7971_v43 = vld [vmem:[%s9091_s22 + $0x98] sm:$0x1] }
 0x23b   : > { %v4169_v37 = vrot.slane %v4168_v54, 4  ;;  %v6425_v52 = vrot.slane %v6423_v23, 5  ;;  %v6429_v2 = vrot.slane %v6427_v7, 4  ;;  %v8170_v5 = vrot.slane %v8154_v36, 9 }
 0x23c   : > { %v4179_v3 = vrot.slane %v4178_v38, 4  ;;  %v6420_v29 = vor.u32 %v6419_v16, %v6416_v25  ;;  %v6435_v40 = vrot.slane %v6433_v34, 5  ;;  %v6092_v6 = vrot.slane %v8129_v46, 5  ;;  %v7951_v46 = vld [vmem:[%s9091_s22 + $0x9c] sm:$0xf] }
 0x23d   : > { %v4174_v45 = vsel %vm9170_vm5, %v4169_v37, %v4173_v32  ;;  %v6430_v17 = vor.u32 %v6429_v2, %v6425_v52  ;;  %v6095_v63 = vrot.slane %v8130_v49, 5  ;;  %v7102_v61 = vsel %vm1507_vm8, %v11330_v0, %v11182_v18  ;;  %v11392_v32 = vpop.permute.xlu1 %6995  ;;  %v11404_v37 = vld [vmem:[%s9091_s22 + $0xa0] sm:$0xf] }
 0x23e   : > { %v4184_v36 = vsel %vm9170_vm5, %v4179_v3, %v4183_v39  ;;  %v6421_v54 = vrot.slane %v6420_v29, 4  ;;  %v6093_v23 = vsel %vm9119_vm2, %v8170_v5, %v6092_v6  ;;  %v6094_v7 = vrot.slane %v6092_v6, 4  ;;  %8560 = vmatprep.mubr.msk.bf16.mxu1 %vm1556_vm9, %v7102_v61  ;;  %v8208_v6 = vld [vmem:[%s9091_s22 + $0x9c] sm:$0xf] }
 0x23f   : > { %v7026_v18 = vsel %vm1425_vm6, %v8256_v20, %v11141_v26  ;;  %v8004_v0 = vcombine.low %v4174_v45, %v4184_v36  ;;  %v6431_v38 = vrot.slane %v6430_v17, 4  ;;  %v4577_v25 = vor.u32 %v11344_v8, %v11334_v50  ;;  %v11430_v36 = vld [vmem:[%s9091_s22 + $0xa0] sm:$0xf] }
 0x240   : > { %v6426_v39 = vsel %vm9170_vm5, %v6421_v54, %v6425_v52  ;;  %v6096_v16 = vsel %vm9119_vm2, %v6094_v7, %v6095_v63  ;;  %v4587_v34 = vor.u32 %v4586_v9, %v11346_v56  ;;  %v4590_v49 = vshll.u32 %v7971_v43, 16  ;;  %v11419_v63 = vpop.permute.xlu0 %5040  ;;  %v11433_v54 = vld [vmem:[%s9091_s22 + $0xa4] sm:$0x1] }
 0x241   : > { %4864 = vrot.lane.b32.xlu0 %v8004_v0, %s9044_s24  ;;  %v6436_v26 = vsel %vm9170_vm5, %v6431_v38, %v6435_v40  ;;  %v8282_v17 = vcombine.low %v6093_v23, %v6096_v16  ;;  %v4578_v45 = vrot.slane %v4577_v25, 4  ;;  %v4595_v50 = vshrl.u32 %v7951_v46, 16  ;;  %v8233_v40 = vld [vmem:[%s9091_s22 + $0x90] sm:$0xe]  ;;  %v11435_v23 = vpop.permute.xlu1 %6837 }
 0x242   : > { %v8297_v8 = vcombine.low %v6426_v39, %v6436_v26  ;;  %v4588_v20 = vrot.slane %v4587_v34, 4  ;;  %v4592_v52 = vrot.slane %v4590_v49, 5  ;;  %v4598_v2 = vshll.u32 %v7951_v46, 16 }
 0x243   : > { %v7072_v9 = vsel %vm1474_vm7, %v7026_v18, %v11191_v31  ;;  %v4583_v5 = vsel %vm9170_vm5, %v4578_v45, %v11346_v56  ;;  %v11414_v3 = vrot.slane %v4595_v50, 4  ;;  %v4604_v29 = vshll.u32 %v11404_v37, 16 }
 0x244   : > { %6929 = vrot.lane.b32.xlu1 %v8297_v8, %s9043_s23  ;;  %v4593_v61 = vsel %vm9170_vm5, %v4588_v20, %v4592_v52  ;;  %v11424_v43 = vrot.slane %v4598_v2, 5  ;;  %v4608_v31 = vshrl.u32 %v11404_v37, 16  ;;  %v7104_v56 = vsel %vm1507_vm8, %v7072_v9, %v11222_v62  ;;  %v8101_v62 = vld [vmem:[%s9091_s22 + $0x24] sm:$0xf]  ;;  %v11458_v52 = vpop.permute.xlu0 %4850 }
 0x245   : > { %6851 = vrot.lane.b32.xlu0 %v8282_v17, %s9044_s24  ;;  %v8035_v7 = vcombine.low %v4583_v5, %v4593_v61  ;;  %v11438_v18 = vrot.slane %v4604_v29, 5  ;;  %v8020_v0 = vcombine.low %v7951_v46, %v11404_v37  ;;  %v5149_v38 = vsel %vm1507_vm8, %v11368_v22, %v11230_v15  ;;  %8561 = vmatmul.mubr.msk.bf16.vlgmr.msra.gmra.mrb[32].mxu1 %vm1556_vm9, %v7104_v56  ;;  %v11455_v17 = vpop.f32.mrb[8].mxu0  ;;  %v8975_v29 = vld [vmem:[%s9091_s22 + $0x28] sm:$0xf]  ;;  %v11464_v61 = vpop.permute.xlu1 %4962 }
 0x246   : > { %v8249_v25 = vrot.slane %v8233_v40, 9  ;;  %v6693_v39 = vrot.slane %v11357_v41, 5  ;;  %v6696_v16 = vrot.slane %v11360_v14, 5  ;;  %v6438_v34 = vshrl.u32 %v8208_v6, 16  ;;  %8525 = vmatmul.mubr.msk.bf16.vlgmr.msra.gmra.mrb[32].mxu0 %vm1556_vm9, %v5149_v38  ;;  %12919 = vst [vmem:[#allocation8_spill] sm:$0xff] %v11455_v17 }
 0x247   : > { %v6441_v49 = vshll.u32 %v8208_v6, 16  ;;  %v6447_v26 = vshll.u32 %v11430_v36, 16  ;;  %v6451_v46 = vshrl.u32 %v11430_v36, 16  ;;  %v6457_v37 = vshll.u32 %v11433_v54, 16  ;;  %v8234_v6 = vld [vmem:[%s9091_s22 + $0x9c] sm:$0xe] }
 0x248   : > { %5054 = vrot.lane.b32.xlu1 %v8035_v7, %s9045_s25  ;;  %v6694_v15 = vsel %vm9119_vm2, %v8249_v25, %v6693_v39  ;;  %v6695_v41 = vrot.slane %v6693_v39, 4  ;;  %v6440_v22 = vrot.slane %v6438_v34, 4  ;;  %v5614_v14 = vshrl.u32 %v8101_v62, 16 }
 0x249   : > { %4976 = vrot.lane.b32.xlu0 %v8020_v0, %s9043_s23  ;;  %v6443_v45 = vrot.slane %v6441_v49, 5  ;;  %v6449_v50 = vrot.slane %v6447_v26, 5  ;;  %v6453_v8 = vrot.slane %v6451_v46, 4  ;;  %v6459_v20 = vrot.slane %v6457_v37, 5  ;;  %v8976_v49 = vld [vmem:[%s9091_s22 + $0x2c] sm:$0x1] }
 0x24a   : > { %v6697_v2 = vsel %vm9119_vm2, %v6695_v41, %v6696_v16  ;;  %v5616_v9 = vrot.slane %v5614_v14, 4  ;;  %v5617_v5 = vshll.u32 %v8101_v62, 16  ;;  %v5623_v40 = vshll.u32 %v8975_v29, 16 }
 0x24b   : > { %v8313_v56 = vcombine.low %v6694_v15, %v6697_v2  ;;  %v6444_v7 = vor.u32 %v6443_v45, %v6440_v22  ;;  %v6454_v0 = vor.u32 %v6453_v8, %v6449_v50  ;;  %v5627_v38 = vshrl.u32 %v8975_v29, 16  ;;  %v8977_v15 = vld [vmem:[%s9091_s22 + $0x24] sm:$0xf]  ;;  %v8978_v22 = vld [vmem:[%s9091_s22 + $0x28] sm:$0xf] }
 0x24c   : > { %v4610_v25 = vrot.slane %v4608_v31, 4  ;;  %v5619_v39 = vrot.slane %v5617_v5, 5  ;;  %v5625_v34 = vrot.slane %v5623_v40, 5  ;;  %v5633_v26 = vshll.u32 %v8976_v49, 16  ;;  %v7972_v31 = vld [vmem:[%s9091_s22 + $0xa4] sm:$0x1] }
 0x24d   : > { %7009 = vrot.lane.b32.xlu1 %v8313_v56, %s9045_s25  ;;  %v6445_v62 = vrot.slane %v6444_v7, 4  ;;  %v6455_v16 = vrot.slane %v6454_v0, 4  ;;  %v5629_v46 = vrot.slane %v5627_v38, 4  ;;  %v8250_v37 = vrot.slane %v8234_v6, 9  ;;  %v11477_v6 = vpop.permute.xlu0 %4852  ;;  %v11484_v38 = vpop.permute.xlu1 %6917 }
 0x24e   : > { %v5620_v41 = vor.u32 %v5619_v39, %v5616_v9  ;;  %v5635_v14 = vrot.slane %v5633_v26, 5  ;;  %v7979_v45 = vcombine.low %v8977_v15, %v8978_v22  ;;  %v6700_v8 = vrot.slane %v11430_v36, 5  ;;  %v11479_v9 = vpop.f32.mrb[8].mxu1  ;;  %v8132_v22 = vld [vmem:[%s9091_s22 + $0xa0] sm:$0xf] }
 0x24f   : > { %v6450_v2 = vsel %vm9170_vm5, %v6445_v62, %v6449_v50  ;;  %v6460_v5 = vsel %vm9170_vm5, %v6455_v16, %v6459_v20  ;;  %v5630_v29 = vor.u32 %v5629_v46, %v5625_v34  ;;  %v6703_v40 = vrot.slane %v11433_v54, 5  ;;  %12920 = vst [vmem:[#allocation9_spill] sm:$0xff] %v11479_v9  ;;  %v7905_v50 = vld [vmem:[%s9091_s22 + $0x9c] sm:$0xf]  ;;  %v11486_v20 = vpop.f32.mrb[9].mxu0  ;;  %v11492_v16 = vpop.f32.mrb[9].mxu1 }
 0x250   : > { %v8298_v56 = vcombine.low %v6450_v2, %v6460_v5  ;;  %v5621_v7 = vrot.slane %v5620_v41, 4  ;;  %v6701_v36 = vsel %vm9119_vm2, %v8250_v37, %v6700_v8  ;;  %v6702_v0 = vrot.slane %v6700_v8, 4  ;;  %12921 = vst [vmem:[#allocation10_spill] sm:$0xff] %v11486_v20  ;;  %v8155_v62 = vld [vmem:[%s9091_s22 + $0x9c] sm:$0xe]  ;;  %12922 = vst [vmem:[#allocation11_spill] sm:$0xff] %v11492_v16 }
 0x251   : > { %v5631_v54 = vrot.slane %v5630_v29, 4  ;;  %v4601_v39 = vor.u32 %v11424_v43, %v11414_v3  ;;  %v4611_v49 = vor.u32 %v4610_v25, %v11438_v18  ;;  %v4614_v26 = vshll.u32 %v7972_v31, 16  ;;  %v11494_v46 = vpop.f32.mrb[10].mxu0  ;;  %v8979_v43 = vld [vmem:[%s9091_s22 + $0x30] sm:$0xf]  ;;  %v11507_v31 = vpop.f32.mrb[10].mxu1 }
 0x252   : > { %12923 = vst [vmem:[#allocation12_spill] sm:$0xff] %v11494_v46  ;;  %6931 = vrot.lane.b32.xlu0 %v8298_v56, %s9043_s23  ;;  %v5626_v37 = vsel %vm9170_vm5, %v5621_v7, %v5625_v34  ;;  %v5074_v41 = vsel %vm1425_vm6, %v7979_v45, %v11252_v59  ;;  %v6704_v3 = vsel %vm9119_vm2, %v6702_v0, %v6703_v40  ;;  %v8980_v25 = vld [vmem:[%s9091_s22 + $0x34] sm:$0xf]  ;;  %v8133_v8 = vld [vmem:[%s9091_s22 + $0xa4] sm:$0x1]  ;;  %12924 = vst [vmem:[#allocation13_spill] sm:$0xff] %v11507_v31 }
 0x253   : > { %v7980_v15 = vcombine.low %v8979_v43, %v8980_v25  ;;  %v11509_v2 = vpop.f32.mrb[11].mxu0  ;;  %v5636_v5 = vsel %vm9170_vm5, %v5631_v54, %v5635_v14  ;;  %v8314_v34 = vcombine.low %v6701_v36, %v6704_v3  ;;  %v4602_v29 = vrot.slane %v4601_v39, 4  ;;  %v7906_v59 = vld [vmem:[%s9091_s22 + $0xa0] sm:$0xf]  ;;  %v11514_v45 = vpop.f32.mrb[11].mxu1 }
 0x254   : > { %12925 = vst [vmem:[#allocation14_spill] sm:$0xff] %v11509_v2  ;;  %v4612_v56 = vrot.slane %v4611_v49, 4  ;;  %12926 = vst [vmem:[#allocation15_spill] sm:$0xff] %v11514_v45  ;;  %v8257_v40 = vcombine.low %v5626_v37, %v5636_v5  ;;  %v4616_v7 = vrot.slane %v4614_v26, 5  ;;  %v11518_v0 = vsel %vm1474_vm7, %v5074_v41, %v11278_v21  ;;  %v7925_v39 = vld [vmem:[%s9091_s22 + $0xa4] sm:$0x1]  ;;  %v11532_v41 = vpop.permute.xlu0 %6839  ;;  %v11536_v5 = vpop.permute.xlu1 %5042 }
 0x255   : > { %v8171_v43 = vrot.slane %v8155_v62, 9  ;;  %7011 = vrot.lane.b32.xlu1 %v8314_v34, %s9045_s25  ;;  %v4607_v14 = vsel %vm9170_vm5, %v4602_v29, %v11438_v18  ;;  %v6099_v36 = vrot.slane %v8132_v22, 5  ;;  %v6102_v54 = vrot.slane %v8133_v8, 5  ;;  %v8104_v62 = vld [vmem:[%s9091_s22 + $0x30] sm:$0xf] }
 0x256   : > { %v4186_v49 = vshrl.u32 %v7905_v50, 16  ;;  %v4617_v3 = vsel %vm9170_vm5, %v4612_v56, %v4616_v7  ;;  %v11529_v26 = vsel %vm1425_vm6, %v7980_v15, %v11284_v53  ;;  %v4189_v21 = vshll.u32 %v7905_v50, 16  ;;  %v8982_v45 = vld [vmem:[%s9091_s22 + $0x38] sm:$0x1]  ;;  %v7954_v2 = vld [vmem:[%s9091_s22 + $0xac] sm:$0xf] }
 0x257   : > { %v4195_v37 = vshll.u32 %v7906_v59, 16  ;;  %v8036_v25 = vcombine.low %v4607_v14, %v4617_v3  ;;  %v6100_v18 = vsel %vm9119_vm2, %v8171_v43, %v6099_v36  ;;  %v6101_v22 = vrot.slane %v6099_v36, 4  ;;  %v7953_v14 = vld [vmem:[%s9091_s22 + $0xa8] sm:$0xf] }
 0x258   : > { %v4188_v8 = vrot.slane %v4186_v49, 4  ;;  %v4191_v34 = vrot.slane %v4189_v21, 5  ;;  %v4199_v56 = vshrl.u32 %v7906_v59, 16  ;;  %v4205_v53 = vshll.u32 %v7925_v39, 16 }
 0x259   : > { %v4197_v29 = vrot.slane %v4195_v37, 5  ;;  %v7029_v50 = vsel %vm1425_vm6, %v8257_v40, %v11241_v44  ;;  %5056 = vrot.lane.b32.xlu0 %v8036_v25, %s9045_s25  ;;  %v6103_v15 = vsel %vm9119_vm2, %v6101_v22, %v6102_v54  ;;  %v5638_v7 = vshrl.u32 %v8104_v62, 16  ;;  %v11544_v37 = vpop.f32.mrb[12].mxu0  ;;  %v8981_v44 = vld [vmem:[%s9091_s22 + $0x34] sm:$0xf] }
 0x25a   : > { %v5641_v43 = vshll.u32 %v8104_v62, 16  ;;  %v8283_v36 = vcombine.low %v6100_v18, %v6103_v15  ;;  %v4192_v49 = vor.u32 %v4191_v34, %v4188_v8  ;;  %v4201_v3 = vrot.slane %v4199_v56, 4  ;;  %12927 = vst [vmem:[#allocation16_spill] sm:$0xff] %v11544_v37  ;;  %v11550_v18 = vpop.permute.xlu0 %4964  ;;  %v7907_v15 = vld [vmem:[%s9091_s22 + $0xa8] sm:$0xf]  ;;  %v11569_v16 = vpop.f32.mrb[13].mxu0 }
 0x25b   : > { %v4207_v21 = vrot.slane %v4205_v53, 5  ;;  %v5640_v59 = vrot.slane %v5638_v7, 4  ;;  %v5647_v40 = vshll.u32 %v8981_v44, 16  ;;  %v5651_v25 = vshrl.u32 %v8981_v44, 16  ;;  %v11553_v7 = vpop.permute.xlu1 %6997  ;;  %12929 = vst [vmem:[#allocation18_spill] sm:$0xff] %v11569_v16 }
 0x25c   : > { %v5643_v39 = vrot.slane %v5641_v43, 5  ;;  %6853 = vrot.lane.b32.xlu1 %v8283_v36, %s9044_s24  ;;  %v4193_v54 = vrot.slane %v4192_v49, 4  ;;  %v4202_v22 = vor.u32 %v4201_v3, %v4197_v29  ;;  %v5657_v62 = vshll.u32 %v8982_v45, 16 }
 0x25d   : > { %v4619_v31 = vshrl.u32 %v7953_v14, 16  ;;  %v5649_v34 = vrot.slane %v5647_v40, 5  ;;  %v5653_v56 = vrot.slane %v5651_v25, 4  ;;  %v4622_v53 = vshll.u32 %v7953_v14, 16  ;;  %v11564_v40 = vpop.f32.mrb[12].mxu1 }
 0x25e   : > { %v5644_v8 = vor.u32 %v5643_v39, %v5640_v59  ;;  %v4198_v43 = vsel %vm9170_vm5, %v4193_v54, %v4197_v29  ;;  %v4203_v36 = vrot.slane %v4202_v22, 4  ;;  %v11559_v45 = vsel %vm1474_vm7, %v7029_v50, %v11319_v57  ;;  %v7908_v39 = vld [vmem:[%s9091_s22 + $0xac] sm:$0xf]  ;;  %12928 = vst [vmem:[#allocation17_spill] sm:$0xff] %v11564_v40  ;;  %v7926_v54 = vld [vmem:[%s9091_s22 + $0xb0] sm:$0x1]  ;;  %v11581_v16 = vpop.permute.xlu0 %6919 }
 0x25f   : > { %v5659_v49 = vrot.slane %v5657_v62, 5  ;;  %v5654_v44 = vor.u32 %v5653_v56, %v5649_v34  ;;  %v11561_v37 = vrot.slane %v4619_v31, 4  ;;  %v4628_v59 = vshll.u32 %v7954_v2, 16 }
 0x260   : > { %v5645_v3 = vrot.slane %v5644_v8, 4  ;;  %v4208_v25 = vsel %vm9170_vm5, %v4203_v36, %v4207_v21  ;;  %v4632_v46 = vshrl.u32 %v7954_v2, 16  ;;  %v8021_v29 = vcombine.low %v7953_v14, %v7954_v2  ;;  %v11575_v8 = vpop.f32.mrb[13].mxu1  ;;  %v8211_v36 = vld [vmem:[%s9091_s22 + $0xa8] sm:$0xf] }
 0x261   : > { %v4210_v22 = vshrl.u32 %v7907_v15, 16  ;;  %v8005_v57 = vcombine.low %v4198_v43, %v4208_v25  ;;  %v5655_v31 = vrot.slane %v5654_v44, 4  ;;  %v11573_v62 = vrot.slane %v4622_v53, 5  ;;  %12930 = vst [vmem:[#allocation19_spill] sm:$0xff] %v11575_v8  ;;  %v11590_v44 = vld [vmem:[%s9091_s22 + $0xac] sm:$0xf] }
 0x262   : > { %v5650_v50 = vsel %vm9170_vm5, %v5645_v3, %v5649_v34  ;;  %v11577_v56 = vrot.slane %v4628_v59, 5  ;;  %4978 = vrot.lane.b32.xlu1 %v8021_v29, %s9043_s23  ;;  %v4213_v2 = vshll.u32 %v7907_v15, 16  ;;  %v4219_v14 = vshll.u32 %v7908_v39, 16  ;;  %v11592_v15 = vpop.permute.xlu1 %6999  ;;  %v11594_v59 = vpop.f32.mrb[14].mxu0 }
 0x263   : > { %v4212_v21 = vrot.slane %v4210_v22, 4  ;;  %4866 = vrot.lane.b32.xlu0 %v8005_v57, %s9044_s24  ;;  %v5660_v34 = vsel %vm9170_vm5, %v5655_v31, %v5659_v49  ;;  %v4223_v53 = vshrl.u32 %v7908_v39, 16  ;;  %v4229_v43 = vshll.u32 %v7926_v54, 16  ;;  %12931 = vst [vmem:[#allocation20_spill] sm:$0xff] %v11592_v15  ;;  %12932 = vst [vmem:[#allocation21_spill] sm:$0xff] %v11594_v59  ;;  %v11602_v39 = vpop.f32.mrb[14].mxu1  ;;  %v11621_v35 = vpop.permute.xlu0 %5044 }
 0x264   : > { %v5151_v3 = vsel %vm1507_vm8, %v11518_v0, %v11337_v11  ;;  %v8258_v25 = vcombine.low %v5650_v50, %v5660_v34  ;;  %v11596_v29 = vrot.slane %v4632_v46, 4  ;;  %v4215_v22 = vrot.slane %v4213_v2, 5  ;;  %v11599_v49 = vld [vmem:[%s9091_s22 + $0xb0] sm:$0x1]  ;;  %12933 = vst [vmem:[#allocation22_spill] sm:$0xff] %v11602_v39  ;;  %v11610_v31 = vpop.f32.mrb[15].mxu0 }
 0x265   : > { %v4221_v57 = vrot.slane %v4219_v14, 5  ;;  %8528 = vmatprep.mubr.msk.bf16.mxu0 %vm1556_vm9, %v5151_v3  ;;  %v4225_v54 = vrot.slane %v4223_v53, 4  ;;  %v11607_v11 = vsel %vm1474_vm7, %v11529_v26, %v11363_v12  ;;  %v6462_v0 = vshrl.u32 %v8211_v36, 16  ;;  %v8156_v46 = vld [vmem:[%s9091_s22 + $0xa8] sm:$0xe]  ;;  %12934 = vst [vmem:[#allocation23_spill] sm:$0xff] %v11610_v31 }
 0x266   : > { %v6465_v50 = vshll.u32 %v8211_v36, 16  ;;  %v4216_v2 = vor.u32 %v4215_v22, %v4212_v21  ;;  %v4231_v14 = vrot.slane %v4229_v43, 5  ;;  %v6471_v34 = vshll.u32 %v11590_v44, 16  ;;  %v8135_v59 = vld [vmem:[%s9091_s22 + $0xac] sm:$0xf]  ;;  %v11615_v39 = vpop.f32.mrb[15].mxu1 }
 0x267   : > { %v6475_v3 = vshrl.u32 %v11590_v44, 16  ;;  %12935 = vst [vmem:[#allocation24_spill] sm:$0xff] %v11615_v39  ;;  %v4226_v53 = vor.u32 %v4225_v54, %v4221_v57  ;;  %v6464_v8 = vrot.slane %v6462_v0, 4  ;;  %v6481_v12 = vshll.u32 %v11599_v49, 16  ;;  %v8136_v26 = vld [vmem:[%s9091_s22 + $0xb0] sm:$0x1]  ;;  %v11623_v39 = vpop.permute.xlu1 %6841 }
 0x268   : > { %v6467_v40 = vrot.slane %v6465_v50, 5  ;;  %v4217_v20 = vrot.slane %v4216_v2, 4  ;;  %v6473_v36 = vrot.slane %v6471_v34, 5  ;;  %v8172_v17 = vrot.slane %v8156_v46, 9  ;;  %v11619_v15 = vld [vmem:[#allocation2] ss:$0 sm:$0xff] }
 0x269   : > { %v6477_v9 = vrot.slane %v6475_v3, 4  ;;  %v4227_v31 = vrot.slane %v4226_v53, 4  ;;  %v6483_v43 = vrot.slane %v6481_v12, 5  ;;  %v6106_v22 = vrot.slane %v8135_v59, 5  ;;  %v11634_v34 = vld [vmem:[#allocation3] ss:$0 sm:$0xff] }
 0x26a   : > { %v6468_v21 = vor.u32 %v6467_v40, %v6464_v8  ;;  %v4222_v54 = vsel %vm9170_vm5, %v4217_v20, %v4221_v57  ;;  %v6109_v50 = vrot.slane %v8136_v26, 5  ;;  %v7106_v46 = vsel %vm1507_vm8, %v11559_v45, %v11371_v19  ;;  %v7973_v45 = vld [vmem:[%s9091_s22 + $0xb0] sm:$0x1]  ;;  %v7955_v26 = vld [vmem:[%s9091_s22 + $0xb4] sm:$0xf] }
 0x26b   : > { %v6478_v0 = vor.u32 %v6477_v9, %v6473_v36  ;;  %v4232_v40 = vsel %vm9170_vm5, %v4227_v31, %v4231_v14  ;;  %v6107_v59 = vsel %vm9119_vm2, %v8172_v17, %v6106_v22  ;;  %v6108_v2 = vrot.slane %v6106_v22, 4  ;;  %8564 = vmatprep.mubr.msk.bf16.mxu1 %vm1556_vm9, %v7106_v46  ;;  %v11642_v31 = vpop.f32.mrb[16].mxu0  ;;  %v11662_v22 = vpop.permute.xlu0 %4854 }
 0x26c   : > { %v6469_v8 = vrot.slane %v6468_v21, 4  ;;  %v7032_v9 = vsel %vm1425_vm6, %v8258_v25, %v11332_v1  ;;  %v8006_v20 = vcombine.low %v4222_v54, %v4232_v40  ;;  %v1758_v19 = vmul.f32 %v11012_v42, %v11619_v15  ;;  %v11664_v54 = vpop.permute.xlu1 %4966  ;;  %v11672_v40 = vpop.f32.mrb[16].mxu1 }
 0x26d   : > { %v6479_v57 = vrot.slane %v6478_v0, 4  ;;  %v6110_v14 = vsel %vm9119_vm2, %v6108_v2, %v6109_v50  ;;  %v7076_v3 = vsel %vm1474_vm7, %v7032_v9, %v11384_v48  ;;  %v3722_v1 = vmul.f32 %v11023_v30, %v11619_v15  ;;  %v11680_v2 = vpop.f32.mrb[17].mxu0 }
 0x26e   : > { %v6474_v17 = vsel %vm9170_vm5, %v6469_v8, %v6473_v36  ;;  %4868 = vrot.lane.b32.xlu0 %v8006_v20, %s9044_s24  ;;  %v8284_v25 = vcombine.low %v6107_v59, %v6110_v14  ;;  %v1796_v53 = vadd.f32 %v11634_v34, %v1758_v19  ;;  %v4625_v12 = vor.u32 %v11573_v62, %v11561_v37  ;;  %v7956_v62 = vld [vmem:[%s9091_s22 + $0xb8] sm:$0xf] }
 0x26f   : > { %v6484_v42 = vsel %vm9170_vm5, %v6479_v57, %v6483_v43  ;;  %v3754_v21 = vadd.f32 %v11634_v34, %v3722_v1  ;;  %v4635_v48 = vor.u32 %v11596_v29, %v11577_v56  ;;  %v4638_v30 = vshll.u32 %v7973_v45, 16  ;;  %v8235_v45 = vld [vmem:[%s9091_s22 + $0xa8] sm:$0xe] }
 0x270   : > { %v8299_v36 = vcombine.low %v6474_v17, %v6484_v42  ;;  %8664 = vtanh.f32 %v1796_v53  ;;  %v4626_v43 = vrot.slane %v4625_v12, 4  ;;  %v1756_v0 = vmul.f32 %v11619_v15, %v11032_v10  ;;  %v11687_v17 = vpop.f32.mrb[17].mxu1  ;;  %v11691_v42 = vpop.f32.mrb[18].mxu0 }
 0x271   : > { %v3720_v37 = vmul.f32 %v11619_v15, %v11034_v28  ;;  %8666 = vtanh.f32 %v3754_v21  ;;  %v4636_v29 = vrot.slane %v4635_v48, 4  ;;  %v4640_v50 = vrot.slane %v4638_v30, 5  ;;  %12936 = vst [vmem:[#allocation25_spill] sm:$0xff] %v11691_v42  ;;  %v11701_v21 = vpop.permute.xlu0 %4856  ;;  %v11703_v48 = vpop.permute.xlu1 %6921 }
 0x272   : > { %6933 = vrot.lane.b32.xlu1 %v8299_v36, %s9043_s23  ;;  %v4643_v46 = vshrl.u32 %v7955_v26, 16  ;;  %6855 = vrot.lane.b32.xlu0 %v8284_v25, %s9044_s24  ;;  %v4631_v8 = vsel %vm9170_vm5, %v4626_v43, %v11577_v56  ;;  %v1794_v10 = vadd.f32 %v11634_v34, %v1756_v0  ;;  %v4646_v59 = vshll.u32 %v7955_v26, 16  ;;  %v8214_v36 = vld [vmem:[%s9091_s22 + $0xb4] sm:$0xf]  ;;  %v11713_v0 = vpop.f32.mrb[18].mxu1 }
 0x273   : > { %v3752_v28 = vadd.f32 %v11634_v34, %v3720_v37  ;;  %v4641_v9 = vsel %vm9170_vm5, %v4636_v29, %v4640_v50  ;;  %v4652_v57 = vshll.u32 %v7956_v62, 16  ;;  %v4656_v19 = vshrl.u32 %v7956_v62, 16  ;;  %12937 = vst [vmem:[#allocation26_spill] sm:$0xff] %v11713_v0  ;;  %v11723_v50 = vld [vmem:[%s9091_s22 + $0xb8] sm:$0xf] }
 0x274   : > { %v11684_v20 = vrot.slane %v4643_v46, 4  ;;  %v8037_v56 = vcombine.low %v4631_v8, %v4641_v9  ;;  %8668 = vtanh.f32 %v1794_v10  ;;  %v11689_v14 = vrot.slane %v4646_v59, 5  ;;  %v8217_v0 = vld [vmem:[%s9091_s22 + $0xc0] sm:$0xf] }
 0x275   : > { %v8022_v1 = vcombine.low %v7955_v26, %v7956_v62  ;;  %8670 = vtanh.f32 %v3752_v28  ;;  %v11694_v25 = vrot.slane %v4652_v57, 5  ;;  %v11696_v53 = vrot.slane %v4656_v19, 4  ;;  %v8107_v57 = vld [vmem:[%s9091_s22 + $0x3c] sm:$0xf] }
 0x276   : > { %v1759_v12 = vmul.f32 %v11042_v60, %v11619_v15  ;;  %5058 = vrot.lane.b32.xlu1 %v8037_v56, %s9045_s25  ;;  %v3723_v26 = vmul.f32 %v11048_v4, %v11619_v15  ;;  %v7108_v30 = vsel %vm1507_vm8, %v7076_v3, %v11392_v32  ;;  %v1757_v43 = vmul.f32 %v11619_v15, %v11057_v27  ;;  %v11726_v32 = vpop.f32.mrb[19].mxu0  ;;  %v11740_v3 = vpop.f32.mrb[19].mxu1 }
 0x277   : > { %4980 = vrot.lane.b32.xlu0 %v8022_v1, %s9043_s23  ;;  %v8251_v60 = vrot.slane %v8235_v45, 9  ;;  %v3721_v62 = vmul.f32 %v11619_v15, %v11059_v47  ;;  %v5153_v29 = vsel %vm1507_vm8, %v11607_v11, %v11419_v63  ;;  %v6707_v4 = vrot.slane %v11590_v44, 5  ;;  %8565 = vmatmul.mubr.msk.bf16.gmra.mrb[36].mxu1 %vm1556_vm9, %v7108_v30  ;;  %12938 = vst [vmem:[#allocation27_spill] sm:$0xff] %v11726_v32  ;;  %v11737_v44 = vld [vmem:[%s9091_s22 + $0xbc] sm:$0x1] }
 0x278   : > { %v1797_v37 = vadd.f32 %v11634_v34, %v1759_v12  ;;  %v3755_v27 = vadd.f32 %v11634_v34, %v3723_v26  ;;  %v1795_v47 = vadd.f32 %v11634_v34, %v1757_v43  ;;  %v6710_v63 = vrot.slane %v11599_v49, 5  ;;  %8529 = vmatmul.mubr.msk.bf16.gmra.mrb[36].mxu0 %vm1556_vm9, %v5153_v29  ;;  %12939 = vst [vmem:[#allocation28_spill] sm:$0xff] %v11740_v3  ;;  %v11753_v12 = vpop.permute.xlu0 %6843  ;;  %v11755_v26 = vpop.permute.xlu1 %5046 }
 0x279   : > { %v6486_v11 = vshrl.u32 %v8214_v36, 16  ;;  %v3753_v46 = vadd.f32 %v11634_v34, %v3721_v62  ;;  %v6708_v8 = vsel %vm9119_vm2, %v8251_v60, %v6707_v4  ;;  %v6709_v10 = vrot.slane %v6707_v4, 4 }
 0x27a   : > { %8672 = vtanh.f32 %v1797_v37  ;;  %v8665_v28 = vpop.eup %8664  ;;  %v6489_v49 = vshll.u32 %v8214_v36, 16  ;;  %v6495_v9 = vshll.u32 %v11723_v50, 16  ;;  %v6499_v56 = vshrl.u32 %v11723_v50, 16 }
 0x27b   : > { %8674 = vtanh.f32 %v3755_v27  ;;  %v6488_v59 = vrot.slane %v6486_v11, 4  ;;  %v8667_v19 = vpop.eup %8666  ;;  %1861 = vst.msk [vmem:[%s11731_s20 + $0x10] sm:$0xff] %vm1858_vm10, %v8665_v28  ;;  %v6711_v45 = vsel %vm9119_vm2, %v6709_v10, %v6710_v63  ;;  %v6505_v1 = vshll.u32 %v11737_v44, 16 }
 0x27c   : > { %8676 = vtanh.f32 %v1795_v47  ;;  %7851 = vst.msk [vmem:[%s11731_s20 + $0x110] sm:$0xff] %vm1858_vm10, %v8667_v19  ;;  %v8315_v36 = vcombine.low %v6708_v8, %v6711_v45  ;;  %v6491_v30 = vrot.slane %v6489_v49, 5  ;;  %v6497_v43 = vrot.slane %v6495_v9, 5  ;;  %v8983_v47 = vld [vmem:[%s9091_s22 + $0x40] sm:$0xf] }
 0x27d   : > { %8678 = vtanh.f32 %v3753_v46  ;;  %v6501_v60 = vrot.slane %v6499_v56, 4  ;;  %v6507_v37 = vrot.slane %v6505_v1, 5  ;;  %v5662_v62 = vshrl.u32 %v8107_v57, 16  ;;  %v8984_v46 = vld [vmem:[%s9091_s22 + $0x44] sm:$0x1] }
 0x27e   : > { %v5665_v29 = vshll.u32 %v8107_v57, 16  ;;  %v8669_v4 = vpop.eup %8668  ;;  %7013 = vrot.lane.b32.xlu1 %v8315_v36, %s9045_s25  ;;  %v6492_v27 = vor.u32 %v6491_v30, %v6488_v59  ;;  %v5671_v63 = vshll.u32 %v8983_v47, 16  ;;  %v5675_v11 = vshrl.u32 %v8983_v47, 16  ;;  %v8236_v8 = vld [vmem:[%s9091_s22 + $0xb4] sm:$0xe] }
 0x27f   : > { %v5681_v10 = vshll.u32 %v8984_v46, 16  ;;  %v8671_v28 = vpop.eup %8670  ;;  %1859 = vst.msk [vmem:[%s11731_s20] sm:$0xff] %vm1858_vm10, %v8669_v4  ;;  %v6502_v49 = vor.u32 %v6501_v60, %v6497_v43  ;;  %v5664_v9 = vrot.slane %v5662_v62, 4  ;;  %v8985_v45 = vld [vmem:[%s9091_s22 + $0x3c] sm:$0xf]  ;;  %v8252_v4 = vrot.slane %v8236_v8, 9  ;;  %v11771_v60 = vpop.permute.xlu0 %4968 }
 0x280   : > { %v5667_v19 = vrot.slane %v5665_v29, 5  ;;  %v8986_v57 = vld [vmem:[%s9091_s22 + $0x40] sm:$0xf]  ;;  %7849 = vst.msk [vmem:[%s11731_s20 + $0x100] sm:$0xff] %vm1858_vm10, %v8671_v28  ;;  %v6493_v1 = vrot.slane %v6492_v27, 4  ;;  %v5673_v59 = vrot.slane %v5671_v63, 5  ;;  %v11773_v62 = vpop.permute.xlu1 %7001 }
 0x281   : > { %v7981_v56 = vcombine.low %v8985_v45, %v8986_v57  ;;  %v5677_v36 = vrot.slane %v5675_v11, 4  ;;  %v5683_v30 = vrot.slane %v5681_v10, 5  ;;  %v6503_v47 = vrot.slane %v6502_v49, 4  ;;  %v7974_v11 = vld [vmem:[%s9091_s22 + $0xbc] sm:$0x1] }
 0x282   : > { %v5668_v3 = vor.u32 %v5667_v19, %v5664_v9  ;;  %v6498_v29 = vsel %vm9170_vm5, %v6493_v1, %v6497_v43  ;;  %v6714_v27 = vrot.slane %v11723_v50, 5  ;;  %v6717_v63 = vrot.slane %v11737_v44, 5  ;;  %v8157_v1 = vld [vmem:[%s9091_s22 + $0xb4] sm:$0xe] }
 0x283   : > { %v5080_v46 = vsel %vm1425_vm6, %v7981_v56, %v11458_v52  ;;  %v5678_v28 = vor.u32 %v5677_v36, %v5673_v59  ;;  %v6508_v52 = vsel %vm9170_vm5, %v6503_v47, %v6507_v37  ;;  %v4649_v49 = vor.u32 %v11689_v14, %v11684_v20  ;;  %v8138_v37 = vld [vmem:[%s9091_s22 + $0xb8] sm:$0xf] }
 0x284   : > { %v8673_v10 = vpop.eup %8672  ;;  %v5669_v8 = vrot.slane %v5668_v3, 4  ;;  %v4659_v43 = vor.u32 %v11696_v53, %v11694_v25  ;;  %v8300_v50 = vcombine.low %v6498_v29, %v6508_v52  ;;  %v6715_v19 = vsel %vm9119_vm2, %v8252_v4, %v6714_v27  ;;  %v8139_v3 = vld [vmem:[%s9091_s22 + $0xbc] sm:$0x1] }
 0x285   : > { %v8675_v9 = vpop.eup %8674  ;;  %1862 = vst.msk [vmem:[%s11731_s20 + $0x18] sm:$0xff] %vm1858_vm10, %v8673_v10  ;;  %v5679_v44 = vrot.slane %v5678_v28, 4  ;;  %v6716_v45 = vrot.slane %v6714_v27, 4  ;;  %v4650_v14 = vrot.slane %v4649_v49, 4  ;;  %v4662_v56 = vshll.u32 %v7974_v11, 16  ;;  %v11817_v49 = vpop.permute.xlu0 %6923 }
 0x286   : > { %v8677_v57 = vpop.eup %8676  ;;  %7852 = vst.msk [vmem:[%s11731_s20 + $0x118] sm:$0xff] %vm1858_vm10, %v8675_v9  ;;  %v5674_v20 = vsel %vm9170_vm5, %v5669_v8, %v5673_v59  ;;  %v4660_v53 = vrot.slane %v4659_v43, 4  ;;  %6935 = vrot.lane.b32.xlu0 %v8300_v50, %s9043_s23  ;;  %v11806_v29 = vsel %vm1474_vm7, %v5080_v46, %v11464_v61  ;;  %v8987_v59 = vld [vmem:[%s9091_s22 + $0x48] sm:$0xf]  ;;  %v8988_v28 = vld [vmem:[%s9091_s22 + $0x4c] sm:$0xf]  ;;  %v11819_v61 = vpop.permute.xlu1 %7003 }
 0x287   : > { %v8679_v36 = vpop.eup %8678  ;;  %1860 = vst.msk [vmem:[%s11731_s20 + $0x8] sm:$0xff] %vm1858_vm10, %v8677_v57  ;;  %v5684_v47 = vsel %vm9170_vm5, %v5679_v44, %v5683_v30  ;;  %v6718_v4 = vsel %vm9119_vm2, %v6716_v45, %v6717_v63  ;;  %v7982_v27 = vcombine.low %v8987_v59, %v8988_v28  ;;  %v7909_v11 = vld [vmem:[%s9091_s22 + $0xb4] sm:$0xf]  ;;  %v4655_v30 = vsel %vm9170_vm5, %v4650_v14, %v11694_v25  ;;  %v7910_v63 = vld [vmem:[%s9091_s22 + $0xb8] sm:$0xf] }
 0x288   : > { %7850 = vst.msk [vmem:[%s11731_s20 + $0x108] sm:$0xff] %vm1858_vm10, %v8679_v36  ;;  %v8259_v10 = vcombine.low %v5674_v20, %v5684_v47  ;;  %v8316_v52 = vcombine.low %v6715_v19, %v6718_v4  ;;  %v4664_v8 = vrot.slane %v4662_v56, 5  ;;  %v8173_v43 = vrot.slane %v8157_v1, 9  ;;  %v7927_v44 = vld [vmem:[%s9091_s22 + $0xbc] sm:$0x1] }
 0x289   : > { %v11823_v46 = vsel %vm1425_vm6, %v7982_v27, %v11477_v6  ;;  %v6113_v9 = vrot.slane %v8138_v37, 5  ;;  %v6116_v50 = vrot.slane %v8139_v3, 5  ;;  %v4234_v45 = vshrl.u32 %v7909_v11, 16  ;;  %v8110_v20 = vld [vmem:[%s9091_s22 + $0x48] sm:$0xf] }
 0x28a   : > { %v7035_v19 = vsel %vm1425_vm6, %v8259_v10, %v11435_v23  ;;  %7015 = vrot.lane.b32.xlu1 %v8316_v52, %s9045_s25  ;;  %v4665_v25 = vsel %vm9170_vm5, %v4660_v53, %v4664_v8  ;;  %v4237_v57 = vshll.u32 %v7909_v11, 16  ;;  %v4243_v37 = vshll.u32 %v7910_v63, 16  ;;  %v7957_v28 = vld [vmem:[%s9091_s22 + $0xc0] sm:$0xf]  ;;  %v11844_v8 = vpop.permute.xlu1 %6845 }
 0x28b   : > { %v8038_v14 = vcombine.low %v4655_v30, %v4665_v25  ;;  %v6114_v6 = vsel %vm9119_vm2, %v8173_v43, %v6113_v9  ;;  %v6115_v56 = vrot.slane %v6113_v9, 4  ;;  %v4236_v3 = vrot.slane %v4234_v45, 4  ;;  %v11842_v30 = vpop.permute.xlu0 %5048  ;;  %v8989_v9 = vld [vmem:[%s9091_s22 + $0x4c] sm:$0xf]  ;;  %v8990_v25 = vld [vmem:[%s9091_s22 + $0x50] sm:$0x1] }
 0x28c   : > { %v4239_v1 = vrot.slane %v4237_v57, 5  ;;  %v4247_v36 = vshrl.u32 %v7910_v63, 16  ;;  %v4253_v23 = vshll.u32 %v7927_v44, 16  ;;  %v4245_v47 = vrot.slane %v4243_v37, 5  ;;  %v7958_v57 = vld [vmem:[%s9091_s22 + $0xc4] sm:$0xf] }
 0x28d   : > { %5060 = vrot.lane.b32.xlu0 %v8038_v14, %s9045_s25  ;;  %v6117_v53 = vsel %vm9119_vm2, %v6115_v56, %v6116_v50  ;;  %v11839_v4 = vsel %vm1474_vm7, %v7035_v19, %v11484_v38  ;;  %v5686_v59 = vshrl.u32 %v8110_v20, 16  ;;  %v5689_v43 = vshll.u32 %v8110_v20, 16 }
 0x28e   : > { %v8285_v27 = vcombine.low %v6114_v6, %v6117_v53  ;;  %v4240_v11 = vor.u32 %v4239_v1, %v4236_v3  ;;  %v4249_v10 = vrot.slane %v4247_v36, 4  ;;  %v4255_v52 = vrot.slane %v4253_v23, 5  ;;  %v7911_v1 = vld [vmem:[%s9091_s22 + $0xc0] sm:$0xf] }
 0x28f   : > { %v5688_v63 = vrot.slane %v5686_v59, 4  ;;  %v5695_v50 = vshll.u32 %v8989_v9, 16  ;;  %v5699_v44 = vshrl.u32 %v8989_v9, 16  ;;  %v5705_v45 = vshll.u32 %v8990_v25, 16  ;;  %v7912_v9 = vld [vmem:[%s9091_s22 + $0xc4] sm:$0xf]  ;;  %v11862_v42 = vpop.permute.xlu0 %4858 }
 0x290   : > { %6857 = vrot.lane.b32.xlu1 %v8285_v27, %s9044_s24  ;;  %v4241_v38 = vrot.slane %v4240_v11, 4  ;;  %v4250_v19 = vor.u32 %v4249_v10, %v4245_v47  ;;  %v4667_v14 = vshrl.u32 %v7957_v28, 16  ;;  %v5691_v6 = vrot.slane %v5689_v43, 5  ;;  %v7928_v25 = vld [vmem:[%s9091_s22 + $0xc8] sm:$0x1] }
 0x291   : > { %v5697_v56 = vrot.slane %v5695_v50, 5  ;;  %v5701_v37 = vrot.slane %v5699_v44, 4  ;;  %v4670_v3 = vshll.u32 %v7957_v28, 16  ;;  %v5707_v23 = vrot.slane %v5705_v45, 5 }
 0x292   : > { %v4246_v20 = vsel %vm9170_vm5, %v4241_v38, %v4245_v47  ;;  %v4251_v36 = vrot.slane %v4250_v19, 4  ;;  %v11853_v53 = vrot.slane %v4667_v14, 4  ;;  %v5692_v59 = vor.u32 %v5691_v6, %v5688_v63  ;;  %v11864_v47 = vpop.permute.xlu1 %4970 }
 0x293   : > { %v5702_v27 = vor.u32 %v5701_v37, %v5697_v56  ;;  %v11855_v11 = vrot.slane %v4670_v3, 5  ;;  %v4676_v10 = vshll.u32 %v7958_v57, 16  ;;  %v4680_v50 = vshrl.u32 %v7958_v57, 16  ;;  %v11868_v14 = vpop.f32.mrb[20].mxu0  ;;  %v11870_v6 = vpop.f32.mrb[20].mxu1 }
 0x294   : > { %v4256_v43 = vsel %vm9170_vm5, %v4251_v36, %v4255_v52  ;;  %v8023_v44 = vcombine.low %v7957_v28, %v7958_v57  ;;  %v4258_v32 = vshrl.u32 %v7911_v1, 16  ;;  %v5693_v19 = vrot.slane %v5692_v59, 4  ;;  %12940 = vst [vmem:[#allocation29_spill] sm:$0xff] %v11868_v14  ;;  %12941 = vst [vmem:[#allocation30_spill] sm:$0xff] %v11870_v6  ;;  %v11875_v3 = vpop.f32.mrb[21].mxu0 }
 0x295   : > { %v8007_v38 = vcombine.low %v4246_v20, %v4256_v43  ;;  %v5703_v63 = vrot.slane %v5702_v27, 4  ;;  %v11866_v45 = vrot.slane %v4676_v10, 5  ;;  %v11872_v52 = vrot.slane %v4680_v50, 4  ;;  %12942 = vst [vmem:[#allocation31_spill] sm:$0xff] %v11875_v3  ;;  %v11877_v20 = vpop.f32.mrb[21].mxu1 }
 0x296   : > { %4982 = vrot.lane.b32.xlu1 %v8023_v44, %s9043_s23  ;;  %v4260_v28 = vrot.slane %v4258_v32, 4  ;;  %v4261_v57 = vshll.u32 %v7911_v1, 16  ;;  %v4267_v37 = vshll.u32 %v7912_v9, 16  ;;  %12943 = vst [vmem:[#allocation32_spill] sm:$0xff] %v11877_v20  ;;  %v5698_v36 = vsel %vm9170_vm5, %v5693_v19, %v5697_v56  ;;  %v11885_v43 = vld [vmem:[%s9091_s22 + $0xc4] sm:$0xf]  ;;  %v11917_v14 = vpop.permute.xlu1 %6925 }
 0x297   : > { %4870 = vrot.lane.b32.xlu0 %v8007_v38, %s9044_s24  ;;  %v5708_v59 = vsel %vm9170_vm5, %v5703_v63, %v5707_v23  ;;  %v4271_v27 = vshrl.u32 %v7912_v9, 16  ;;  %v4277_v10 = vshll.u32 %v7928_v25, 16  ;;  %v11887_v32 = vpop.f32.mrb[22].mxu0  ;;  %v11889_v1 = vpop.f32.mrb[22].mxu1  ;;  %v5155_v56 = vsel %vm1507_vm8, %v11806_v29, %v11536_v5  ;;  %v11895_v38 = vld [vmem:[%s9091_s22 + $0xc8] sm:$0x1] }
 0x298   : > { %12944 = vst [vmem:[#allocation33_spill] sm:$0xff] %v11887_v32  ;;  %12945 = vst [vmem:[#allocation34_spill] sm:$0xff] %v11889_v1  ;;  %v8260_v50 = vcombine.low %v5698_v36, %v5708_v59  ;;  %v4263_v44 = vrot.slane %v4261_v57, 5  ;;  %v4269_v20 = vrot.slane %v4267_v37, 5  ;;  %v11897_v23 = vpop.f32.mrb[23].mxu0  ;;  %v11899_v9 = vpop.f32.mrb[23].mxu1  ;;  %v11904_v63 = vsel %vm1474_vm7, %v11823_v46, %v11550_v18  ;;  %8532 = vmatprep.mubr.msk.bf16.mxu0 %vm1556_vm9, %v5155_v56 }
 0x299   : > { %12946 = vst [vmem:[#allocation35_spill] sm:$0xff] %v11897_v23  ;;  %12947 = vst [vmem:[#allocation36_spill] sm:$0xff] %v11899_v9  ;;  %v4273_v25 = vrot.slane %v4271_v27, 4  ;;  %v4279_v19 = vrot.slane %v4277_v10, 5  ;;  %v6510_v57 = vshrl.u32 %v8217_v0, 16  ;;  %v6513_v36 = vshll.u32 %v8217_v0, 16  ;;  %v11915_v56 = vpop.permute.xlu0 %4860 }
 0x29a   : > { %v8158_v37 = vld [vmem:[%s9091_s22 + $0xc0] sm:$0xe]  ;;  %v7038_v5 = vsel %vm1425_vm6, %v8260_v50, %v11532_v41  ;;  %v4264_v29 = vor.u32 %v4263_v44, %v4260_v28  ;;  %v6519_v59 = vshll.u32 %v11885_v43, 16  ;;  %v8141_v9 = vld [vmem:[%s9091_s22 + $0xc4] sm:$0xf]  ;;  %v6523_v10 = vshrl.u32 %v11885_v43, 16 }
 0x29b   : > { %v4274_v23 = vor.u32 %v4273_v25, %v4269_v20  ;;  %v6512_v27 = vrot.slane %v6510_v57, 4  ;;  %v6529_v1 = vshll.u32 %v11895_v38, 16  ;;  %v8142_v18 = vld [vmem:[%s9091_s22 + $0xc8] sm:$0x1]  ;;  %v6515_v32 = vrot.slane %v6513_v36, 5 }
 0x29c   : > { %v4265_v46 = vrot.slane %v4264_v29, 4  ;;  %v6521_v3 = vrot.slane %v6519_v59, 5  ;;  %v8174_v6 = vrot.slane %v8158_v37, 9  ;;  %v6525_v0 = vrot.slane %v6523_v10, 4 }
 0x29d   : > { %v4275_v41 = vrot.slane %v4274_v23, 4  ;;  %v6531_v28 = vrot.slane %v6529_v1, 5  ;;  %v6120_v50 = vrot.slane %v8141_v9, 5  ;;  %v6516_v25 = vor.u32 %v6515_v32, %v6512_v27  ;;  %v7975_v27 = vld [vmem:[%s9091_s22 + $0xc8] sm:$0x1] }
 0x29e   : > { %v4270_v44 = vsel %vm9170_vm5, %v4265_v46, %v4269_v20  ;;  %v6123_v57 = vrot.slane %v8142_v18, 5  ;;  %v7110_v29 = vsel %vm1507_vm8, %v11839_v4, %v11553_v7  ;;  %v6526_v36 = vor.u32 %v6525_v0, %v6521_v3  ;;  %v11946_v18 = vpop.permute.xlu0 %6847  ;;  %v11948_v46 = vpop.permute.xlu1 %5050  ;;  %v7959_v0 = vld [vmem:[%s9091_s22 + $0xcc] sm:$0xf] }
 0x29f   : > { %v4280_v37 = vsel %vm9170_vm5, %v4275_v41, %v4279_v19  ;;  %v6121_v23 = vsel %vm9119_vm2, %v8174_v6, %v6120_v50  ;;  %v6122_v59 = vrot.slane %v6120_v50, 4  ;;  %8568 = vmatprep.mubr.msk.bf16.mxu1 %vm1556_vm9, %v7110_v29  ;;  %v6517_v9 = vrot.slane %v6516_v25, 4  ;;  %v7960_v50 = vld [vmem:[%s9091_s22 + $0xd0] sm:$0xf] }
 0x2a0   : > { %v8008_v1 = vcombine.low %v4270_v44, %v4280_v37  ;;  %v7080_v20 = vsel %vm1474_vm7, %v7038_v5, %v11581_v16  ;;  %v1762_v32 = vmul.f32 %v11269_v13, %v11619_v15  ;;  %v6527_v7 = vrot.slane %v6526_v36, 4 }
 0x2a1   : > { %v6124_v4 = vsel %vm9119_vm2, %v6122_v59, %v6123_v57  ;;  %v3726_v6 = vmul.f32 %v11286_v58, %v11619_v15  ;;  %v4673_v19 = vor.u32 %v11855_v11, %v11853_v53  ;;  %v6522_v16 = vsel %vm9170_vm5, %v6517_v9, %v6521_v3  ;;  %v8237_v9 = vld [vmem:[%s9091_s22 + $0xc0] sm:$0xe] }
 0x2a2   : > { %4872 = vrot.lane.b32.xlu0 %v8008_v1, %s9044_s24  ;;  %v8286_v5 = vcombine.low %v6121_v23, %v6124_v4  ;;  %v1800_v13 = vadd.f32 %v11634_v34, %v1762_v32  ;;  %v4683_v10 = vor.u32 %v11872_v52, %v11866_v45  ;;  %v6532_v58 = vsel %vm9170_vm5, %v6527_v7, %v6531_v28  ;;  %v11973_v7 = vpop.permute.xlu0 %4972  ;;  %v11975_v4 = vpop.permute.xlu1 %7005 }
 0x2a3   : > { %v3758_v53 = vadd.f32 %v11634_v34, %v3726_v6  ;;  %v4674_v11 = vrot.slane %v4673_v19, 4  ;;  %v4686_v41 = vshll.u32 %v7975_v27, 16  ;;  %v8301_v3 = vcombine.low %v6522_v16, %v6532_v58  ;;  %v12948_v16 = vld [vmem:[#allocation4_spill] sm:$0xff] }
 0x2a4   : > { %8680 = vtanh.f32 %v1800_v13  ;;  %v4684_v44 = vrot.slane %v4683_v10, 4  ;;  %v1760_v52 = vmul.f32 %v11619_v15, %v11297_v55  ;;  %v3724_v28 = vmul.f32 %v11619_v15, %v11299_v51  ;;  %v8220_v13 = vld [vmem:[%s9091_s22 + $0xcc] sm:$0xf] }
 0x2a5   : > { %8682 = vtanh.f32 %v3758_v53  ;;  %v4679_v25 = vsel %vm9170_vm5, %v4674_v11, %v11866_v45  ;;  %v4688_v57 = vrot.slane %v4686_v41, 5  ;;  %6937 = vrot.lane.b32.xlu1 %v8301_v3, %s9043_s23  ;;  %v4691_v37 = vshrl.u32 %v7959_v0, 16  ;;  %v12949_v10 = vld [vmem:[#allocation5_spill] sm:$0xff]  ;;  %v12950_v53 = vld [vmem:[#allocation20_spill] sm:$0xff]  ;;  %v12951_v41 = vld [vmem:[#allocation6_spill] sm:$0xff] }
 0x2a6   : > { %6859 = vrot.lane.b32.xlu0 %v8286_v5, %s9044_s24  ;;  %v1798_v29 = vadd.f32 %v11634_v34, %v1760_v52  ;;  %v4694_v36 = vshll.u32 %v7959_v0, 16  ;;  %v4700_v23 = vshll.u32 %v7960_v50, 16  ;;  %v3756_v59 = vadd.f32 %v11634_v34, %v3724_v28  ;;  %v12000_v28 = vld [vmem:[%s9091_s22 + $0xd0] sm:$0xf] }
 0x2a7   : > { %v4689_v55 = vsel %vm9170_vm5, %v4684_v44, %v4688_v57  ;;  %v4704_v45 = vshrl.u32 %v7960_v50, 16  ;;  %v8024_v1 = vcombine.low %v7959_v0, %v7960_v50  ;;  %v11969_v51 = vrot.slane %v4691_v37, 4  ;;  %v12952_v44 = vld [vmem:[#allocation7_spill] sm:$0xff] }
 0x2a8   : > { %v8039_v32 = vcombine.low %v4679_v25, %v4689_v55  ;;  %8684 = vtanh.f32 %v1798_v29  ;;  %v11971_v27 = vrot.slane %v4694_v36, 5  ;;  %v11977_v6 = vrot.slane %v4700_v23, 5  ;;  %v12007_v36 = vld [vmem:[%s9091_s22 + $0xd4] sm:$0x1] }
 0x2a9   : > { %8686 = vtanh.f32 %v3756_v59  ;;  %v11979_v19 = vrot.slane %v4704_v45, 4  ;;  %v1763_v5 = vmul.f32 %v12948_v16, %v11619_v15  ;;  %v3727_v58 = vmul.f32 %v12949_v10, %v11619_v15 }
 0x2aa   : > { %5062 = vrot.lane.b32.xlu1 %v8039_v32, %s9045_s25  ;;  %4984 = vrot.lane.b32.xlu0 %v8024_v1, %s9043_s23  ;;  %v7112_v11 = vsel %vm1507_vm8, %v7080_v20, %v12950_v53  ;;  %v1761_v0 = vmul.f32 %v11619_v15, %v12951_v41  ;;  %v8253_v50 = vrot.slane %v8237_v9, 9  ;;  %v3725_v52 = vmul.f32 %v11619_v15, %v12952_v44  ;;  %v8113_v1 = vld [vmem:[%s9091_s22 + $0x54] sm:$0xf]  ;;  %v12015_v9 = vpop.permute.xlu0 %6927  ;;  %v12017_v32 = vpop.permute.xlu1 %7007 }
 0x2ab   : > { %v1801_v3 = vadd.f32 %v11634_v34, %v1763_v5  ;;  %v5157_v25 = vsel %vm1507_vm8, %v11904_v63, %v11621_v35  ;;  %v6721_v57 = vrot.slane %v11885_v43, 5  ;;  %8569 = vmatmul.mubr.msk.bf16.gmra.mrb[40].mxu1 %vm1556_vm9, %v7112_v11  ;;  %v3759_v20 = vadd.f32 %v11634_v34, %v3727_v58 }
 0x2ac   : > { %v1799_v29 = vadd.f32 %v11634_v34, %v1761_v0  ;;  %v6724_v37 = vrot.slane %v11895_v38, 5  ;;  %v6534_v23 = vshrl.u32 %v8220_v13, 16  ;;  %8533 = vmatmul.mubr.msk.bf16.gmra.mrb[40].mxu0 %vm1556_vm9, %v5157_v25  ;;  %v3757_v35 = vadd.f32 %v11634_v34, %v3725_v52  ;;  %v8991_v25 = vld [vmem:[%s9091_s22 + $0x58] sm:$0xf] }
 0x2ad   : > { %8688 = vtanh.f32 %v1801_v3  ;;  %v6722_v43 = vsel %vm9119_vm2, %v8253_v50, %v6721_v57  ;;  %v6723_v63 = vrot.slane %v6721_v57, 4  ;;  %v6537_v45 = vshll.u32 %v8220_v13, 16 }
 0x2ae   : > { %v8681_v55 = vpop.eup %8680  ;;  %8690 = vtanh.f32 %v3759_v20  ;;  %v6536_v59 = vrot.slane %v6534_v23, 4  ;;  %v6543_v38 = vshll.u32 %v12000_v28, 16  ;;  %v6547_v10 = vshrl.u32 %v12000_v28, 16  ;;  %v8238_v23 = vld [vmem:[%s9091_s22 + $0xcc] sm:$0xe] }
 0x2af   : > { %v8683_v16 = vpop.eup %8682  ;;  %1865 = vst.msk [vmem:[%s11731_s20 + $0x30] sm:$0xff] %vm1858_vm10, %v8681_v55  ;;  %8692 = vtanh.f32 %v1799_v29  ;;  %v6725_v5 = vsel %vm9119_vm2, %v6723_v63, %v6724_v37  ;;  %v6553_v58 = vshll.u32 %v12007_v36, 16  ;;  %v6539_v53 = vrot.slane %v6537_v45, 5  ;;  %v8992_v29 = vld [vmem:[%s9091_s22 + $0x5c] sm:$0x1] }
 0x2b0   : > { %7855 = vst.msk [vmem:[%s11731_s20 + $0x130] sm:$0xff] %vm1858_vm10, %v8683_v16  ;;  %8694 = vtanh.f32 %v3757_v35  ;;  %v8317_v13 = vcombine.low %v6722_v43, %v6725_v5  ;;  %v6545_v11 = vrot.slane %v6543_v38, 5  ;;  %v6549_v41 = vrot.slane %v6547_v10, 4  ;;  %v8993_v45 = vld [vmem:[%s9091_s22 + $0x54] sm:$0xf] }
 0x2b1   : > { %v6555_v0 = vrot.slane %v6553_v58, 5  ;;  %v5710_v50 = vshrl.u32 %v8113_v1, 16  ;;  %v5713_v3 = vshll.u32 %v8113_v1, 16  ;;  %v6540_v52 = vor.u32 %v6539_v53, %v6536_v59  ;;  %v8994_v38 = vld [vmem:[%s9091_s22 + $0x58] sm:$0xf]  ;;  %v12037_v58 = vpop.permute.xlu0 %5052 }
 0x2b2   : > { %v8685_v44 = vpop.eup %8684  ;;  %7017 = vrot.lane.b32.xlu1 %v8317_v13, %s9045_s25  ;;  %v5719_v57 = vshll.u32 %v8991_v25, 16  ;;  %v5723_v20 = vshrl.u32 %v8991_v25, 16  ;;  %v5729_v37 = vshll.u32 %v8992_v29, 16  ;;  %v6550_v43 = vor.u32 %v6549_v41, %v6545_v11  ;;  %v12039_v13 = vpop.permute.xlu1 %6849 }
 0x2b3   : > { %v8687_v35 = vpop.eup %8686  ;;  %1863 = vst.msk [vmem:[%s11731_s20 + $0x20] sm:$0xff] %vm1858_vm10, %v8685_v44  ;;  %v5712_v63 = vrot.slane %v5710_v50, 4  ;;  %v5715_v55 = vrot.slane %v5713_v3, 5  ;;  %v7983_v1 = vcombine.low %v8993_v45, %v8994_v38  ;;  %v6541_v16 = vrot.slane %v6540_v52, 4  ;;  %v8116_v45 = vld [vmem:[%s9091_s22 + $0x60] sm:$0xf] }
 0x2b4   : > { %7853 = vst.msk [vmem:[%s11731_s20 + $0x120] sm:$0xff] %vm1858_vm10, %v8687_v35  ;;  %v5721_v59 = vrot.slane %v5719_v57, 5  ;;  %v5725_v5 = vrot.slane %v5723_v20, 4  ;;  %v5731_v10 = vrot.slane %v5729_v37, 5  ;;  %v6551_v53 = vrot.slane %v6550_v43, 4 }
 0x2b5   : > { %v5716_v44 = vor.u32 %v5715_v55, %v5712_v63  ;;  %v5086_v41 = vsel %vm1425_vm6, %v7983_v1, %v11662_v22  ;;  %v8254_v50 = vrot.slane %v8238_v23, 9  ;;  %v6546_v3 = vsel %vm9170_vm5, %v6541_v16, %v6545_v11  ;;  %v7976_v20 = vld [vmem:[%s9091_s22 + $0xd4] sm:$0x1] }
 0x2b6   : > { %v5726_v25 = vor.u32 %v5725_v5, %v5721_v59  ;;  %v6728_v52 = vrot.slane %v12000_v28, 5  ;;  %v6731_v57 = vrot.slane %v12007_v36, 5  ;;  %v6556_v37 = vsel %vm9170_vm5, %v6551_v53, %v6555_v0  ;;  %v8995_v5 = vld [vmem:[%s9091_s22 + $0x60] sm:$0xf]  ;;  %v8996_v53 = vld [vmem:[%s9091_s22 + $0x64] sm:$0xf] }
 0x2b7   : > { %v8689_v29 = vpop.eup %8688  ;;  %v5717_v35 = vrot.slane %v5716_v44, 4  ;;  %v4697_v22 = vor.u32 %v11971_v27, %v11969_v51  ;;  %v4707_v11 = vor.u32 %v11979_v19, %v11977_v6  ;;  %v8302_v28 = vcombine.low %v6546_v3, %v6556_v37  ;;  %v12076_v3 = vpop.permute.xlu1 %4974 }
 0x2b8   : > { %v8691_v23 = vpop.eup %8690  ;;  %1866 = vst.msk [vmem:[%s11731_s20 + $0x38] sm:$0xff] %vm1858_vm10, %v8689_v29  ;;  %v5727_v43 = vrot.slane %v5726_v25, 4  ;;  %v6729_v36 = vsel %vm9119_vm2, %v8254_v50, %v6728_v52  ;;  %v6730_v0 = vrot.slane %v6728_v52, 4  ;;  %v4710_v55 = vshll.u32 %v7976_v20, 16  ;;  %v12074_v50 = vpop.permute.xlu0 %4862  ;;  %v8997_v20 = vld [vmem:[%s9091_s22 + $0x64] sm:$0xf] }
 0x2b9   : > { %v8693_v63 = vpop.eup %8692  ;;  %7856 = vst.msk [vmem:[%s11731_s20 + $0x138] sm:$0xff] %vm1858_vm10, %v8691_v23  ;;  %v5722_v51 = vsel %vm9170_vm5, %v5717_v35, %v5721_v59  ;;  %v4698_v27 = vrot.slane %v4697_v22, 4  ;;  %v4708_v19 = vrot.slane %v4707_v11, 4  ;;  %6939 = vrot.lane.b32.xlu0 %v8302_v28, %s9043_s23  ;;  %v5127_v59 = vsel %vm1474_vm7, %v5086_v41, %v11664_v54  ;;  %v8998_v11 = vld [vmem:[%s9091_s22 + $0x68] sm:$0x1] }
 0x2ba   : > { %v8695_v38 = vpop.eup %8694  ;;  %1864 = vst.msk [vmem:[%s11731_s20 + $0x28] sm:$0xff] %vm1858_vm10, %v8693_v63  ;;  %v5732_v1 = vsel %vm9170_vm5, %v5727_v43, %v5731_v10  ;;  %v6732_v16 = vsel %vm9119_vm2, %v6730_v0, %v6731_v57  ;;  %v7984_v44 = vcombine.low %v8995_v5, %v8996_v53  ;;  %v4712_v52 = vrot.slane %v4710_v55, 5  ;;  %v12955_v53 = vld [vmem:[#allocation10_spill] sm:$0xff] }
 0x2bb   : > { %7854 = vst.msk [vmem:[%s11731_s20 + $0x128] sm:$0xff] %vm1858_vm10, %v8695_v38  ;;  %v8261_v25 = vcombine.low %v5722_v51, %v5732_v1  ;;  %v8318_v10 = vcombine.low %v6729_v36, %v6732_v16  ;;  %v4703_v33 = vsel %vm9170_vm5, %v4698_v27, %v11977_v6  ;;  %v5734_v41 = vshrl.u32 %v8116_v45, 16  ;;  %v12093_v6 = vld [vmem:[%s9091_s22 + $0x6c] sm:$0xf]  ;;  %v12108_v38 = vpop.permute.xlu1 %6929 }
 0x2bc   : > { %v5089_v54 = vsel %vm1425_vm6, %v7984_v44, %v11701_v21  ;;  %v5737_v57 = vshll.u32 %v8116_v45, 16  ;;  %v5743_v29 = vshll.u32 %v8997_v20, 16  ;;  %v4713_v35 = vsel %vm9170_vm5, %v4708_v19, %v4712_v52  ;;  %v12106_v45 = vpop.permute.xlu0 %4864  ;;  %v12957_v52 = vld [vmem:[#allocation12_spill] sm:$0xff] }
 0x2bd   : > { %v7041_v37 = vsel %vm1425_vm6, %v8261_v25, %v11623_v39  ;;  %7019 = vrot.lane.b32.xlu1 %v8318_v10, %s9045_s25  ;;  %v5747_v22 = vshrl.u32 %v8997_v20, 16  ;;  %v5753_v23 = vshll.u32 %v8998_v11, 16  ;;  %v8040_v28 = vcombine.low %v4703_v33, %v4713_v35  ;;  %v12956_v10 = vld [vmem:[#allocation11_spill] sm:$0xff] }
 0x2be   : > { %v7082_v21 = vsel %vm1474_vm7, %v7041_v37, %v11703_v48  ;;  %v5736_v43 = vrot.slane %v5734_v41, 4  ;;  %v5739_v36 = vrot.slane %v5737_v57, 5  ;;  %v5745_v0 = vrot.slane %v5743_v29, 5  ;;  %v12958_v41 = vld [vmem:[#allocation13_spill] sm:$0xff] }
 0x2bf   : > { %v5749_v63 = vrot.slane %v5747_v22, 4  ;;  %v5755_v51 = vrot.slane %v5753_v23, 5  ;;  %v5159_v39 = vsel %vm1507_vm8, %v5127_v59, %v11755_v26  ;;  %5064 = vrot.lane.b32.xlu0 %v8040_v28, %s9045_s25  ;;  %v5129_v19 = vsel %vm1474_vm7, %v5089_v54, %v11771_v60  ;;  %v12953_v26 = vld [vmem:[#allocation8_spill] sm:$0xff]  ;;  %v12954_v59 = vld [vmem:[#allocation9_spill] sm:$0xff]  ;;  %v12117_v44 = vpop.f32.mrb[24].mxu0 }
 0x2c0   : > { %v5740_v27 = vor.u32 %v5739_v36, %v5736_v43  ;;  %8536 = vmatprep.mubr.msk.bf16.mxu0 %vm1556_vm9, %v5159_v39  ;;  %v7114_v55 = vsel %vm1507_vm8, %v7082_v21, %v11773_v62  ;;  %v5758_v48 = vshrl.u32 %v12093_v6, 16  ;;  %v1766_v16 = vmul.f32 %v12953_v26, %v11619_v15  ;;  %v12119_v62 = vpop.f32.mrb[24].mxu1  ;;  %v12127_v20 = vpop.f32.mrb[25].mxu0  ;;  %v12960_v26 = vld [vmem:[#allocation15_spill] sm:$0xff] }
 0x2c1   : > { %v5750_v1 = vor.u32 %v5749_v63, %v5745_v0  ;;  %v3730_v5 = vmul.f32 %v12954_v59, %v11619_v15  ;;  %v1764_v60 = vmul.f32 %v11619_v15, %v12955_v53  ;;  %8572 = vmatprep.mubr.msk.bf16.mxu1 %vm1556_vm9, %v7114_v55  ;;  %v3728_v33 = vmul.f32 %v11619_v15, %v12956_v10  ;;  %v12129_v29 = vpop.f32.mrb[25].mxu1  ;;  %v12134_v23 = vpop.f32.mrb[26].mxu0  ;;  %v12149_v55 = vld [vmem:[#allocation2] ss:$0 sm:$0xff]  ;;  %v12157_v53 = vld [vmem:[#allocation3] ss:$0 sm:$0xff] }
 0x2c2   : > { %v5741_v25 = vrot.slane %v5740_v27, 4  ;;  %v1767_v54 = vmul.f32 %v12957_v52, %v11619_v15  ;;  %v3731_v57 = vmul.f32 %v12958_v41, %v11619_v15  ;;  %v1804_v35 = vadd.f32 %v11634_v34, %v1766_v16  ;;  %v12136_v28 = vpop.f32.mrb[26].mxu1  ;;  %v12143_v63 = vpop.f32.mrb[27].mxu0 }
 0x2c3   : > { %v5751_v37 = vrot.slane %v5750_v1, 4  ;;  %v3762_v22 = vadd.f32 %v11634_v34, %v3730_v5  ;;  %v1802_v11 = vadd.f32 %v11634_v34, %v1764_v60  ;;  %v3760_v15 = vadd.f32 %v11634_v34, %v3728_v33  ;;  %v12145_v39 = vpop.f32.mrb[27].mxu1  ;;  %v12959_v1 = vld [vmem:[#allocation14_spill] sm:$0xff]  ;;  %v12168_v52 = vpop.permute.xlu1 %5054 }
 0x2c4   : > { %v5746_v21 = vsel %vm9170_vm5, %v5741_v25, %v5745_v0  ;;  %v1805_v43 = vadd.f32 %v11634_v34, %v1767_v54  ;;  %v3763_v36 = vadd.f32 %v11634_v34, %v3731_v57  ;;  %8696 = vtanh.f32 %v1804_v35  ;;  %v9001_v33 = vld [vmem:[%s9091_s22 + $0x70] sm:$0xf]  ;;  %v9002_v57 = vld [vmem:[%s9091_s22 + $0x74] sm:$0x1] }
 0x2c5   : > { %v5756_v27 = vsel %vm9170_vm5, %v5751_v37, %v5755_v51  ;;  %v1765_v0 = vmul.f32 %v12149_v55, %v12959_v1  ;;  %v3729_v16 = vmul.f32 %v12149_v55, %v12960_v26  ;;  %8698 = vtanh.f32 %v3762_v22  ;;  %v9005_v1 = vld [vmem:[%s9091_s22 + $0x78] sm:$0xf] }
 0x2c6   : > { %v8262_v59 = vcombine.low %v5746_v21, %v5756_v27  ;;  %v5161_v34 = vsel %vm1507_vm8, %v5129_v19, %v11842_v30  ;;  %v5760_v5 = vrot.slane %v5758_v48, 4  ;;  %8700 = vtanh.f32 %v1802_v11  ;;  %v12166_v48 = vpop.permute.xlu0 %6851 }
 0x2c7   : > { %v1803_v51 = vadd.f32 %v12157_v53, %v1765_v0  ;;  %v3761_v60 = vadd.f32 %v12157_v53, %v3729_v16  ;;  %8537 = vmatmul.mubr.msk.bf16.gmra.mrb[44].mxu0 %vm1556_vm9, %v5161_v34  ;;  %v5761_v25 = vshll.u32 %v12093_v6, 16  ;;  %8702 = vtanh.f32 %v3760_v15  ;;  %v9004_v15 = vld [vmem:[%s9091_s22 + $0x70] sm:$0xf]  ;;  %v9006_v0 = vld [vmem:[%s9091_s22 + $0x7c] sm:$0xf] }
 0x2c8   : > { %v7044_v10 = vsel %vm1425_vm6, %v8262_v59, %v11753_v12  ;;  %v5767_v30 = vshll.u32 %v9001_v33, 16  ;;  %v5771_v19 = vshrl.u32 %v9001_v33, 16  ;;  %8704 = vtanh.f32 %v1805_v43  ;;  %v8122_v12 = vld [vmem:[%s9091_s22 + $0x78] sm:$0xf]  ;;  %v9007_v34 = vld [vmem:[%s9091_s22 + $0x7c] sm:$0xf] }
 0x2c9   : > { %v7084_v54 = vsel %vm1474_vm7, %v7044_v10, %v11817_v49  ;;  %v5763_v41 = vrot.slane %v5761_v25, 5  ;;  %v5777_v6 = vshll.u32 %v9002_v57, 16  ;;  %8706 = vtanh.f32 %v3763_v36  ;;  %v9003_v49 = vld [vmem:[%s9091_s22 + $0x6c] sm:$0xf] }
 0x2ca   : > { %v7116_v37 = vsel %vm1507_vm8, %v7084_v54, %v11819_v61  ;;  %v5769_v35 = vrot.slane %v5767_v30, 5  ;;  %v5773_v22 = vrot.slane %v5771_v19, 4  ;;  %8708 = vtanh.f32 %v1803_v51  ;;  %v12188_v33 = vpop.permute.xlu0 %4976  ;;  %v12190_v30 = vpop.permute.xlu1 %7009 }
 0x2cb   : > { %8573 = vmatmul.mubr.msk.bf16.gmra.mrb[44].mxu1 %vm1556_vm9, %v7116_v37  ;;  %v5764_v11 = vor.u32 %v5763_v41, %v5760_v5  ;;  %v5779_v21 = vrot.slane %v5777_v6, 5  ;;  %v7985_v43 = vcombine.low %v9003_v49, %v9004_v15  ;;  %8710 = vtanh.f32 %v3761_v60 }
 0x2cc   : > { %v5774_v27 = vor.u32 %v5773_v22, %v5769_v35  ;;  %v7986_v26 = vcombine.low %v9005_v1, %v9006_v0  ;;  %v5782_v36 = vshrl.u32 %v8122_v12, 16  ;;  %v5785_v59 = vshll.u32 %v8122_v12, 16  ;;  %v12962_v1 = vld [vmem:[#allocation17_spill] sm:$0xff] }
 0x2cd   : > { %v5765_v16 = vrot.slane %v5764_v11, 4  ;;  %v5092_v61 = vsel %vm1425_vm6, %v7985_v43, %v11862_v42  ;;  %v5791_v51 = vshll.u32 %v9007_v34, 16  ;;  %v5795_v57 = vshrl.u32 %v9007_v34, 16  ;;  %v12961_v43 = vld [vmem:[#allocation16_spill] sm:$0xff] }
 0x2ce   : > { %v5775_v5 = vrot.slane %v5774_v27, 4  ;;  %v5131_v25 = vsel %vm1474_vm7, %v5092_v61, %v11864_v47  ;;  %v5095_v60 = vsel %vm1425_vm6, %v7986_v26, %v11915_v56  ;;  %v5784_v10 = vrot.slane %v5782_v36, 4  ;;  %v8697_v19 = vpop.eup %8696  ;;  %v9008_v56 = vld [vmem:[%s9091_s22 + $0x80] sm:$0x1] }
 0x2cf   : > { %v5770_v42 = vsel %vm9170_vm5, %v5765_v16, %v5769_v35  ;;  %v5787_v54 = vrot.slane %v5785_v59, 5  ;;  %v5793_v41 = vrot.slane %v5791_v51, 5  ;;  %v8699_v6 = vpop.eup %8698  ;;  %1869 = vst.msk [vmem:[%s11731_s20 + $0x50] sm:$0xff] %vm1858_vm10, %v8697_v19  ;;  %v5801_v12 = vshll.u32 %v9008_v56, 16  ;;  %v12964_v36 = vld [vmem:[#allocation19_spill] sm:$0xff] }
 0x2d0   : > { %v5780_v47 = vsel %vm9170_vm5, %v5775_v5, %v5779_v21  ;;  %v5163_v37 = vsel %vm1507_vm8, %v5131_v25, %v11948_v46  ;;  %v5133_v22 = vsel %vm1474_vm7, %v5095_v60, %v11973_v7  ;;  %v8701_v35 = vpop.eup %8700  ;;  %7859 = vst.msk [vmem:[%s11731_s20 + $0x150] sm:$0xff] %vm1858_vm10, %v8699_v6  ;;  %v5797_v15 = vrot.slane %v5795_v57, 4  ;;  %v12963_v7 = vld [vmem:[#allocation18_spill] sm:$0xff] }
 0x2d1   : > { %v8263_v11 = vcombine.low %v5770_v42, %v5780_v47  ;;  %v5788_v49 = vor.u32 %v5787_v54, %v5784_v10  ;;  %8540 = vmatprep.mubr.msk.bf16.mxu0 %vm1556_vm9, %v5163_v37  ;;  %v1770_v21 = vmul.f32 %v12149_v55, %v12961_v43  ;;  %v8703_v27 = vpop.eup %8702  ;;  %1867 = vst.msk [vmem:[%s11731_s20 + $0x40] sm:$0xff] %vm1858_vm10, %v8701_v35  ;;  %v5803_v46 = vrot.slane %v5801_v12, 5  ;;  %v12228_v54 = vpop.permute.xlu0 %6931  ;;  %v12965_v12 = vld [vmem:[#allocation21_spill] sm:$0xff]  ;;  %v12966_v35 = vld [vmem:[#allocation22_spill] sm:$0xff]  ;;  %v12968_v43 = vld [vmem:[#allocation24_spill] sm:$0xff] }
 0x2d2   : > { %v3734_v0 = vmul.f32 %v12149_v55, %v12962_v1  ;;  %v1768_v26 = vmul.f32 %v12149_v55, %v12963_v7  ;;  %v3732_v16 = vmul.f32 %v12149_v55, %v12964_v36  ;;  %v8705_v61 = vpop.eup %8704  ;;  %7857 = vst.msk [vmem:[%s11731_s20 + $0x140] sm:$0xff] %vm1858_vm10, %v8703_v27  ;;  %v5798_v51 = vor.u32 %v5797_v15, %v5793_v41  ;;  %v8125_v15 = vld [vmem:[%s9091_s22 + $0x84] sm:$0xf] }
 0x2d3   : > { %v7047_v59 = vsel %vm1425_vm6, %v8263_v11, %v11844_v8  ;;  %v5789_v34 = vrot.slane %v5788_v49, 4  ;;  %v1808_v5 = vadd.f32 %v12157_v53, %v1770_v21  ;;  %v8707_v25 = vpop.eup %8706  ;;  %1870 = vst.msk [vmem:[%s11731_s20 + $0x58] sm:$0xff] %vm1858_vm10, %v8705_v61  ;;  %v12230_v8 = vpop.permute.xlu1 %7011  ;;  %v1771_v37 = vmul.f32 %v12149_v55, %v12965_v12  ;;  %v12967_v49 = vld [vmem:[#allocation23_spill] sm:$0xff] }
 0x2d4   : > { %v7086_v60 = vsel %vm1474_vm7, %v7047_v59, %v11917_v14  ;;  %v3766_v10 = vadd.f32 %v12157_v53, %v3734_v0  ;;  %v1806_v19 = vadd.f32 %v12157_v53, %v1768_v26  ;;  %v3764_v42 = vadd.f32 %v12157_v53, %v3732_v16  ;;  %v8709_v57 = vpop.eup %8708  ;;  %7860 = vst.msk [vmem:[%s11731_s20 + $0x158] sm:$0xff] %vm1858_vm10, %v8707_v25 }
 0x2d5   : > { %v5794_v6 = vsel %vm9170_vm5, %v5789_v34, %v5793_v41  ;;  %v5799_v47 = vrot.slane %v5798_v51, 4  ;;  %v7118_v14 = vsel %vm1507_vm8, %v7086_v60, %v11975_v4  ;;  %8712 = vtanh.f32 %v1808_v5  ;;  %v8711_v56 = vpop.eup %8710  ;;  %1868 = vst.msk [vmem:[%s11731_s20 + $0x48] sm:$0xff] %vm1858_vm10, %v8709_v57  ;;  %v12264_v34 = vpop.permute.xlu0 %5056 }
 0x2d6   : > { %8714 = vtanh.f32 %v3766_v10  ;;  %8576 = vmatprep.mubr.msk.bf16.mxu1 %vm1556_vm9, %v7118_v14  ;;  %v3735_v11 = vmul.f32 %v12149_v55, %v12966_v35  ;;  %v1769_v41 = vmul.f32 %v12149_v55, %v12967_v49  ;;  %7858 = vst.msk [vmem:[%s11731_s20 + $0x148] sm:$0xff] %vm1858_vm10, %v8711_v56  ;;  %v3733_v21 = vmul.f32 %v12149_v55, %v12968_v43  ;;  %v9012_v14 = vld [vmem:[%s9091_s22 + $0x88] sm:$0xf]  ;;  %v9014_v35 = vld [vmem:[%s9091_s22 + $0x94] sm:$0xf] }
 0x2d7   : > { %v5804_v4 = vsel %vm9170_vm5, %v5799_v47, %v5803_v46  ;;  %8716 = vtanh.f32 %v1806_v19  ;;  %v5165_v27 = vsel %vm1507_vm8, %v5133_v22, %v12037_v58  ;;  %v1809_v0 = vadd.f32 %v12157_v53, %v1771_v37  ;;  %v9009_v58 = vld [vmem:[%s9091_s22 + $0x88] sm:$0xf]  ;;  %v12266_v51 = vpop.permute.xlu1 %6853  ;;  %v9013_v37 = vld [vmem:[%s9091_s22 + $0x90] sm:$0xf] }
 0x2d8   : > { %v8264_v1 = vcombine.low %v5794_v6, %v5804_v4  ;;  %8718 = vtanh.f32 %v3764_v42  ;;  %v3767_v7 = vadd.f32 %v12157_v53, %v3735_v11  ;;  %8541 = vmatmul.mubr.msk.bf16.gmra.mrb[48].mxu0 %vm1556_vm9, %v5165_v27  ;;  %v1807_v26 = vadd.f32 %v12157_v53, %v1769_v41  ;;  %v9010_v6 = vld [vmem:[%s9091_s22 + $0x8c] sm:$0x1] }
 0x2d9   : > { %v3765_v46 = vadd.f32 %v12157_v53, %v3733_v21  ;;  %v5806_v36 = vshrl.u32 %v8125_v15, 16  ;;  %v5809_v16 = vshll.u32 %v8125_v15, 16  ;;  %8720 = vtanh.f32 %v1809_v0  ;;  %v9015_v21 = vld [vmem:[%s9091_s22 + $0x94] sm:$0xf] }
 0x2da   : > { %v7050_v61 = vsel %vm1425_vm6, %v8264_v1, %v11946_v18  ;;  %v5815_v22 = vshll.u32 %v9009_v58, 16  ;;  %v5819_v59 = vshrl.u32 %v9009_v58, 16  ;;  %8722 = vtanh.f32 %v3767_v7  ;;  %v8128_v18 = vld [vmem:[%s9091_s22 + $0x90] sm:$0xf] }
 0x2db   : > { %v7088_v5 = vsel %vm1474_vm7, %v7050_v61, %v12015_v9  ;;  %v5808_v25 = vrot.slane %v5806_v36, 4  ;;  %v5811_v60 = vrot.slane %v5809_v16, 5  ;;  %8724 = vtanh.f32 %v1807_v26  ;;  %v9011_v9 = vld [vmem:[%s9091_s22 + $0x84] sm:$0xf]  ;;  %v12288_v36 = vpop.permute.xlu0 %4866  ;;  %v12290_v16 = vpop.permute.xlu1 %4978 }
 0x2dc   : > { %v7120_v10 = vsel %vm1507_vm8, %v7088_v5, %v12017_v32  ;;  %v5817_v19 = vrot.slane %v5815_v22, 5  ;;  %v5821_v42 = vrot.slane %v5819_v59, 4  ;;  %8726 = vtanh.f32 %v3765_v46 }
 0x2dd   : > { %8577 = vmatmul.mubr.msk.bf16.gmra.mrb[48].mxu1 %vm1556_vm9, %v7120_v10  ;;  %v5812_v57 = vor.u32 %v5811_v60, %v5808_v25  ;;  %v5825_v47 = vshll.u32 %v9010_v6, 16  ;;  %v7987_v56 = vcombine.low %v9011_v9, %v9012_v14  ;;  %v7988_v11 = vcombine.low %v9013_v37, %v9014_v35 }
 0x2de   : > { %v5822_v12 = vor.u32 %v5821_v42, %v5817_v19  ;;  %v5830_v49 = vshrl.u32 %v8128_v18, 16  ;;  %v5833_v32 = vshll.u32 %v8128_v18, 16  ;;  %v5839_v27 = vshll.u32 %v9015_v21, 16 }
 0x2df   : > { %v8713_v41 = vpop.eup %8712  ;;  %v5813_v15 = vrot.slane %v5812_v57, 4  ;;  %v5827_v4 = vrot.slane %v5825_v47, 5  ;;  %v5098_v43 = vsel %vm1425_vm6, %v7987_v56, %v12074_v50  ;;  %v5101_v26 = vsel %vm1425_vm6, %v7988_v11, %v12106_v45  ;;  %v9016_v45 = vld [vmem:[%s9091_s22 + $0x98] sm:$0x1] }
 0x2e0   : > { %v8715_v1 = vpop.eup %8714  ;;  %1873 = vst.msk [vmem:[%s11731_s20 + $0x70] sm:$0xff] %vm1858_vm10, %v8713_v41  ;;  %v5823_v0 = vrot.slane %v5822_v12, 4  ;;  %v5135_v7 = vsel %vm1474_vm7, %v5098_v43, %v12076_v3  ;;  %v5832_v46 = vrot.slane %v5830_v49, 4  ;;  %v5835_v58 = vrot.slane %v5833_v32, 5  ;;  %v12328_v49 = vpop.permute.xlu0 %4868 }
 0x2e1   : > { %v8717_v50 = vpop.eup %8716  ;;  %7863 = vst.msk [vmem:[%s11731_s20 + $0x170] sm:$0xff] %vm1858_vm10, %v8715_v1  ;;  %v5818_v61 = vsel %vm9170_vm5, %v5813_v15, %v5817_v19  ;;  %v5841_v22 = vrot.slane %v5839_v27, 5  ;;  %v5843_v59 = vshrl.u32 %v9015_v21, 16  ;;  %v5849_v25 = vshll.u32 %v9016_v45, 16  ;;  %v12970_v21 = vld [vmem:[#allocation26_spill] sm:$0xff]  ;;  %v12971_v1 = vld [vmem:[#allocation27_spill] sm:$0xff] }
 0x2e2   : > { %v8719_v5 = vpop.eup %8718  ;;  %1871 = vst.msk [vmem:[%s11731_s20 + $0x60] sm:$0xff] %vm1858_vm10, %v8717_v50  ;;  %v5828_v3 = vsel %vm9170_vm5, %v5823_v0, %v5827_v4  ;;  %v5167_v60 = vsel %vm1507_vm8, %v5135_v7, %v12168_v52  ;;  %v5137_v18 = vsel %vm1474_vm7, %v5101_v26, %v12188_v33  ;;  %v5836_v19 = vor.u32 %v5835_v58, %v5832_v46  ;;  %v12969_v4 = vld [vmem:[#allocation25_spill] sm:$0xff]  ;;  %v8131_v7 = vld [vmem:[%s9091_s22 + $0x9c] sm:$0xf]  ;;  %v12972_v26 = vld [vmem:[#allocation28_spill] sm:$0xff] }
 0x2e3   : > { %7861 = vst.msk [vmem:[%s11731_s20 + $0x160] sm:$0xff] %vm1858_vm10, %v8719_v5  ;;  %v8265_v10 = vcombine.low %v5818_v61, %v5828_v3  ;;  %v5845_v42 = vrot.slane %v5843_v59, 4  ;;  %8544 = vmatprep.mubr.msk.bf16.mxu0 %vm1556_vm9, %v5167_v60  ;;  %v1774_v57 = vmul.f32 %v12149_v55, %v11642_v31  ;;  %v8721_v6 = vpop.eup %8720  ;;  %v5851_v47 = vrot.slane %v5849_v25, 5 }
 0x2e4   : > { %v3738_v9 = vmul.f32 %v12149_v55, %v11672_v40  ;;  %v1772_v52 = vmul.f32 %v12149_v55, %v11680_v2  ;;  %v3736_v33 = vmul.f32 %v12149_v55, %v11687_v17  ;;  %v8723_v14 = vpop.eup %8722  ;;  %1874 = vst.msk [vmem:[%s11731_s20 + $0x78] sm:$0xff] %vm1858_vm10, %v8721_v6  ;;  %v5837_v12 = vrot.slane %v5836_v19, 4 }
 0x2e5   : > { %v7053_v56 = vsel %vm1425_vm6, %v8265_v10, %v12039_v13  ;;  %v5846_v31 = vor.u32 %v5845_v42, %v5841_v22  ;;  %v1812_v37 = vadd.f32 %v12157_v53, %v1774_v57  ;;  %v8725_v35 = vpop.eup %8724  ;;  %7864 = vst.msk [vmem:[%s11731_s20 + $0x178] sm:$0xff] %vm1858_vm10, %v8723_v14  ;;  %v12330_v13 = vpop.permute.xlu1 %6933  ;;  %v1775_v43 = vmul.f32 %v12149_v55, %v12969_v4 }
 0x2e6   : > { %v7090_v40 = vsel %vm1474_vm7, %v7053_v56, %v12108_v38  ;;  %v3770_v2 = vadd.f32 %v12157_v53, %v3738_v9  ;;  %v1810_v17 = vadd.f32 %v12157_v53, %v1772_v52  ;;  %v3768_v11 = vadd.f32 %v12157_v53, %v3736_v33  ;;  %v8727_v32 = vpop.eup %8726  ;;  %1872 = vst.msk [vmem:[%s11731_s20 + $0x68] sm:$0xff] %vm1858_vm10, %v8725_v35  ;;  %v12362_v10 = vpop.permute.xlu0 %6855  ;;  %v9019_v35 = vld [vmem:[%s9091_s22 + $0x9c] sm:$0xf] }
 0x2e7   : > { %v5842_v41 = vsel %vm9170_vm5, %v5837_v12, %v5841_v22  ;;  %v5847_v15 = vrot.slane %v5846_v31, 4  ;;  %v7122_v38 = vsel %vm1507_vm8, %v7090_v40, %v12190_v30  ;;  %8728 = vtanh.f32 %v1812_v37  ;;  %7862 = vst.msk [vmem:[%s11731_s20 + $0x168] sm:$0xff] %vm1858_vm10, %v8727_v32  ;;  %v9018_v31 = vld [vmem:[%s9091_s22 + $0xa4] sm:$0x1]  ;;  %v9020_v40 = vld [vmem:[%s9091_s22 + $0xa0] sm:$0xf] }
 0x2e8   : > { %8730 = vtanh.f32 %v3770_v2  ;;  %8580 = vmatprep.mubr.msk.bf16.mxu1 %vm1556_vm9, %v7122_v38  ;;  %v3739_v27 = vmul.f32 %v12149_v55, %v12970_v21  ;;  %v1773_v0 = vmul.f32 %v12149_v55, %v12971_v1  ;;  %v3737_v46 = vmul.f32 %v12149_v55, %v12972_v26  ;;  %v9021_v1 = vld [vmem:[%s9091_s22 + $0xac] sm:$0xf] }
 0x2e9   : > { %v5852_v30 = vsel %vm9170_vm5, %v5847_v15, %v5851_v47  ;;  %8732 = vtanh.f32 %v1810_v17  ;;  %v5169_v50 = vsel %vm1507_vm8, %v5137_v18, %v12264_v34  ;;  %v1813_v58 = vadd.f32 %v12157_v53, %v1775_v43  ;;  %v9017_v34 = vld [vmem:[%s9091_s22 + $0xa0] sm:$0xf]  ;;  %v5059_v19 = vpop.permute.xlu1 %5058  ;;  %v8134_v47 = vld [vmem:[%s9091_s22 + $0xa8] sm:$0xf] }
 0x2ea   : > { %v8266_v61 = vcombine.low %v5842_v41, %v5852_v30  ;;  %8734 = vtanh.f32 %v3768_v11  ;;  %v3771_v22 = vadd.f32 %v12157_v53, %v3739_v27  ;;  %8545 = vmatmul.mubr.msk.bf16.gmra.mrb[52].mxu0 %vm1556_vm9, %v5169_v50  ;;  %v1811_v59 = vadd.f32 %v12157_v53, %v1773_v0 }
 0x2eb   : > { %v3769_v5 = vadd.f32 %v12157_v53, %v3737_v46  ;;  %v5854_v3 = vshrl.u32 %v8131_v7, 16  ;;  %v5857_v45 = vshll.u32 %v8131_v7, 16  ;;  %8736 = vtanh.f32 %v1813_v58 }
 0x2ec   : > { %v7056_v25 = vsel %vm1425_vm6, %v8266_v61, %v12166_v48  ;;  %v5863_v60 = vshll.u32 %v9017_v34, 16  ;;  %v5867_v18 = vshrl.u32 %v9017_v34, 16  ;;  %8738 = vtanh.f32 %v3771_v22  ;;  %v12367_v9 = vpop.f32.mrb[28].mxu0  ;;  %v12369_v48 = vpop.f32.mrb[28].mxu1  ;;  %v9024_v34 = vld [vmem:[%s9091_s22 + $0xb0] sm:$0x1] }
 0x2ed   : > { %v7092_v42 = vsel %vm1474_vm7, %v7056_v25, %v12228_v54  ;;  %v5856_v57 = vrot.slane %v5854_v3, 4  ;;  %v5859_v6 = vrot.slane %v5857_v45, 5  ;;  %8740 = vtanh.f32 %v1811_v59  ;;  %v12373_v56 = vpop.f32.mrb[29].mxu0  ;;  %v12375_v54 = vpop.f32.mrb[29].mxu1  ;;  %v9022_v45 = vld [vmem:[%s9091_s22 + $0xa8] sm:$0xf] }
 0x2ee   : > { %v7124_v52 = vsel %vm1507_vm8, %v7092_v42, %v12230_v8  ;;  %v5865_v33 = vrot.slane %v5863_v60, 5  ;;  %v5869_v14 = vrot.slane %v5867_v18, 4  ;;  %8742 = vtanh.f32 %v3769_v5  ;;  %v12381_v17 = vpop.f32.mrb[30].mxu0  ;;  %v12383_v8 = vpop.f32.mrb[30].mxu1 }
 0x2ef   : > { %8581 = vmatmul.mubr.msk.bf16.gmra.mrb[52].mxu1 %vm1556_vm9, %v7124_v52  ;;  %v5860_v12 = vor.u32 %v5859_v6, %v5856_v57  ;;  %v5873_v37 = vshll.u32 %v9018_v31, 16  ;;  %v7989_v2 = vcombine.low %v9019_v35, %v9020_v40  ;;  %v5878_v32 = vshrl.u32 %v8134_v47, 16  ;;  %v12385_v15 = vpop.f32.mrb[31].mxu0  ;;  %v12387_v38 = vpop.f32.mrb[31].mxu1  ;;  %v12974_v31 = vld [vmem:[#allocation30_spill] sm:$0xff]  ;;  %v12975_v35 = vld [vmem:[#allocation31_spill] sm:$0xff] }
 0x2f0   : > { %v5870_v11 = vor.u32 %v5869_v14, %v5865_v33  ;;  %v5881_v41 = vshll.u32 %v8134_v47, 16  ;;  %v5887_v0 = vshll.u32 %v9021_v1, 16  ;;  %v5891_v22 = vshrl.u32 %v9021_v1, 16  ;;  %v4981_v59 = vpop.permute.xlu0 %4980  ;;  %v12973_v47 = vld [vmem:[#allocation29_spill] sm:$0xff]  ;;  %v12976_v40 = vld [vmem:[#allocation32_spill] sm:$0xff] }
 0x2f1   : > { %v8729_v4 = vpop.eup %8728  ;;  %v5861_v43 = vrot.slane %v5860_v12, 4  ;;  %v5875_v21 = vrot.slane %v5873_v37, 5  ;;  %v5104_v27 = vsel %vm1425_vm6, %v7989_v2, %v12288_v36  ;;  %v5880_v46 = vrot.slane %v5878_v32, 4  ;;  %v7014_v12 = vpop.permute.xlu1 %7013 }
 0x2f2   : > { %v8731_v7 = vpop.eup %8730  ;;  %1877 = vst.msk [vmem:[%s11731_s20 + $0x90] sm:$0xff] %vm1858_vm10, %v8729_v4  ;;  %v5871_v30 = vrot.slane %v5870_v11, 4  ;;  %v5139_v26 = vsel %vm1474_vm7, %v5104_v27, %v12290_v16  ;;  %v5883_v61 = vrot.slane %v5881_v41, 5  ;;  %v5889_v58 = vrot.slane %v5887_v0, 5  ;;  %v9023_v16 = vld [vmem:[%s9091_s22 + $0xac] sm:$0xf] }
 0x2f3   : > { %v8733_v50 = vpop.eup %8732  ;;  %7867 = vst.msk [vmem:[%s11731_s20 + $0x190] sm:$0xff] %vm1858_vm10, %v8731_v7  ;;  %v5866_v36 = vsel %vm9170_vm5, %v5861_v43, %v5865_v33  ;;  %v7990_v25 = vcombine.low %v9022_v45, %v9023_v16  ;;  %v5897_v60 = vshll.u32 %v9024_v34, 16  ;;  %v5171_v18 = vsel %vm1507_vm8, %v5139_v26, %v5059_v19  ;;  %v12980_v45 = vld [vmem:[#allocation36_spill] sm:$0xff] }
 0x2f4   : > { %v8735_v5 = vpop.eup %8734  ;;  %1875 = vst.msk [vmem:[%s11731_s20 + $0x80] sm:$0xff] %vm1858_vm10, %v8733_v50  ;;  %v5876_v3 = vsel %vm9170_vm5, %v5871_v30, %v5875_v21  ;;  %v5884_v57 = vor.u32 %v5883_v61, %v5880_v46  ;;  %v5893_v6 = vrot.slane %v5891_v22, 4  ;;  %8548 = vmatprep.mubr.msk.bf16.mxu0 %vm1556_vm9, %v5171_v18  ;;  %v1778_v52 = vmul.f32 %v12149_v55, %v12973_v47  ;;  %v12978_v61 = vld [vmem:[#allocation34_spill] sm:$0xff] }
 0x2f5   : > { %7865 = vst.msk [vmem:[%s11731_s20 + $0x180] sm:$0xff] %vm1858_vm10, %v8735_v5  ;;  %v8267_v42 = vcombine.low %v5866_v36, %v5876_v3  ;;  %v8737_v33 = vpop.eup %8736  ;;  %v5899_v14 = vrot.slane %v5897_v60, 5  ;;  %v3742_v37 = vmul.f32 %v12149_v55, %v12974_v31  ;;  %v1776_v19 = vmul.f32 %v12149_v55, %v12975_v35  ;;  %v12979_v5 = vld [vmem:[#allocation35_spill] sm:$0xff] }
 0x2f6   : > { %v3740_v2 = vmul.f32 %v12149_v55, %v12976_v40  ;;  %v8739_v11 = vpop.eup %8738  ;;  %1878 = vst.msk [vmem:[%s11731_s20 + $0x98] sm:$0xff] %vm1858_vm10, %v8737_v33  ;;  %v5885_v41 = vrot.slane %v5884_v57, 4  ;;  %v5894_v4 = vor.u32 %v5893_v6, %v5889_v58  ;;  %v1816_v43 = vadd.f32 %v12157_v53, %v1778_v52 }
 0x2f7   : > { %v7059_v32 = vsel %vm1425_vm6, %v8267_v42, %v12266_v51  ;;  %v8741_v21 = vpop.eup %8740  ;;  %7868 = vst.msk [vmem:[%s11731_s20 + $0x198] sm:$0xff] %vm1858_vm10, %v8739_v11  ;;  %v3774_v1 = vadd.f32 %v12157_v53, %v3742_v37  ;;  %v1814_v0 = vadd.f32 %v12157_v53, %v1776_v19  ;;  %v3743_v22 = vmul.f32 %v12149_v55, %v12978_v61 }
 0x2f8   : > { %v7094_v27 = vsel %vm1474_vm7, %v7059_v32, %v12330_v13  ;;  %v3772_v7 = vadd.f32 %v12157_v53, %v3740_v2  ;;  %v8743_v30 = vpop.eup %8742  ;;  %1876 = vst.msk [vmem:[%s11731_s20 + $0x88] sm:$0xff] %vm1858_vm10, %v8741_v21  ;;  %v5890_v51 = vsel %vm9170_vm5, %v5885_v41, %v5889_v58  ;;  %v5895_v26 = vrot.slane %v5894_v4, 4  ;;  %v6936_v50 = vpop.permute.xlu0 %6935  ;;  %v12977_v13 = vld [vmem:[#allocation33_spill] sm:$0xff] }
 0x2f9   : > { %v7126_v46 = vsel %vm1507_vm8, %v7094_v27, %v7014_v12  ;;  %8744 = vtanh.f32 %v1816_v43  ;;  %7866 = vst.msk [vmem:[%s11731_s20 + $0x188] sm:$0xff] %vm1858_vm10, %v8743_v30  ;;  %v1779_v36 = vmul.f32 %v12149_v55, %v12977_v13  ;;  %v1777_v3 = vmul.f32 %v12149_v55, %v12979_v5  ;;  %v9025_v43 = vld [vmem:[%s9091_s22 + $0xb8] sm:$0xf] }
 0x2fa   : > { %8746 = vtanh.f32 %v3774_v1  ;;  %8584 = vmatprep.mubr.msk.bf16.mxu1 %vm1556_vm9, %v7126_v46  ;;  %v5900_v58 = vsel %vm9170_vm5, %v5895_v26, %v5899_v14  ;;  %v3741_v16 = vmul.f32 %v12149_v55, %v12980_v45  ;;  %v3775_v18 = vadd.f32 %v12157_v53, %v3743_v22 }
 0x2fb   : > { %8748 = vtanh.f32 %v1814_v0  ;;  %v8268_v34 = vcombine.low %v5890_v51, %v5900_v58  ;;  %v1817_v60 = vadd.f32 %v12157_v53, %v1779_v36  ;;  %v1815_v57 = vadd.f32 %v12157_v53, %v1777_v3  ;;  %v8140_v3 = vld [vmem:[%s9091_s22 + $0xc0] sm:$0xf] }
 0x2fc   : > { %8750 = vtanh.f32 %v3772_v7  ;;  %v7016_v42 = vpop.permute.xlu1 %7015  ;;  %v3773_v6 = vadd.f32 %v12157_v53, %v3741_v16  ;;  %v5107_v47 = vsel %vm1425_vm6, %v7990_v25, %v12328_v49  ;;  %v1782_v25 = vmul.f32 %v12149_v55, %v12117_v44 }
 0x2fd   : > { %v7062_v52 = vsel %vm1425_vm6, %v8268_v34, %v12362_v10  ;;  %8752 = vtanh.f32 %v1817_v60  ;;  %v5141_v33 = vsel %vm1474_vm7, %v5107_v47, %v4981_v59  ;;  %v8137_v10 = vld [vmem:[%s9091_s22 + $0xb4] sm:$0xf]  ;;  %v3746_v11 = vmul.f32 %v12149_v55, %v12119_v62 }
 0x2fe   : > { %v7096_v14 = vsel %vm1474_vm7, %v7062_v52, %v6936_v50  ;;  %8754 = vtanh.f32 %v3775_v18  ;;  %v5902_v40 = vshrl.u32 %v8137_v10, 16  ;;  %v1820_v2 = vadd.f32 %v12157_v53, %v1782_v25 }
 0x2ff   : > { %v5061_v12 = vpop.permute.xlu0 %5060  ;;  %v7128_v31 = vsel %vm1507_vm8, %v7096_v14, %v7016_v42  ;;  %8756 = vtanh.f32 %v1815_v57  ;;  %v5905_v32 = vshll.u32 %v8137_v10, 16  ;;  %v1780_v44 = vmul.f32 %v12149_v55, %v12127_v20 }
 0x300   : > { %v5173_v37 = vsel %vm1507_vm8, %v5141_v33, %v5061_v12  ;;  %8758 = vtanh.f32 %v3773_v6  ;;  %8585 = vmatmul.mubr.msk.bf16.gmra.mrb[56].mxu1 %vm1556_vm9, %v7128_v31  ;;  %v3744_v41 = vmul.f32 %v12149_v55, %v12129_v29  ;;  %v5911_v21 = vshll.u32 %v9025_v43, 16  ;;  %v9026_v33 = vld [vmem:[%s9091_s22 + $0xbc] sm:$0x1] }
 0x301   : > { %8549 = vmatmul.mubr.msk.bf16.gmra.mrb[56].mxu0 %vm1556_vm9, %v5173_v37  ;;  %8760 = vtanh.f32 %v1820_v2  ;;  %v3778_v27 = vadd.f32 %v12157_v53, %v3746_v11  ;;  %v1818_v62 = vadd.f32 %v12157_v53, %v1780_v44  ;;  %v1783_v20 = vmul.f32 %v12149_v55, %v12134_v23 }
 0x302   : > { %v3776_v0 = vadd.f32 %v12157_v53, %v3744_v41  ;;  %v5904_v29 = vrot.slane %v5902_v40, 4  ;;  %v5907_v51 = vrot.slane %v5905_v32, 5  ;;  %v5915_v26 = vshrl.u32 %v9025_v43, 16  ;;  %v12498_v13 = vpop.permute.xlu1 %6857  ;;  %v9029_v43 = vld [vmem:[%s9091_s22 + $0xb8] sm:$0xf] }
 0x303   : > { %v8745_v49 = vpop.eup %8744  ;;  %8762 = vtanh.f32 %v3778_v27  ;;  %v1821_v46 = vadd.f32 %v12157_v53, %v1783_v20  ;;  %v12496_v50 = vrot.slane %v5911_v21, 5  ;;  %v3747_v23 = vmul.f32 %v12149_v55, %v12136_v28  ;;  %v9030_v20 = vld [vmem:[%s9091_s22 + $0xc8] sm:$0x1] }
 0x304   : > { %v8747_v59 = vpop.eup %8746  ;;  %1881 = vst.msk [vmem:[%s11731_s20 + $0xb0] sm:$0xff] %vm1858_vm10, %v8745_v49  ;;  %8764 = vtanh.f32 %v1818_v62  ;;  %v1781_v36 = vmul.f32 %v12149_v55, %v12143_v63  ;;  %v3745_v61 = vmul.f32 %v12149_v55, %v12145_v39  ;;  %v1786_v22 = vmul.f32 %v12149_v55, %v12367_v9 }
 0x305   : > { %v8749_v35 = vpop.eup %8748  ;;  %7871 = vst.msk [vmem:[%s11731_s20 + $0x1b0] sm:$0xff] %vm1858_vm10, %v8747_v59  ;;  %8766 = vtanh.f32 %v3776_v0  ;;  %v3750_v5 = vmul.f32 %v12149_v55, %v12369_v48  ;;  %v3779_v58 = vadd.f32 %v12157_v53, %v3747_v23  ;;  %v1784_v28 = vmul.f32 %v12149_v55, %v12373_v56 }
 0x306   : > { %v8751_v19 = vpop.eup %8750  ;;  %1879 = vst.msk [vmem:[%s11731_s20 + $0xa0] sm:$0xff] %vm1858_vm10, %v8749_v35  ;;  %8768 = vtanh.f32 %v1821_v46  ;;  %v1819_v45 = vadd.f32 %v12157_v53, %v1781_v36  ;;  %v3748_v63 = vmul.f32 %v12149_v55, %v12375_v54  ;;  %v5917_v16 = vrot.slane %v5915_v26, 4 }
 0x307   : > { %7869 = vst.msk [vmem:[%s11731_s20 + $0x1a0] sm:$0xff] %vm1858_vm10, %v8751_v19  ;;  %v8753_v4 = vpop.eup %8752  ;;  %v3777_v39 = vadd.f32 %v12157_v53, %v3745_v61  ;;  %v1824_v34 = vadd.f32 %v12157_v53, %v1786_v22  ;;  %v1787_v9 = vmul.f32 %v12149_v55, %v12381_v17  ;;  %v5908_v48 = vor.u32 %v5907_v51, %v5904_v29 }
 0x308   : > { %v8755_v1 = vpop.eup %8754  ;;  %1882 = vst.msk [vmem:[%s11731_s20 + $0xb8] sm:$0xff] %vm1858_vm10, %v8753_v4  ;;  %8770 = vtanh.f32 %v3779_v58  ;;  %v3782_v60 = vadd.f32 %v12157_v53, %v3750_v5  ;;  %v3751_v56 = vmul.f32 %v12149_v55, %v12383_v8  ;;  %v5926_v18 = vshrl.u32 %v8140_v3, 16  ;;  %v12527_v6 = vpop.permute.xlu1 %4982  ;;  %v9028_v4 = vld [vmem:[%s9091_s22 + $0xb4] sm:$0xf] }
 0x309   : > { %v8757_v7 = vpop.eup %8756  ;;  %7872 = vst.msk [vmem:[%s11731_s20 + $0x1b8] sm:$0xff] %vm1858_vm10, %v8755_v1  ;;  %8772 = vtanh.f32 %v1819_v45  ;;  %v1822_v54 = vadd.f32 %v12157_v53, %v1784_v28  ;;  %v1785_v42 = vmul.f32 %v12149_v55, %v12385_v15  ;;  %v5929_v17 = vshll.u32 %v8140_v3, 16  ;;  %v4871_v12 = vpop.permute.xlu0 %4870 }
 0x30a   : > { %v8759_v30 = vpop.eup %8758  ;;  %1880 = vst.msk [vmem:[%s11731_s20 + $0xa8] sm:$0xff] %vm1858_vm10, %v8757_v7  ;;  %8774 = vtanh.f32 %v3777_v39  ;;  %v3780_v47 = vadd.f32 %v12157_v53, %v3748_v63  ;;  %v3749_v52 = vmul.f32 %v12149_v55, %v12387_v38  ;;  %v5918_v8 = vor.u32 %v5917_v16, %v12496_v50  ;;  %v9027_v38 = vld [vmem:[%s9091_s22 + $0xc4] sm:$0xf] }
 0x30b   : > { %7870 = vst.msk [vmem:[%s11731_s20 + $0x1a8] sm:$0xff] %vm1858_vm10, %v8759_v30  ;;  %v8761_v57 = vpop.eup %8760  ;;  %v5921_v14 = vshll.u32 %v9026_v33, 16  ;;  %8776 = vtanh.f32 %v1824_v34  ;;  %v1825_v15 = vadd.f32 %v12157_v53, %v1787_v9  ;;  %v12537_v37 = vrot.slane %v5908_v48, 4 }
 0x30c   : > { %1885 = vst.msk [vmem:[%s11731_s20 + $0xd0] sm:$0xff] %vm1858_vm10, %v8761_v57  ;;  %8778 = vtanh.f32 %v3782_v60  ;;  %v3783_v49 = vadd.f32 %v12157_v53, %v3751_v56  ;;  %v5935_v59 = vshll.u32 %v9027_v38, 16  ;;  %v5939_v25 = vshrl.u32 %v9027_v38, 16 }
 0x30d   : > { %v8763_v31 = vpop.eup %8762  ;;  %8780 = vtanh.f32 %v1822_v54  ;;  %v1823_v35 = vadd.f32 %v12157_v53, %v1785_v42  ;;  %v12544_v40 = vrot.slane %v5926_v18, 4  ;;  %v12546_v2 = vrot.slane %v5929_v17, 5 }
 0x30e   : > { %v8765_v10 = vpop.eup %8764  ;;  %7875 = vst.msk [vmem:[%s11731_s20 + $0x1d0] sm:$0xff] %vm1858_vm10, %v8763_v31  ;;  %8782 = vtanh.f32 %v3780_v47  ;;  %v3781_v11 = vadd.f32 %v12157_v53, %v3749_v52  ;;  %v5919_v44 = vrot.slane %v5918_v8, 4  ;;  %v5923_v41 = vrot.slane %v5921_v14, 5 }
 0x30f   : > { %v8767_v19 = vpop.eup %8766  ;;  %1883 = vst.msk [vmem:[%s11731_s20 + $0xc0] sm:$0xff] %vm1858_vm10, %v8765_v10  ;;  %v7991_v21 = vcombine.low %v9028_v4, %v9029_v43  ;;  %8784 = vtanh.f32 %v1825_v15  ;;  %v12561_v62 = vrot.slane %v5935_v59, 5  ;;  %v12563_v0 = vrot.slane %v5939_v25, 4 }
 0x310   : > { %v8769_v32 = vpop.eup %8768  ;;  %7873 = vst.msk [vmem:[%s11731_s20 + $0x1c0] sm:$0xff] %vm1858_vm10, %v8767_v19  ;;  %8786 = vtanh.f32 %v3783_v49  ;;  %v5945_v7 = vshll.u32 %v9030_v20, 16  ;;  %v5914_v51 = vsel %vm9170_vm5, %v12537_v37, %v12496_v50  ;;  %v5932_v26 = vor.u32 %v12546_v2, %v12544_v40 }
 0x311   : > { %1886 = vst.msk [vmem:[%s11731_s20 + $0xd8] sm:$0xff] %vm1858_vm10, %v8769_v32  ;;  %8788 = vtanh.f32 %v1823_v35  ;;  %v5924_v22 = vsel %vm9170_vm5, %v5919_v44, %v5923_v41  ;;  %v5110_v5 = vsel %vm1425_vm6, %v7991_v21, %v4871_v12  ;;  %v5942_v60 = vor.u32 %v12563_v0, %v12561_v62 }
 0x312   : > { %v8771_v30 = vpop.eup %8770  ;;  %8790 = vtanh.f32 %v3781_v11  ;;  %v5143_v63 = vsel %vm1474_vm7, %v5110_v5, %v12527_v6  ;;  %v8269_v17 = vcombine.low %v5914_v51, %v5924_v22  ;;  %v5933_v40 = vrot.slane %v5932_v26, 4 }
 0x313   : > { %v8773_v61 = vpop.eup %8772  ;;  %7876 = vst.msk [vmem:[%s11731_s20 + $0x1d8] sm:$0xff] %vm1858_vm10, %v8771_v30  ;;  %v5943_v2 = vrot.slane %v5942_v60, 4  ;;  %v9032_v30 = vld [vmem:[%s9091_s22 + $0xc4] sm:$0xf]  ;;  %v12662_v60 = vld [vmem:[#allocation3] ss:$0 sm:$0xff] }
 0x314   : > { %v12559_v1 = vpop.permute.xlu0 %4872  ;;  %v8775_v28 = vpop.eup %8774  ;;  %1884 = vst.msk [vmem:[%s11731_s20 + $0xc8] sm:$0xff] %vm1858_vm10, %v8773_v61  ;;  %v7065_v19 = vsel %vm1425_vm6, %v8269_v17, %v12498_v13  ;;  %v5938_v41 = vsel %vm9170_vm5, %v5933_v40, %v12561_v62 }
 0x315   : > { %v8777_v48 = vpop.eup %8776  ;;  %7874 = vst.msk [vmem:[%s11731_s20 + $0x1c8] sm:$0xff] %vm1858_vm10, %v8775_v28 }
 0x316   : > { %v8779_v6 = vpop.eup %8778  ;;  %1889 = vst.msk [vmem:[%s11731_s20 + $0xf0] sm:$0xff] %vm1858_vm10, %v8777_v48 }
 0x317   : > { %v12555_v27 = vpop.permute.xlu1 %6937  ;;  %v8781_v33 = vpop.eup %8780  ;;  %7879 = vst.msk [vmem:[%s11731_s20 + $0x1f0] sm:$0xff] %vm1858_vm10, %v8779_v6 }
 0x318   : > { %v8562_v29 = vpop.f32.mrb[32].mxu1  ;;  %v8783_v31 = vpop.eup %8782  ;;  %1887 = vst.msk [vmem:[%s11731_s20 + $0xe0] sm:$0xff] %vm1858_vm10, %v8781_v33 }
 0x319   : > { %v8526_v46 = vpop.f32.mrb[32].mxu0  ;;  %v7345_v23 = vmul.f32 %v12149_v55, %v8562_v29  ;;  %v7216_v36 = vpop.f32.mrb[33].mxu1  ;;  %7877 = vst.msk [vmem:[%s11731_s20 + $0x1e0] sm:$0xff] %vm1858_vm10, %v8783_v31  ;;  %v9031_v29 = vld [vmem:[%s9091_s22 + $0xc0] sm:$0xf] }
 0x31a   : > { %v5390_v50 = vmul.f32 %v12149_v55, %v8526_v46  ;;  %v5261_v3 = vpop.f32.mrb[33].mxu0  ;;  %v7343_v58 = vmul.f32 %v12149_v55, %v7216_v36  ;;  %v8563_v45 = vpop.f32.mrb[34].mxu1  ;;  %v7992_v51 = vcombine.low %v9031_v29, %v9032_v30 }
 0x31b   : > { %v7377_v39 = vadd.f32 %v12157_v53, %v7345_v23  ;;  %v5388_v34 = vmul.f32 %v12149_v55, %v5261_v3  ;;  %v7346_v9 = vmul.f32 %v12149_v55, %v8563_v45  ;;  %v8527_v42 = vpop.f32.mrb[34].mxu0  ;;  %v7219_v57 = vpop.f32.mrb[35].mxu1 }
 0x31c   : > { %v5063_v16 = vpop.permute.xlu1 %5062  ;;  %v5422_v18 = vadd.f32 %v12157_v53, %v5390_v50  ;;  %v7375_v54 = vadd.f32 %v12157_v53, %v7343_v58  ;;  %v5391_v52 = vmul.f32 %v12149_v55, %v8527_v42  ;;  %v5264_v8 = vpop.f32.mrb[35].mxu0  ;;  %v7344_v15 = vmul.f32 %v12149_v55, %v7219_v57 }
 0x31d   : > { %v5175_v56 = vsel %vm1507_vm8, %v5143_v63, %v5063_v16  ;;  %8792 = vtanh.f32 %v7377_v39  ;;  %v5420_v47 = vadd.f32 %v12157_v53, %v5388_v34  ;;  %v7378_v14 = vadd.f32 %v12157_v53, %v7346_v9  ;;  %v6860_v37 = vpop.permute.xlu0 %6859  ;;  %v8785_v10 = vpop.eup %8784  ;;  %v12657_v63 = vld [vmem:[#allocation2] ss:$0 sm:$0xff] }
 0x31e   : > { %8552 = vmatprep.mubr.msk.bf16.mxu0 %vm1556_vm9, %v5175_v56  ;;  %8794 = vtanh.f32 %v5422_v18  ;;  %v5389_v12 = vmul.f32 %v12149_v55, %v5264_v8  ;;  %v5423_v49 = vadd.f32 %v12157_v53, %v5391_v52  ;;  %v7376_v59 = vadd.f32 %v12157_v53, %v7344_v15  ;;  %v8787_v25 = vpop.eup %8786  ;;  %1890 = vst.msk [vmem:[%s11731_s20 + $0xf8] sm:$0xff] %vm1858_vm10, %v8785_v10 }
 0x31f   : > { %8796 = vtanh.f32 %v5420_v47  ;;  %v5947_v55 = vrot.slane %v5945_v7, 5  ;;  %v8789_v35 = vpop.eup %8788  ;;  %7880 = vst.msk [vmem:[%s11731_s20 + $0x1f8] sm:$0xff] %vm1858_vm10, %v8787_v25  ;;  %v5113_v5 = vsel %vm1425_vm6, %v7992_v51, %v12559_v1 }
 0x320   : > { %8798 = vtanh.f32 %v7375_v54  ;;  %v5421_v38 = vadd.f32 %v12157_v53, %v5389_v12  ;;  %v8791_v11 = vpop.eup %8790  ;;  %v7098_v53 = vsel %vm1474_vm7, %v7065_v19, %v12555_v27  ;;  %1888 = vst.msk [vmem:[%s11731_s20 + $0xe8] sm:$0xff] %vm1858_vm10, %v8789_v35 }
 0x321   : > { %8800 = vtanh.f32 %v5423_v49  ;;  %7878 = vst.msk [vmem:[%s11731_s20 + $0x1e8] sm:$0xff] %vm1858_vm10, %v8791_v11  ;;  %v4985_v13 = vpop.permute.xlu0 %4984  ;;  %v5948_v4 = vsel %vm9170_vm5, %v5943_v2, %v5947_v55 }
 0x322   : > { %8802 = vtanh.f32 %v7378_v14  ;;  %v8270_v0 = vcombine.low %v5938_v41, %v5948_v4  ;;  %v5145_v50 = vsel %vm1474_vm7, %v5113_v5, %v4985_v13 }
 0x323   : > { %8804 = vtanh.f32 %v5421_v38 }
 0x324   : > { %v7018_v32 = vpop.permute.xlu1 %7017  ;;  %8806 = vtanh.f32 %v7376_v59  ;;  %v7068_v46 = vsel %vm1425_vm6, %v8270_v0, %v6860_v37 }
 0x325   : > { %v7130_v44 = vsel %vm1507_vm8, %v7098_v53, %v7018_v32 }
 0x326   : > { %8588 = vmatprep.mubr.msk.bf16.mxu1 %vm1556_vm9, %v7130_v44 }
 0x327   : > { %v8793_v43 = vpop.eup %8792 }
 0x328   : > { %v8795_v21 = vpop.eup %8794  ;;  %8343 = vst.msk [vmem:[%s11731_s20 + $0x310] sm:$0xff] %vm1858_vm10, %v8793_v43 }
 0x329   : > { %v8797_v27 = vpop.eup %8796  ;;  %8065 = vst.msk [vmem:[%s11731_s20 + $0x210] sm:$0xff] %vm1858_vm10, %v8795_v21 }
 0x32a   : > { %v8799_v20 = vpop.eup %8798  ;;  %8063 = vst.msk [vmem:[%s11731_s20 + $0x200] sm:$0xff] %vm1858_vm10, %v8797_v27 }
 0x32b   : > { %v8801_v7 = vpop.eup %8800  ;;  %v6940_v62 = vpop.permute.xlu0 %6939  ;;  %8341 = vst.msk [vmem:[%s11731_s20 + $0x300] sm:$0xff] %vm1858_vm10, %v8799_v20 }
 0x32c   : > { %v8803_v24 = vpop.eup %8802  ;;  %8066 = vst.msk [vmem:[%s11731_s20 + $0x218] sm:$0xff] %vm1858_vm10, %v8801_v7  ;;  %v7100_v36 = vsel %vm1474_vm7, %v7068_v46, %v6940_v62 }
 0x32d   : > { %v8805_v26 = vpop.eup %8804  ;;  %8344 = vst.msk [vmem:[%s11731_s20 + $0x318] sm:$0xff] %vm1858_vm10, %v8803_v24 }
 0x32e   : > { %v8807_v23 = vpop.eup %8806  ;;  %8064 = vst.msk [vmem:[%s11731_s20 + $0x208] sm:$0xff] %vm1858_vm10, %v8805_v26 }
 0x32f   : > { %v7020_v61 = vpop.permute.xlu1 %7019  ;;  %8342 = vst.msk [vmem:[%s11731_s20 + $0x308] sm:$0xff] %vm1858_vm10, %v8807_v23 }
 0x330   : > { %v7132_v22 = vsel %vm1507_vm8, %v7100_v36, %v7020_v61 }
 0x331   : > { %8589 = vmatmul.mubr.msk.bf16.gmra.mrb[60].mxu1 %vm1556_vm9, %v7132_v22  ;;  %v5065_v3 = vpop.permute.xlu0 %5064 }
 0x332   : > { %v5177_v58 = vsel %vm1507_vm8, %v5145_v50, %v5065_v3 }
 0x333   : > { %8553 = vmatmul.mubr.msk.bf16.gmra.mrb[60].mxu0 %vm1556_vm9, %v5177_v58 }
 0x34a   : > { %v8566_v45 = vpop.f32.mrb[36].mxu1 }
 0x34b   : > { %v8530_v28 = vpop.f32.mrb[36].mxu0  ;;  %v7349_v16 = vmul.f32 %v12657_v63, %v8566_v45  ;;  %v7232_v39 = vpop.f32.mrb[37].mxu1 }
 0x34c   : > { %v5394_v34 = vmul.f32 %v12657_v63, %v8530_v28  ;;  %v5277_v9 = vpop.f32.mrb[37].mxu0  ;;  %v7347_v1 = vmul.f32 %v12657_v63, %v7232_v39  ;;  %v8567_v48 = vpop.f32.mrb[38].mxu1 }
 0x34d   : > { %v7381_v56 = vadd.f32 %v12662_v60, %v7349_v16  ;;  %v5392_v18 = vmul.f32 %v12657_v63, %v5277_v9  ;;  %v8531_v54 = vpop.f32.mrb[38].mxu0  ;;  %v7350_v42 = vmul.f32 %v12657_v63, %v8567_v48  ;;  %v7235_v57 = vpop.f32.mrb[39].mxu1 }
 0x34e   : > { %v5426_v6 = vadd.f32 %v12662_v60, %v5394_v34  ;;  %v7379_v17 = vadd.f32 %v12662_v60, %v7347_v1  ;;  %v5395_v47 = vmul.f32 %v12657_v63, %v8531_v54  ;;  %v5280_v52 = vpop.f32.mrb[39].mxu0  ;;  %v7348_v8 = vmul.f32 %v12657_v63, %v7235_v57 }
 0x34f   : > { %8808 = vtanh.f32 %v7381_v56  ;;  %v5424_v33 = vadd.f32 %v12662_v60, %v5392_v18  ;;  %v5393_v14 = vmul.f32 %v12657_v63, %v5280_v52  ;;  %v7382_v15 = vadd.f32 %v12662_v60, %v7350_v42 }
 0x350   : > { %8810 = vtanh.f32 %v5426_v6  ;;  %v5427_v12 = vadd.f32 %v12662_v60, %v5395_v47  ;;  %v7380_v37 = vadd.f32 %v12662_v60, %v7348_v8 }
 0x351   : > { %8812 = vtanh.f32 %v5424_v33  ;;  %v5425_v31 = vadd.f32 %v12662_v60, %v5393_v14 }
 0x352   : > { %8814 = vtanh.f32 %v7379_v17 }
 0x353   : > { %8816 = vtanh.f32 %v5427_v12 }
 0x354   : > { %8818 = vtanh.f32 %v7382_v15 }
 0x355   : > { %8820 = vtanh.f32 %v5425_v31 }
 0x356   : > { %8822 = vtanh.f32 %v7380_v37 }
 0x359   : > { %v8809_v49 = vpop.eup %8808 }
 0x35a   : > { %v8811_v10 = vpop.eup %8810  ;;  %8347 = vst.msk [vmem:[%s11731_s20 + $0x330] sm:$0xff] %vm1858_vm10, %v8809_v49 }
 0x35b   : > { %v8813_v38 = vpop.eup %8812  ;;  %8069 = vst.msk [vmem:[%s11731_s20 + $0x230] sm:$0xff] %vm1858_vm10, %v8811_v10 }
 0x35c   : > { %v8815_v59 = vpop.eup %8814  ;;  %8067 = vst.msk [vmem:[%s11731_s20 + $0x220] sm:$0xff] %vm1858_vm10, %v8813_v38 }
 0x35d   : > { %v8817_v25 = vpop.eup %8816  ;;  %8345 = vst.msk [vmem:[%s11731_s20 + $0x320] sm:$0xff] %vm1858_vm10, %v8815_v59 }
 0x35e   : > { %v8819_v55 = vpop.eup %8818  ;;  %8070 = vst.msk [vmem:[%s11731_s20 + $0x238] sm:$0xff] %vm1858_vm10, %v8817_v25 }
 0x35f   : > { %v8821_v35 = vpop.eup %8820  ;;  %8348 = vst.msk [vmem:[%s11731_s20 + $0x338] sm:$0xff] %vm1858_vm10, %v8819_v55 }
 0x360   : > { %v8823_v19 = vpop.eup %8822  ;;  %8068 = vst.msk [vmem:[%s11731_s20 + $0x228] sm:$0xff] %vm1858_vm10, %v8821_v35 }
 0x361   : > { %8346 = vst.msk [vmem:[%s11731_s20 + $0x328] sm:$0xff] %vm1858_vm10, %v8823_v19 }
 0x37e   : > { %v8570_v40 = vpop.f32.mrb[40].mxu1 }
 0x37f   : > { %v8534_v2 = vpop.f32.mrb[40].mxu0  ;;  %v7353_v11 = vmul.f32 %v12657_v63, %v8570_v40  ;;  %v7248_v53 = vpop.f32.mrb[41].mxu1 }
 0x380   : > { %v5398_v32 = vmul.f32 %v12657_v63, %v8534_v2  ;;  %v5293_v44 = vpop.f32.mrb[41].mxu0  ;;  %v7351_v13 = vmul.f32 %v12657_v63, %v7248_v53  ;;  %v8571_v41 = vpop.f32.mrb[42].mxu1 }
 0x381   : > { %v7385_v4 = vadd.f32 %v12662_v60, %v7353_v11  ;;  %v5396_v43 = vmul.f32 %v12657_v63, %v5293_v44  ;;  %v8535_v21 = vpop.f32.mrb[42].mxu0  ;;  %v7354_v27 = vmul.f32 %v12657_v63, %v8571_v41  ;;  %v7251_v0 = vpop.f32.mrb[43].mxu1 }
 0x382   : > { %v5430_v20 = vadd.f32 %v12662_v60, %v5398_v32  ;;  %v7383_v7 = vadd.f32 %v12662_v60, %v7351_v13  ;;  %v5399_v62 = vmul.f32 %v12657_v63, %v8535_v21  ;;  %v5296_v24 = vpop.f32.mrb[43].mxu0  ;;  %v7352_v29 = vmul.f32 %v12657_v63, %v7251_v0 }
 0x383   : > { %8824 = vtanh.f32 %v7385_v4  ;;  %v5428_v30 = vadd.f32 %v12662_v60, %v5396_v43  ;;  %v5397_v51 = vmul.f32 %v12657_v63, %v5296_v24  ;;  %v7386_v46 = vadd.f32 %v12662_v60, %v7354_v27 }
 0x384   : > { %8826 = vtanh.f32 %v5430_v20  ;;  %v5431_v26 = vadd.f32 %v12662_v60, %v5399_v62  ;;  %v7384_v36 = vadd.f32 %v12662_v60, %v7352_v29 }
 0x385   : > { %8828 = vtanh.f32 %v5428_v30  ;;  %v5429_v23 = vadd.f32 %v12662_v60, %v5397_v51 }
 0x386   : > { %8830 = vtanh.f32 %v7383_v7 }
 0x387   : > { %8832 = vtanh.f32 %v5431_v26 }
 0x388   : > { %8834 = vtanh.f32 %v7386_v46 }
 0x389   : > { %8836 = vtanh.f32 %v5429_v23 }
 0x38a   : > { %8838 = vtanh.f32 %v7384_v36 }
 0x38d   : > { %v8825_v61 = vpop.eup %8824 }
 0x38e   : > { %v8827_v22 = vpop.eup %8826  ;;  %8351 = vst.msk [vmem:[%s11731_s20 + $0x350] sm:$0xff] %vm1858_vm10, %v8825_v61 }
 0x38f   : > { %v8829_v5 = vpop.eup %8828  ;;  %8073 = vst.msk [vmem:[%s11731_s20 + $0x250] sm:$0xff] %vm1858_vm10, %v8827_v22 }
 0x390   : > { %v8831_v50 = vpop.eup %8830  ;;  %8071 = vst.msk [vmem:[%s11731_s20 + $0x240] sm:$0xff] %vm1858_vm10, %v8829_v5 }
 0x391   : > { %v8833_v3 = vpop.eup %8832  ;;  %8349 = vst.msk [vmem:[%s11731_s20 + $0x340] sm:$0xff] %vm1858_vm10, %v8831_v50 }
 0x392   : > { %v8835_v58 = vpop.eup %8834  ;;  %8074 = vst.msk [vmem:[%s11731_s20 + $0x258] sm:$0xff] %vm1858_vm10, %v8833_v3 }
 0x393   : > { %v8837_v45 = vpop.eup %8836  ;;  %8352 = vst.msk [vmem:[%s11731_s20 + $0x358] sm:$0xff] %vm1858_vm10, %v8835_v58 }
 0x394   : > { %v8839_v28 = vpop.eup %8838  ;;  %8072 = vst.msk [vmem:[%s11731_s20 + $0x248] sm:$0xff] %vm1858_vm10, %v8837_v45 }
 0x395   : > { %8350 = vst.msk [vmem:[%s11731_s20 + $0x348] sm:$0xff] %vm1858_vm10, %v8839_v28 }
 0x39a   : > { %v8538_v16 = vpop.f32.mrb[44].mxu0 }
 0x39b   : > { %v5402_v39 = vmul.f32 %v12657_v63, %v8538_v16  ;;  %v5309_v34 = vpop.f32.mrb[45].mxu0 }
 0x39c   : > { %v5400_v9 = vmul.f32 %v12657_v63, %v5309_v34  ;;  %v8539_v1 = vpop.f32.mrb[46].mxu0 }
 0x39d   : > { %v5434_v48 = vadd.f32 %v12662_v60, %v5402_v39  ;;  %v5403_v56 = vmul.f32 %v12657_v63, %v8539_v1  ;;  %v5312_v18 = vpop.f32.mrb[47].mxu0 }
 0x39e   : > { %v8574_v54 = vpop.f32.mrb[44].mxu1  ;;  %v5432_v42 = vadd.f32 %v12662_v60, %v5400_v9  ;;  %v5401_v57 = vmul.f32 %v12657_v63, %v5312_v18 }
 0x39f   : > { %8840 = vtanh.f32 %v5434_v48  ;;  %v7357_v6 = vmul.f32 %v12657_v63, %v8574_v54  ;;  %v7264_v17 = vpop.f32.mrb[45].mxu1  ;;  %v5435_v47 = vadd.f32 %v12662_v60, %v5403_v56 }
 0x3a0   : > { %8842 = vtanh.f32 %v5432_v42  ;;  %v7355_v52 = vmul.f32 %v12657_v63, %v7264_v17  ;;  %v8575_v8 = vpop.f32.mrb[46].mxu1  ;;  %v5433_v33 = vadd.f32 %v12662_v60, %v5401_v57 }
 0x3a1   : > { %v7389_v14 = vadd.f32 %v12662_v60, %v7357_v6  ;;  %8844 = vtanh.f32 %v5435_v47  ;;  %v7358_v12 = vmul.f32 %v12657_v63, %v8575_v8  ;;  %v7267_v15 = vpop.f32.mrb[47].mxu1 }
 0x3a2   : > { %v7387_v31 = vadd.f32 %v12662_v60, %v7355_v52  ;;  %8846 = vtanh.f32 %v5433_v33  ;;  %v7356_v37 = vmul.f32 %v12657_v63, %v7267_v15 }
 0x3a3   : > { %8848 = vtanh.f32 %v7389_v14  ;;  %v7390_v49 = vadd.f32 %v12662_v60, %v7358_v12 }
 0x3a4   : > { %8850 = vtanh.f32 %v7387_v31  ;;  %v7388_v10 = vadd.f32 %v12662_v60, %v7356_v37 }
 0x3a5   : > { %8852 = vtanh.f32 %v7390_v49 }
 0x3a6   : > { %8854 = vtanh.f32 %v7388_v10 }
 0x3a9   : > { %v8841_v38 = vpop.eup %8840 }
 0x3aa   : > { %v8843_v59 = vpop.eup %8842  ;;  %8077 = vst.msk [vmem:[%s11731_s20 + $0x270] sm:$0xff] %vm1858_vm10, %v8841_v38 }
 0x3ab   : > { %v8845_v25 = vpop.eup %8844  ;;  %8075 = vst.msk [vmem:[%s11731_s20 + $0x260] sm:$0xff] %vm1858_vm10, %v8843_v59  ;;  %v8542_v55 = vpop.f32.mrb[48].mxu0 }
 0x3ac   : > { %v8847_v35 = vpop.eup %8846  ;;  %8078 = vst.msk [vmem:[%s11731_s20 + $0x278] sm:$0xff] %vm1858_vm10, %v8845_v25  ;;  %v5406_v19 = vmul.f32 %v12657_v63, %v8542_v55  ;;  %v5325_v40 = vpop.f32.mrb[49].mxu0 }
 0x3ad   : > { %v8849_v2 = vpop.eup %8848  ;;  %8076 = vst.msk [vmem:[%s11731_s20 + $0x268] sm:$0xff] %vm1858_vm10, %v8847_v35  ;;  %v5404_v11 = vmul.f32 %v12657_v63, %v5325_v40  ;;  %v8543_v53 = vpop.f32.mrb[50].mxu0 }
 0x3ae   : > { %v8851_v32 = vpop.eup %8850  ;;  %8355 = vst.msk [vmem:[%s11731_s20 + $0x370] sm:$0xff] %vm1858_vm10, %v8849_v2  ;;  %v5438_v44 = vadd.f32 %v12662_v60, %v5406_v19  ;;  %v5407_v13 = vmul.f32 %v12657_v63, %v8543_v53  ;;  %v5328_v41 = vpop.f32.mrb[51].mxu0 }
 0x3af   : > { %v8853_v4 = vpop.eup %8852  ;;  %8353 = vst.msk [vmem:[%s11731_s20 + $0x360] sm:$0xff] %vm1858_vm10, %v8851_v32  ;;  %v5436_v43 = vadd.f32 %v12662_v60, %v5404_v11  ;;  %v5405_v21 = vmul.f32 %v12657_v63, %v5328_v41 }
 0x3b0   : > { %v8855_v27 = vpop.eup %8854  ;;  %8356 = vst.msk [vmem:[%s11731_s20 + $0x378] sm:$0xff] %vm1858_vm10, %v8853_v4  ;;  %8856 = vtanh.f32 %v5438_v44  ;;  %v8578_v0 = vpop.f32.mrb[48].mxu1  ;;  %v5439_v20 = vadd.f32 %v12662_v60, %v5407_v13 }
 0x3b1   : > { %8354 = vst.msk [vmem:[%s11731_s20 + $0x368] sm:$0xff] %vm1858_vm10, %v8855_v27  ;;  %v7361_v7 = vmul.f32 %v12657_v63, %v8578_v0  ;;  %8858 = vtanh.f32 %v5436_v43  ;;  %v7280_v62 = vpop.f32.mrb[49].mxu1  ;;  %v5437_v24 = vadd.f32 %v12662_v60, %v5405_v21 }
 0x3b2   : > { %v7359_v29 = vmul.f32 %v12657_v63, %v7280_v62  ;;  %8860 = vtanh.f32 %v5439_v20  ;;  %v8579_v30 = vpop.f32.mrb[50].mxu1 }
 0x3b3   : > { %v7393_v51 = vadd.f32 %v12662_v60, %v7361_v7  ;;  %v7362_v26 = vmul.f32 %v12657_v63, %v8579_v30  ;;  %8862 = vtanh.f32 %v5437_v24  ;;  %v7283_v46 = vpop.f32.mrb[51].mxu1 }
 0x3b4   : > { %v7391_v23 = vadd.f32 %v12662_v60, %v7359_v29  ;;  %v7360_v36 = vmul.f32 %v12657_v63, %v7283_v46 }
 0x3b5   : > { %8864 = vtanh.f32 %v7393_v51  ;;  %v7394_v61 = vadd.f32 %v12662_v60, %v7362_v26 }
 0x3b6   : > { %8866 = vtanh.f32 %v7391_v23  ;;  %v7392_v22 = vadd.f32 %v12662_v60, %v7360_v36 }
 0x3b7   : > { %8868 = vtanh.f32 %v7394_v61 }
 0x3b8   : > { %8870 = vtanh.f32 %v7392_v22 }
 0x3ba   : > { %v8857_v5 = vpop.eup %8856 }
 0x3bb   : > { %v8859_v50 = vpop.eup %8858  ;;  %8081 = vst.msk [vmem:[%s11731_s20 + $0x290] sm:$0xff] %vm1858_vm10, %v8857_v5 }
 0x3bc   : > { %v8861_v3 = vpop.eup %8860  ;;  %8079 = vst.msk [vmem:[%s11731_s20 + $0x280] sm:$0xff] %vm1858_vm10, %v8859_v50 }
 0x3bd   : > { %v8863_v58 = vpop.eup %8862  ;;  %8082 = vst.msk [vmem:[%s11731_s20 + $0x298] sm:$0xff] %vm1858_vm10, %v8861_v3  ;;  %v8546_v45 = vpop.f32.mrb[52].mxu0 }
 0x3be   : > { %8080 = vst.msk [vmem:[%s11731_s20 + $0x288] sm:$0xff] %vm1858_vm10, %v8863_v58  ;;  %v5410_v28 = vmul.f32 %v12657_v63, %v8546_v45  ;;  %v5341_v16 = vpop.f32.mrb[53].mxu0 }
 0x3bf   : > { %v8865_v39 = vpop.eup %8864  ;;  %v5408_v34 = vmul.f32 %v12657_v63, %v5341_v16  ;;  %v8547_v9 = vpop.f32.mrb[54].mxu0 }
 0x3c0   : > { %v8867_v1 = vpop.eup %8866  ;;  %8359 = vst.msk [vmem:[%s11731_s20 + $0x390] sm:$0xff] %vm1858_vm10, %v8865_v39  ;;  %v5442_v48 = vadd.f32 %v12662_v60, %v5410_v28  ;;  %v5411_v56 = vmul.f32 %v12657_v63, %v8547_v9  ;;  %v5344_v18 = vpop.f32.mrb[55].mxu0 }
 0x3c1   : > { %v8869_v54 = vpop.eup %8868  ;;  %8357 = vst.msk [vmem:[%s11731_s20 + $0x380] sm:$0xff] %vm1858_vm10, %v8867_v1  ;;  %v5440_v42 = vadd.f32 %v12662_v60, %v5408_v34  ;;  %v5409_v57 = vmul.f32 %v12657_v63, %v5344_v18 }
 0x3c2   : > { %v8871_v6 = vpop.eup %8870  ;;  %8360 = vst.msk [vmem:[%s11731_s20 + $0x398] sm:$0xff] %vm1858_vm10, %v8869_v54  ;;  %8872 = vtanh.f32 %v5442_v48  ;;  %v8582_v17 = vpop.f32.mrb[52].mxu1  ;;  %v5443_v47 = vadd.f32 %v12662_v60, %v5411_v56 }
 0x3c3   : > { %8358 = vst.msk [vmem:[%s11731_s20 + $0x388] sm:$0xff] %vm1858_vm10, %v8871_v6  ;;  %v7365_v52 = vmul.f32 %v12657_v63, %v8582_v17  ;;  %8874 = vtanh.f32 %v5440_v42  ;;  %v7296_v8 = vpop.f32.mrb[53].mxu1  ;;  %v5441_v33 = vadd.f32 %v12662_v60, %v5409_v57 }
 0x3c4   : > { %v7363_v14 = vmul.f32 %v12657_v63, %v7296_v8  ;;  %8876 = vtanh.f32 %v5443_v47  ;;  %v8583_v12 = vpop.f32.mrb[54].mxu1 }
 0x3c5   : > { %v7397_v15 = vadd.f32 %v12662_v60, %v7365_v52  ;;  %v7366_v31 = vmul.f32 %v12657_v63, %v8583_v12  ;;  %8878 = vtanh.f32 %v5441_v33  ;;  %v7299_v37 = vpop.f32.mrb[55].mxu1 }
 0x3c6   : > { %v7395_v49 = vadd.f32 %v12662_v60, %v7363_v14  ;;  %v7364_v10 = vmul.f32 %v12657_v63, %v7299_v37 }
 0x3c7   : > { %8880 = vtanh.f32 %v7397_v15  ;;  %v7398_v38 = vadd.f32 %v12662_v60, %v7366_v31 }
 0x3c8   : > { %8882 = vtanh.f32 %v7395_v49  ;;  %v7396_v59 = vadd.f32 %v12662_v60, %v7364_v10 }
 0x3c9   : > { %8884 = vtanh.f32 %v7398_v38 }
 0x3ca   : > { %8886 = vtanh.f32 %v7396_v59 }
 0x3cc   : > { %v8873_v25 = vpop.eup %8872 }
 0x3cd   : > { %v8875_v55 = vpop.eup %8874  ;;  %8085 = vst.msk [vmem:[%s11731_s20 + $0x2b0] sm:$0xff] %vm1858_vm10, %v8873_v25 }
 0x3ce   : > { %v8877_v35 = vpop.eup %8876  ;;  %8083 = vst.msk [vmem:[%s11731_s20 + $0x2a0] sm:$0xff] %vm1858_vm10, %v8875_v55 }
 0x3cf   : > { %v8879_v19 = vpop.eup %8878  ;;  %8086 = vst.msk [vmem:[%s11731_s20 + $0x2b8] sm:$0xff] %vm1858_vm10, %v8877_v35 }
 0x3d0   : > { %8084 = vst.msk [vmem:[%s11731_s20 + $0x2a8] sm:$0xff] %vm1858_vm10, %v8879_v19 }
 0x3d1   : > { %v8881_v40 = vpop.eup %8880 }
 0x3d2   : > { %v8883_v2 = vpop.eup %8882  ;;  %8363 = vst.msk [vmem:[%s11731_s20 + $0x3b0] sm:$0xff] %vm1858_vm10, %v8881_v40 }
 0x3d3   : > { %v8885_v11 = vpop.eup %8884  ;;  %8361 = vst.msk [vmem:[%s11731_s20 + $0x3a0] sm:$0xff] %vm1858_vm10, %v8883_v2  ;;  %v8586_v44 = vpop.f32.mrb[56].mxu1 }
 0x3d4   : > { %v8887_v53 = vpop.eup %8886  ;;  %8364 = vst.msk [vmem:[%s11731_s20 + $0x3b8] sm:$0xff] %vm1858_vm10, %v8885_v11  ;;  %v8550_v32 = vpop.f32.mrb[56].mxu0  ;;  %v7369_v41 = vmul.f32 %v12657_v63, %v8586_v44 }
 0x3d5   : > { %8362 = vst.msk [vmem:[%s11731_s20 + $0x3a8] sm:$0xff] %vm1858_vm10, %v8887_v53  ;;  %v5414_v13 = vmul.f32 %v12657_v63, %v8550_v32  ;;  %v5357_v4 = vpop.f32.mrb[57].mxu0  ;;  %v7312_v43 = vpop.f32.mrb[57].mxu1 }
 0x3d6   : > { %v5412_v21 = vmul.f32 %v12657_v63, %v5357_v4  ;;  %v7367_v27 = vmul.f32 %v12657_v63, %v7312_v43  ;;  %v8551_v0 = vpop.f32.mrb[58].mxu0  ;;  %v8587_v20 = vpop.f32.mrb[58].mxu1  ;;  %v7401_v62 = vadd.f32 %v12662_v60, %v7369_v41 }
 0x3d7   : > { %v5446_v7 = vadd.f32 %v12662_v60, %v5414_v13  ;;  %v5415_v24 = vmul.f32 %v12657_v63, %v8551_v0  ;;  %v7370_v29 = vmul.f32 %v12657_v63, %v8587_v20  ;;  %v5360_v30 = vpop.f32.mrb[59].mxu0  ;;  %v7315_v51 = vpop.f32.mrb[59].mxu1 }
 0x3d8   : > { %v5444_v26 = vadd.f32 %v12662_v60, %v5412_v21  ;;  %v7399_v46 = vadd.f32 %v12662_v60, %v7367_v27  ;;  %v5413_v23 = vmul.f32 %v12657_v63, %v5360_v30  ;;  %v7368_v36 = vmul.f32 %v12657_v63, %v7315_v51 }
 0x3d9   : > { %8888 = vtanh.f32 %v5446_v7  ;;  %v5447_v61 = vadd.f32 %v12662_v60, %v5415_v24  ;;  %v7402_v22 = vadd.f32 %v12662_v60, %v7370_v29 }
 0x3da   : > { %8890 = vtanh.f32 %v7401_v62  ;;  %v5445_v5 = vadd.f32 %v12662_v60, %v5413_v23  ;;  %v7400_v50 = vadd.f32 %v12662_v60, %v7368_v36 }
 0x3db   : > { %8892 = vtanh.f32 %v5444_v26 }
 0x3dc   : > { %8894 = vtanh.f32 %v7399_v46 }
 0x3dd   : > { %8896 = vtanh.f32 %v5447_v61 }
 0x3de   : > { %8898 = vtanh.f32 %v7402_v22 }
 0x3df   : > { %8900 = vtanh.f32 %v5445_v5 }
 0x3e0   : > { %8902 = vtanh.f32 %v7400_v50 }
 0x3e3   : > { %v8889_v3 = vpop.eup %8888 }
 0x3e4   : > { %v8891_v58 = vpop.eup %8890  ;;  %8089 = vst.msk [vmem:[%s11731_s20 + $0x2d0] sm:$0xff] %vm1858_vm10, %v8889_v3 }
 0x3e5   : > { %v8893_v45 = vpop.eup %8892  ;;  %8367 = vst.msk [vmem:[%s11731_s20 + $0x3d0] sm:$0xff] %vm1858_vm10, %v8891_v58 }
 0x3e6   : > { %v8895_v28 = vpop.eup %8894  ;;  %8087 = vst.msk [vmem:[%s11731_s20 + $0x2c0] sm:$0xff] %vm1858_vm10, %v8893_v45 }
 0x3e7   : > { %v8897_v16 = vpop.eup %8896  ;;  %8365 = vst.msk [vmem:[%s11731_s20 + $0x3c0] sm:$0xff] %vm1858_vm10, %v8895_v28 }
 0x3e8   : > { %v8899_v39 = vpop.eup %8898  ;;  %8090 = vst.msk [vmem:[%s11731_s20 + $0x2d8] sm:$0xff] %vm1858_vm10, %v8897_v16 }
 0x3e9   : > { %v8901_v34 = vpop.eup %8900  ;;  %8368 = vst.msk [vmem:[%s11731_s20 + $0x3d8] sm:$0xff] %vm1858_vm10, %v8899_v39 }
 0x3ea   : > { %v8903_v9 = vpop.eup %8902  ;;  %8088 = vst.msk [vmem:[%s11731_s20 + $0x2c8] sm:$0xff] %vm1858_vm10, %v8901_v34 }
 0x3eb   : > { %8366 = vst.msk [vmem:[%s11731_s20 + $0x3c8] sm:$0xff] %vm1858_vm10, %v8903_v9 }
 0x404   : > { %v8590_v1 = vpop.f32.mrb[60].mxu1 }
 0x405   : > { %v7373_v48 = vmul.f32 %v12657_v63, %v8590_v1  ;;  %v7328_v56 = vpop.f32.mrb[61].mxu1 }
 0x406   : > { %v7371_v18 = vmul.f32 %v12657_v63, %v7328_v56  ;;  %v8591_v54 = vpop.f32.mrb[62].mxu1  ;;  %v8554_v42 = vpop.f32.mrb[60].mxu0 }
 0x407   : > { %v7405_v57 = vadd.f32 %v12662_v60, %v7373_v48  ;;  %v7374_v6 = vmul.f32 %v12657_v63, %v8591_v54  ;;  %v7331_v17 = vpop.f32.mrb[63].mxu1  ;;  %v5418_v47 = vmul.f32 %v12657_v63, %v8554_v42  ;;  %v5373_v52 = vpop.f32.mrb[61].mxu0 }
 0x408   : > { %v7403_v8 = vadd.f32 %v12662_v60, %v7371_v18  ;;  %v7372_v33 = vmul.f32 %v12657_v63, %v7331_v17  ;;  %v5416_v14 = vmul.f32 %v12657_v63, %v5373_v52  ;;  %v8555_v12 = vpop.f32.mrb[62].mxu0 }
 0x409   : > { %8904 = vtanh.f32 %v7405_v57  ;;  %v7406_v15 = vadd.f32 %v12662_v60, %v7374_v6  ;;  %v5450_v31 = vadd.f32 %v12662_v60, %v5418_v47  ;;  %v5419_v37 = vmul.f32 %v12657_v63, %v8555_v12  ;;  %v5376_v49 = vpop.f32.mrb[63].mxu0 }
 0x40a   : > { %8906 = vtanh.f32 %v7403_v8  ;;  %v5448_v10 = vadd.f32 %v12662_v60, %v5416_v14  ;;  %v5417_v38 = vmul.f32 %v12657_v63, %v5376_v49  ;;  %v7404_v25 = vadd.f32 %v12662_v60, %v7372_v33 }
 0x40b   : > { %8908 = vtanh.f32 %v7406_v15  ;;  %v5451_v59 = vadd.f32 %v12662_v60, %v5419_v37 }
 0x40c   : > { %8910 = vtanh.f32 %v5450_v31  ;;  %v5449_v55 = vadd.f32 %v12662_v60, %v5417_v38 }
 0x40d   : > { %8912 = vtanh.f32 %v5448_v10 }
 0x40e   : > { %8914 = vtanh.f32 %v5451_v59 }
 0x40f   : > { %8916 = vtanh.f32 %v5449_v55 }
 0x410   : > { %8918 = vtanh.f32 %v7404_v25 }
 0x413   : > { %v8905_v35 = vpop.eup %8904 }
 0x414   : > { %v8907_v19 = vpop.eup %8906  ;;  %8371 = vst.msk [vmem:[%s11731_s20 + $0x3f0] sm:$0xff] %vm1858_vm10, %v8905_v35 }
 0x415   : > { %v8909_v63 = vpop.eup %8908  ;;  %8369 = vst.msk [vmem:[%s11731_s20 + $0x3e0] sm:$0xff] %vm1858_vm10, %v8907_v19 }
 0x416   : > { %v8911_v40 = vpop.eup %8910  ;;  %8372 = vst.msk [vmem:[%s11731_s20 + $0x3f8] sm:$0xff] %vm1858_vm10, %v8909_v63 }
 0x417   : > { %v8913_v2 = vpop.eup %8912  ;;  %8093 = vst.msk [vmem:[%s11731_s20 + $0x2f0] sm:$0xff] %vm1858_vm10, %v8911_v40 }
 0x418   : > { %v8915_v60 = vpop.eup %8914  ;;  %8091 = vst.msk [vmem:[%s11731_s20 + $0x2e0] sm:$0xff] %vm1858_vm10, %v8913_v2 }
 0x419   : > { %v8917_v11 = vpop.eup %8916  ;;  %8094 = vst.msk [vmem:[%s11731_s20 + $0x2f8] sm:$0xff] %vm1858_vm10, %v8915_v60 }
 0x41a   : > { %v8919_v53 = vpop.eup %8918  ;;  %8092 = vst.msk [vmem:[%s11731_s20 + $0x2e8] sm:$0xff] %vm1858_vm10, %v8917_v11 }
 0x41b   : > { %8370 = vst.msk [vmem:[%s11731_s20 + $0x3e8] sm:$0xff] %vm1858_vm10, %v8919_v53 }
 0x41c PF: > { %s18_s19 = sadd.s32 1, %s9041_s19  }
 0x41d   : > { %p15_p4 = scmp.ge.s32.totalorder %s18_s19, 4  }
 0x41f   :  { %17 = sbr.rel (!%p15_p4) target bundleno = 3 (0x3), region = 74 }

</bundles_post_ra>
